<compile_context>
chip_gen: v7x
topology: tpu7x:2x2x1
jax: 0.10.0
libtpu: 0.0.40
codegen_flags: <defaults>
</compile_context>

<pallas_src>
import jax
import jax.numpy as jnp
from jax.experimental import pallas as pl
from jax.experimental.pallas import tpu as pltpu


# ----------------------------------------------------------------------------
# Host-side constant builders (pure weight preprocessing, done once per call).
# ----------------------------------------------------------------------------
def _toeplitz_conv_mat(w, w_in, w_out):
    """w: (Cout, Cin, KH, KW) -> T: (KH, Cin*w_in, Cout*w_out) with
       T[kh, ci*w_in + wi, co*w_out + wo] = w[co, ci, kh, wi - wo] for 0 <= wi-wo < KW."""
    c_out, c_in, kh_sz, kw_sz = w.shape
    wi = jnp.arange(w_in)[:, None]
    wo = jnp.arange(w_out)[None, :]
    kw = wi - wo                                          # (w_in, w_out)
    valid = ((kw >= 0) & (kw < kw_sz)).astype(w.dtype)
    kw_c = jnp.clip(kw, 0, kw_sz - 1)
    t = w[:, :, :, kw_c] * valid                          # (Cout, Cin, KH, w_in, w_out)
    return t.transpose(2, 1, 3, 0, 4).reshape(kh_sz, c_in * w_in, c_out * w_out)


def _row_selector(n_pairs, n_in, parity):
    """(n_pairs, n_in) 0/1 matrix selecting row 2*i + parity."""
    return (jnp.arange(n_in)[None, :] ==
            (2 * jnp.arange(n_pairs)[:, None] + parity)).astype(jnp.float32)


def _col_selector(n_chan, w_in, w_half, parity):
    """(C*w_in, C*w_half) 0/1 matrix: within each channel block select col 2*j + parity."""
    q = jnp.arange(n_chan * w_in)
    p = jnp.arange(n_chan * w_half)
    ci, w = q // w_in, q % w_in
    cj, j = p // w_half, p % w_half
    return ((ci[:, None] == cj[None, :]) &
            (w[:, None] == (2 * j[None, :] + parity))).astype(jnp.float32)


def _build_constants(params, h_in, w_in):
    w_c1 = params["w_c1"].astype(jnp.float32)             # (6, 1, 5, 5)
    b_c1 = params["b_c1"].astype(jnp.float32)
    w_c2 = params["w_c2"].astype(jnp.float32)             # (16, 6, 5, 5)
    b_c2 = params["b_c2"].astype(jnp.float32)

    c1o, _, k1, _ = w_c1.shape
    c2o, _, k2, _ = w_c2.shape

    hc1, wc1 = h_in - k1 + 1, w_in - k1 + 1                # 76, 76
    hp1, wp1 = hc1 // 2, wc1 // 2                          # 38, 38
    hc2, wc2 = hp1 - k2 + 1, wp1 - k2 + 1                  # 34, 34
    hp2, wp2 = hc2 // 2, wc2 // 2                          # 17, 17

    t1 = _toeplitz_conv_mat(w_c1, w_in, wc1)               # (5,  80, 456)
    t2 = _toeplitz_conv_mat(w_c2, wp1, wc2)                # (5, 228, 544)
    b1e = jnp.repeat(b_c1, wc1)[None, :]                   # (1, 456)
    b2e = jnp.repeat(b_c2, wc2)[None, :]                   # (1, 544)

    r0_1, r1_1 = _row_selector(hp1, hc1, 0), _row_selector(hp1, hc1, 1)
    c0_1, c1_1 = _col_selector(c1o, wc1, wp1, 0), _col_selector(c1o, wc1, wp1, 1)
    r0_2, r1_2 = _row_selector(hp2, hc2, 0), _row_selector(hp2, hc2, 1)
    c0_2, c1_2 = _col_selector(c2o, wc2, wp2, 0), _col_selector(c2o, wc2, wp2, 1)

    # fc1 weight (in_features, 120), in PyTorch flatten order co*Hp2*Wp2 + i*Wp2 + j.
    # Re-arrange so w1r[i, co*Wp2 + j, n] matches the kernel's pooled-feature layout.
    w1 = params["w1"].astype(jnp.float32)
    d_h = w1.shape[1]
    w1r = (w1.reshape(c2o, hp2, wp2, d_h)
             .transpose(1, 0, 2, 3)
             .reshape(hp2, c2o * wp2, d_h))                # (17, 272, 120)

    return (t1, b1e, r0_1, r1_1, c0_1, c1_1,
            t2, b2e, r0_2, r1_2, c0_2, c1_2, w1r)


# ----------------------------------------------------------------------------
# Fused kernel: one batch element per grid step, everything resident in VMEM.
# ----------------------------------------------------------------------------
def _lenet_kernel(x_ref, t1_ref, b1e_ref, r0a_ref, r1a_ref, c0a_ref, c1a_ref,
                  t2_ref, b2e_ref, r0b_ref, r1b_ref, c0b_ref, c1b_ref,
                  w1r_ref, b1f_ref, w2f_ref, b2f_ref, w3f_ref, b3f_ref, o_ref):
    def mm(a, b):
        return jnp.dot(a, b, preferred_element_type=jnp.float32)

    x0 = x_ref[0, 0]                                       # (H, W), single input channel

    # ---- conv1 (5x5 valid) as KH banded-Toeplitz MXU matmuls ----
    kh1 = t1_ref.shape[0]
    hc1 = x0.shape[0] - kh1 + 1                            # 76
    y1 = mm(x0[0:hc1, :], t1_ref[0])
    for kh in range(1, kh1):
        y1 = y1 + mm(x0[kh:kh + hc1, :], t1_ref[kh])       # (76, 6*76)
    y1 = jnp.maximum(y1 + b1e_ref[...], 0.0)               # bias + ReLU

    # ---- max_pool2d(2): even/odd selection matmuls + max ----
    rmax1 = jnp.maximum(mm(r0a_ref[...], y1), mm(r1a_ref[...], y1))        # (38, 456)
    p1 = jnp.maximum(mm(rmax1, c0a_ref[...]), mm(rmax1, c1a_ref[...]))     # (38, 6*38)

    # ---- conv2 (5x5 valid over 6 channels) ----
    kh2 = t2_ref.shape[0]
    hc2 = p1.shape[0] - kh2 + 1                            # 34
    y2 = mm(p1[0:hc2, :], t2_ref[0])
    for kh in range(1, kh2):
        y2 = y2 + mm(p1[kh:kh + hc2, :], t2_ref[kh])       # (34, 16*34)
    y2 = jnp.maximum(y2 + b2e_ref[...], 0.0)

    # ---- max_pool2d(2) ----
    rmax2 = jnp.maximum(mm(r0b_ref[...], y2), mm(r1b_ref[...], y2))        # (17, 544)
    p2 = jnp.maximum(mm(rmax2, c0b_ref[...]), mm(rmax2, c1b_ref[...]))     # (17, 16*17)

    # ---- fc1 + ReLU (flatten folded into w1r; contract the 17 pooled rows) ----
    h = b1f_ref[...]                                       # (1, 120)
    for i in range(p2.shape[0]):
        h = h + mm(p2[i:i + 1, :], w1r_ref[i])
    h = jnp.maximum(h, 0.0)

    # ---- fc2 + ReLU ----
    h = jnp.maximum(mm(h, w2f_ref[...]) + b2f_ref[...], 0.0)               # (1, 84)

    # ---- fc3 + softmax ----
    logits = mm(h, w3f_ref[...]) + b3f_ref[...]                            # (1, n_cls)
    m = jnp.max(logits, axis=-1, keepdims=True)
    e = jnp.exp(logits - m)
    o_ref[0] = e / jnp.sum(e, axis=-1, keepdims=True)


def lenet_forward(x, params):
    """x: (B, 1, 80, 80); params in PyTorch conv layout, fc weights pre-transposed."""
    x = x.astype(jnp.float32)
    batch, c_in, h_in, w_in = x.shape
    consts = _build_constants(params, h_in, w_in)

    b1f = params["b1"].astype(jnp.float32).reshape(1, -1)
    w2f = params["w2"].astype(jnp.float32)
    b2f = params["b2"].astype(jnp.float32).reshape(1, -1)
    w3f = params["w3"].astype(jnp.float32)
    b3f = params["b3"].astype(jnp.float32).reshape(1, -1)
    n_cls = w3f.shape[1]

    const_inputs = consts + (b1f, w2f, b2f, w3f, b3f)

    def _const_spec(a):
        nd = a.ndim
        return pl.BlockSpec(a.shape, lambda b, _nd=nd: (0,) * _nd)

    in_specs = [pl.BlockSpec((1, c_in, h_in, w_in), lambda b: (b, 0, 0, 0))]
    in_specs += [_const_spec(a) for a in const_inputs]

    out = pl.pallas_call(
        _lenet_kernel,
        out_shape=jax.ShapeDtypeStruct((batch, 1, n_cls), jnp.float32),
        grid_spec=pltpu.PrefetchScalarGridSpec(
            num_scalar_prefetch=0,
            grid=(batch,),
            in_specs=in_specs,
            out_specs=pl.BlockSpec((1, 1, n_cls), lambda b: (b, 0, 0)),
        ),
        compiler_params=pltpu.CompilerParams(
            dimension_semantics=("parallel",),            # v7x: one batch elem per TC
            vmem_limit_bytes=32 * 1024 * 1024,            # double-buffered consts ~15 MiB
        ),
    )(x, *const_inputs)
    return out[:, 0, :]


# ----------------------------------------------------------------------------
# Pure-JAX reference (for a self-check against the PyTorch semantics).
# ----------------------------------------------------------------------------
def lenet_reference(x, params):
    hp = jax.lax.Precision.HIGHEST
    dn = ("NCHW", "OIHW", "NCHW")
    y = jax.lax.conv_general_dilated(x, params["w_c1"], (1, 1), "VALID",
                                     dimension_numbers=dn, precision=hp)
    y = jnp.maximum(y + params["b_c1"][None, :, None, None], 0.0)
    y = jax.lax.reduce_window(y, -jnp.inf, jax.lax.max, (1, 1, 2, 2), (1, 1, 2, 2), "VALID")
    y = jax.lax.conv_general_dilated(y, params["w_c2"], (1, 1), "VALID",
                                     dimension_numbers=dn, precision=hp)
    y = jnp.maximum(y + params["b_c2"][None, :, None, None], 0.0)
    y = jax.lax.reduce_window(y, -jnp.inf, jax.lax.max, (1, 1, 2, 2), (1, 1, 2, 2), "VALID")
    f = y.reshape(y.shape[0], -1)
    h = jnp.maximum(jnp.dot(f, params["w1"], precision=hp) + params["b1"], 0.0)
    h = jnp.maximum(jnp.dot(h, params["w2"], precision=hp) + params["b2"], 0.0)
    logits = jnp.dot(h, params["w3"], precision=hp) + params["b3"]
    return jax.nn.softmax(logits, axis=-1)


if __name__ == "__main__":
    key = jax.random.PRNGKey(0)
    ks = jax.random.split(key, 8)

    B = 2
    # LeNet's fc1 size is derived from a (1, 80, 80) input -> 16*17*17 = 4624.
    x = jax.random.normal(ks[0], (B, 1, 80, 80), dtype=jnp.float32)

    n_size = 16 * 17 * 17
    params = {
        "w_c1": jax.random.normal(ks[1], (6, 1, 5, 5), jnp.float32) * 0.1,
        "b_c1": jax.random.normal(ks[2], (6,), jnp.float32) * 0.1,
        "w_c2": jax.random.normal(ks[3], (16, 6, 5, 5), jnp.float32) * 0.05,
        "b_c2": jax.random.normal(ks[4], (16,), jnp.float32) * 0.05,
        # Linear weights stored pre-transposed: y = x @ W + b
        "w1": jax.random.normal(ks[5], (n_size, 120), jnp.float32) * 0.02,
        "b1": jnp.zeros((1, 120), jnp.float32),
        "w2": jax.random.normal(ks[6], (120, 84), jnp.float32) * 0.05,
        "b2": jnp.zeros((1, 84), jnp.float32),
        "w3": jax.random.normal(ks[7], (84, 2), jnp.float32) * 0.05,
        "b3": jnp.zeros((1, 2), jnp.float32),
    }

    out = jax.jit(lenet_forward)(x, params)
    out = jax.block_until_ready(out)
    ref = lenet_reference(x, params)

    assert out.shape == (B, 2)
    assert bool(jnp.all(jnp.isfinite(out)))
    assert bool(jnp.allclose(jnp.sum(out, axis=-1), 1.0, atol=1e-5))
    assert bool(jnp.allclose(out, ref, atol=1e-2)), "mismatch vs pure-JAX reference"
    print("KERNEL_OK")
</pallas_src>

<mosaic_0001>
module attributes {stable_mosaic.version = 11 : i64} {
  func.func @_lenet_kernel(%arg0: i32, %arg1: memref<1x1x80x80xf32, #tpu.memory_space<vmem>>, %arg2: memref<5x80x456xf32, #tpu.memory_space<vmem>>, %arg3: memref<1x456xf32, #tpu.memory_space<vmem>>, %arg4: memref<38x76xf32, #tpu.memory_space<vmem>>, %arg5: memref<38x76xf32, #tpu.memory_space<vmem>>, %arg6: memref<456x228xf32, #tpu.memory_space<vmem>>, %arg7: memref<456x228xf32, #tpu.memory_space<vmem>>, %arg8: memref<5x228x544xf32, #tpu.memory_space<vmem>>, %arg9: memref<1x544xf32, #tpu.memory_space<vmem>>, %arg10: memref<17x34xf32, #tpu.memory_space<vmem>>, %arg11: memref<17x34xf32, #tpu.memory_space<vmem>>, %arg12: memref<544x272xf32, #tpu.memory_space<vmem>>, %arg13: memref<544x272xf32, #tpu.memory_space<vmem>>, %arg14: memref<17x272x120xf32, #tpu.memory_space<vmem>>, %arg15: memref<1x120xf32, #tpu.memory_space<vmem>>, %arg16: memref<120x84xf32, #tpu.memory_space<vmem>>, %arg17: memref<1x84xf32, #tpu.memory_space<vmem>>, %arg18: memref<84x2xf32, #tpu.memory_space<vmem>>, %arg19: memref<1x2xf32, #tpu.memory_space<vmem>>, %arg20: memref<1x1x2xf32, #tpu.memory_space<vmem>>) attributes {dimension_semantics = [#tpu.dimension_semantics<parallel>], iteration_bounds = array<i64: 2>, scalar_prefetch = 0 : i64, scratch_operands = 0 : i64, tpu.core_type = #tpu.core_type<tc>, window_params = [{transform_indices = @transform_0, window_bounds = array<i64: 1, 1, 80, 80>}, {pipeline_mode = #tpu.pipeline_mode<synchronous>, transform_indices = @transform_1, window_bounds = array<i64: 5, 80, 456>}, {pipeline_mode = #tpu.pipeline_mode<synchronous>, transform_indices = @transform_2, window_bounds = array<i64: 1, 456>}, {pipeline_mode = #tpu.pipeline_mode<synchronous>, transform_indices = @transform_3, window_bounds = array<i64: 38, 76>}, {pipeline_mode = #tpu.pipeline_mode<synchronous>, transform_indices = @transform_4, window_bounds = array<i64: 38, 76>}, {pipeline_mode = #tpu.pipeline_mode<synchronous>, transform_indices = @transform_5, window_bounds = array<i64: 456, 228>}, {pipeline_mode = #tpu.pipeline_mode<synchronous>, transform_indices = @transform_6, window_bounds = array<i64: 456, 228>}, {pipeline_mode = #tpu.pipeline_mode<synchronous>, transform_indices = @transform_7, window_bounds = array<i64: 5, 228, 544>}, {pipeline_mode = #tpu.pipeline_mode<synchronous>, transform_indices = @transform_8, window_bounds = array<i64: 1, 544>}, {pipeline_mode = #tpu.pipeline_mode<synchronous>, transform_indices = @transform_9, window_bounds = array<i64: 17, 34>}, {pipeline_mode = #tpu.pipeline_mode<synchronous>, transform_indices = @transform_10, window_bounds = array<i64: 17, 34>}, {pipeline_mode = #tpu.pipeline_mode<synchronous>, transform_indices = @transform_11, window_bounds = array<i64: 544, 272>}, {pipeline_mode = #tpu.pipeline_mode<synchronous>, transform_indices = @transform_12, window_bounds = array<i64: 544, 272>}, {pipeline_mode = #tpu.pipeline_mode<synchronous>, transform_indices = @transform_13, window_bounds = array<i64: 17, 272, 120>}, {pipeline_mode = #tpu.pipeline_mode<synchronous>, transform_indices = @transform_14, window_bounds = array<i64: 1, 120>}, {pipeline_mode = #tpu.pipeline_mode<synchronous>, transform_indices = @transform_15, window_bounds = array<i64: 120, 84>}, {pipeline_mode = #tpu.pipeline_mode<synchronous>, transform_indices = @transform_16, window_bounds = array<i64: 1, 84>}, {pipeline_mode = #tpu.pipeline_mode<synchronous>, transform_indices = @transform_17, window_bounds = array<i64: 84, 2>}, {pipeline_mode = #tpu.pipeline_mode<synchronous>, transform_indices = @transform_18, window_bounds = array<i64: 1, 2>}, {transform_indices = @transform_19, window_bounds = array<i64: 1, 1, 2>}]} {
    %c0 = arith.constant 0 : index
    %c0_0 = arith.constant 0 : index
    %c0_1 = arith.constant 0 : index
    %c0_2 = arith.constant 0 : index
    %0 = vector.load %arg1[%c0, %c0_0, %c0_1, %c0_2] : memref<1x1x80x80xf32, #tpu.memory_space<vmem>>, vector<1x1x80x80xf32>
    %1 = vector.shape_cast %0 : vector<1x1x80x80xf32> to vector<80x80xf32>
    %2 = vector.extract_strided_slice %1 {offsets = [0, 0], sizes = [76, 80], strides = [1, 1]} : vector<80x80xf32> to vector<76x80xf32>
    %c0_3 = arith.constant 0 : index
    %c0_4 = arith.constant 0 : index
    %c0_5 = arith.constant 0 : index
    %3 = vector.load %arg2[%c0_3, %c0_4, %c0_5] : memref<5x80x456xf32, #tpu.memory_space<vmem>>, vector<1x80x456xf32>
    %4 = vector.shape_cast %3 : vector<1x80x456xf32> to vector<80x456xf32>
    %cst = arith.constant dense<0.000000e+00> : vector<76x456xf32>
    %5 = tpu.matmul %2, %4, %cst {dimension_numbers = #tpu.dot_dimension_numbers<[1], [0], [0], [1], [0, 0, 1, 1], [], []>} : vector<76x80xf32>, vector<80x456xf32>, vector<76x456xf32> -> vector<76x456xf32>
    %6 = vector.extract_strided_slice %1 {offsets = [1, 0], sizes = [76, 80], strides = [1, 1]} : vector<80x80xf32> to vector<76x80xf32>
    %c1 = arith.constant 1 : index
    %c0_6 = arith.constant 0 : index
    %c0_7 = arith.constant 0 : index
    %7 = vector.load %arg2[%c1, %c0_6, %c0_7] : memref<5x80x456xf32, #tpu.memory_space<vmem>>, vector<1x80x456xf32>
    %8 = vector.shape_cast %7 : vector<1x80x456xf32> to vector<80x456xf32>
    %cst_8 = arith.constant dense<0.000000e+00> : vector<76x456xf32>
    %9 = tpu.matmul %6, %8, %cst_8 {dimension_numbers = #tpu.dot_dimension_numbers<[1], [0], [0], [1], [0, 0, 1, 1], [], []>} : vector<76x80xf32>, vector<80x456xf32>, vector<76x456xf32> -> vector<76x456xf32>
    %10 = arith.addf %5, %9 : vector<76x456xf32>
    %11 = vector.extract_strided_slice %1 {offsets = [2, 0], sizes = [76, 80], strides = [1, 1]} : vector<80x80xf32> to vector<76x80xf32>
    %c2 = arith.constant 2 : index
    %c0_9 = arith.constant 0 : index
    %c0_10 = arith.constant 0 : index
    %12 = vector.load %arg2[%c2, %c0_9, %c0_10] : memref<5x80x456xf32, #tpu.memory_space<vmem>>, vector<1x80x456xf32>
    %13 = vector.shape_cast %12 : vector<1x80x456xf32> to vector<80x456xf32>
    %cst_11 = arith.constant dense<0.000000e+00> : vector<76x456xf32>
    %14 = tpu.matmul %11, %13, %cst_11 {dimension_numbers = #tpu.dot_dimension_numbers<[1], [0], [0], [1], [0, 0, 1, 1], [], []>} : vector<76x80xf32>, vector<80x456xf32>, vector<76x456xf32> -> vector<76x456xf32>
    %15 = arith.addf %10, %14 : vector<76x456xf32>
    %16 = vector.extract_strided_slice %1 {offsets = [3, 0], sizes = [76, 80], strides = [1, 1]} : vector<80x80xf32> to vector<76x80xf32>
    %c3 = arith.constant 3 : index
    %c0_12 = arith.constant 0 : index
    %c0_13 = arith.constant 0 : index
    %17 = vector.load %arg2[%c3, %c0_12, %c0_13] : memref<5x80x456xf32, #tpu.memory_space<vmem>>, vector<1x80x456xf32>
    %18 = vector.shape_cast %17 : vector<1x80x456xf32> to vector<80x456xf32>
    %cst_14 = arith.constant dense<0.000000e+00> : vector<76x456xf32>
    %19 = tpu.matmul %16, %18, %cst_14 {dimension_numbers = #tpu.dot_dimension_numbers<[1], [0], [0], [1], [0, 0, 1, 1], [], []>} : vector<76x80xf32>, vector<80x456xf32>, vector<76x456xf32> -> vector<76x456xf32>
    %20 = arith.addf %15, %19 : vector<76x456xf32>
    %21 = vector.extract_strided_slice %1 {offsets = [4, 0], sizes = [76, 80], strides = [1, 1]} : vector<80x80xf32> to vector<76x80xf32>
    %c4 = arith.constant 4 : index
    %c0_15 = arith.constant 0 : index
    %c0_16 = arith.constant 0 : index
    %22 = vector.load %arg2[%c4, %c0_15, %c0_16] : memref<5x80x456xf32, #tpu.memory_space<vmem>>, vector<1x80x456xf32>
    %23 = vector.shape_cast %22 : vector<1x80x456xf32> to vector<80x456xf32>
    %cst_17 = arith.constant dense<0.000000e+00> : vector<76x456xf32>
    %24 = tpu.matmul %21, %23, %cst_17 {dimension_numbers = #tpu.dot_dimension_numbers<[1], [0], [0], [1], [0, 0, 1, 1], [], []>} : vector<76x80xf32>, vector<80x456xf32>, vector<76x456xf32> -> vector<76x456xf32>
    %25 = arith.addf %20, %24 : vector<76x456xf32>
    %c0_18 = arith.constant 0 : index
    %c0_19 = arith.constant 0 : index
    %26 = vector.load %arg3[%c0_18, %c0_19] : memref<1x456xf32, #tpu.memory_space<vmem>>, vector<1x456xf32>
    %27 = vector.broadcast %26 : vector<1x456xf32> to vector<76x456xf32>
    %28 = arith.addf %25, %27 : vector<76x456xf32>
    %cst_20 = arith.constant 0.000000e+00 : f32
    %29 = vector.broadcast %cst_20 : f32 to vector<76x456xf32>
    %30 = arith.maximumf %28, %29 : vector<76x456xf32>
    %c0_21 = arith.constant 0 : index
    %c0_22 = arith.constant 0 : index
    %31 = vector.load %arg4[%c0_21, %c0_22] : memref<38x76xf32, #tpu.memory_space<vmem>>, vector<38x76xf32>
    %cst_23 = arith.constant dense<0.000000e+00> : vector<38x456xf32>
    %32 = tpu.matmul %31, %30, %cst_23 {dimension_numbers = #tpu.dot_dimension_numbers<[1], [0], [0], [1], [0, 0, 1, 1], [], []>} : vector<38x76xf32>, vector<76x456xf32>, vector<38x456xf32> -> vector<38x456xf32>
    %c0_24 = arith.constant 0 : index
    %c0_25 = arith.constant 0 : index
    %33 = vector.load %arg5[%c0_24, %c0_25] : memref<38x76xf32, #tpu.memory_space<vmem>>, vector<38x76xf32>
    %cst_26 = arith.constant dense<0.000000e+00> : vector<38x456xf32>
    %34 = tpu.matmul %33, %30, %cst_26 {dimension_numbers = #tpu.dot_dimension_numbers<[1], [0], [0], [1], [0, 0, 1, 1], [], []>} : vector<38x76xf32>, vector<76x456xf32>, vector<38x456xf32> -> vector<38x456xf32>
    %35 = arith.maximumf %32, %34 : vector<38x456xf32>
    %c0_27 = arith.constant 0 : index
    %c0_28 = arith.constant 0 : index
    %36 = vector.load %arg6[%c0_27, %c0_28] : memref<456x228xf32, #tpu.memory_space<vmem>>, vector<456x228xf32>
    %cst_29 = arith.constant dense<0.000000e+00> : vector<38x228xf32>
    %37 = tpu.matmul %35, %36, %cst_29 {dimension_numbers = #tpu.dot_dimension_numbers<[1], [0], [0], [1], [0, 0, 1, 1], [], []>} : vector<38x456xf32>, vector<456x228xf32>, vector<38x228xf32> -> vector<38x228xf32>
    %c0_30 = arith.constant 0 : index
    %c0_31 = arith.constant 0 : index
    %38 = vector.load %arg7[%c0_30, %c0_31] : memref<456x228xf32, #tpu.memory_space<vmem>>, vector<456x228xf32>
    %cst_32 = arith.constant dense<0.000000e+00> : vector<38x228xf32>
    %39 = tpu.matmul %35, %38, %cst_32 {dimension_numbers = #tpu.dot_dimension_numbers<[1], [0], [0], [1], [0, 0, 1, 1], [], []>} : vector<38x456xf32>, vector<456x228xf32>, vector<38x228xf32> -> vector<38x228xf32>
    %40 = arith.maximumf %37, %39 : vector<38x228xf32>
    %41 = vector.extract_strided_slice %40 {offsets = [0, 0], sizes = [34, 228], strides = [1, 1]} : vector<38x228xf32> to vector<34x228xf32>
    %c0_33 = arith.constant 0 : index
    %c0_34 = arith.constant 0 : index
    %c0_35 = arith.constant 0 : index
    %42 = vector.load %arg8[%c0_33, %c0_34, %c0_35] : memref<5x228x544xf32, #tpu.memory_space<vmem>>, vector<1x228x544xf32>
    %43 = vector.shape_cast %42 : vector<1x228x544xf32> to vector<228x544xf32>
    %cst_36 = arith.constant dense<0.000000e+00> : vector<34x544xf32>
    %44 = tpu.matmul %41, %43, %cst_36 {dimension_numbers = #tpu.dot_dimension_numbers<[1], [0], [0], [1], [0, 0, 1, 1], [], []>} : vector<34x228xf32>, vector<228x544xf32>, vector<34x544xf32> -> vector<34x544xf32>
    %45 = vector.extract_strided_slice %40 {offsets = [1, 0], sizes = [34, 228], strides = [1, 1]} : vector<38x228xf32> to vector<34x228xf32>
    %c1_37 = arith.constant 1 : index
    %c0_38 = arith.constant 0 : index
    %c0_39 = arith.constant 0 : index
    %46 = vector.load %arg8[%c1_37, %c0_38, %c0_39] : memref<5x228x544xf32, #tpu.memory_space<vmem>>, vector<1x228x544xf32>
    %47 = vector.shape_cast %46 : vector<1x228x544xf32> to vector<228x544xf32>
    %cst_40 = arith.constant dense<0.000000e+00> : vector<34x544xf32>
    %48 = tpu.matmul %45, %47, %cst_40 {dimension_numbers = #tpu.dot_dimension_numbers<[1], [0], [0], [1], [0, 0, 1, 1], [], []>} : vector<34x228xf32>, vector<228x544xf32>, vector<34x544xf32> -> vector<34x544xf32>
    %49 = arith.addf %44, %48 : vector<34x544xf32>
    %50 = vector.extract_strided_slice %40 {offsets = [2, 0], sizes = [34, 228], strides = [1, 1]} : vector<38x228xf32> to vector<34x228xf32>
    %c2_41 = arith.constant 2 : index
    %c0_42 = arith.constant 0 : index
    %c0_43 = arith.constant 0 : index
    %51 = vector.load %arg8[%c2_41, %c0_42, %c0_43] : memref<5x228x544xf32, #tpu.memory_space<vmem>>, vector<1x228x544xf32>
    %52 = vector.shape_cast %51 : vector<1x228x544xf32> to vector<228x544xf32>
    %cst_44 = arith.constant dense<0.000000e+00> : vector<34x544xf32>
    %53 = tpu.matmul %50, %52, %cst_44 {dimension_numbers = #tpu.dot_dimension_numbers<[1], [0], [0], [1], [0, 0, 1, 1], [], []>} : vector<34x228xf32>, vector<228x544xf32>, vector<34x544xf32> -> vector<34x544xf32>
    %54 = arith.addf %49, %53 : vector<34x544xf32>
    %55 = vector.extract_strided_slice %40 {offsets = [3, 0], sizes = [34, 228], strides = [1, 1]} : vector<38x228xf32> to vector<34x228xf32>
    %c3_45 = arith.constant 3 : index
    %c0_46 = arith.constant 0 : index
    %c0_47 = arith.constant 0 : index
    %56 = vector.load %arg8[%c3_45, %c0_46, %c0_47] : memref<5x228x544xf32, #tpu.memory_space<vmem>>, vector<1x228x544xf32>
    %57 = vector.shape_cast %56 : vector<1x228x544xf32> to vector<228x544xf32>
    %cst_48 = arith.constant dense<0.000000e+00> : vector<34x544xf32>
    %58 = tpu.matmul %55, %57, %cst_48 {dimension_numbers = #tpu.dot_dimension_numbers<[1], [0], [0], [1], [0, 0, 1, 1], [], []>} : vector<34x228xf32>, vector<228x544xf32>, vector<34x544xf32> -> vector<34x544xf32>
    %59 = arith.addf %54, %58 : vector<34x544xf32>
    %60 = vector.extract_strided_slice %40 {offsets = [4, 0], sizes = [34, 228], strides = [1, 1]} : vector<38x228xf32> to vector<34x228xf32>
    %c4_49 = arith.constant 4 : index
    %c0_50 = arith.constant 0 : index
    %c0_51 = arith.constant 0 : index
    %61 = vector.load %arg8[%c4_49, %c0_50, %c0_51] : memref<5x228x544xf32, #tpu.memory_space<vmem>>, vector<1x228x544xf32>
    %62 = vector.shape_cast %61 : vector<1x228x544xf32> to vector<228x544xf32>
    %cst_52 = arith.constant dense<0.000000e+00> : vector<34x544xf32>
    %63 = tpu.matmul %60, %62, %cst_52 {dimension_numbers = #tpu.dot_dimension_numbers<[1], [0], [0], [1], [0, 0, 1, 1], [], []>} : vector<34x228xf32>, vector<228x544xf32>, vector<34x544xf32> -> vector<34x544xf32>
    %64 = arith.addf %59, %63 : vector<34x544xf32>
    %c0_53 = arith.constant 0 : index
    %c0_54 = arith.constant 0 : index
    %65 = vector.load %arg9[%c0_53, %c0_54] : memref<1x544xf32, #tpu.memory_space<vmem>>, vector<1x544xf32>
    %66 = vector.broadcast %65 : vector<1x544xf32> to vector<34x544xf32>
    %67 = arith.addf %64, %66 : vector<34x544xf32>
    %cst_55 = arith.constant 0.000000e+00 : f32
    %68 = vector.broadcast %cst_55 : f32 to vector<34x544xf32>
    %69 = arith.maximumf %67, %68 : vector<34x544xf32>
    %c0_56 = arith.constant 0 : index
    %c0_57 = arith.constant 0 : index
    %70 = vector.load %arg10[%c0_56, %c0_57] : memref<17x34xf32, #tpu.memory_space<vmem>>, vector<17x34xf32>
    %cst_58 = arith.constant dense<0.000000e+00> : vector<17x544xf32>
    %71 = tpu.matmul %70, %69, %cst_58 {dimension_numbers = #tpu.dot_dimension_numbers<[1], [0], [0], [1], [0, 0, 1, 1], [], []>} : vector<17x34xf32>, vector<34x544xf32>, vector<17x544xf32> -> vector<17x544xf32>
    %c0_59 = arith.constant 0 : index
    %c0_60 = arith.constant 0 : index
    %72 = vector.load %arg11[%c0_59, %c0_60] : memref<17x34xf32, #tpu.memory_space<vmem>>, vector<17x34xf32>
    %cst_61 = arith.constant dense<0.000000e+00> : vector<17x544xf32>
    %73 = tpu.matmul %72, %69, %cst_61 {dimension_numbers = #tpu.dot_dimension_numbers<[1], [0], [0], [1], [0, 0, 1, 1], [], []>} : vector<17x34xf32>, vector<34x544xf32>, vector<17x544xf32> -> vector<17x544xf32>
    %74 = arith.maximumf %71, %73 : vector<17x544xf32>
    %c0_62 = arith.constant 0 : index
    %c0_63 = arith.constant 0 : index
    %75 = vector.load %arg12[%c0_62, %c0_63] : memref<544x272xf32, #tpu.memory_space<vmem>>, vector<544x272xf32>
    %cst_64 = arith.constant dense<0.000000e+00> : vector<17x272xf32>
    %76 = tpu.matmul %74, %75, %cst_64 {dimension_numbers = #tpu.dot_dimension_numbers<[1], [0], [0], [1], [0, 0, 1, 1], [], []>} : vector<17x544xf32>, vector<544x272xf32>, vector<17x272xf32> -> vector<17x272xf32>
    %c0_65 = arith.constant 0 : index
    %c0_66 = arith.constant 0 : index
    %77 = vector.load %arg13[%c0_65, %c0_66] : memref<544x272xf32, #tpu.memory_space<vmem>>, vector<544x272xf32>
    %cst_67 = arith.constant dense<0.000000e+00> : vector<17x272xf32>
    %78 = tpu.matmul %74, %77, %cst_67 {dimension_numbers = #tpu.dot_dimension_numbers<[1], [0], [0], [1], [0, 0, 1, 1], [], []>} : vector<17x544xf32>, vector<544x272xf32>, vector<17x272xf32> -> vector<17x272xf32>
    %79 = arith.maximumf %76, %78 : vector<17x272xf32>
    %c0_68 = arith.constant 0 : index
    %c0_69 = arith.constant 0 : index
    %80 = vector.load %arg15[%c0_68, %c0_69] : memref<1x120xf32, #tpu.memory_space<vmem>>, vector<1x120xf32>
    %81 = vector.extract_strided_slice %79 {offsets = [0, 0], sizes = [1, 272], strides = [1, 1]} : vector<17x272xf32> to vector<1x272xf32>
    %c0_70 = arith.constant 0 : index
    %c0_71 = arith.constant 0 : index
    %c0_72 = arith.constant 0 : index
    %82 = vector.load %arg14[%c0_70, %c0_71, %c0_72] : memref<17x272x120xf32, #tpu.memory_space<vmem>>, vector<1x272x120xf32>
    %83 = vector.shape_cast %82 : vector<1x272x120xf32> to vector<272x120xf32>
    %cst_73 = arith.constant dense<0.000000e+00> : vector<1x120xf32>
    %84 = tpu.matmul %81, %83, %cst_73 {dimension_numbers = #tpu.dot_dimension_numbers<[1], [0], [0], [1], [0, 0, 1, 1], [], []>} : vector<1x272xf32>, vector<272x120xf32>, vector<1x120xf32> -> vector<1x120xf32>
    %85 = arith.addf %80, %84 : vector<1x120xf32>
    %86 = vector.extract_strided_slice %79 {offsets = [1, 0], sizes = [1, 272], strides = [1, 1]} : vector<17x272xf32> to vector<1x272xf32>
    %c1_74 = arith.constant 1 : index
    %c0_75 = arith.constant 0 : index
    %c0_76 = arith.constant 0 : index
    %87 = vector.load %arg14[%c1_74, %c0_75, %c0_76] : memref<17x272x120xf32, #tpu.memory_space<vmem>>, vector<1x272x120xf32>
    %88 = vector.shape_cast %87 : vector<1x272x120xf32> to vector<272x120xf32>
    %cst_77 = arith.constant dense<0.000000e+00> : vector<1x120xf32>
    %89 = tpu.matmul %86, %88, %cst_77 {dimension_numbers = #tpu.dot_dimension_numbers<[1], [0], [0], [1], [0, 0, 1, 1], [], []>} : vector<1x272xf32>, vector<272x120xf32>, vector<1x120xf32> -> vector<1x120xf32>
    %90 = arith.addf %85, %89 : vector<1x120xf32>
    %91 = vector.extract_strided_slice %79 {offsets = [2, 0], sizes = [1, 272], strides = [1, 1]} : vector<17x272xf32> to vector<1x272xf32>
    %c2_78 = arith.constant 2 : index
    %c0_79 = arith.constant 0 : index
    %c0_80 = arith.constant 0 : index
    %92 = vector.load %arg14[%c2_78, %c0_79, %c0_80] : memref<17x272x120xf32, #tpu.memory_space<vmem>>, vector<1x272x120xf32>
    %93 = vector.shape_cast %92 : vector<1x272x120xf32> to vector<272x120xf32>
    %cst_81 = arith.constant dense<0.000000e+00> : vector<1x120xf32>
    %94 = tpu.matmul %91, %93, %cst_81 {dimension_numbers = #tpu.dot_dimension_numbers<[1], [0], [0], [1], [0, 0, 1, 1], [], []>} : vector<1x272xf32>, vector<272x120xf32>, vector<1x120xf32> -> vector<1x120xf32>
    %95 = arith.addf %90, %94 : vector<1x120xf32>
    %96 = vector.extract_strided_slice %79 {offsets = [3, 0], sizes = [1, 272], strides = [1, 1]} : vector<17x272xf32> to vector<1x272xf32>
    %c3_82 = arith.constant 3 : index
    %c0_83 = arith.constant 0 : index
    %c0_84 = arith.constant 0 : index
    %97 = vector.load %arg14[%c3_82, %c0_83, %c0_84] : memref<17x272x120xf32, #tpu.memory_space<vmem>>, vector<1x272x120xf32>
    %98 = vector.shape_cast %97 : vector<1x272x120xf32> to vector<272x120xf32>
    %cst_85 = arith.constant dense<0.000000e+00> : vector<1x120xf32>
    %99 = tpu.matmul %96, %98, %cst_85 {dimension_numbers = #tpu.dot_dimension_numbers<[1], [0], [0], [1], [0, 0, 1, 1], [], []>} : vector<1x272xf32>, vector<272x120xf32>, vector<1x120xf32> -> vector<1x120xf32>
    %100 = arith.addf %95, %99 : vector<1x120xf32>
    %101 = vector.extract_strided_slice %79 {offsets = [4, 0], sizes = [1, 272], strides = [1, 1]} : vector<17x272xf32> to vector<1x272xf32>
    %c4_86 = arith.constant 4 : index
    %c0_87 = arith.constant 0 : index
    %c0_88 = arith.constant 0 : index
    %102 = vector.load %arg14[%c4_86, %c0_87, %c0_88] : memref<17x272x120xf32, #tpu.memory_space<vmem>>, vector<1x272x120xf32>
    %103 = vector.shape_cast %102 : vector<1x272x120xf32> to vector<272x120xf32>
    %cst_89 = arith.constant dense<0.000000e+00> : vector<1x120xf32>
    %104 = tpu.matmul %101, %103, %cst_89 {dimension_numbers = #tpu.dot_dimension_numbers<[1], [0], [0], [1], [0, 0, 1, 1], [], []>} : vector<1x272xf32>, vector<272x120xf32>, vector<1x120xf32> -> vector<1x120xf32>
    %105 = arith.addf %100, %104 : vector<1x120xf32>
    %106 = vector.extract_strided_slice %79 {offsets = [5, 0], sizes = [1, 272], strides = [1, 1]} : vector<17x272xf32> to vector<1x272xf32>
    %c5 = arith.constant 5 : index
    %c0_90 = arith.constant 0 : index
    %c0_91 = arith.constant 0 : index
    %107 = vector.load %arg14[%c5, %c0_90, %c0_91] : memref<17x272x120xf32, #tpu.memory_space<vmem>>, vector<1x272x120xf32>
    %108 = vector.shape_cast %107 : vector<1x272x120xf32> to vector<272x120xf32>
    %cst_92 = arith.constant dense<0.000000e+00> : vector<1x120xf32>
    %109 = tpu.matmul %106, %108, %cst_92 {dimension_numbers = #tpu.dot_dimension_numbers<[1], [0], [0], [1], [0, 0, 1, 1], [], []>} : vector<1x272xf32>, vector<272x120xf32>, vector<1x120xf32> -> vector<1x120xf32>
    %110 = arith.addf %105, %109 : vector<1x120xf32>
    %111 = vector.extract_strided_slice %79 {offsets = [6, 0], sizes = [1, 272], strides = [1, 1]} : vector<17x272xf32> to vector<1x272xf32>
    %c6 = arith.constant 6 : index
    %c0_93 = arith.constant 0 : index
    %c0_94 = arith.constant 0 : index
    %112 = vector.load %arg14[%c6, %c0_93, %c0_94] : memref<17x272x120xf32, #tpu.memory_space<vmem>>, vector<1x272x120xf32>
    %113 = vector.shape_cast %112 : vector<1x272x120xf32> to vector<272x120xf32>
    %cst_95 = arith.constant dense<0.000000e+00> : vector<1x120xf32>
    %114 = tpu.matmul %111, %113, %cst_95 {dimension_numbers = #tpu.dot_dimension_numbers<[1], [0], [0], [1], [0, 0, 1, 1], [], []>} : vector<1x272xf32>, vector<272x120xf32>, vector<1x120xf32> -> vector<1x120xf32>
    %115 = arith.addf %110, %114 : vector<1x120xf32>
    %116 = vector.extract_strided_slice %79 {offsets = [7, 0], sizes = [1, 272], strides = [1, 1]} : vector<17x272xf32> to vector<1x272xf32>
    %c7 = arith.constant 7 : index
    %c0_96 = arith.constant 0 : index
    %c0_97 = arith.constant 0 : index
    %117 = vector.load %arg14[%c7, %c0_96, %c0_97] : memref<17x272x120xf32, #tpu.memory_space<vmem>>, vector<1x272x120xf32>
    %118 = vector.shape_cast %117 : vector<1x272x120xf32> to vector<272x120xf32>
    %cst_98 = arith.constant dense<0.000000e+00> : vector<1x120xf32>
    %119 = tpu.matmul %116, %118, %cst_98 {dimension_numbers = #tpu.dot_dimension_numbers<[1], [0], [0], [1], [0, 0, 1, 1], [], []>} : vector<1x272xf32>, vector<272x120xf32>, vector<1x120xf32> -> vector<1x120xf32>
    %120 = arith.addf %115, %119 : vector<1x120xf32>
    %121 = vector.extract_strided_slice %79 {offsets = [8, 0], sizes = [1, 272], strides = [1, 1]} : vector<17x272xf32> to vector<1x272xf32>
    %c8 = arith.constant 8 : index
    %c0_99 = arith.constant 0 : index
    %c0_100 = arith.constant 0 : index
    %122 = vector.load %arg14[%c8, %c0_99, %c0_100] : memref<17x272x120xf32, #tpu.memory_space<vmem>>, vector<1x272x120xf32>
    %123 = vector.shape_cast %122 : vector<1x272x120xf32> to vector<272x120xf32>
    %cst_101 = arith.constant dense<0.000000e+00> : vector<1x120xf32>
    %124 = tpu.matmul %121, %123, %cst_101 {dimension_numbers = #tpu.dot_dimension_numbers<[1], [0], [0], [1], [0, 0, 1, 1], [], []>} : vector<1x272xf32>, vector<272x120xf32>, vector<1x120xf32> -> vector<1x120xf32>
    %125 = arith.addf %120, %124 : vector<1x120xf32>
    %126 = vector.extract_strided_slice %79 {offsets = [9, 0], sizes = [1, 272], strides = [1, 1]} : vector<17x272xf32> to vector<1x272xf32>
    %c9 = arith.constant 9 : index
    %c0_102 = arith.constant 0 : index
    %c0_103 = arith.constant 0 : index
    %127 = vector.load %arg14[%c9, %c0_102, %c0_103] : memref<17x272x120xf32, #tpu.memory_space<vmem>>, vector<1x272x120xf32>
    %128 = vector.shape_cast %127 : vector<1x272x120xf32> to vector<272x120xf32>
    %cst_104 = arith.constant dense<0.000000e+00> : vector<1x120xf32>
    %129 = tpu.matmul %126, %128, %cst_104 {dimension_numbers = #tpu.dot_dimension_numbers<[1], [0], [0], [1], [0, 0, 1, 1], [], []>} : vector<1x272xf32>, vector<272x120xf32>, vector<1x120xf32> -> vector<1x120xf32>
    %130 = arith.addf %125, %129 : vector<1x120xf32>
    %131 = vector.extract_strided_slice %79 {offsets = [10, 0], sizes = [1, 272], strides = [1, 1]} : vector<17x272xf32> to vector<1x272xf32>
    %c10 = arith.constant 10 : index
    %c0_105 = arith.constant 0 : index
    %c0_106 = arith.constant 0 : index
    %132 = vector.load %arg14[%c10, %c0_105, %c0_106] : memref<17x272x120xf32, #tpu.memory_space<vmem>>, vector<1x272x120xf32>
    %133 = vector.shape_cast %132 : vector<1x272x120xf32> to vector<272x120xf32>
    %cst_107 = arith.constant dense<0.000000e+00> : vector<1x120xf32>
    %134 = tpu.matmul %131, %133, %cst_107 {dimension_numbers = #tpu.dot_dimension_numbers<[1], [0], [0], [1], [0, 0, 1, 1], [], []>} : vector<1x272xf32>, vector<272x120xf32>, vector<1x120xf32> -> vector<1x120xf32>
    %135 = arith.addf %130, %134 : vector<1x120xf32>
    %136 = vector.extract_strided_slice %79 {offsets = [11, 0], sizes = [1, 272], strides = [1, 1]} : vector<17x272xf32> to vector<1x272xf32>
    %c11 = arith.constant 11 : index
    %c0_108 = arith.constant 0 : index
    %c0_109 = arith.constant 0 : index
    %137 = vector.load %arg14[%c11, %c0_108, %c0_109] : memref<17x272x120xf32, #tpu.memory_space<vmem>>, vector<1x272x120xf32>
    %138 = vector.shape_cast %137 : vector<1x272x120xf32> to vector<272x120xf32>
    %cst_110 = arith.constant dense<0.000000e+00> : vector<1x120xf32>
    %139 = tpu.matmul %136, %138, %cst_110 {dimension_numbers = #tpu.dot_dimension_numbers<[1], [0], [0], [1], [0, 0, 1, 1], [], []>} : vector<1x272xf32>, vector<272x120xf32>, vector<1x120xf32> -> vector<1x120xf32>
    %140 = arith.addf %135, %139 : vector<1x120xf32>
    %141 = vector.extract_strided_slice %79 {offsets = [12, 0], sizes = [1, 272], strides = [1, 1]} : vector<17x272xf32> to vector<1x272xf32>
    %c12 = arith.constant 12 : index
    %c0_111 = arith.constant 0 : index
    %c0_112 = arith.constant 0 : index
    %142 = vector.load %arg14[%c12, %c0_111, %c0_112] : memref<17x272x120xf32, #tpu.memory_space<vmem>>, vector<1x272x120xf32>
    %143 = vector.shape_cast %142 : vector<1x272x120xf32> to vector<272x120xf32>
    %cst_113 = arith.constant dense<0.000000e+00> : vector<1x120xf32>
    %144 = tpu.matmul %141, %143, %cst_113 {dimension_numbers = #tpu.dot_dimension_numbers<[1], [0], [0], [1], [0, 0, 1, 1], [], []>} : vector<1x272xf32>, vector<272x120xf32>, vector<1x120xf32> -> vector<1x120xf32>
    %145 = arith.addf %140, %144 : vector<1x120xf32>
    %146 = vector.extract_strided_slice %79 {offsets = [13, 0], sizes = [1, 272], strides = [1, 1]} : vector<17x272xf32> to vector<1x272xf32>
    %c13 = arith.constant 13 : index
    %c0_114 = arith.constant 0 : index
    %c0_115 = arith.constant 0 : index
    %147 = vector.load %arg14[%c13, %c0_114, %c0_115] : memref<17x272x120xf32, #tpu.memory_space<vmem>>, vector<1x272x120xf32>
    %148 = vector.shape_cast %147 : vector<1x272x120xf32> to vector<272x120xf32>
    %cst_116 = arith.constant dense<0.000000e+00> : vector<1x120xf32>
    %149 = tpu.matmul %146, %148, %cst_116 {dimension_numbers = #tpu.dot_dimension_numbers<[1], [0], [0], [1], [0, 0, 1, 1], [], []>} : vector<1x272xf32>, vector<272x120xf32>, vector<1x120xf32> -> vector<1x120xf32>
    %150 = arith.addf %145, %149 : vector<1x120xf32>
    %151 = vector.extract_strided_slice %79 {offsets = [14, 0], sizes = [1, 272], strides = [1, 1]} : vector<17x272xf32> to vector<1x272xf32>
    %c14 = arith.constant 14 : index
    %c0_117 = arith.constant 0 : index
    %c0_118 = arith.constant 0 : index
    %152 = vector.load %arg14[%c14, %c0_117, %c0_118] : memref<17x272x120xf32, #tpu.memory_space<vmem>>, vector<1x272x120xf32>
    %153 = vector.shape_cast %152 : vector<1x272x120xf32> to vector<272x120xf32>
    %cst_119 = arith.constant dense<0.000000e+00> : vector<1x120xf32>
    %154 = tpu.matmul %151, %153, %cst_119 {dimension_numbers = #tpu.dot_dimension_numbers<[1], [0], [0], [1], [0, 0, 1, 1], [], []>} : vector<1x272xf32>, vector<272x120xf32>, vector<1x120xf32> -> vector<1x120xf32>
    %155 = arith.addf %150, %154 : vector<1x120xf32>
    %156 = vector.extract_strided_slice %79 {offsets = [15, 0], sizes = [1, 272], strides = [1, 1]} : vector<17x272xf32> to vector<1x272xf32>
    %c15 = arith.constant 15 : index
    %c0_120 = arith.constant 0 : index
    %c0_121 = arith.constant 0 : index
    %157 = vector.load %arg14[%c15, %c0_120, %c0_121] : memref<17x272x120xf32, #tpu.memory_space<vmem>>, vector<1x272x120xf32>
    %158 = vector.shape_cast %157 : vector<1x272x120xf32> to vector<272x120xf32>
    %cst_122 = arith.constant dense<0.000000e+00> : vector<1x120xf32>
    %159 = tpu.matmul %156, %158, %cst_122 {dimension_numbers = #tpu.dot_dimension_numbers<[1], [0], [0], [1], [0, 0, 1, 1], [], []>} : vector<1x272xf32>, vector<272x120xf32>, vector<1x120xf32> -> vector<1x120xf32>
    %160 = arith.addf %155, %159 : vector<1x120xf32>
    %161 = vector.extract_strided_slice %79 {offsets = [16, 0], sizes = [1, 272], strides = [1, 1]} : vector<17x272xf32> to vector<1x272xf32>
    %c16 = arith.constant 16 : index
    %c0_123 = arith.constant 0 : index
    %c0_124 = arith.constant 0 : index
    %162 = vector.load %arg14[%c16, %c0_123, %c0_124] : memref<17x272x120xf32, #tpu.memory_space<vmem>>, vector<1x272x120xf32>
    %163 = vector.shape_cast %162 : vector<1x272x120xf32> to vector<272x120xf32>
    %cst_125 = arith.constant dense<0.000000e+00> : vector<1x120xf32>
    %164 = tpu.matmul %161, %163, %cst_125 {dimension_numbers = #tpu.dot_dimension_numbers<[1], [0], [0], [1], [0, 0, 1, 1], [], []>} : vector<1x272xf32>, vector<272x120xf32>, vector<1x120xf32> -> vector<1x120xf32>
    %165 = arith.addf %160, %164 : vector<1x120xf32>
    %cst_126 = arith.constant 0.000000e+00 : f32
    %166 = vector.broadcast %cst_126 : f32 to vector<1x120xf32>
    %167 = arith.maximumf %165, %166 : vector<1x120xf32>
    %c0_127 = arith.constant 0 : index
    %c0_128 = arith.constant 0 : index
    %168 = vector.load %arg16[%c0_127, %c0_128] : memref<120x84xf32, #tpu.memory_space<vmem>>, vector<120x84xf32>
    %cst_129 = arith.constant dense<0.000000e+00> : vector<1x84xf32>
    %169 = tpu.matmul %167, %168, %cst_129 {dimension_numbers = #tpu.dot_dimension_numbers<[1], [0], [0], [1], [0, 0, 1, 1], [], []>} : vector<1x120xf32>, vector<120x84xf32>, vector<1x84xf32> -> vector<1x84xf32>
    %c0_130 = arith.constant 0 : index
    %c0_131 = arith.constant 0 : index
    %170 = vector.load %arg17[%c0_130, %c0_131] : memref<1x84xf32, #tpu.memory_space<vmem>>, vector<1x84xf32>
    %171 = arith.addf %169, %170 : vector<1x84xf32>
    %cst_132 = arith.constant 0.000000e+00 : f32
    %172 = vector.broadcast %cst_132 : f32 to vector<1x84xf32>
    %173 = arith.maximumf %171, %172 : vector<1x84xf32>
    %c0_133 = arith.constant 0 : index
    %c0_134 = arith.constant 0 : index
    %174 = vector.load %arg18[%c0_133, %c0_134] : memref<84x2xf32, #tpu.memory_space<vmem>>, vector<84x2xf32>
    %cst_135 = arith.constant dense<0.000000e+00> : vector<1x2xf32>
    %175 = tpu.matmul %173, %174, %cst_135 {dimension_numbers = #tpu.dot_dimension_numbers<[1], [0], [0], [1], [0, 0, 1, 1], [], []>} : vector<1x84xf32>, vector<84x2xf32>, vector<1x2xf32> -> vector<1x2xf32>
    %c0_136 = arith.constant 0 : index
    %c0_137 = arith.constant 0 : index
    %176 = vector.load %arg19[%c0_136, %c0_137] : memref<1x2xf32, #tpu.memory_space<vmem>>, vector<1x2xf32>
    %177 = arith.addf %175, %176 : vector<1x2xf32>
    %cst_138 = arith.constant dense<0xFF800000> : vector<1xf32>
    %178 = vector.multi_reduction <maximumf>, %177, %cst_138 [1] : vector<1x2xf32> to vector<1xf32>
    %179 = vector.shape_cast %178 : vector<1xf32> to vector<1x1xf32>
    %180 = vector.broadcast %179 : vector<1x1xf32> to vector<1x2xf32>
    %181 = arith.subf %177, %180 : vector<1x2xf32>
    %182 = math.exp %181 : vector<1x2xf32>
    %cst_139 = arith.constant dense<0.000000e+00> : vector<1xf32>
    %183 = vector.multi_reduction <add>, %182, %cst_139 [1] : vector<1x2xf32> to vector<1xf32>
    %184 = vector.shape_cast %183 : vector<1xf32> to vector<1x1xf32>
    %185 = vector.broadcast %184 : vector<1x1xf32> to vector<1x2xf32>
    %186 = arith.divf %182, %185 : vector<1x2xf32>
    %c0_140 = arith.constant 0 : index
    %c0_141 = arith.constant 0 : index
    %c0_142 = arith.constant 0 : index
    %187 = vector.load %arg20[%c0_140, %c0_141, %c0_142] : memref<1x1x2xf32, #tpu.memory_space<vmem>>, vector<1x1x2xf32>
    %188 = vector.shape_cast %187 : vector<1x1x2xf32> to vector<1x2xf32>
    %189 = vector.shape_cast %186 : vector<1x2xf32> to vector<1x1x2xf32>
    tpu.vector_store %arg20[%c0_140, %c0_141, %c0_142], %189 {strides = array<i32>} : memref<1x1x2xf32, #tpu.memory_space<vmem>>, vector<1x1x2xf32>,
    return
  }
  func.func @transform_0(%arg0: i32) -> (i32, i32, i32, i32) {
    %c0_i32 = arith.constant 0 : i32
    %c0_i32_0 = arith.constant 0 : i32
    %c0_i32_1 = arith.constant 0 : i32
    %c0_i32_2 = arith.constant 0 : i32
    return %arg0, %c0_i32, %c0_i32_0, %c0_i32_1 : i32, i32, i32, i32
  }
  func.func @transform_1(%arg0: i32) -> (i32, i32, i32) {
    %c0_i32 = arith.constant 0 : i32
    %c0_i32_0 = arith.constant 0 : i32
    %c0_i32_1 = arith.constant 0 : i32
    %c0_i32_2 = arith.constant 0 : i32
    return %c0_i32, %c0_i32_0, %c0_i32_1 : i32, i32, i32
  }
  func.func @transform_2(%arg0: i32) -> (i32, i32) {
    %c0_i32 = arith.constant 0 : i32
    %c0_i32_0 = arith.constant 0 : i32
    %c0_i32_1 = arith.constant 0 : i32
    return %c0_i32, %c0_i32_0 : i32, i32
  }
  func.func @transform_3(%arg0: i32) -> (i32, i32) {
    %c0_i32 = arith.constant 0 : i32
    %c0_i32_0 = arith.constant 0 : i32
    %c0_i32_1 = arith.constant 0 : i32
    return %c0_i32, %c0_i32_0 : i32, i32
  }
  func.func @transform_4(%arg0: i32) -> (i32, i32) {
    %c0_i32 = arith.constant 0 : i32
    %c0_i32_0 = arith.constant 0 : i32
    %c0_i32_1 = arith.constant 0 : i32
    return %c0_i32, %c0_i32_0 : i32, i32
  }
  func.func @transform_5(%arg0: i32) -> (i32, i32) {
    %c0_i32 = arith.constant 0 : i32
    %c0_i32_0 = arith.constant 0 : i32
    %c0_i32_1 = arith.constant 0 : i32
    return %c0_i32, %c0_i32_0 : i32, i32
  }
  func.func @transform_6(%arg0: i32) -> (i32, i32) {
    %c0_i32 = arith.constant 0 : i32
    %c0_i32_0 = arith.constant 0 : i32
    %c0_i32_1 = arith.constant 0 : i32
    return %c0_i32, %c0_i32_0 : i32, i32
  }
  func.func @transform_7(%arg0: i32) -> (i32, i32, i32) {
    %c0_i32 = arith.constant 0 : i32
    %c0_i32_0 = arith.constant 0 : i32
    %c0_i32_1 = arith.constant 0 : i32
    %c0_i32_2 = arith.constant 0 : i32
    return %c0_i32, %c0_i32_0, %c0_i32_1 : i32, i32, i32
  }
  func.func @transform_8(%arg0: i32) -> (i32, i32) {
    %c0_i32 = arith.constant 0 : i32
    %c0_i32_0 = arith.constant 0 : i32
    %c0_i32_1 = arith.constant 0 : i32
    return %c0_i32, %c0_i32_0 : i32, i32
  }
  func.func @transform_9(%arg0: i32) -> (i32, i32) {
    %c0_i32 = arith.constant 0 : i32
    %c0_i32_0 = arith.constant 0 : i32
    %c0_i32_1 = arith.constant 0 : i32
    return %c0_i32, %c0_i32_0 : i32, i32
  }
  func.func @transform_10(%arg0: i32) -> (i32, i32) {
    %c0_i32 = arith.constant 0 : i32
    %c0_i32_0 = arith.constant 0 : i32
    %c0_i32_1 = arith.constant 0 : i32
    return %c0_i32, %c0_i32_0 : i32, i32
  }
  func.func @transform_11(%arg0: i32) -> (i32, i32) {
    %c0_i32 = arith.constant 0 : i32
    %c0_i32_0 = arith.constant 0 : i32
    %c0_i32_1 = arith.constant 0 : i32
    return %c0_i32, %c0_i32_0 : i32, i32
  }
  func.func @transform_12(%arg0: i32) -> (i32, i32) {
    %c0_i32 = arith.constant 0 : i32
    %c0_i32_0 = arith.constant 0 : i32
    %c0_i32_1 = arith.constant 0 : i32
    return %c0_i32, %c0_i32_0 : i32, i32
  }
  func.func @transform_13(%arg0: i32) -> (i32, i32, i32) {
    %c0_i32 = arith.constant 0 : i32
    %c0_i32_0 = arith.constant 0 : i32
    %c0_i32_1 = arith.constant 0 : i32
    %c0_i32_2 = arith.constant 0 : i32
    return %c0_i32, %c0_i32_0, %c0_i32_1 : i32, i32, i32
  }
  func.func @transform_14(%arg0: i32) -> (i32, i32) {
    %c0_i32 = arith.constant 0 : i32
    %c0_i32_0 = arith.constant 0 : i32
    %c0_i32_1 = arith.constant 0 : i32
    return %c0_i32, %c0_i32_0 : i32, i32
  }
  func.func @transform_15(%arg0: i32) -> (i32, i32) {
    %c0_i32 = arith.constant 0 : i32
    %c0_i32_0 = arith.constant 0 : i32
    %c0_i32_1 = arith.constant 0 : i32
    return %c0_i32, %c0_i32_0 : i32, i32
  }
  func.func @transform_16(%arg0: i32) -> (i32, i32) {
    %c0_i32 = arith.constant 0 : i32
    %c0_i32_0 = arith.constant 0 : i32
    %c0_i32_1 = arith.constant 0 : i32
    return %c0_i32, %c0_i32_0 : i32, i32
  }
  func.func @transform_17(%arg0: i32) -> (i32, i32) {
    %c0_i32 = arith.constant 0 : i32
    %c0_i32_0 = arith.constant 0 : i32
    %c0_i32_1 = arith.constant 0 : i32
    return %c0_i32, %c0_i32_0 : i32, i32
  }
  func.func @transform_18(%arg0: i32) -> (i32, i32) {
    %c0_i32 = arith.constant 0 : i32
    %c0_i32_0 = arith.constant 0 : i32
    %c0_i32_1 = arith.constant 0 : i32
    return %c0_i32, %c0_i32_0 : i32, i32
  }
  func.func @transform_19(%arg0: i32) -> (i32, i32, i32) {
    %c0_i32 = arith.constant 0 : i32
    %c0_i32_0 = arith.constant 0 : i32
    %c0_i32_1 = arith.constant 0 : i32
    return %arg0, %c0_i32, %c0_i32_0 : i32, i32, i32
  }
}

</mosaic_0001>

<bundles_post_ra>
// kernel: lenet_forward.1
= control target key start
LH: loop header
LB: loop body
LE: loop exit
PB: predicated region body
PF: predicated region fallthrough
CT: control target
= control target key end

     0   :  { %s25427_s0 = inlined_call_operand.vmem [shape: f32[2,1,80,80], index: 0, kind: input, shape index: {}]   ;;  %s25428_s1 = inlined_call_operand.vmem [shape: f32[5,80,456], index: 1, kind: input, shape index: {}]   ;;  %s25429_s2 = inlined_call_operand.vmem [shape: f32[1,456], index: 2, kind: input, shape index: {}]   ;;  %s25430_s3 = inlined_call_operand.vmem [shape: f32[38,76], index: 3, kind: input, shape index: {}]   ;;  %s25431_s4 = inlined_call_operand.vmem [shape: f32[38,76], index: 4, kind: input, shape index: {}]   ;;  %s25432_s5 = inlined_call_operand.vmem [shape: f32[456,228], index: 5, kind: input, shape index: {}]   ;;  %s25433_s6 = inlined_call_operand.vmem [shape: f32[456,228], index: 6, kind: input, shape index: {}]   ;;  %s25434_s7 = inlined_call_operand.vmem [shape: f32[5,228,544], index: 7, kind: input, shape index: {}]   ;;  %s25435_s8 = inlined_call_operand.vmem [shape: f32[1,544], index: 8, kind: input, shape index: {}]   ;;  %s25436_s9 = inlined_call_operand.vmem [shape: f32[17,34], index: 9, kind: input, shape index: {}]   ;;  %s25437_s10 = inlined_call_operand.vmem [shape: f32[17,34], index: 10, kind: input, shape index: {}]   ;;  %s25438_s11 = inlined_call_operand.vmem [shape: f32[544,272], index: 11, kind: input, shape index: {}]   ;;  %s25439_s12 = inlined_call_operand.vmem [shape: f32[544,272], index: 12, kind: input, shape index: {}]   ;;  %s25440_s13 = inlined_call_operand.vmem [shape: f32[17,272,120], index: 13, kind: input, shape index: {}]   ;;  %s25441_s14 = inlined_call_operand.vmem [shape: f32[1,120], index: 14, kind: input, shape index: {}]   ;;  %s25442_s15 = inlined_call_operand.vmem [shape: f32[120,84], index: 15, kind: input, shape index: {}]   ;;  %s25443_s16 = inlined_call_operand.vmem [shape: f32[1,84], index: 16, kind: input, shape index: {}]   ;;  %s25444_s17 = inlined_call_operand.vmem [shape: f32[84,2], index: 17, kind: input, shape index: {}]   ;;  %s25445_s18 = inlined_call_operand.vmem [shape: f32[1,2], index: 18, kind: input, shape index: {}]   ;;  %s25446_s19 = inlined_call_operand.hbm [shape: f32[2,1,2], index: 19, kind: output, shape index: {}]  }
   0x1   :  { %25458 = sst [smem:[#allocation12_spill]] %s25427_s0 }
   0x2   :  { %25459 = sst [smem:[#allocation13_spill]] %s25428_s1 }
   0x3   :  { %25460 = sst [smem:[#allocation14_spill]] %s25429_s2 }
   0x4   :  { %25461 = sst [smem:[#allocation15_spill]] %s25430_s3 }
   0x5   :  { %25462 = sst [smem:[#allocation16_spill]] %s25431_s4 }
   0x6   :  { %25463 = sst [smem:[#allocation17_spill]] %s25446_s19 }
   0x7   :  { %24 = vsyncpa [#allocation3], 0 }
   0x8   :  { %26 = vsyncpa [#allocation3 + $0x1], 0  ;;  %s17019_s0 = smov 0   ;;  %s17021_s30 = smov 0  }
   0x9   :  { %s17023_s20 = smov 0   ;;  %s17025_s21 = smov 0  }
   0xa LB: > { %25464 = sst [smem:[#allocation5_spill]] %s16900_s0  ;;  %s17040_s1 = sadd.s32 4294967295, %s16912_s21   ;;  %s16912_s21 = sphi %s17025_s21, %s25485_s21   ;;  %s16908_s20 = sphi %s17023_s20, %s25487_s20   ;;  %s16904_s30 = sphi %s17021_s30, %s25489_s30   ;;  %s16900_s0 = sphi %s17019_s0, %s25488_s0  }
   0xb   : > { %25465 = sst [smem:[#allocation6_spill]] %s16908_s20  ;;  %s11392_s22 = sadd.s32 4294967294, %s16912_s21  }
   0xc   : > { %25466 = sst [smem:[#allocation7_spill]] %s16912_s21  ;;  %s17044_s2 = sadd.s32 1, %s16912_s21  }
   0xd   : > { %25467 = sst [smem:[#allocation8_spill]] %s17044_s2  ;;  %s443_s23 = sadd.s32 1, %s16908_s20 }
   0xe   : > { %s440_s24 = ssub.s32 %s16912_s21, %s17044_s2  ;;  %p453_p0 = scmp.ne.s32.totalorder %s16908_s20, %s16904_s30 }
   0xf   : > { %p441_p1 = scmp.eq.s32.totalorder %s440_s24, 0  ;;  %p454_p2 = scmp.eq.s32.totalorder %s17040_s1, 1 }
  0x10   : > { %p459_p3 = scmp.ne.s32.totalorder %s16904_s30, %s16900_s0  ;;  %p460_p4 = scmp.eq.s32.totalorder %s11392_s22, 1 }
  0x11   : > { %s17055_s25 = scalar_select %p441_p1, %s16908_s20, %s443_s23  }
  0x12   : > { %p17057_p5 = por %p454_p2, %p453_p0  ;;  %p17061_p6 = por %p460_p4, %p459_p3 }
  0x13   : > { %25468 = sst [smem:[#allocation9_spill]] %s17055_s25  ;;  %p11395_p7 = scmp.ge.s32.totalorder %s16912_s21, 1 }
  0x14   : > { %s25469_s3 = scalar_select %p17057_p5, 1, 0 }
  0x15   : > { %s25471_s26 = scalar_select %p17061_p6, 1, 0 }
  0x16   : > { %25470 = sst [smem:[#allocation10_spill]] %s25469_s3  ;;  %p540_p8 = scmp.lt.s32.totalorder %s16912_s21, 3 }
  0x17   : > { %25472 = sst [smem:[#allocation11_spill]] %s25471_s26 }
  0x18   : > { %p541_p9 = pnand %p11395_p7, %p540_p8 }
  0x19   : > { %s25473_s29 = sld [smem:[#allocation13_spill]] (!%p541_p9)  ;;  %p595_p10 = scmp.lt.s32.totalorder (!%p541_p9), %s17040_s1, 1  ;;  %v16914_v7 = vmov (!%p541_p9), 0.0   ;;  %vm1303_vm0 = vcmask (!%p541_p9), 1045504   ;;  %vm701_vm1 = vcmask (!%p541_p9), 1046528   ;;  %vm721_vm2 = vcmask (!%p541_p9), 654336  }
  0x1a   : > { %544 = sbr.rel (%p541_p9) target bundleno = 3533 (0xdcd), region = 96  ;;  %806 = vmatprep.mubr.f32.mxu0 (!%p541_p9), %v16914_v7  ;;  %931 = vmatprep.mubr.f32.mxu1 (!%p541_p9), %v16914_v7  ;;  %s25474_s0 = sld [smem:[#allocation12_spill]] (!%p541_p9)  ;;  %vm1674_vm3 = vcmask (!%p541_p9), 1044480   ;;  %vm2045_vm4 = vcmask (!%p541_p9), 1043456   ;;  %vm16915_vm5 = vmmov (!%p541_p9), 1   ;;  %vm2482_vm7 = vcmask (!%p541_p9), 621568  }
  0x1b   : > { %vm18176_vm6 = vmpackc.low (!%p541_p9), %vm2045_vm4, %vm16915_vm5  ;;  %s25478_s19 = sld [smem:[#allocation15_spill]] (!%p541_p9)  ;;  %s25479_s4 = sld [smem:[#allocation16_spill]] (!%p541_p9)  ;;  %vm3044_vm8 = vcmask (!%p541_p9), 588800   ;;  %vm3888_vm9 = vcmask (!%p541_p9), 818176   ;;  %vm16917_vm10 = vmmov (!%p541_p9), 0   ;;  %vm6086_vm11 = vcmask (!%p541_p9), 1041408  }
  0x1c   : > { %vm6076_vm12 = vcmask (!%p541_p9), 277504   ;;  %vm6825_vm13 = vcmask (!%p541_p9), 261120   ;;  %vm8061_vm14 = vcmask (!%p541_p9), 130048   ;;  %vm11147_vm15 = vcmask (!%p541_p9), 982016   ;;  %s12979_s22 = sshll.u32 (!%p541_p9), %s17040_s1, 4  ;;  %s25481_s26 = sld [smem:[#allocation17_spill]] (!%p541_p9) }
  0x1f   : > { %v11398_v0 = vld [vmem:[%s25473_s29 + $0x148] sm:$0xff] (!%p541_p9)  ;;  %v11400_v2 = vld [vmem:[%s25473_s29 + $0x158] sm:$0xff] (!%p541_p9)  ;;  %v11397_v5 = vld [vmem:[%s25473_s29 + $0x140] sm:$0xff] (!%p541_p9) }
  0x20   : > { %v11402_v1 = vld [vmem:[%s25473_s29 + $0x168] sm:$0xff] (!%p541_p9)  ;;  %v11404_v4 = vld [vmem:[%s25473_s29 + $0x178] sm:$0xff] (!%p541_p9)  ;;  %v11401_v6 = vld [vmem:[%s25473_s29 + $0x160] sm:$0xff] (!%p541_p9) }
  0x21   : > { %v14099_v3 = vpack.c.bf16 %v11402_v1, %v11398_v0  ;;  %v14119_v8 = vpack.c.bf16 %v11404_v4, %v11400_v2  ;;  %v14101_v9 = vpack.c.bf16 %v11401_v6, %v11397_v5  ;;  %v11399_v10 = vld [vmem:[%s25473_s29 + $0x150] sm:$0xff]  ;;  %v11406_v12 = vld [vmem:[%s25473_s29 + $0x188] sm:$0xff]  ;;  %s17098_s23 = scalar_select %p595_p10, %s17040_s1, 1  ;;  %v11408_v15 = vld [vmem:[%s25473_s29 + $0x198] sm:$0xff] }
  0x22   : > { %v11403_v11 = vld [vmem:[%s25473_s29 + $0x170] sm:$0xff]  ;;  %v11410_v14 = vld [vmem:[%s25473_s29 + $0x1a8] sm:$0xff]  ;;  %v11412_v16 = vld [vmem:[%s25473_s29 + $0x1b8] sm:$0xff]  ;;  %s25384_s24 = scalar_lea.hbm %s25481_s26, %s12979_s22  ;;  %s16918_s1 = smov [#allocation2]  }
  0x23   : > { %14100 = vmatprep.subr.bf16.mxu0 %v14099_v3  ;;  %v14121_v13 = vpack.c.bf16 %v11403_v11, %v11399_v10  ;;  %14120 = vmatprep.subr.bf16.mxu1 %v14119_v8  ;;  %v14103_v17 = vpack.c.bf16 %v11410_v14, %v11406_v12  ;;  %v14123_v18 = vpack.c.bf16 %v11412_v16, %v11408_v15  ;;  %v11405_v19 = vld [vmem:[%s25473_s29 + $0x180] sm:$0xff]  ;;  %v11407_v21 = vld [vmem:[%s25473_s29 + $0x190] sm:$0xff]  ;;  %v11414_v24 = vld [vmem:[%s25473_s29 + $0x1c8] sm:$0xff]  ;;  %s16802_s25 = smul.u32 80, %s17098_s23  ;;  %s16854_s27 = sshll.u32 %s16918_s1, 4  ;;  %s16855_s27 = int_to_ptr.vmem [resolvable:$false] %s16854_s27 }
  0x24   : > { %14102 = vmatpush1.bf16.msra.mxu0 %v14101_v9  ;;  %v11409_v20 = vld [vmem:[%s25473_s29 + $0x1a0] sm:$0xff]  ;;  %v11411_v23 = vld [vmem:[%s25473_s29 + $0x1b0] sm:$0xff]  ;;  %v11418_v25 = vld [vmem:[%s25473_s29 + $0x1e8] sm:$0xff] }
  0x25   : > { %14122 = vmatpush1.bf16.msra.mxu1 %v14121_v13  ;;  %v14105_v22 = vpack.c.bf16 %v11409_v20, %v11405_v19  ;;  %14104 = vmatprep.subr.bf16.mxu0 %v14103_v17  ;;  %v14125_v26 = vpack.c.bf16 %v11411_v23, %v11407_v21  ;;  %v14107_v27 = vpack.c.bf16 %v11418_v25, %v11414_v24  ;;  %v11416_v28 = vld [vmem:[%s25473_s29 + $0x1d8] sm:$0xff]  ;;  %v11413_v30 = vld [vmem:[%s25473_s29 + $0x1c0] sm:$0xff]  ;;  %v11415_v33 = vld [vmem:[%s25473_s29 + $0x1d0] sm:$0xff]  ;;  %s17176_s3 = scalar_lea.vmem %s25474_s0, %s16802_s25 }
  0x26   : > { %14124 = vmatprep.subr.bf16.mxu1 %v14123_v18  ;;  %v11420_v29 = vld [vmem:[%s25473_s29 + $0x1f8] sm:$0xff]  ;;  %v11417_v32 = vld [vmem:[%s25473_s29 + $0x1e0] sm:$0xff]  ;;  %v11419_v34 = vld [vmem:[%s25473_s29 + $0x1f0] sm:$0xff] }
  0x27   : > { %v14127_v31 = vpack.c.bf16 %v11420_v29, %v11416_v28  ;;  %v14109_v35 = vpack.c.bf16 %v11417_v32, %v11413_v30  ;;  %v11422_v36 = vld [vmem:[%s25473_s29 + $0x208] sm:$0xff]  ;;  %v11424_v38 = vld [vmem:[%s25473_s29 + $0x218] sm:$0xff]  ;;  %v14129_v39 = vpack.c.bf16 %v11419_v34, %v11415_v33  ;;  %v11421_v42 = vld [vmem:[%s25473_s29 + $0x200] sm:$0xff] }
  0x28   : > { %14106 = vmatpush1.bf16.msra.mxu0 %v14105_v22  ;;  %v11426_v37 = vld [vmem:[%s25473_s29 + $0x228] sm:$0xff]  ;;  %v11428_v41 = vld [vmem:[%s25473_s29 + $0x238] sm:$0xff]  ;;  %v11425_v43 = vld [vmem:[%s25473_s29 + $0x220] sm:$0xff] }
  0x29   : > { %14126 = vmatpush1.bf16.msra.mxu1 %v14125_v26  ;;  %14108 = vmatprep.subr.bf16.mxu0 %v14107_v27  ;;  %v14111_v40 = vpack.c.bf16 %v11426_v37, %v11422_v36  ;;  %v14131_v44 = vpack.c.bf16 %v11428_v41, %v11424_v38  ;;  %v11423_v45 = vld [vmem:[%s25473_s29 + $0x210] sm:$0xff]  ;;  %v11430_v47 = vld [vmem:[%s25473_s29 + $0x248] sm:$0xff]  ;;  %v11432_v49 = vld [vmem:[%s25473_s29 + $0x258] sm:$0xff]  ;;  %v14113_v51 = vpack.c.bf16 %v11425_v43, %v11421_v42 }
  0x2a   : > { %14128 = vmatprep.subr.bf16.mxu1 %v14127_v31  ;;  %v11427_v46 = vld [vmem:[%s25473_s29 + $0x230] sm:$0xff]  ;;  %v11434_v48 = vld [vmem:[%s25473_s29 + $0x268] sm:$0xff]  ;;  %v11436_v50 = vld [vmem:[%s25473_s29 + $0x278] sm:$0xff] }
  0x2b   : > { %v11429_v52 = vld [vmem:[%s25473_s29 + $0x240] sm:$0xff]  ;;  %v11431_v54 = vld [vmem:[%s25473_s29 + $0x250] sm:$0xff]  ;;  %v14133_v55 = vpack.c.bf16 %v11427_v46, %v11423_v45  ;;  %v14115_v56 = vpack.c.bf16 %v11434_v48, %v11430_v47  ;;  %v17203_v59 = vld [vmem:[%s17176_s3 + $0x8] sm:$0xff]  ;;  %v14135_v60 = vpack.c.bf16 %v11436_v50, %v11432_v49 }
  0x2c   : > { %14110 = vmatpush1.bf16.msra.mxu0 %v14109_v35  ;;  %v11433_v53 = vld [vmem:[%s25473_s29 + $0x260] sm:$0xff]  ;;  %v11435_v57 = vld [vmem:[%s25473_s29 + $0x270] sm:$0xff]  ;;  %v611_v62 = vld [vmem:[%s25473_s29 + $0x8] sm:$0xff]  ;;  %v1305_v2 = vrot.slane %v17203_v59, 2  ;;  %v703_v6 = vrot.slane %v17203_v59, 1  ;;  %v1676_v46 = vrot.slane %v17203_v59, 3 }
  0x2d   : > { %14130 = vmatpush1.bf16.msra.mxu1 %v14129_v39  ;;  %14112 = vmatprep.subr.bf16.mxu0 %v14111_v40  ;;  %v17200_v58 = vld [vmem:[%s17176_s3] sm:$0xff]  ;;  %v17206_v61 = vld [vmem:[%s17176_s3 + $0x10] sm:$0xff]  ;;  %v615_v63 = vld [vmem:[%s25473_s29 + $0x28] sm:$0xff]  ;;  %v14117_v4 = vpack.c.bf16 %v11433_v53, %v11429_v52  ;;  %v14137_v9 = vpack.c.bf16 %v11435_v57, %v11431_v54 }
  0x2e   : > { %14132 = vmatprep.subr.bf16.mxu1 %v14131_v44  ;;  %v1304_v0 = vrot.slane %v17200_v58, 2  ;;  %v17216_v1 = vld [vmem:[%s17176_s3 + $0x18] sm:$0xff]  ;;  %v1307_v3 = vrot.slane %v17206_v61, 2  ;;  %v702_v5 = vrot.slane %v17200_v58, 1  ;;  %v14139_v10 = vpack.c.bf16 %v615_v63, %v611_v62  ;;  %v610_v11 = vld [vmem:[%s25473_s29] sm:$0xff]  ;;  %v619_v15 = vld [vmem:[%s25473_s29 + $0x48] sm:$0xff] }
  0x2f   : > { %v1309_v8 = vrot.slane %v17216_v1, 2  ;;  %v614_v13 = vld [vmem:[%s25473_s29 + $0x20] sm:$0xff]  ;;  %v623_v17 = vld [vmem:[%s25473_s29 + $0x68] sm:$0xff]  ;;  %v613_v18 = vld [vmem:[%s25473_s29 + $0x18] sm:$0xff]  ;;  %v705_v22 = vrot.slane %v17206_v61, 1  ;;  %v707_v41 = vrot.slane %v17216_v1, 1 }
  0x30   : > { %14114 = vmatpush1.bf16.msra.mxu0 %v14113_v51  ;;  %v17227_v12 = vsel %vm1303_vm0, %v1304_v0, %v1305_v2  ;;  %v17233_v14 = vld [vmem:[%s17176_s3 + $0x20] sm:$0xff]  ;;  %v17239_v16 = vsel %vm1303_vm0, %v1305_v2, %v1307_v3  ;;  %v617_v19 = vld [vmem:[%s25473_s29 + $0x38] sm:$0xff]  ;;  %v704_v21 = vsel %vm701_vm1, %v702_v5, %v703_v6  ;;  %v612_v24 = vld [vmem:[%s25473_s29 + $0x10] sm:$0xff]  ;;  %v14141_v27 = vpack.c.bf16 %v614_v13, %v610_v11 }
  0x31   : > { %14134 = vmatpush1.bf16.msra.mxu1 %v14133_v55  ;;  %14116 = vmatprep.subr.bf16.mxu0 %v14115_v56  ;;  %v17251_v20 = vsel %vm1303_vm0, %v1307_v3, %v1309_v8  ;;  %v14159_v23 = vpack.c.bf16 %v617_v19, %v613_v18  ;;  %v616_v25 = vld [vmem:[%s25473_s29 + $0x30] sm:$0xff]  ;;  %v1311_v26 = vrot.slane %v17233_v14, 2  ;;  %v621_v28 = vld [vmem:[%s25473_s29 + $0x58] sm:$0xff]  ;;  %v14143_v30 = vpack.c.bf16 %v623_v17, %v619_v15  ;;  %v618_v31 = vld [vmem:[%s25473_s29 + $0x40] sm:$0xff] }
  0x32   : > { %14136 = vmatprep.subr.bf16.mxu1 %v14135_v60  ;;  %v625_v29 = vld [vmem:[%s25473_s29 + $0x78] sm:$0xff]  ;;  %v622_v32 = vld [vmem:[%s25473_s29 + $0x60] sm:$0xff]  ;;  %v627_v33 = vld [vmem:[%s25473_s29 + $0x88] sm:$0xff]  ;;  %v14161_v34 = vpack.c.bf16 %v616_v25, %v612_v24  ;;  %v706_v40 = vsel %vm701_vm1, %v703_v6, %v705_v22  ;;  %v1675_v44 = vrot.slane %v17200_v58, 3  ;;  %v1678_v57 = vrot.slane %v17206_v61, 3 }
  0x33   : > { %v17280_v35 = vsel %vm1303_vm0, %v1309_v8, %v1311_v26  ;;  %v631_v36 = vld [vmem:[%s25473_s29 + $0xa8] sm:$0xff]  ;;  %v14163_v37 = vpack.c.bf16 %v625_v29, %v621_v28  ;;  %v620_v38 = vld [vmem:[%s25473_s29 + $0x50] sm:$0xff]  ;;  %v629_v42 = vld [vmem:[%s25473_s29 + $0x98] sm:$0xff]  ;;  %v14145_v45 = vpack.c.bf16 %v622_v32, %v618_v31  ;;  %v708_v60 = vsel %vm701_vm1, %v705_v22, %v707_v41 }
  0x34   : > { %14118 = vmatpush1.bf16.msra.mxu0 %v14117_v4  ;;  %v624_v39 = vld [vmem:[%s25473_s29 + $0x70] sm:$0xff]  ;;  %v633_v43 = vld [vmem:[%s25473_s29 + $0xb8] sm:$0xff]  ;;  %v14147_v47 = vpack.c.bf16 %v631_v36, %v627_v33  ;;  %v626_v48 = vld [vmem:[%s25473_s29 + $0x80] sm:$0xff]  ;;  %v17325_v56 = vsel %vm1674_vm3, %v1675_v44, %v1676_v46  ;;  %v709_v62 = vrot.slane %v17233_v14, 1  ;;  %v1680_v2 = vrot.slane %v17216_v1, 3 }
  0x35   : > { %14138 = vmatpush1.bf16.msra.mxu1 %v14137_v9  ;;  %14140 = vmatprep.subr.bf16.mxu0 %v14139_v10  ;;  %v630_v49 = vld [vmem:[%s25473_s29 + $0xa0] sm:$0xff]  ;;  %v14165_v50 = vpack.c.bf16 %v624_v39, %v620_v38  ;;  %v635_v51 = vld [vmem:[%s25473_s29 + $0xc8] sm:$0xff]  ;;  %v14167_v53 = vpack.c.bf16 %v633_v43, %v629_v42  ;;  %v628_v54 = vld [vmem:[%s25473_s29 + $0x90] sm:$0xff]  ;;  %v17344_v5 = vsel %vm1674_vm3, %v1676_v46, %v1678_v57  ;;  %v1682_v6 = vrot.slane %v17233_v14, 3 }
  0x36   : > { %14160 = vmatprep.subr.bf16.mxu1 %v14159_v23  ;;  %v639_v52 = vld [vmem:[%s25473_s29 + $0xe8] sm:$0xff]  ;;  %v632_v55 = vld [vmem:[%s25473_s29 + $0xb0] sm:$0xff]  ;;  %v637_v63 = vld [vmem:[%s25473_s29 + $0xd8] sm:$0xff]  ;;  %v14149_v4 = vpack.c.bf16 %v630_v49, %v626_v48  ;;  %v17357_v15 = vsel %vm1674_vm3, %v1678_v57, %v1680_v2  ;;  %v710_v23 = vsel %vm701_vm1, %v707_v41, %v709_v62 }
  0x37   : > { %11437 = vmatmul.mubr.msk.f32.vlgmr.msra.gmra.mrb[0].mxu0 %vm721_vm2, %v704_v21  ;;  %v641_v0 = vld [vmem:[%s25473_s29 + $0xf8] sm:$0xff]  ;;  %v17341_v3 = vld [vmem:[%s17176_s3 + $0x28] sm:$0xff]  ;;  %v14151_v8 = vpack.c.bf16 %v639_v52, %v635_v51  ;;  %v634_v9 = vld [vmem:[%s25473_s29 + $0xc0] sm:$0xff]  ;;  %v14169_v11 = vpack.c.bf16 %v632_v55, %v628_v54  ;;  %v17372_v22 = vsel %vm1674_vm3, %v1680_v2, %v1682_v6  ;;  %v2049_v2 = vrot.slane %v17206_v61, 4 }
  0x38   : > { %11447 = vmatmul.mubr.msk.f32.vlgmr.msra.gmra.mrb[0].mxu1 %vm721_vm2, %v704_v21  ;;  %812 = vmatprep.mubr.f32.mxu0 %v16914_v7  ;;  %v638_v10 = vld [vmem:[%s25473_s29 + $0xe0] sm:$0xff]  ;;  %v636_v13 = vld [vmem:[%s25473_s29 + $0xd0] sm:$0xff]  ;;  %v14171_v17 = vpack.c.bf16 %v641_v0, %v637_v63  ;;  %v643_v19 = vld [vmem:[%s25473_s29 + $0x108] sm:$0xff]  ;;  %v711_v24 = vrot.slane %v17341_v3, 1  ;;  %v2047_v63 = vrot.slane %v17203_v59, 4 }
  0x39   : > { %937 = vmatprep.mubr.f32.mxu1 %v16914_v7  ;;  %14142 = vmatpush1.bf16.msra.mxu0 %v14141_v27  ;;  %v640_v18 = vld [vmem:[%s25473_s29 + $0xf0] sm:$0xff]  ;;  %v647_v21 = vld [vmem:[%s25473_s29 + $0x128] sm:$0xff]  ;;  %v645_v25 = vld [vmem:[%s25473_s29 + $0x118] sm:$0xff]  ;;  %v14153_v29 = vpack.c.bf16 %v638_v10, %v634_v9 }
  0x3a   : > { %14144 = vmatprep.subr.bf16.mxu0 %v14143_v30  ;;  %14162 = vmatpush1.bf16.msra.mxu1 %v14161_v34  ;;  %v649_v27 = vld [vmem:[%s25473_s29 + $0x138] sm:$0xff]  ;;  %v17386_v28 = vld [vmem:[%s17176_s3 + $0x30] sm:$0xff]  ;;  %v14173_v30 = vpack.c.bf16 %v640_v18, %v636_v13  ;;  %v14155_v31 = vpack.c.bf16 %v647_v21, %v643_v19  ;;  %v642_v32 = vld [vmem:[%s25473_s29 + $0x100] sm:$0xff] }
  0x3b   : > { %11438 = vmatmul.mubr.msk.f32.gmra.mrb[2].mxu0 %vm721_vm2, %v706_v40  ;;  %14164 = vmatprep.subr.bf16.mxu1 %v14163_v37  ;;  %v646_v33 = vld [vmem:[%s25473_s29 + $0x120] sm:$0xff]  ;;  %v644_v34 = vld [vmem:[%s25473_s29 + $0x110] sm:$0xff]  ;;  %v14175_v36 = vpack.c.bf16 %v649_v27, %v645_v25  ;;  %v11478_v38 = vld [vmem:[%s25473_s29 + $0x288] sm:$0xff]  ;;  %v713_v41 = vrot.slane %v17386_v28, 1 }
  0x3c   : > { %11448 = vmatmul.mubr.msk.f32.gmra.mrb[2].mxu1 %vm721_vm2, %v706_v40  ;;  %818 = vmatprep.mubr.f32.mxu0 %v16914_v7  ;;  %v648_v37 = vld [vmem:[%s25473_s29 + $0x130] sm:$0xff]  ;;  %v11482_v39 = vld [vmem:[%s25473_s29 + $0x2a8] sm:$0xff]  ;;  %v712_v40 = vsel %vm701_vm1, %v709_v62, %v711_v24  ;;  %v11480_v42 = vld [vmem:[%s25473_s29 + $0x298] sm:$0xff]  ;;  %v2046_v62 = vrot.slane %v17200_v58, 4 }
  0x3d   : > { %943 = vmatprep.mubr.f32.mxu1 %v16914_v7  ;;  %14146 = vmatpush1.bf16.msra.mxu0 %v14145_v45  ;;  %v11484_v43 = vld [vmem:[%s25473_s29 + $0x2b8] sm:$0xff]  ;;  %v14157_v45 = vpack.c.bf16 %v646_v33, %v642_v32  ;;  %v14177_v46 = vpack.c.bf16 %v648_v37, %v644_v34  ;;  %v714_v49 = vsel %vm701_vm1, %v711_v24, %v713_v41  ;;  %v17428_v51 = vld [vmem:[%s17176_s3 + $0x40] sm:$0xff]  ;;  %v17437_v54 = vld [vmem:[%s17176_s3 + $0x48] sm:$0xff] }
  0x3e   : > { %14148 = vmatprep.subr.bf16.mxu0 %v14147_v47  ;;  %14166 = vmatpush1.bf16.msra.mxu1 %v14165_v50  ;;  %v17419_v44 = vld [vmem:[%s17176_s3 + $0x38] sm:$0xff]  ;;  %v14179_v47 = vpack.c.bf16 %v11482_v39, %v11478_v38  ;;  %v14199_v48 = vpack.c.bf16 %v11484_v43, %v11480_v42  ;;  %v719_v57 = vrot.slane %v17437_v54, 1  ;;  %v17454_v0 = vsel %vm2045_vm4, %v2046_v62, %v2047_v63  ;;  %v11486_v9 = vld [vmem:[%s25473_s29 + $0x2c8] sm:$0xff]  ;;  %v11483_v13 = vld [vmem:[%s25473_s29 + $0x2b0] sm:$0xff]  ;;  %s25475_s3 = sld [smem:[#allocation14_spill]] }
  0x3f   : > { %11439 = vmatmul.mubr.msk.f32.gmra.mrb[4].mxu0 %vm721_vm2, %v708_v60  ;;  %14168 = vmatprep.subr.bf16.mxu1 %v14167_v53  ;;  %v715_v50 = vrot.slane %v17419_v44, 1  ;;  %v717_v53 = vrot.slane %v17428_v51, 1  ;;  %v11490_v10 = vld [vmem:[%s25473_s29 + $0x2e8] sm:$0xff]  ;;  %v11488_v18 = vld [vmem:[%s25473_s29 + $0x2d8] sm:$0xff]  ;;  %v11485_v25 = vld [vmem:[%s25473_s29 + $0x2c0] sm:$0xff] }
  0x40   : > { %11449 = vmatmul.mubr.msk.f32.gmra.mrb[4].mxu1 %vm721_vm2, %v708_v60  ;;  %824 = vmatprep.mubr.f32.mxu0 %v16914_v7  ;;  %v11492_v19 = vld [vmem:[%s25473_s29 + $0x2f8] sm:$0xff]  ;;  %v14183_v24 = vpack.c.bf16 %v11490_v10, %v11486_v9  ;;  %v11489_v27 = vld [vmem:[%s25473_s29 + $0x2e0] sm:$0xff]  ;;  %v11487_v33 = vld [vmem:[%s25473_s29 + $0x2d0] sm:$0xff] }
  0x41   : > { %949 = vmatprep.mubr.f32.mxu1 %v16914_v7  ;;  %14150 = vmatpush1.bf16.msra.mxu0 %v14149_v4  ;;  %v716_v52 = vsel %vm701_vm1, %v713_v41, %v715_v50  ;;  %v718_v55 = vsel %vm701_vm1, %v715_v50, %v717_v53  ;;  %v720_v60 = vsel %vm701_vm1, %v717_v53, %v719_v57  ;;  %v11477_v4 = vld [vmem:[%s25473_s29 + $0x280] sm:$0xff]  ;;  %v11491_v34 = vld [vmem:[%s25473_s29 + $0x2f0] sm:$0xff]  ;;  %v11496_v37 = vld [vmem:[%s25473_s29 + $0x318] sm:$0xff] }
  0x42   : > { %14152 = vmatprep.subr.bf16.mxu0 %v14151_v8  ;;  %14170 = vmatpush1.bf16.msra.mxu1 %v14169_v11  ;;  %v11481_v8 = vld [vmem:[%s25473_s29 + $0x2a0] sm:$0xff]  ;;  %v11479_v11 = vld [vmem:[%s25473_s29 + $0x290] sm:$0xff]  ;;  %v14203_v32 = vpack.c.bf16 %v11492_v19, %v11488_v18  ;;  %v11500_v38 = vld [vmem:[%s25473_s29 + $0x338] sm:$0xff]  ;;  %v14185_v39 = vpack.c.bf16 %v11489_v27, %v11485_v25  ;;  %v14205_v43 = vpack.c.bf16 %v11491_v34, %v11487_v33 }
  0x43   : > { %11440 = vmatmul.mubr.msk.f32.gmra.mrb[6].mxu0 %vm721_vm2, %v710_v23  ;;  %14172 = vmatprep.subr.bf16.mxu1 %v14171_v17  ;;  %v17480_v17 = vsel %vm2045_vm4, %v2047_v63, %v2049_v2  ;;  %v14181_v21 = vpack.c.bf16 %v11481_v8, %v11477_v4  ;;  %v11497_v42 = vld [vmem:[%s25473_s29 + $0x320] sm:$0xff]  ;;  %v11508_v53 = vld [vmem:[%s25473_s29 + $0x378] sm:$0xff]  ;;  %v11503_v63 = vld [vmem:[%s25473_s29 + $0x350] sm:$0xff] }
  0x44   : > { %11450 = vmatmul.mubr.msk.f32.gmra.mrb[6].mxu1 %vm721_vm2, %v710_v23  ;;  %830 = vmatprep.mubr.f32.mxu0 %v16914_v7  ;;  %v2051_v23 = vrot.slane %v17216_v1, 4  ;;  %v11507_v4 = vld [vmem:[%s25473_s29 + $0x370] sm:$0xff]  ;;  %v11510_v8 = vld [vmem:[%s25473_s29 + $0x388] sm:$0xff]  ;;  %v11512_v10 = vld [vmem:[%s25473_s29 + $0x398] sm:$0xff] }
  0x45   : > { %955 = vmatprep.mubr.f32.mxu1 %v16914_v7  ;;  %14154 = vmatpush1.bf16.msra.mxu0 %v14153_v29  ;;  %v11494_v29 = vld [vmem:[%s25473_s29 + $0x308] sm:$0xff]  ;;  %v14213_v18 = vpack.c.bf16 %v11507_v4, %v11503_v63  ;;  %v11515_v25 = vld [vmem:[%s25473_s29 + $0x3b0] sm:$0xff]  ;;  %v11560_v63 = vld [vmem:[%s25473_s29 + $0x478] sm:$0xff] }
  0x46   : > { %14174 = vmatpush1.bf16.msra.mxu1 %v14173_v30  ;;  %14156 = vmatprep.subr.bf16.mxu0 %v14155_v31  ;;  %v14201_v30 = vpack.c.bf16 %v11483_v13, %v11479_v11  ;;  %v11498_v31 = vld [vmem:[%s25473_s29 + $0x328] sm:$0xff]  ;;  %v11516_v11 = vld [vmem:[%s25473_s29 + $0x3b8] sm:$0xff] }
  0x47   : > { %11441 = vmatmul.mubr.msk.f32.gmra.mrb[8].mxu0 %vm721_vm2, %v712_v40  ;;  %14176 = vmatprep.subr.bf16.mxu1 %v14175_v36  ;;  %v17513_v36 = vsel %vm2045_vm4, %v2049_v2, %v2051_v23  ;;  %v14187_v41 = vpack.c.bf16 %v11498_v31, %v11494_v29  ;;  %v11514_v9 = vld [vmem:[%s25473_s29 + $0x3a8] sm:$0xff]  ;;  %v11544_v31 = vld [vmem:[%s25473_s29 + $0x3f8] sm:$0xff] }
  0x48   : > { %11451 = vmatmul.mubr.msk.f32.gmra.mrb[8].mxu1 %vm721_vm2, %v712_v40  ;;  %836 = vmatprep.mubr.f32.mxu0 %v16914_v7  ;;  %v2053_v40 = vrot.slane %v17233_v14, 4  ;;  %v14195_v19 = vpack.c.bf16 %v11514_v9, %v11510_v8  ;;  %v11538_v27 = vld [vmem:[%s25473_s29 + $0x3c8] sm:$0xff]  ;;  %v11557_v8 = vld [vmem:[%s25473_s29 + $0x460] sm:$0xff] }
  0x49   : > { %961 = vmatprep.mubr.f32.mxu1 %v16914_v7  ;;  %14158 = vmatpush1.bf16.msra.mxu0 %v14157_v45  ;;  %v11502_v45 = vld [vmem:[%s25473_s29 + $0x348] sm:$0xff] }
  0x4a   : > { %14178 = vmatpush1.bf16.msra.mxu1 %v14177_v46  ;;  %14180 = vmatprep.subr.bf16.mxu0 %v14179_v47  ;;  %v11506_v46 = vld [vmem:[%s25473_s29 + $0x368] sm:$0xff]  ;;  %v14207_v47 = vpack.c.bf16 %v11500_v38, %v11496_v37  ;;  %v17549_v50 = vsel %vm2045_vm4, %v2051_v23, %v2053_v40  ;;  %v11511_v23 = vld [vmem:[%s25473_s29 + $0x390] sm:$0xff]  ;;  %v11537_v37 = vld [vmem:[%s25473_s29 + $0x3c0] sm:$0xff] }
  0x4b   : > { %11442 = vmatmul.mubr.msk.f32.gmra.mrb[10].mxu0 %vm721_vm2, %v714_v49  ;;  %14200 = vmatprep.subr.bf16.mxu1 %v14199_v48  ;;  %v11495_v48 = vld [vmem:[%s25473_s29 + $0x310] sm:$0xff]  ;;  %v11542_v29 = vld [vmem:[%s25473_s29 + $0x3e8] sm:$0xff]  ;;  %v14217_v33 = vpack.c.bf16 %v11515_v25, %v11511_v23  ;;  %v11541_v38 = vld [vmem:[%s25473_s29 + $0x3e0] sm:$0xff] }
  0x4c   : > { %11452 = vmatmul.mubr.msk.f32.gmra.mrb[10].mxu1 %vm721_vm2, %v714_v49  ;;  %842 = vmatprep.mubr.f32.mxu0 %v16914_v7  ;;  %v11499_v49 = vld [vmem:[%s25473_s29 + $0x330] sm:$0xff]  ;;  %v14219_v34 = vpack.c.bf16 %v11542_v29, %v11538_v27  ;;  %v11565_v25 = vld [vmem:[%s25473_s29 + $0x4a0] sm:$0xff] }
  0x4d   : > { %967 = vmatprep.mubr.f32.mxu1 %v16914_v7  ;;  %v14209_v62 = vpack.c.bf16 %v11499_v49, %v11495_v48  ;;  %v11545_v48 = vld [vmem:[%s25473_s29 + $0x400] sm:$0xff]  ;;  %v11563_v29 = vld [vmem:[%s25473_s29 + $0x490] sm:$0xff] }
  0x4e   : > { %v11549_v49 = vld [vmem:[%s25473_s29 + $0x420] sm:$0xff] }
  0x4f   : > { %11443 = vmatmul.mubr.msk.f32.gmra.mrb[12].mxu0 %vm721_vm2, %v716_v52 }
  0x50   : > { %11453 = vmatmul.mubr.msk.f32.gmra.mrb[12].mxu1 %vm721_vm2, %v716_v52  ;;  %848 = vmatprep.mubr.f32.mxu0 %v16914_v7  ;;  %v11504_v52 = vld [vmem:[%s25473_s29 + $0x358] sm:$0xff] }
  0x51   : > { %973 = vmatprep.mubr.f32.mxu1 %v16914_v7  ;;  %v14211_v2 = vpack.c.bf16 %v11508_v53, %v11504_v52  ;;  %v11554_v52 = vld [vmem:[%s25473_s29 + $0x448] sm:$0xff] }
  0x53   : > { %11444 = vmatmul.mubr.msk.f32.gmra.mrb[14].mxu0 %vm721_vm2, %v718_v55 }
  0x54   : > { %11454 = vmatmul.mubr.msk.f32.gmra.mrb[14].mxu1 %vm721_vm2, %v718_v55  ;;  %854 = vmatprep.mubr.f32.mxu0 %v16914_v7 }
  0x55   : > { %979 = vmatprep.mubr.f32.mxu1 %v16914_v7 }
  0x57   : > { %11445 = vmatmul.mubr.msk.f32.gmra.mrb[16].mxu0 %vm721_vm2, %v720_v60 }
  0x58   : > { %11455 = vmatmul.mubr.msk.f32.gmra.mrb[16].mxu1 %vm721_vm2, %v720_v60  ;;  %860 = vmatprep.mubr.f32.mxu0 %v16914_v7  ;;  %v11505_v60 = vld [vmem:[%s25473_s29 + $0x360] sm:$0xff] }
  0x59   : > { %985 = vmatprep.mubr.f32.mxu1 %v16914_v7 }
  0x5b   : > { %11446 = vmatmul.mubr.msk.f32.gmra.mrb[18].mxu0 %vm721_vm2, %v719_v57 }
  0x5c   : > { %11456 = vmatmul.mubr.msk.f32.gmra.mrb[18].mxu1 %vm721_vm2, %v719_v57  ;;  %1076 = vmatprep.mubr.f32.mxu0 %v16914_v7  ;;  %v14191_v57 = vpack.c.bf16 %v11506_v46, %v11502_v45  ;;  %v11552_v45 = vld [vmem:[%s25473_s29 + $0x438] sm:$0xff]  ;;  %v14221_v46 = vpack.c.bf16 %v11541_v38, %v11537_v37 }
  0x5d   : > { %1201 = vmatprep.mubr.f32.mxu1 %v16914_v7  ;;  %v11576_v37 = vld [vmem:[%s25473_s29 + $0x4f8] sm:$0xff] }
  0x5f   : > { %11457 = vmatmul.mubr.msk.f32.vlgmr.msra.gmra.mrb[0].mxu0 %vm721_vm2, %v17200_v58 }
  0x60   : > { %11467 = vmatmul.mubr.msk.f32.vlgmr.msra.gmra.mrb[0].mxu1 %vm721_vm2, %v17200_v58  ;;  %1082 = vmatprep.mubr.f32.mxu0 %v16914_v7  ;;  %v11493_v58 = vld [vmem:[%s25473_s29 + $0x300] sm:$0xff] }
  0x61   : > { %1207 = vmatprep.mubr.f32.mxu1 %v16914_v7  ;;  %14182 = vmatpush1.bf16.msra.mxu0 %v14181_v21  ;;  %v14189_v55 = vpack.c.bf16 %v11497_v42, %v11493_v58  ;;  %v11513_v21 = vld [vmem:[%s25473_s29 + $0x3a0] sm:$0xff]  ;;  %v11539_v58 = vld [vmem:[%s25473_s29 + $0x3d0] sm:$0xff] }
  0x62   : > { %14184 = vmatprep.subr.bf16.mxu0 %v14183_v24  ;;  %14202 = vmatpush1.bf16.msra.mxu1 %v14201_v30  ;;  %v14215_v24 = vpack.c.bf16 %v11516_v11, %v11512_v10  ;;  %v11540_v30 = vld [vmem:[%s25473_s29 + $0x3d8] sm:$0xff]  ;;  %v11543_v42 = vld [vmem:[%s25473_s29 + $0x3f0] sm:$0xff]  ;;  %v11562_v10 = vld [vmem:[%s25473_s29 + $0x488] sm:$0xff] }
  0x63   : > { %11458 = vmatmul.mubr.msk.f32.gmra.mrb[2].mxu0 %vm721_vm2, %v17203_v59  ;;  %14204 = vmatprep.subr.bf16.mxu1 %v14203_v32  ;;  %v14241_v53 = vpack.c.bf16 %v11543_v42, %v11539_v58  ;;  %v11566_v11 = vld [vmem:[%s25473_s29 + $0x4a8] sm:$0xff]  ;;  %v11573_v58 = vld [vmem:[%s25473_s29 + $0x4e0] sm:$0xff]  ;;  %v11571_v42 = vld [vmem:[%s25473_s29 + $0x4d0] sm:$0xff] }
  0x64   : > { %11468 = vmatmul.mubr.msk.f32.gmra.mrb[2].mxu1 %vm721_vm2, %v17203_v59  ;;  %1088 = vmatprep.mubr.f32.mxu0 %v16914_v7  ;;  %v11501_v59 = vld [vmem:[%s25473_s29 + $0x340] sm:$0xff] }
  0x65   : > { %1213 = vmatprep.mubr.f32.mxu1 %v16914_v7  ;;  %14186 = vmatpush1.bf16.msra.mxu0 %v14185_v39  ;;  %v14193_v13 = vpack.c.bf16 %v11505_v60, %v11501_v59  ;;  %v11546_v39 = vld [vmem:[%s25473_s29 + $0x408] sm:$0xff]  ;;  %v11547_v59 = vld [vmem:[%s25473_s29 + $0x410] sm:$0xff] }
  0x66   : > { %14188 = vmatprep.subr.bf16.mxu0 %v14187_v41  ;;  %14206 = vmatpush1.bf16.msra.mxu1 %v14205_v43  ;;  %v11550_v41 = vld [vmem:[%s25473_s29 + $0x428] sm:$0xff]  ;;  %v11548_v43 = vld [vmem:[%s25473_s29 + $0x418] sm:$0xff]  ;;  %v11551_v60 = vld [vmem:[%s25473_s29 + $0x430] sm:$0xff] }
  0x67   : > { %11459 = vmatmul.mubr.msk.f32.gmra.mrb[4].mxu0 %vm721_vm2, %v17206_v61  ;;  %14208 = vmatprep.subr.bf16.mxu1 %v14207_v47  ;;  %v14223_v47 = vpack.c.bf16 %v11550_v41, %v11546_v39  ;;  %v14245_v9 = vpack.c.bf16 %v11551_v60, %v11547_v59  ;;  %v11569_v41 = vld [vmem:[%s25473_s29 + $0x4c0] sm:$0xff]  ;;  %v1317_v60 = vrot.slane %v17419_v44, 2 }
  0x68   : > { %11469 = vmatmul.mubr.msk.f32.gmra.mrb[4].mxu1 %vm721_vm2, %v17206_v61  ;;  %1094 = vmatprep.mubr.f32.mxu0 %v16914_v7  ;;  %v11509_v61 = vld [vmem:[%s25473_s29 + $0x380] sm:$0xff] }
  0x69   : > { %1219 = vmatprep.mubr.f32.mxu1 %v16914_v7  ;;  %14190 = vmatpush1.bf16.msra.mxu0 %v14189_v55  ;;  %v14197_v32 = vpack.c.bf16 %v11513_v21, %v11509_v61  ;;  %v11558_v55 = vld [vmem:[%s25473_s29 + $0x468] sm:$0xff]  ;;  %v11564_v61 = vld [vmem:[%s25473_s29 + $0x498] sm:$0xff] }
  0x6a   : > { %14192 = vmatprep.subr.bf16.mxu0 %v14191_v57  ;;  %14210 = vmatpush1.bf16.msra.mxu1 %v14209_v62  ;;  %v14243_v57 = vpack.c.bf16 %v11552_v45, %v11548_v43  ;;  %v11556_v62 = vld [vmem:[%s25473_s29 + $0x458] sm:$0xff]  ;;  %v14227_v4 = vpack.c.bf16 %v11558_v55, %v11554_v52  ;;  %v11575_v45 = vld [vmem:[%s25473_s29 + $0x4f0] sm:$0xff] }
  0x6b   : > { %11460 = vmatmul.mubr.msk.f32.gmra.mrb[6].mxu0 %vm721_vm2, %v17216_v1  ;;  %14212 = vmatprep.subr.bf16.mxu1 %v14211_v2  ;;  %v14225_v2 = vpack.c.bf16 %v11549_v49, %v11545_v48  ;;  %v11568_v21 = vld [vmem:[%s25473_s29 + $0x4b8] sm:$0xff]  ;;  %v1315_v49 = vrot.slane %v17386_v28, 2  ;;  %v14257_v55 = vpack.c.bf16 %v11575_v45, %v11571_v42  ;;  %v11615_v42 = vld [vmem:[%s25473_s29 + $0x590] sm:$0xff] }
  0x6c   : > { %11470 = vmatmul.mubr.msk.f32.gmra.mrb[6].mxu1 %vm721_vm2, %v17216_v1  ;;  %1100 = vmatprep.mubr.f32.mxu0 %v16914_v7  ;;  %v14239_v1 = vpack.c.bf16 %v11544_v31, %v11540_v30  ;;  %v14251_v30 = vpack.c.bf16 %v11568_v21, %v11564_v61  ;;  %v11567_v31 = vld [vmem:[%s25473_s29 + $0x4b0] sm:$0xff]  ;;  %v11600_v52 = vld [vmem:[%s25473_s29 + $0x518] sm:$0xff] }
  0x6d   : > { %1225 = vmatprep.mubr.f32.mxu1 %v16914_v7  ;;  %14194 = vmatpush1.bf16.msra.mxu0 %v14193_v13  ;;  %v14247_v13 = vpack.c.bf16 %v11560_v63, %v11556_v62  ;;  %v14253_v39 = vpack.c.bf16 %v11567_v31, %v11563_v29  ;;  %v1318_v62 = vsel %vm1303_vm0, %v1315_v49, %v1317_v60  ;;  %v1319_v63 = vrot.slane %v17428_v51, 2  ;;  %v11612_v61 = vld [vmem:[%s25473_s29 + $0x578] sm:$0xff]  ;;  %v11618_v29 = vld [vmem:[%s25473_s29 + $0x5a8] sm:$0xff]  ;;  %v11607_v31 = vld [vmem:[%s25473_s29 + $0x550] sm:$0xff] }
  0x6e   : > { %14214 = vmatpush1.bf16.msra.mxu1 %v14213_v18  ;;  %14196 = vmatprep.subr.bf16.mxu0 %v14195_v19  ;;  %v11555_v18 = vld [vmem:[%s25473_s29 + $0x450] sm:$0xff]  ;;  %v11624_v45 = vld [vmem:[%s25473_s29 + $0x5d8] sm:$0xff] }
  0x6f   : > { %11461 = vmatmul.mubr.msk.f32.gmra.mrb[8].mxu0 %vm721_vm2, %v17233_v14  ;;  %14216 = vmatprep.subr.bf16.mxu1 %v14215_v24  ;;  %v11559_v19 = vld [vmem:[%s25473_s29 + $0x470] sm:$0xff]  ;;  %v14231_v24 = vpack.c.bf16 %v11566_v11, %v11562_v10  ;;  %v11606_v10 = vld [vmem:[%s25473_s29 + $0x548] sm:$0xff] }
  0x70   : > { %11471 = vmatmul.mubr.msk.f32.gmra.mrb[8].mxu1 %vm721_vm2, %v17233_v14  ;;  %1106 = vmatprep.mubr.f32.mxu0 %v16914_v7  ;;  %v14249_v27 = vpack.c.bf16 %v11559_v19, %v11555_v18  ;;  %v11610_v11 = vld [vmem:[%s25473_s29 + $0x568] sm:$0xff]  ;;  %v11603_v18 = vld [vmem:[%s25473_s29 + $0x530] sm:$0xff]  ;;  %v11608_v19 = vld [vmem:[%s25473_s29 + $0x558] sm:$0xff] }
  0x71   : > { %1231 = vmatprep.mubr.f32.mxu1 %v16914_v7  ;;  %14198 = vmatpush1.bf16.msra.mxu0 %v14197_v32  ;;  %v11570_v32 = vld [vmem:[%s25473_s29 + $0x4c8] sm:$0xff] }
  0x72   : > { %14218 = vmatpush1.bf16.msra.mxu1 %v14217_v33  ;;  %14220 = vmatprep.subr.bf16.mxu0 %v14219_v34  ;;  %v11574_v33 = vld [vmem:[%s25473_s29 + $0x4e8] sm:$0xff]  ;;  %v1313_v34 = vrot.slane %v17341_v3, 2 }
  0x73   : > { %11462 = vmatmul.mubr.msk.f32.gmra.mrb[10].mxu0 %vm721_vm2, %v17341_v3  ;;  %14240 = vmatprep.subr.bf16.mxu1 %v14239_v1  ;;  %v11572_v1 = vld [vmem:[%s25473_s29 + $0x4d8] sm:$0xff] }
  0x74   : > { %11472 = vmatmul.mubr.msk.f32.gmra.mrb[10].mxu1 %vm721_vm2, %v17341_v3  ;;  %1112 = vmatprep.mubr.f32.mxu0 %v16914_v7  ;;  %v14255_v43 = vpack.c.bf16 %v11576_v37, %v11572_v1  ;;  %v1314_v48 = vsel %vm1303_vm0, %v1311_v26, %v1313_v34  ;;  %v1316_v59 = vsel %vm1303_vm0, %v1313_v34, %v1315_v49  ;;  %v11620_v34 = vld [vmem:[%s25473_s29 + $0x5b8] sm:$0xff]  ;;  %v11625_v49 = vld [vmem:[%s25473_s29 + $0x5e0] sm:$0xff] }
  0x75   : > { %1237 = vmatprep.mubr.f32.mxu1 %v16914_v7 }
  0x77   : > { %11463 = vmatmul.mubr.msk.f32.gmra.mrb[12].mxu0 %vm721_vm2, %v17386_v28 }
  0x78   : > { %11473 = vmatmul.mubr.msk.f32.gmra.mrb[12].mxu1 %vm721_vm2, %v17386_v28  ;;  %1118 = vmatprep.mubr.f32.mxu0 %v16914_v7 }
  0x79   : > { %1243 = vmatprep.mubr.f32.mxu1 %v16914_v7 }
  0x7b   : > { %11464 = vmatmul.mubr.msk.f32.gmra.mrb[14].mxu0 %vm721_vm2, %v17419_v44 }
  0x7c   : > { %11474 = vmatmul.mubr.msk.f32.gmra.mrb[14].mxu1 %vm721_vm2, %v17419_v44  ;;  %1124 = vmatprep.mubr.f32.mxu0 %v16914_v7 }
  0x7d   : > { %1249 = vmatprep.mubr.f32.mxu1 %v16914_v7 }
  0x7f   : > { %11465 = vmatmul.mubr.msk.f32.gmra.mrb[16].mxu0 %vm721_vm2, %v17428_v51 }
  0x80   : > { %11475 = vmatmul.mubr.msk.f32.gmra.mrb[16].mxu1 %vm721_vm2, %v17428_v51  ;;  %1130 = vmatprep.mubr.f32.mxu0 %v16914_v7 }
  0x81   : > { %1255 = vmatprep.mubr.f32.mxu1 %v16914_v7 }
  0x83   : > { %11466 = vmatmul.mubr.msk.f32.gmra.mrb[18].mxu0 %vm721_vm2, %v17437_v54 }
  0x84   : > { %11476 = vmatmul.mubr.msk.f32.gmra.mrb[18].mxu1 %vm721_vm2, %v17437_v54  ;;  %1407 = vmatprep.mubr.f32.mxu0 %v16914_v7 }
  0x85   : > { %1532 = vmatprep.mubr.f32.mxu1 %v16914_v7 }
  0x87   : > { %11517 = vmatmul.mubr.msk.f32.vlgmr.msra.gmra.mrb[0].mxu0 %vm721_vm2, %v17227_v12 }
  0x88   : > { %11527 = vmatmul.mubr.msk.f32.vlgmr.msra.gmra.mrb[0].mxu1 %vm721_vm2, %v17227_v12  ;;  %1413 = vmatprep.mubr.f32.mxu0 %v16914_v7  ;;  %v11553_v12 = vld [vmem:[%s25473_s29 + $0x440] sm:$0xff] }
  0x89   : > { %1538 = vmatprep.mubr.f32.mxu1 %v16914_v7  ;;  %14222 = vmatpush1.bf16.msra.mxu0 %v14221_v46  ;;  %v14229_v23 = vpack.c.bf16 %v11557_v8, %v11553_v12  ;;  %v11598_v46 = vld [vmem:[%s25473_s29 + $0x508] sm:$0xff]  ;;  %v11597_v8 = vld [vmem:[%s25473_s29 + $0x500] sm:$0xff] }
  0x8a   : > { %14224 = vmatprep.subr.bf16.mxu0 %v14223_v47  ;;  %14242 = vmatpush1.bf16.msra.mxu1 %v14241_v53  ;;  %v11602_v47 = vld [vmem:[%s25473_s29 + $0x528] sm:$0xff]  ;;  %v11604_v53 = vld [vmem:[%s25473_s29 + $0x538] sm:$0xff] }
  0x8b   : > { %11518 = vmatmul.mubr.msk.f32.gmra.mrb[2].mxu0 %vm721_vm2, %v17239_v16  ;;  %14244 = vmatprep.subr.bf16.mxu1 %v14243_v57  ;;  %v14259_v57 = vpack.c.bf16 %v11602_v47, %v11598_v46  ;;  %v14279_v26 = vpack.c.bf16 %v11604_v53, %v11600_v52  ;;  %v11628_v46 = vld [vmem:[%s25473_s29 + $0x5f8] sm:$0xff]  ;;  %v11623_v53 = vld [vmem:[%s25473_s29 + $0x5d0] sm:$0xff] }
  0x8c   : > { %11528 = vmatmul.mubr.msk.f32.gmra.mrb[2].mxu1 %vm721_vm2, %v17239_v16  ;;  %1419 = vmatprep.mubr.f32.mxu0 %v16914_v7  ;;  %v11561_v16 = vld [vmem:[%s25473_s29 + $0x480] sm:$0xff] }
  0x8d   : > { %1544 = vmatprep.mubr.f32.mxu1 %v16914_v7  ;;  %14226 = vmatpush1.bf16.msra.mxu0 %v14225_v2  ;;  %v14233_v38 = vpack.c.bf16 %v11565_v25, %v11561_v16  ;;  %v1320_v2 = vsel %vm1303_vm0, %v1317_v60, %v1319_v63  ;;  %v11609_v16 = vld [vmem:[%s25473_s29 + $0x560] sm:$0xff]  ;;  %v11614_v25 = vld [vmem:[%s25473_s29 + $0x588] sm:$0xff]  ;;  %v11632_v60 = vld [vmem:[%s25473_s29 + $0x618] sm:$0xff] }
  0x8e   : > { %14228 = vmatprep.subr.bf16.mxu0 %v14227_v4  ;;  %14246 = vmatpush1.bf16.msra.mxu1 %v14245_v9  ;;  %v1321_v4 = vrot.slane %v17437_v54, 2  ;;  %v11601_v9 = vld [vmem:[%s25473_s29 + $0x520] sm:$0xff]  ;;  %v14267_v37 = vpack.c.bf16 %v11618_v29, %v11614_v25 }
  0x8f   : > { %11519 = vmatmul.mubr.msk.f32.gmra.mrb[4].mxu0 %vm721_vm2, %v17251_v20  ;;  %14248 = vmatprep.subr.bf16.mxu1 %v14247_v13  ;;  %v11599_v13 = vld [vmem:[%s25473_s29 + $0x510] sm:$0xff]  ;;  %v14261_v21 = vpack.c.bf16 %v11601_v9, %v11597_v8  ;;  %v2375_v29 = vld [vmem:[%s25475_s3] sm:$0xf]  ;;  %s593_s3 = sand.u32 1, %s16904_s30  }
  0x90   : > { %11529 = vmatmul.mubr.msk.f32.gmra.mrb[4].mxu1 %vm721_vm2, %v17251_v20  ;;  %1425 = vmatprep.mubr.f32.mxu0 %v16914_v7  ;;  %v14235_v20 = vpack.c.bf16 %v11574_v33, %v11570_v32  ;;  %v1322_v12 = vsel %vm1303_vm0, %v1319_v63, %v1321_v4  ;;  %v11611_v32 = vld [vmem:[%s25473_s29 + $0x570] sm:$0xff]  ;;  %v11616_v33 = vld [vmem:[%s25473_s29 + $0x598] sm:$0xff]  ;;  %s594_s25 = scalar_lea.vmem [#allocation2], %s593_s3  ;;  %s11325_s21 = scalar_lea.sflag [#allocation3], %s593_s3 }
  0x91   : > { %1550 = vmatprep.mubr.f32.mxu1 %v16914_v7  ;;  %14230 = vmatpush1.bf16.msra.mxu0 %v14229_v23  ;;  %v14263_v23 = vpack.c.bf16 %v11610_v11, %v11606_v10  ;;  %v11631_v9 = vld [vmem:[%s25473_s29 + $0x610] sm:$0xff]  ;;  %s11337_s20 = sshll.u32 %s594_s25, 4  ;;  %s25386_s20 = int_to_ptr.vmem [resolvable:$true] %s11337_s20 }
  0x92   : > { %14232 = vmatprep.subr.bf16.mxu0 %v14231_v24  ;;  %14250 = vmatpush1.bf16.msra.mxu1 %v14249_v27  ;;  %v11605_v24 = vld [vmem:[%s25473_s29 + $0x540] sm:$0xff]  ;;  %v14281_v27 = vpack.c.bf16 %v11603_v18, %v11599_v13  ;;  %v11635_v10 = vld [vmem:[%s25473_s29 + $0x630] sm:$0xff]  ;;  %v1686_v13 = vrot.slane %v17386_v28, 3  ;;  %s16850_s23 = scalar_lea.vmem %s25386_s20, 16  ;;  %p16857_p0 = scmp.lt.s32.totalorder %s25386_s20, %s16855_s27 }
  0x93   : > { %11520 = vmatmul.mubr.msk.f32.gmra.mrb[6].mxu0 %vm721_vm2, %v17280_v35  ;;  %14252 = vmatprep.subr.bf16.mxu1 %v14251_v30  ;;  %v14283_v30 = vpack.c.bf16 %v11612_v61, %v11608_v19  ;;  %v14265_v1 = vpack.c.bf16 %v11609_v16, %v11605_v24  ;;  %v14297_v19 = vpack.c.bf16 %v11635_v10, %v11631_v9  ;;  %v1692_v24 = vrot.slane %v17437_v54, 3  ;;  %p16851_p11 = scmp.ne.s32.totalorder %s25386_s20, %s16850_s23 }
  0x94   : > { %11530 = vmatmul.mubr.msk.f32.gmra.mrb[6].mxu1 %vm721_vm2, %v17280_v35  ;;  %1431 = vmatprep.mubr.f32.mxu0 %v16914_v7  ;;  %v14237_v35 = vpack.c.bf16 %v11573_v58, %v11569_v41  ;;  %v11626_v41 = vld [vmem:[%s25473_s29 + $0x5e8] sm:$0xff]  ;;  %v14287_v58 = vpack.c.bf16 %v11620_v34, %v11616_v33 }
  0x95   : > { %1556 = vmatprep.mubr.f32.mxu1 %v16914_v7  ;;  %14234 = vmatpush1.bf16.msra.mxu0 %v14233_v38  ;;  %v11617_v38 = vld [vmem:[%s25473_s29 + $0x5a0] sm:$0xff]  ;;  %p16852_p12 = pnand %p16851_p11, %p17057_p5 }
  0x96   : > { %14254 = vmatpush1.bf16.msra.mxu1 %v14253_v39  ;;  %14236 = vmatprep.subr.bf16.mxu0 %v14235_v20  ;;  %v14285_v39 = vpack.c.bf16 %v11611_v32, %v11607_v31  ;;  %v11622_v20 = vld [vmem:[%s25473_s29 + $0x5c8] sm:$0xff] }
  0x97   : > { %11521 = vmatmul.mubr.msk.f32.gmra.mrb[8].mxu0 %vm721_vm2, %v1314_v48  ;;  %14256 = vmatprep.subr.bf16.mxu1 %v14255_v43  ;;  %v11619_v43 = vld [vmem:[%s25473_s29 + $0x5b0] sm:$0xff]  ;;  %p16853_p13 = pneg %p16852_p12 }
  0x98   : > { %11531 = vmatmul.mubr.msk.f32.gmra.mrb[8].mxu1 %vm721_vm2, %v1314_v48  ;;  %1437 = vmatprep.mubr.f32.mxu0 %v16914_v7  ;;  %v14271_v48 = vpack.c.bf16 %v11626_v41, %v11622_v20  ;;  %v14289_v52 = vpack.c.bf16 %v11619_v43, %v11615_v42 }
  0x99   : > { %1562 = vmatprep.mubr.f32.mxu1 %v16914_v7  ;;  %14238 = vmatpush1.bf16.msra.mxu0 %v14237_v35  ;;  %v14291_v35 = vpack.c.bf16 %v11628_v46, %v11624_v45 }
  0x9a   : > { %14258 = vmatpush1.bf16.msra.mxu1 %v14257_v55  ;;  %14260 = vmatprep.subr.bf16.mxu0 %v14259_v57  ;;  %v11627_v55 = vld [vmem:[%s25473_s29 + $0x5f0] sm:$0xff]  ;;  %v11630_v57 = vld [vmem:[%s25473_s29 + $0x608] sm:$0xff] }
  0x9b   : > { %11522 = vmatmul.mubr.msk.f32.gmra.mrb[10].mxu0 %vm721_vm2, %v1316_v59  ;;  %14280 = vmatprep.subr.bf16.mxu1 %v14279_v26  ;;  %v11634_v26 = vld [vmem:[%s25473_s29 + $0x628] sm:$0xff] }
  0x9c   : > { %11532 = vmatmul.mubr.msk.f32.gmra.mrb[10].mxu1 %vm721_vm2, %v1316_v59  ;;  %1443 = vmatprep.mubr.f32.mxu0 %v16914_v7  ;;  %v1684_v59 = vrot.slane %v17341_v3, 3 }
  0x9d   : > { %1568 = vmatprep.mubr.f32.mxu1 %v16914_v7 }
  0x9e   : > { %v1685_v11 = vsel %vm1674_vm3, %v1682_v6, %v1684_v59  ;;  %v1688_v6 = vrot.slane %v17419_v44, 3 }
  0x9f   : > { %11523 = vmatmul.mubr.msk.f32.gmra.mrb[12].mxu0 %vm721_vm2, %v1318_v62 }
  0xa0   : > { %11533 = vmatmul.mubr.msk.f32.gmra.mrb[12].mxu1 %vm721_vm2, %v1318_v62  ;;  %1449 = vmatprep.mubr.f32.mxu0 %v16914_v7  ;;  %v11636_v62 = vld [vmem:[%s25473_s29 + $0x638] sm:$0xff]  ;;  %v1689_v61 = vsel %vm1674_vm3, %v1686_v13, %v1688_v6 }
  0xa1   : > { %1574 = vmatprep.mubr.f32.mxu1 %v16914_v7  ;;  %v14295_v8 = vpack.c.bf16 %v11636_v62, %v11632_v60 }
  0xa3   : > { %11524 = vmatmul.mubr.msk.f32.gmra.mrb[14].mxu0 %vm721_vm2, %v1320_v2 }
  0xa4   : > { %11534 = vmatmul.mubr.msk.f32.gmra.mrb[14].mxu1 %vm721_vm2, %v1320_v2  ;;  %1455 = vmatprep.mubr.f32.mxu0 %v16914_v7  ;;  %v14293_v2 = vpack.c.bf16 %v11627_v55, %v11623_v53 }
  0xa5   : > { %1580 = vmatprep.mubr.f32.mxu1 %v16914_v7 }
  0xa7   : > { %11525 = vmatmul.mubr.msk.f32.gmra.mrb[16].mxu0 %vm721_vm2, %v1322_v12 }
  0xa8   : > { %11535 = vmatmul.mubr.msk.f32.gmra.mrb[16].mxu1 %vm721_vm2, %v1322_v12  ;;  %1461 = vmatprep.mubr.f32.mxu0 %v16914_v7  ;;  %v11633_v12 = vld [vmem:[%s25473_s29 + $0x620] sm:$0xff] }
  0xa9   : > { %1586 = vmatprep.mubr.f32.mxu1 %v16914_v7 }
  0xab   : > { %11526 = vmatmul.mubr.msk.f32.gmra.mrb[18].mxu0 %vm721_vm2, %v1321_v4 }
  0xac   : > { %11536 = vmatmul.mubr.msk.f32.gmra.mrb[18].mxu1 %vm721_vm2, %v1321_v4  ;;  %1778 = vmatprep.mubr.f32.mxu0 %v16914_v7  ;;  %v11629_v4 = vld [vmem:[%s25473_s29 + $0x600] sm:$0xff] }
  0xad   : > { %1903 = vmatprep.mubr.f32.mxu1 %v16914_v7  ;;  %v14277_v18 = vpack.c.bf16 %v11633_v12, %v11629_v4 }
  0xaf   : > { %11577 = vmatmul.mubr.msk.f32.vlgmr.msra.gmra.mrb[0].mxu0 %vm721_vm2, %v17325_v56 }
  0xb0   : > { %11587 = vmatmul.mubr.msk.f32.vlgmr.msra.gmra.mrb[0].mxu1 %vm721_vm2, %v17325_v56  ;;  %1784 = vmatprep.mubr.f32.mxu0 %v16914_v7  ;;  %v11613_v56 = vld [vmem:[%s25473_s29 + $0x580] sm:$0xff] }
  0xb1   : > { %1909 = vmatprep.mubr.f32.mxu1 %v16914_v7  ;;  %14262 = vmatpush1.bf16.msra.mxu0 %v14261_v21  ;;  %v14269_v47 = vpack.c.bf16 %v11617_v38, %v11613_v56  ;;  %v1690_v21 = vrot.slane %v17428_v51, 3 }
  0xb2   : > { %14264 = vmatprep.subr.bf16.mxu0 %v14263_v23  ;;  %14282 = vmatpush1.bf16.msra.mxu1 %v14281_v27 }
  0xb3   : > { %11578 = vmatmul.mubr.msk.f32.gmra.mrb[2].mxu0 %vm721_vm2, %v17344_v5  ;;  %14284 = vmatprep.subr.bf16.mxu1 %v14283_v30  ;;  %v1691_v23 = vsel %vm1674_vm3, %v1688_v6, %v1690_v21  ;;  %v1693_v16 = vsel %vm1674_vm3, %v1690_v21, %v1692_v24 }
  0xb4   : > { %11588 = vmatmul.mubr.msk.f32.gmra.mrb[2].mxu1 %vm721_vm2, %v17344_v5  ;;  %1790 = vmatprep.mubr.f32.mxu0 %v16914_v7  ;;  %v11621_v5 = vld [vmem:[%s25473_s29 + $0x5c0] sm:$0xff] }
  0xb5   : > { %1915 = vmatprep.mubr.f32.mxu1 %v16914_v7  ;;  %14266 = vmatpush1.bf16.msra.mxu0 %v14265_v1  ;;  %v14273_v63 = vpack.c.bf16 %v11625_v49, %v11621_v5 }
  0xb6   : > { %14268 = vmatprep.subr.bf16.mxu0 %v14267_v37  ;;  %14286 = vmatpush1.bf16.msra.mxu1 %v14285_v39 }
  0xb7   : > { %11579 = vmatmul.mubr.msk.f32.gmra.mrb[4].mxu0 %vm721_vm2, %v17357_v15  ;;  %14288 = vmatprep.subr.bf16.mxu1 %v14287_v58 }
  0xb8   : > { %11589 = vmatmul.mubr.msk.f32.gmra.mrb[4].mxu1 %vm721_vm2, %v17357_v15  ;;  %1796 = vmatprep.mubr.f32.mxu0 %v16914_v7  ;;  %v14275_v15 = vpack.c.bf16 %v11634_v26, %v11630_v57 }
  0xb9   : > { %1921 = vmatprep.mubr.f32.mxu1 %v16914_v7  ;;  %14270 = vmatpush1.bf16.msra.mxu0 %v14269_v47 }
  0xba   : > { %14272 = vmatprep.subr.bf16.mxu0 %v14271_v48  ;;  %14290 = vmatpush1.bf16.msra.mxu1 %v14289_v52 }
  0xbb   : > { %11580 = vmatmul.mubr.msk.f32.gmra.mrb[6].mxu0 %vm721_vm2, %v17372_v22  ;;  %14292 = vmatprep.subr.bf16.mxu1 %v14291_v35 }
  0xbc   : > { %11590 = vmatmul.mubr.msk.f32.gmra.mrb[6].mxu1 %vm721_vm2, %v17372_v22  ;;  %1802 = vmatprep.mubr.f32.mxu0 %v16914_v7  ;;  %v1687_v22 = vsel %vm1674_vm3, %v1684_v59, %v1686_v13 }
  0xbd   : > { %1927 = vmatprep.mubr.f32.mxu1 %v16914_v7  ;;  %14274 = vmatpush1.bf16.msra.mxu0 %v14273_v63 }
  0xbe   : > { %14294 = vmatpush1.bf16.msra.mxu1 %v14293_v2  ;;  %14276 = vmatprep.subr.bf16.mxu0 %v14275_v15 }
  0xbf   : > { %11581 = vmatmul.mubr.msk.f32.gmra.mrb[8].mxu0 %vm721_vm2, %v1685_v11  ;;  %14296 = vmatprep.subr.bf16.mxu1 %v14295_v8 }
  0xc0   : > { %11591 = vmatmul.mubr.msk.f32.gmra.mrb[8].mxu1 %vm721_vm2, %v1685_v11  ;;  %1808 = vmatprep.mubr.f32.mxu0 %v16914_v7 }
  0xc1   : > { %1933 = vmatprep.mubr.f32.mxu1 %v16914_v7  ;;  %14278 = vmatpush1.bf16.msra.mxu0 %v14277_v18 }
  0xc2   : > { %14298 = vmatpush1.bf16.msra.mxu1 %v14297_v19 }
  0xc3   : > { %11582 = vmatmul.mubr.msk.f32.gmra.mrb[10].mxu0 %vm721_vm2, %v1687_v22 }
  0xc4   : > { %11592 = vmatmul.mubr.msk.f32.gmra.mrb[10].mxu1 %vm721_vm2, %v1687_v22  ;;  %1814 = vmatprep.mubr.f32.mxu0 %v16914_v7 }
  0xc5   : > { %1939 = vmatprep.mubr.f32.mxu1 %v16914_v7 }
  0xc7   : > { %11583 = vmatmul.mubr.msk.f32.gmra.mrb[12].mxu0 %vm721_vm2, %v1689_v61 }
  0xc8   : > { %11593 = vmatmul.mubr.msk.f32.gmra.mrb[12].mxu1 %vm721_vm2, %v1689_v61  ;;  %1820 = vmatprep.mubr.f32.mxu0 %v16914_v7 }
  0xc9   : > { %1945 = vmatprep.mubr.f32.mxu1 %v16914_v7 }
  0xcb   : > { %11584 = vmatmul.mubr.msk.f32.gmra.mrb[14].mxu0 %vm721_vm2, %v1691_v23 }
  0xcc   : > { %11594 = vmatmul.mubr.msk.f32.gmra.mrb[14].mxu1 %vm721_vm2, %v1691_v23  ;;  %1826 = vmatprep.mubr.f32.mxu0 %v16914_v7 }
  0xcd   : > { %1951 = vmatprep.mubr.f32.mxu1 %v16914_v7 }
  0xcf   : > { %11585 = vmatmul.mubr.msk.f32.gmra.mrb[16].mxu0 %vm721_vm2, %v1693_v16 }
  0xd0   : > { %11595 = vmatmul.mubr.msk.f32.gmra.mrb[16].mxu1 %vm721_vm2, %v1693_v16  ;;  %1832 = vmatprep.mubr.f32.mxu0 %v16914_v7 }
  0xd1   : > { %1957 = vmatprep.mubr.f32.mxu1 %v16914_v7 }
  0xd3   : > { %11586 = vmatmul.mubr.msk.f32.gmra.mrb[18].mxu0 %vm721_vm2, %v1692_v24 }
  0xd4   : > { %11596 = vmatmul.mubr.msk.f32.gmra.mrb[18].mxu1 %vm721_vm2, %v1692_v24  ;;  %2149 = vmatprep.mubr.f32.mxu0 %v16914_v7 }
  0xd5   : > { %2274 = vmatprep.mubr.f32.mxu1 %v16914_v7 }
  0xd7   : > { %11637 = vmatmul.mubr.msk.f32.vlgmr.msra.gmra.mrb[0].mxu0 %vm721_vm2, %v17454_v0 }
  0xd8   : > { %11647 = vmatmul.mubr.msk.f32.vlgmr.msra.gmra.mrb[0].mxu1 %vm721_vm2, %v17454_v0  ;;  %2155 = vmatprep.mubr.f32.mxu0 %v16914_v7  ;;  %v2055_v0 = vrot.slane %v17341_v3, 4 }
  0xd9   : > { %2280 = vmatprep.mubr.f32.mxu1 %v16914_v7 }
  0xdb   : > { %11638 = vmatmul.mubr.msk.f32.gmra.mrb[2].mxu0 %vm721_vm2, %v17480_v17 }
  0xdc   : > { %11648 = vmatmul.mubr.msk.f32.gmra.mrb[2].mxu1 %vm721_vm2, %v17480_v17  ;;  %2161 = vmatprep.mubr.f32.mxu0 %v16914_v7  ;;  %v2056_v17 = vsel %vm2045_vm4, %v2053_v40, %v2055_v0  ;;  %v2063_v40 = vrot.slane %v17437_v54, 4  ;;  %v2377_v54 = vlaneseq }
  0xdd   : > { %2286 = vmatprep.mubr.f32.mxu1 %v16914_v7 }
  0xde   : > { %v18065_v25 = vshrl.u32 %v2377_v54, 7 }
  0xdf   : > { %11639 = vmatmul.mubr.msk.f32.gmra.mrb[4].mxu0 %vm721_vm2, %v17513_v36 }
  0xe0   : > { %11649 = vmatmul.mubr.msk.f32.gmra.mrb[4].mxu1 %vm721_vm2, %v17513_v36  ;;  %2167 = vmatprep.mubr.f32.mxu0 %v16914_v7  ;;  %v2057_v36 = vrot.slane %v17386_v28, 4  ;;  %v2061_v28 = vrot.slane %v17428_v51, 4  ;;  %v2379_v27 = vsub.s32 0, %v18065_v25  ;;  %v2387_v30 = vsub.s32 2, %v18065_v25 }
  0xe1   : > { %2292 = vmatprep.mubr.f32.mxu1 %v16914_v7  ;;  %v2383_v31 = vsub.s32 1, %v18065_v25  ;;  %v2391_v32 = vsub.s32 3, %v18065_v25 }
  0xe2   : > { %v2058_v3 = vsel %vm2045_vm4, %v2055_v0, %v2057_v36  ;;  %v2064_v51 = vsel %vm2045_vm4, %v2061_v28, %v2063_v40  ;;  %v18076_v33 = vrot.slane %v2375_v29, %v2379_v27  ;;  %v18080_v1 = vrot.slane %v2375_v29, %v2387_v30 }
  0xe3   : > { %11640 = vmatmul.mubr.msk.f32.gmra.mrb[6].mxu0 %vm721_vm2, %v17549_v50  ;;  %v18084_v37 = vrot.slane %v2375_v29, %v2383_v31  ;;  %v18088_v39 = vrot.slane %v2375_v29, %v2391_v32 }
  0xe4   : > { %11650 = vmatmul.mubr.msk.f32.gmra.mrb[6].mxu1 %vm721_vm2, %v17549_v50  ;;  %2173 = vmatprep.mubr.f32.mxu0 %v16914_v7  ;;  %v2059_v50 = vrot.slane %v17419_v44, 4 }
  0xe5   : > { %2298 = vmatprep.mubr.f32.mxu1 %v16914_v7 }
  0xe6   : > { %v2060_v14 = vsel %vm2045_vm4, %v2057_v36, %v2059_v50  ;;  %v2062_v44 = vsel %vm2045_vm4, %v2059_v50, %v2061_v28 }
  0xe7   : > { %11641 = vmatmul.mubr.msk.f32.gmra.mrb[8].mxu0 %vm721_vm2, %v2056_v17 }
  0xe8   : > { %11651 = vmatmul.mubr.msk.f32.gmra.mrb[8].mxu1 %vm721_vm2, %v2056_v17  ;;  %2179 = vmatprep.mubr.f32.mxu0 %v16914_v7 }
  0xe9   : > { %2304 = vmatprep.mubr.f32.mxu1 %v16914_v7 }
  0xeb   : > { %11642 = vmatmul.mubr.msk.f32.gmra.mrb[10].mxu0 %vm721_vm2, %v2058_v3 }
  0xec   : > { %11652 = vmatmul.mubr.msk.f32.gmra.mrb[10].mxu1 %vm721_vm2, %v2058_v3  ;;  %2185 = vmatprep.mubr.f32.mxu0 %v16914_v7 }
  0xed   : > { %2310 = vmatprep.mubr.f32.mxu1 %v16914_v7 }
  0xef   : > { %11643 = vmatmul.mubr.msk.f32.gmra.mrb[12].mxu0 %vm721_vm2, %v2060_v14 }
  0xf0   : > { %11653 = vmatmul.mubr.msk.f32.gmra.mrb[12].mxu1 %vm721_vm2, %v2060_v14  ;;  %2191 = vmatprep.mubr.f32.mxu0 %v16914_v7 }
  0xf1   : > { %2316 = vmatprep.mubr.f32.mxu1 %v16914_v7 }
  0xf3   : > { %11644 = vmatmul.mubr.msk.f32.gmra.mrb[14].mxu0 %vm721_vm2, %v2062_v44 }
  0xf4   : > { %11654 = vmatmul.mubr.msk.f32.gmra.mrb[14].mxu1 %vm721_vm2, %v2062_v44  ;;  %2197 = vmatprep.mubr.f32.mxu0 %v16914_v7 }
  0xf5   : > { %2322 = vmatprep.mubr.f32.mxu1 %v16914_v7 }
  0xf7   : > { %11645 = vmatmul.mubr.msk.f32.gmra.mrb[16].mxu0 %vm721_vm2, %v2064_v51 }
  0xf8   : > { %11655 = vmatmul.mubr.msk.f32.gmra.mrb[16].mxu1 %vm721_vm2, %v2064_v51  ;;  %2203 = vmatprep.mubr.f32.mxu0 %v16914_v7 }
  0xf9   : > { %2328 = vmatprep.mubr.f32.mxu1 %v16914_v7 }
  0xfb   : > { %11646 = vmatmul.mubr.msk.f32.gmra.mrb[18].mxu0 %vm721_vm2, %v2063_v40 }
  0xfc   : > { %11656 = vmatmul.mubr.msk.f32.gmra.mrb[18].mxu1 %vm721_vm2, %v2063_v40  ;;  %2574 = vmatprep.mubr.f32.mxu0 %v16914_v7 }
  0xfd   : > { %2669 = vmatprep.mubr.f32.mxu1 %v16914_v7 }
 0x1aa   : > { %v2151_v34 = vpop.f32.mrb[0].mxu0 }
 0x1ab   : > { %v2276_v56 = vpop.f32.mrb[0].mxu1  ;;  %v2153_v38 = vpop.f32.mrb[1].mxu0  ;;  %v2397_v41 = vadd.f32 %v18076_v33, %v2151_v34 }
 0x1ac   : > { %v2278_v20 = vpop.f32.mrb[1].mxu1  ;;  %v2399_v58 = vadd.f32 %v18080_v1, %v2276_v56  ;;  %v2398_v42 = vadd.f32 %v18084_v37, %v2153_v38 }
 0x1ad   : > { %v2400_v45 = vadd.f32 %v18088_v39, %v2278_v20  ;;  %v2437_v53 = vmax.f32 %v2397_v41, 0.0 }
 0x1ae   : > { %v2157_v43 = vpop.f32.mrb[2].mxu0  ;;  %v2439_v57 = vmax.f32 %v2399_v58, 0.0  ;;  %v2438_v26 = vmax.f32 %v2398_v42, 0.0 }
 0x1af   : > { %v2401_v46 = vadd.f32 %v18076_v33, %v2157_v43  ;;  %v2282_v47 = vpop.f32.mrb[2].mxu1  ;;  %v2159_v48 = vpop.f32.mrb[3].mxu0  ;;  %v2440_v63 = vmax.f32 %v2400_v45, 0.0 }
 0x1b0   : > { %v2403_v5 = vadd.f32 %v18080_v1, %v2282_v47  ;;  %v2402_v49 = vadd.f32 %v18084_v37, %v2159_v48  ;;  %v2284_v52 = vpop.f32.mrb[3].mxu1 }
 0x1b1   : > { %v2441_v35 = vmax.f32 %v2401_v46, 0.0  ;;  %v2404_v55 = vadd.f32 %v18088_v39, %v2284_v52 }
 0x1b2   : > { %v2443_v59 = vmax.f32 %v2403_v5, 0.0  ;;  %v2442_v60 = vmax.f32 %v2402_v49, 0.0  ;;  %v2163_v62 = vpop.f32.mrb[4].mxu0 }
 0x1b3   : > { %v18098_v2 = vpack.c.bf16 %v2441_v35, %v2437_v53  ;;  %v2444_v15 = vmax.f32 %v2404_v55, 0.0  ;;  %v2288_v4 = vpop.f32.mrb[4].mxu1  ;;  %v2165_v12 = vpop.f32.mrb[5].mxu0  ;;  %v2405_v13 = vadd.f32 %v18076_v33, %v2163_v62 }
 0x1b4   : > { %v18100_v8 = vpack.c.bf16 %v2443_v59, %v2439_v57  ;;  %v18102_v9 = vpack.c.bf16 %v2442_v60, %v2438_v26  ;;  %v2290_v10 = vpop.f32.mrb[5].mxu1  ;;  %v2407_v18 = vadd.f32 %v18080_v1, %v2288_v4  ;;  %v2406_v19 = vadd.f32 %v18084_v37, %v2165_v12 }
 0x1b5   : > { %v18104_v11 = vpack.c.bf16 %v2444_v15, %v2440_v63  ;;  %v2408_v6 = vadd.f32 %v18088_v39, %v2290_v10  ;;  %v2445_v17 = vmax.f32 %v2405_v13, 0.0 }
 0x1b6   : > { %v2169_v22 = vpop.f32.mrb[6].mxu0  ;;  %14300 = vmatprep.subr.bf16.mxu0 %v18102_v9  ;;  %v2447_v50 = vmax.f32 %v2407_v18, 0.0  ;;  %v2446_v14 = vmax.f32 %v2406_v19, 0.0 }
 0x1b7   : > { %v2409_v61 = vadd.f32 %v18076_v33, %v2169_v22  ;;  %v2294_v21 = vpop.f32.mrb[6].mxu1  ;;  %14322 = vmatprep.subr.bf16.mxu1 %v18104_v11  ;;  %v2171_v23 = vpop.f32.mrb[7].mxu0  ;;  %14302 = vmatpush1.bf16.msra.mxu0 %v18098_v2  ;;  %v2448_v51 = vmax.f32 %v2408_v6, 0.0 }
 0x1b8   : > { %v2411_v24 = vadd.f32 %v18080_v1, %v2294_v21  ;;  %v2410_v16 = vadd.f32 %v18084_v37, %v2171_v23  ;;  %v2296_v0 = vpop.f32.mrb[7].mxu1  ;;  %14324 = vmatpush1.bf16.msra.mxu1 %v18100_v8 }
 0x1b9   : > { %v2449_v36 = vmax.f32 %v2409_v61, 0.0  ;;  %v2412_v3 = vadd.f32 %v18088_v39, %v2296_v0 }
 0x1ba   : > { %v2451_v28 = vmax.f32 %v2411_v24, 0.0  ;;  %v2450_v44 = vmax.f32 %v2410_v16, 0.0  ;;  %v2175_v40 = vpop.f32.mrb[8].mxu0 }
 0x1bb   : > { %v18118_v54 = vpack.c.bf16 %v2449_v36, %v2445_v17  ;;  %v2452_v29 = vmax.f32 %v2412_v3, 0.0  ;;  %v2300_v34 = vpop.f32.mrb[8].mxu1  ;;  %v2177_v56 = vpop.f32.mrb[9].mxu0  ;;  %v2413_v42 = vadd.f32 %v18076_v33, %v2175_v40 }
 0x1bc   : > { %v18120_v38 = vpack.c.bf16 %v2451_v28, %v2447_v50  ;;  %v18122_v20 = vpack.c.bf16 %v2450_v44, %v2446_v14  ;;  %v2302_v41 = vpop.f32.mrb[9].mxu1  ;;  %v2415_v43 = vadd.f32 %v18080_v1, %v2300_v34  ;;  %v2414_v45 = vadd.f32 %v18084_v37, %v2177_v56 }
 0x1bd   : > { %v18124_v58 = vpack.c.bf16 %v2452_v29, %v2448_v51  ;;  %v2416_v47 = vadd.f32 %v18088_v39, %v2302_v41  ;;  %v2453_v55 = vmax.f32 %v2413_v42, 0.0 }
 0x1be   : > { %v2181_v46 = vpop.f32.mrb[10].mxu0  ;;  %14304 = vmatprep.subr.bf16.mxu0 %v18122_v20  ;;  %v2455_v59 = vmax.f32 %v2415_v43, 0.0  ;;  %v2454_v60 = vmax.f32 %v2414_v45, 0.0 }
 0x1bf   : > { %v2417_v48 = vadd.f32 %v18076_v33, %v2181_v46  ;;  %v2306_v5 = vpop.f32.mrb[10].mxu1  ;;  %14326 = vmatprep.subr.bf16.mxu1 %v18124_v58  ;;  %v2183_v49 = vpop.f32.mrb[11].mxu0  ;;  %14306 = vmatpush1.bf16.msra.mxu0 %v18118_v54  ;;  %v2456_v4 = vmax.f32 %v2416_v47, 0.0 }
 0x1c0   : > { %v2419_v52 = vadd.f32 %v18080_v1, %v2306_v5  ;;  %v2418_v53 = vadd.f32 %v18084_v37, %v2183_v49  ;;  %v2308_v35 = vpop.f32.mrb[11].mxu1  ;;  %14328 = vmatpush1.bf16.msra.mxu1 %v18120_v38 }
 0x1c1   : > { %v2457_v57 = vmax.f32 %v2417_v48, 0.0  ;;  %v2420_v26 = vadd.f32 %v18088_v39, %v2308_v35 }
 0x1c2   : > { %v2459_v62 = vmax.f32 %v2419_v52, 0.0  ;;  %v2458_v63 = vmax.f32 %v2418_v53, 0.0  ;;  %v2187_v15 = vpop.f32.mrb[12].mxu0 }
 0x1c3   : > { %v18138_v12 = vpack.c.bf16 %v2457_v57, %v2453_v55  ;;  %v2460_v10 = vmax.f32 %v2420_v26, 0.0  ;;  %v2312_v13 = vpop.f32.mrb[12].mxu1  ;;  %v2189_v18 = vpop.f32.mrb[13].mxu0  ;;  %v2421_v21 = vadd.f32 %v18076_v33, %v2187_v15 }
 0x1c4   : > { %v18140_v19 = vpack.c.bf16 %v2459_v62, %v2455_v59  ;;  %v18142_v22 = vpack.c.bf16 %v2458_v63, %v2454_v60  ;;  %v2314_v6 = vpop.f32.mrb[13].mxu1  ;;  %v2423_v23 = vadd.f32 %v18080_v1, %v2312_v13  ;;  %v2422_v24 = vadd.f32 %v18084_v37, %v2189_v18 }
 0x1c5   : > { %v18144_v61 = vpack.c.bf16 %v2460_v10, %v2456_v4  ;;  %v2424_v0 = vadd.f32 %v18088_v39, %v2314_v6  ;;  %v2461_v44 = vmax.f32 %v2421_v21, 0.0 }
 0x1c6   : > { %v2193_v16 = vpop.f32.mrb[14].mxu0  ;;  %14308 = vmatprep.subr.bf16.mxu0 %v18142_v22  ;;  %v2463_v29 = vmax.f32 %v2423_v23, 0.0  ;;  %v2462_v34 = vmax.f32 %v2422_v24, 0.0 }
 0x1c7   : > { %v2425_v17 = vadd.f32 %v18076_v33, %v2193_v16  ;;  %v2318_v36 = vpop.f32.mrb[14].mxu1  ;;  %14330 = vmatprep.subr.bf16.mxu1 %v18144_v61  ;;  %v2195_v3 = vpop.f32.mrb[15].mxu0  ;;  %14310 = vmatpush1.bf16.msra.mxu0 %v18138_v12  ;;  %v2464_v43 = vmax.f32 %v2424_v0, 0.0 }
 0x1c8   : > { %v2427_v50 = vadd.f32 %v18080_v1, %v2318_v36  ;;  %v2426_v14 = vadd.f32 %v18084_v37, %v2195_v3  ;;  %v2320_v28 = vpop.f32.mrb[15].mxu1  ;;  %14332 = vmatpush1.bf16.msra.mxu1 %v18140_v19 }
 0x1c9   : > { %v2465_v40 = vmax.f32 %v2425_v17, 0.0  ;;  %v2428_v51 = vadd.f32 %v18088_v39, %v2320_v28  ;;  %v2700_v28 = vld [vmem:[%s25479_s4] sm:$0xff] }
 0x1ca   : > { %v2467_v56 = vmax.f32 %v2427_v50, 0.0  ;;  %v2466_v41 = vmax.f32 %v2426_v14, 0.0  ;;  %v2199_v42 = vpop.f32.mrb[16].mxu0  ;;  %v2478_v50 = vld [vmem:[%s25478_s19 + $0x8] sm:$0xff]  ;;  %v2937_v14 = vld [vmem:[%s25432_s5 + $0x38] sm:$0xff] }
 0x1cb   : > { %v18158_v45 = vpack.c.bf16 %v2465_v40, %v2461_v44  ;;  %v2468_v46 = vmax.f32 %v2428_v51, 0.0  ;;  %v2324_v47 = vpop.f32.mrb[16].mxu1  ;;  %v2201_v48 = vpop.f32.mrb[17].mxu0  ;;  %v2429_v35 = vadd.f32 %v18076_v33, %v2199_v42  ;;  %v3250_v40 = vld [vmem:[%s25433_s6] sm:$0xff]  ;;  %v3252_v51 = vld [vmem:[%s25433_s6 + $0x10] sm:$0xff] }
 0x1cc   : > { %v18160_v5 = vpack.c.bf16 %v2467_v56, %v2463_v29  ;;  %v18162_v49 = vpack.c.bf16 %v2466_v41, %v2462_v34  ;;  %v2326_v52 = vpop.f32.mrb[17].mxu1  ;;  %v2431_v55 = vadd.f32 %v18080_v1, %v2324_v47  ;;  %v2430_v57 = vadd.f32 %v18084_v37, %v2201_v48  ;;  %v3255_v34 = vld [vmem:[%s25433_s6 + $0x28] sm:$0xff]  ;;  %v3257_v56 = vld [vmem:[%s25433_s6 + $0x38] sm:$0xff]  ;;  %v2934_v41 = vld [vmem:[%s25432_s5 + $0x20] sm:$0xff] }
 0x1cd   : > { %v14333_v53 = vpack.c.bf16 %v2468_v46, %v2464_v43  ;;  %v2432_v59 = vadd.f32 %v18088_v39, %v2326_v52  ;;  %v2469_v13 = vmax.f32 %v2429_v35, 0.0  ;;  %v2936_v42 = vld [vmem:[%s25432_s5 + $0x30] sm:$0xff]  ;;  %v2939_v43 = vld [vmem:[%s25432_s5 + $0x48] sm:$0xff]  ;;  %v14501_v47 = vpack.c.bf16 %v3252_v51, %v3250_v40 }
 0x1ce   : > { %v2205_v26 = vpop.f32.mrb[18].mxu0  ;;  %14312 = vmatprep.subr.bf16.mxu0 %v18162_v49  ;;  %v2471_v21 = vmax.f32 %v2431_v55, 0.0  ;;  %v2470_v23 = vmax.f32 %v2430_v57, 0.0  ;;  %v2701_v46 = vld [vmem:[%s25479_s4 + $0x8] sm:$0xff]  ;;  %v14503_v48 = vpack.c.bf16 %v3257_v56, %v3255_v34  ;;  %v3256_v52 = vld [vmem:[%s25433_s6 + $0x30] sm:$0xff]  ;;  %v3261_v55 = vld [vmem:[%s25433_s6 + $0x58] sm:$0xff] }
 0x1cf   : > { %v2433_v60 = vadd.f32 %v18076_v33, %v2205_v26  ;;  %v2330_v62 = vpop.f32.mrb[18].mxu1  ;;  %14334 = vmatprep.subr.bf16.mxu1 %v14333_v53  ;;  %v2207_v63 = vpop.f32.mrb[19].mxu0  ;;  %14314 = vmatpush1.bf16.msra.mxu0 %v18158_v45  ;;  %v2472_v16 = vmax.f32 %v2432_v59, 0.0  ;;  %v2938_v57 = vld [vmem:[%s25432_s5 + $0x40] sm:$0xff]  ;;  %v2940_v26 = vld [vmem:[%s25432_s5 + $0x50] sm:$0xff]  ;;  %v2943_v59 = vld [vmem:[%s25432_s5 + $0x68] sm:$0xff] }
 0x1d0   : > { %v2435_v15 = vadd.f32 %v18080_v1, %v2330_v62  ;;  %v2434_v4 = vadd.f32 %v18084_v37, %v2207_v63  ;;  %v2332_v10 = vpop.f32.mrb[19].mxu1  ;;  %14336 = vmatpush1.bf16.msra.mxu1 %v18160_v5  ;;  %v2702_v62 = vld [vmem:[%s25479_s4 + $0x10] sm:$0xff]  ;;  %v2955_v51 = vld [vmem:[%s25432_s5 + $0xc8] sm:$0xff] }
 0x1d1   : > { %v2473_v18 = vmax.f32 %v2433_v60, 0.0  ;;  %v2436_v6 = vadd.f32 %v18088_v39, %v2332_v10  ;;  %v2477_v39 = vld [vmem:[%s25478_s19] sm:$0xff]  ;;  %v2945_v60 = vld [vmem:[%s25432_s5 + $0x78] sm:$0xff]  ;;  %v2952_v40 = vld [vmem:[%s25432_s5 + $0xb0] sm:$0xff] }
 0x1d2   : > { %v2475_v24 = vmax.f32 %v2435_v15, 0.0  ;;  %v2474_v33 = vmax.f32 %v2434_v4, 0.0  ;;  %v14397_v4 = vpack.c.bf16 %v2940_v26, %v2938_v57  ;;  %v3258_v10 = vld [vmem:[%s25433_s6 + $0x40] sm:$0xff]  ;;  %v3276_v26 = vld [vmem:[%s25433_s6 + $0xd0] sm:$0xff] }
 0x1d3   : > { %v14318_v0 = vpack.c.bf16 %v2473_v18, %v2469_v13  ;;  %v2476_v17 = vmax.f32 %v2436_v6, 0.0  ;;  %v3260_v13 = vld [vmem:[%s25433_s6 + $0x50] sm:$0xff]  ;;  %v3263_v18 = vld [vmem:[%s25433_s6 + $0x68] sm:$0xff]  ;;  %v14399_v6 = vpack.c.bf16 %v2945_v60, %v2943_v59  ;;  %v3274_v57 = vld [vmem:[%s25433_s6 + $0xc0] sm:$0xff] }
 0x1d4   : > { %v14340_v37 = vpack.c.bf16 %v2475_v24, %v2471_v21  ;;  %v14315_v36 = vpack.c.bf16 %v2474_v33, %v2470_v23  ;;  %v3265_v21 = vld [vmem:[%s25433_s6 + $0x78] sm:$0xff]  ;;  %v2942_v23 = vld [vmem:[%s25432_s5 + $0x60] sm:$0xff]  ;;  %v2944_v24 = vld [vmem:[%s25432_s5 + $0x70] sm:$0xff] }
 0x1d5   : > { %v14337_v3 = vpack.c.bf16 %v2476_v17, %v2472_v16  ;;  %v2947_v33 = vld [vmem:[%s25432_s5 + $0x88] sm:$0xff]  ;;  %v2949_v16 = vld [vmem:[%s25432_s5 + $0x98] sm:$0xff]  ;;  %v14509_v17 = vpack.c.bf16 %v3260_v13, %v3258_v10  ;;  %v14511_v1 = vpack.c.bf16 %v3265_v21, %v3263_v18  ;;  %v14525_v13 = vpack.c.bf16 %v3276_v26, %v3274_v57  ;;  %v3278_v21 = vld [vmem:[%s25433_s6 + $0xe0] sm:$0xff] }
 0x1d6   : > { %14317 = vmatprep.subr.msk.bf16.mxu0 %vm18176_vm6, %v14315_v36  ;;  %v3279_v59 = vld [vmem:[%s25433_s6 + $0xe8] sm:$0xff]  ;;  %v2965_v10 = vld [vmem:[%s25432_s5 + $0x118] sm:$0xff]  ;;  %v3296_v26 = vld [vmem:[%s25433_s6 + $0x170] sm:$0xff] }
 0x1d7   : > { %14339 = vmatprep.subr.msk.bf16.mxu1 %vm18176_vm6, %v14337_v3  ;;  %14320 = vmatpush1.bf16.msk.msra.mxu0 %vm18176_vm6, %v14318_v0 }
 0x1d8   : > { %14342 = vmatpush1.bf16.msk.msra.mxu1 %vm18176_vm6, %v14340_v37  ;;  %14344 = vmatprep.subr.bf16.mxu0 %v18102_v9  ;;  %v2931_v9 = vld [vmem:[%s25432_s5 + $0x8] sm:$0xff] }
 0x1d9   : > { %14366 = vmatprep.subr.bf16.mxu1 %v18104_v11  ;;  %v2933_v11 = vld [vmem:[%s25432_s5 + $0x18] sm:$0xff] }
 0x1da   : > { %11659 = vmatmul.mubr.msk.f32.vlgmr.msra.gmra.mrb[20].mxu0 %vm2482_vm7, %v2477_v39 }
 0x1db   : > { %11666 = vmatmul.mubr.msk.f32.vlgmr.msra.gmra.mrb[20].mxu1 %vm2482_vm7, %v2477_v39  ;;  %14346 = vmatpush1.bf16.msra.mxu0 %v18098_v2  ;;  %v2479_v2 = vld [vmem:[%s25478_s19 + $0x10] sm:$0xff]  ;;  %v3267_v39 = vld [vmem:[%s25433_s6 + $0x88] sm:$0xff] }
 0x1dc   : > { %14368 = vmatpush1.bf16.msra.mxu1 %v18100_v8  ;;  %14348 = vmatprep.subr.bf16.mxu0 %v18122_v20  ;;  %v2480_v8 = vld [vmem:[%s25478_s19 + $0x18] sm:$0xff]  ;;  %v2481_v20 = vld [vmem:[%s25478_s19 + $0x20] sm:$0x3f] }
 0x1dd   : > { %14370 = vmatprep.subr.bf16.mxu1 %v18124_v58  ;;  %2580 = vmatprep.mubr.f32.mxu0 %v16914_v7  ;;  %v14387_v58 = vpack.c.bf16 %v2933_v11, %v2931_v9  ;;  %v2948_v9 = vld [vmem:[%s25432_s5 + $0x90] sm:$0xff]  ;;  %v2951_v11 = vld [vmem:[%s25432_s5 + $0xa8] sm:$0xff] }
 0x1de   : > { %11660 = vmatmul.mubr.msk.f32.gmra.mrb[22].mxu0 %vm2482_vm7, %v2478_v50  ;;  %2675 = vmatprep.mubr.f32.mxu1 %v16914_v7 }
 0x1df   : > { %14350 = vmatpush1.bf16.msra.mxu0 %v18118_v54  ;;  %2586 = vmatprep.mubr.f32.mxu0 %v16914_v7  ;;  %v3251_v54 = vld [vmem:[%s25433_s6 + $0x8] sm:$0xff] }
 0x1e0   : > { %14372 = vmatpush1.bf16.msra.mxu1 %v18120_v38  ;;  %14352 = vmatprep.subr.bf16.mxu0 %v18142_v22  ;;  %v3253_v38 = vld [vmem:[%s25433_s6 + $0x18] sm:$0xff] }
 0x1e1   : > { %14374 = vmatprep.subr.bf16.mxu1 %v18144_v61  ;;  %11667 = vmatmul.mubr.msk.f32.gmra.mrb[22].mxu1 %vm2482_vm7, %v2478_v50  ;;  %v14499_v22 = vpack.c.bf16 %v3253_v38, %v3251_v54  ;;  %v2935_v61 = vld [vmem:[%s25432_s5 + $0x28] sm:$0xff]  ;;  %v14403_v50 = vpack.c.bf16 %v2949_v16, %v2947_v33  ;;  %v2953_v54 = vld [vmem:[%s25432_s5 + $0xb8] sm:$0xff]  ;;  %v2704_v38 = vld [vmem:[%s25479_s4 + $0x20] sm:$0x3f] }
 0x1e2   : > { %11661 = vmatmul.mubr.msk.f32.gmra.mrb[24].mxu0 %vm2482_vm7, %v2479_v2  ;;  %2681 = vmatprep.mubr.f32.mxu1 %v16914_v7  ;;  %v14391_v29 = vpack.c.bf16 %v2937_v14, %v2935_v61  ;;  %v3271_v61 = vld [vmem:[%s25433_s6 + $0xa8] sm:$0xff]  ;;  %v14407_v14 = vpack.c.bf16 %v2953_v54, %v2951_v11  ;;  %v3285_v16 = vld [vmem:[%s25433_s6 + $0x118] sm:$0xff]  ;;  %v2966_v54 = vld [vmem:[%s25432_s5 + $0x120] sm:$0xff] }
 0x1e3   : > { %14354 = vmatpush1.bf16.msra.mxu0 %v18138_v12  ;;  %2592 = vmatprep.mubr.f32.mxu0 %v16914_v7  ;;  %v2930_v12 = vld [vmem:[%s25432_s5] sm:$0xff]  ;;  %v3289_v11 = vld [vmem:[%s25433_s6 + $0x138] sm:$0xff] }
 0x1e4   : > { %14376 = vmatpush1.bf16.msra.mxu1 %v18140_v19  ;;  %14356 = vmatprep.subr.bf16.mxu0 %v18162_v49  ;;  %v2932_v19 = vld [vmem:[%s25432_s5 + $0x10] sm:$0xff]  ;;  %v3254_v49 = vld [vmem:[%s25433_s6 + $0x20] sm:$0xff] }
 0x1e5   : > { %14378 = vmatprep.subr.bf16.mxu1 %v14333_v53  ;;  %11668 = vmatmul.mubr.msk.f32.gmra.mrb[24].mxu1 %vm2482_vm7, %v2479_v2  ;;  %v14389_v44 = vpack.c.bf16 %v2932_v19, %v2930_v12  ;;  %v3259_v53 = vld [vmem:[%s25433_s6 + $0x48] sm:$0xff]  ;;  %v14505_v63 = vpack.c.bf16 %v3256_v52, %v3254_v49  ;;  %v3269_v2 = vld [vmem:[%s25433_s6 + $0x98] sm:$0xff]  ;;  %v3266_v19 = vld [vmem:[%s25433_s6 + $0x80] sm:$0xff] }
 0x1e6   : > { %11662 = vmatmul.mubr.msk.f32.gmra.mrb[26].mxu0 %vm2482_vm7, %v2480_v8  ;;  %2687 = vmatprep.mubr.f32.mxu1 %v16914_v7  ;;  %v14507_v15 = vpack.c.bf16 %v3261_v55, %v3259_v53  ;;  %v2959_v49 = vld [vmem:[%s25432_s5 + $0xe8] sm:$0xff]  ;;  %v2961_v52 = vld [vmem:[%s25432_s5 + $0xf8] sm:$0xff] }
 0x1e7   : > { %14358 = vmatpush1.bf16.msra.mxu0 %v18158_v45  ;;  %2598 = vmatprep.mubr.f32.mxu0 %v16914_v7  ;;  %v2941_v45 = vld [vmem:[%s25432_s5 + $0x58] sm:$0xff]  ;;  %v14415_v60 = vpack.c.bf16 %v2961_v52, %v2959_v49 }
 0x1e8   : > { %14380 = vmatpush1.bf16.msra.mxu1 %v18160_v5  ;;  %14361 = vmatprep.subr.msk.bf16.mxu0 %vm18176_vm6, %v14315_v36  ;;  %v14393_v5 = vpack.c.bf16 %v2936_v42, %v2934_v41  ;;  %v14395_v35 = vpack.c.bf16 %v2941_v45, %v2939_v43  ;;  %v3262_v36 = vld [vmem:[%s25433_s6 + $0x60] sm:$0xff]  ;;  %v3272_v43 = vld [vmem:[%s25433_s6 + $0xb0] sm:$0xff]  ;;  %v3275_v45 = vld [vmem:[%s25433_s6 + $0xc8] sm:$0xff] }
 0x1e9   : > { %14383 = vmatprep.subr.msk.bf16.mxu1 %vm18176_vm6, %v14337_v3  ;;  %11669 = vmatmul.mubr.msk.f32.gmra.mrb[26].mxu1 %vm2482_vm7, %v2480_v8  ;;  %v3264_v3 = vld [vmem:[%s25433_s6 + $0x70] sm:$0xff]  ;;  %v2946_v8 = vld [vmem:[%s25432_s5 + $0x80] sm:$0xff]  ;;  %v3297_v49 = vld [vmem:[%s25433_s6 + $0x178] sm:$0xff] }
 0x1ea   : > { %11663 = vmatmul.mubr.msk.f32.gmra.mrb[28].mxu0 %vm2482_vm7, %v2481_v20  ;;  %2693 = vmatprep.mubr.f32.mxu1 %v16914_v7  ;;  %v14405_v12 = vpack.c.bf16 %v2948_v9, %v2946_v8  ;;  %v3270_v42 = vld [vmem:[%s25433_s6 + $0xa0] sm:$0xff]  ;;  %v3287_v8 = vld [vmem:[%s25433_s6 + $0x128] sm:$0xff] }
 0x1eb   : > { %14364 = vmatpush1.bf16.msk.msra.mxu0 %vm18176_vm6, %v14318_v0  ;;  %2784 = vmatprep.mubr.f32.mxu0 %v16914_v7  ;;  %v2703_v0 = vld [vmem:[%s25479_s4 + $0x18] sm:$0xff]  ;;  %v14521_v53 = vpack.c.bf16 %v3272_v43, %v3270_v42  ;;  %v3292_v43 = vld [vmem:[%s25433_s6 + $0x150] sm:$0xff]  ;;  %s16856_s4 = scalar_lea.vmem %s16855_s27, 32 }
 0x1ec   : > { %14386 = vmatpush1.bf16.msk.msra.mxu1 %vm18176_vm6, %v14340_v37  ;;  %14388 = vmatprep.subr.bf16.mxu0 %v14387_v58  ;;  %v14401_v37 = vpack.c.bf16 %v2944_v24, %v2942_v23  ;;  %v14515_v58 = vpack.c.bf16 %v3269_v2, %v3267_v39  ;;  %v3280_v23 = vld [vmem:[%s25433_s6 + $0xf0] sm:$0xff]  ;;  %v3283_v24 = vld [vmem:[%s25433_s6 + $0x108] sm:$0xff]  ;;  %p16858_p1 = scmp.lt.s32.totalorder %s16856_s4, %s16850_s23 }
 0x1ed   : > { %11670 = vmatmul.mubr.msk.f32.gmra.mrb[28].mxu1 %vm2482_vm7, %v2481_v20  ;;  %14500 = vmatprep.subr.bf16.mxu1 %v14499_v22  ;;  %v14513_v20 = vpack.c.bf16 %v3264_v3, %v3262_v36  ;;  %v3268_v22 = vld [vmem:[%s25433_s6 + $0x90] sm:$0xff]  ;;  %v14529_v36 = vpack.c.bf16 %v3280_v23, %v3278_v21  ;;  %v14531_v3 = vpack.c.bf16 %v3285_v16, %v3283_v24  ;;  %v2985_v16 = vld [vmem:[%s25432_s5 + $0x1b8] sm:$0xff] }
 0x1ee   : > { %11673 = vmatmul.mubr.msk.f32.vlgmr.msra.gmra.mrb[30].mxu0 %vm2482_vm7, %v2700_v28  ;;  %2879 = vmatprep.mubr.f32.mxu1 %v16914_v7  ;;  %v14517_v34 = vpack.c.bf16 %v3268_v22, %v3266_v19  ;;  %v3284_v2 = vld [vmem:[%s25433_s6 + $0x110] sm:$0xff]  ;;  %v14535_v19 = vpack.c.bf16 %v3289_v11, %v3287_v8  ;;  %v2989_v11 = vld [vmem:[%s25432_s5 + $0x1d8] sm:$0xff]  ;;  %p16859_p2 = por %p16858_p1, %p16857_p0 }
 0x1ef   : > { %2790 = vmatprep.mubr.f32.mxu0 %v16914_v7  ;;  %14390 = vmatpush1.bf16.msra.mxu0 %v14389_v44  ;;  %v2950_v44 = vld [vmem:[%s25432_s5 + $0xa0] sm:$0xff]  ;;  %v3300_v23 = vld [vmem:[%s25433_s6 + $0x190] sm:$0xff] }
 0x1f0   : > { %14392 = vmatprep.subr.bf16.mxu0 %v14391_v29  ;;  %v2957_v29 = vld [vmem:[%s25432_s5 + $0xd8] sm:$0xff]  ;;  %v14409_v41 = vpack.c.bf16 %v2952_v40, %v2950_v44  ;;  %v3291_v44 = vld [vmem:[%s25433_s6 + $0x148] sm:$0xff]  ;;  %p16860_p3 = pnand %p16859_p2, %p16853_p13 }
 0x1f1   : > { %11680 = vmatmul.mubr.msk.f32.vlgmr.msra.gmra.mrb[30].mxu1 %vm2482_vm7, %v2700_v28  ;;  %v3273_v28 = vld [vmem:[%s25433_s6 + $0xb8] sm:$0xff] }
 0x1f2   : > { %11674 = vmatmul.mubr.msk.f32.gmra.mrb[32].mxu0 %vm2482_vm7, %v2701_v46  ;;  %2885 = vmatprep.mubr.f32.mxu1 %v16914_v7  ;;  %v14519_v56 = vpack.c.bf16 %v3273_v28, %v3271_v61  ;;  %v3286_v61 = vld [vmem:[%s25433_s6 + $0x120] sm:$0xff]  ;;  %v3293_v40 = vld [vmem:[%s25433_s6 + $0x158] sm:$0xff] }
 0x1f3   : > { %2796 = vmatprep.mubr.f32.mxu0 %v16914_v7  ;;  %14502 = vmatpush1.bf16.msra.mxu1 %v14501_v47  ;;  %v3277_v47 = vld [vmem:[%s25433_s6 + $0xd8] sm:$0xff] }
 0x1f4   : > { %14504 = vmatprep.subr.bf16.mxu1 %v14503_v48  ;;  %14394 = vmatpush1.bf16.msra.mxu0 %v14393_v5  ;;  %v2954_v48 = vld [vmem:[%s25432_s5 + $0xc0] sm:$0xff]  ;;  %v2956_v5 = vld [vmem:[%s25432_s5 + $0xd0] sm:$0xff] }
 0x1f5   : > { %11681 = vmatmul.mubr.msk.f32.gmra.mrb[32].mxu1 %vm2482_vm7, %v2701_v46  ;;  %14396 = vmatprep.subr.bf16.mxu0 %v14395_v35  ;;  %v14411_v46 = vpack.c.bf16 %v2957_v29, %v2955_v51  ;;  %v14523_v35 = vpack.c.bf16 %v3277_v47, %v3275_v45  ;;  %v14413_v55 = vpack.c.bf16 %v2956_v5, %v2954_v48  ;;  %v2977_v47 = vld [vmem:[%s25432_s5 + $0x178] sm:$0xff]  ;;  %v3295_v48 = vld [vmem:[%s25433_s6 + $0x168] sm:$0xff] }
 0x1f6   : > { %11675 = vmatmul.mubr.msk.f32.gmra.mrb[34].mxu0 %vm2482_vm7, %v2702_v62  ;;  %2891 = vmatprep.mubr.f32.mxu1 %v16914_v7  ;;  %v14539_v29 = vpack.c.bf16 %v3293_v40, %v3291_v44  ;;  %v14543_v52 = vpack.c.bf16 %v3297_v49, %v3295_v48  ;;  %v2991_v44 = vld [vmem:[%s25432_s5 + $0x1e8] sm:$0xff]  ;;  %v2993_v40 = vld [vmem:[%s25432_s5 + $0x1f8] sm:$0xff] }
 0x1f7   : > { %2802 = vmatprep.mubr.f32.mxu0 %v16914_v7  ;;  %14506 = vmatpush1.bf16.msra.mxu1 %v14505_v63  ;;  %v2958_v63 = vld [vmem:[%s25432_s5 + $0xe0] sm:$0xff]  ;;  %v2995_v48 = vld [vmem:[%s25432_s5 + $0x208] sm:$0xff] }
 0x1f8   : > { %14508 = vmatprep.subr.bf16.mxu1 %v14507_v15  ;;  %14398 = vmatpush1.bf16.msra.mxu0 %v14397_v4  ;;  %v2960_v15 = vld [vmem:[%s25432_s5 + $0xf0] sm:$0xff]  ;;  %v2963_v4 = vld [vmem:[%s25432_s5 + $0x108] sm:$0xff] }
 0x1f9   : > { %11682 = vmatmul.mubr.msk.f32.gmra.mrb[34].mxu1 %vm2482_vm7, %v2702_v62  ;;  %14400 = vmatprep.subr.bf16.mxu0 %v14399_v6  ;;  %v3281_v62 = vld [vmem:[%s25433_s6 + $0xf8] sm:$0xff]  ;;  %v14417_v6 = vpack.c.bf16 %v2960_v15, %v2958_v63  ;;  %v14419_v33 = vpack.c.bf16 %v2965_v10, %v2963_v4  ;;  %v3299_v63 = vld [vmem:[%s25433_s6 + $0x188] sm:$0xff] }
 0x1fa   : > { %11676 = vmatmul.mubr.msk.f32.gmra.mrb[36].mxu0 %vm2482_vm7, %v2703_v0  ;;  %2897 = vmatprep.mubr.f32.mxu1 %v16914_v7  ;;  %v14527_v18 = vpack.c.bf16 %v3281_v62, %v3279_v59  ;;  %v2981_v62 = vld [vmem:[%s25432_s5 + $0x198] sm:$0xff]  ;;  %v3315_v49 = vld [vmem:[%s25433_s6 + $0x208] sm:$0xff] }
 0x1fb   : > { %2808 = vmatprep.mubr.f32.mxu0 %v16914_v7  ;;  %14510 = vmatpush1.bf16.msra.mxu1 %v14509_v17  ;;  %v2964_v17 = vld [vmem:[%s25432_s5 + $0x110] sm:$0xff]  ;;  %v3301_v4 = vld [vmem:[%s25433_s6 + $0x198] sm:$0xff] }
 0x1fc   : > { %14512 = vmatprep.subr.bf16.mxu1 %v14511_v1  ;;  %14402 = vmatpush1.bf16.msra.mxu0 %v14401_v37  ;;  %v2967_v1 = vld [vmem:[%s25432_s5 + $0x128] sm:$0xff]  ;;  %v2969_v37 = vld [vmem:[%s25432_s5 + $0x138] sm:$0xff]  ;;  %v14547_v10 = vpack.c.bf16 %v3301_v4, %v3299_v63 }
 0x1fd   : > { %11683 = vmatmul.mubr.msk.f32.gmra.mrb[36].mxu1 %vm2482_vm7, %v2703_v0  ;;  %14404 = vmatprep.subr.bf16.mxu0 %v14403_v50  ;;  %v2962_v0 = vld [vmem:[%s25432_s5 + $0x100] sm:$0xff]  ;;  %v14423_v9 = vpack.c.bf16 %v2969_v37, %v2967_v1  ;;  %v3305_v1 = vld [vmem:[%s25433_s6 + $0x1b8] sm:$0xff] }
 0x1fe   : > { %11677 = vmatmul.mubr.msk.f32.gmra.mrb[38].mxu0 %vm2482_vm7, %v2704_v38  ;;  %2903 = vmatprep.mubr.f32.mxu1 %v16914_v7  ;;  %v14421_v39 = vpack.c.bf16 %v2964_v17, %v2962_v0  ;;  %v3282_v50 = vld [vmem:[%s25433_s6 + $0x100] sm:$0xff]  ;;  %v3303_v0 = vld [vmem:[%s25433_s6 + $0x1a8] sm:$0xff] }
 0x1ff   : > { %14514 = vmatpush1.bf16.msra.mxu1 %v14513_v20  ;;  %v2971_v20 = vld [vmem:[%s25432_s5 + $0x148] sm:$0xff]  ;;  %v14551_v37 = vpack.c.bf16 %v3305_v1, %v3303_v0  ;;  %v2994_v0 = vld [vmem:[%s25432_s5 + $0x200] sm:$0xff] }
 0x200   : > { %14516 = vmatprep.subr.bf16.mxu1 %v14515_v58  ;;  %14406 = vmatpush1.bf16.msra.mxu0 %v14405_v12  ;;  %v2973_v58 = vld [vmem:[%s25432_s5 + $0x158] sm:$0xff]  ;;  %v14533_v12 = vpack.c.bf16 %v3284_v2, %v3282_v50  ;;  %v3304_v2 = vld [vmem:[%s25433_s6 + $0x1b0] sm:$0xff]  ;;  %v3314_v1 = vld [vmem:[%s25433_s6 + $0x200] sm:$0xff] }
 0x201   : > { %11684 = vmatmul.mubr.msk.f32.gmra.mrb[38].mxu1 %vm2482_vm7, %v2704_v38  ;;  %14408 = vmatprep.subr.bf16.mxu0 %v14407_v14  ;;  %v2968_v38 = vld [vmem:[%s25432_s5 + $0x130] sm:$0xff]  ;;  %v14427_v28 = vpack.c.bf16 %v2973_v58, %v2971_v20  ;;  %v3309_v20 = vld [vmem:[%s25433_s6 + $0x1d8] sm:$0xff] }
 0x202   : > { %v14425_v22 = vpack.c.bf16 %v2968_v38, %v2966_v54  ;;  %v3288_v14 = vld [vmem:[%s25433_s6 + $0x130] sm:$0xff]  ;;  %v3307_v54 = vld [vmem:[%s25433_s6 + $0x1c8] sm:$0xff] }
 0x203   : > { %14518 = vmatpush1.bf16.msra.mxu1 %v14517_v34  ;;  %v14537_v51 = vpack.c.bf16 %v3288_v14, %v3286_v61  ;;  %v2970_v34 = vld [vmem:[%s25432_s5 + $0x140] sm:$0xff]  ;;  %v14555_v58 = vpack.c.bf16 %v3309_v20, %v3307_v54  ;;  %v3308_v14 = vld [vmem:[%s25433_s6 + $0x1d0] sm:$0xff] }
 0x204   : > { %14520 = vmatprep.subr.bf16.mxu1 %v14519_v56  ;;  %14410 = vmatpush1.bf16.msra.mxu0 %v14409_v41  ;;  %v2972_v56 = vld [vmem:[%s25432_s5 + $0x150] sm:$0xff]  ;;  %v3290_v41 = vld [vmem:[%s25433_s6 + $0x140] sm:$0xff] }
 0x205   : > { %14412 = vmatprep.subr.bf16.mxu0 %v14411_v46  ;;  %v14429_v42 = vpack.c.bf16 %v2972_v56, %v2970_v34  ;;  %v14541_v45 = vpack.c.bf16 %v3292_v43, %v3290_v41  ;;  %v2975_v46 = vld [vmem:[%s25432_s5 + $0x168] sm:$0xff]  ;;  %v3313_v34 = vld [vmem:[%s25433_s6 + $0x1f8] sm:$0xff]  ;;  %v2990_v56 = vld [vmem:[%s25432_s5 + $0x1e0] sm:$0xff] }
 0x206   : > { %v14431_v5 = vpack.c.bf16 %v2977_v47, %v2975_v46  ;;  %v2992_v41 = vld [vmem:[%s25432_s5 + $0x1f0] sm:$0xff] }
 0x207   : > { %14522 = vmatpush1.bf16.msra.mxu1 %v14521_v53  ;;  %v2974_v53 = vld [vmem:[%s25432_s5 + $0x160] sm:$0xff]  ;;  %v14449_v43 = vpack.c.bf16 %v2992_v41, %v2990_v56  ;;  %v3312_v46 = vld [vmem:[%s25433_s6 + $0x1f0] sm:$0xff]  ;;  %v3325_v56 = vld [vmem:[%s25433_s6 + $0x258] sm:$0xff] }
 0x208   : > { %14524 = vmatprep.subr.bf16.mxu1 %v14523_v35  ;;  %14414 = vmatpush1.bf16.msra.mxu0 %v14413_v55  ;;  %v2976_v35 = vld [vmem:[%s25432_s5 + $0x170] sm:$0xff]  ;;  %v3294_v55 = vld [vmem:[%s25433_s6 + $0x160] sm:$0xff] }
 0x209   : > { %14416 = vmatprep.subr.bf16.mxu0 %v14415_v60  ;;  %v14433_v57 = vpack.c.bf16 %v2976_v35, %v2974_v53  ;;  %v14545_v59 = vpack.c.bf16 %v3296_v26, %v3294_v55  ;;  %v2979_v60 = vld [vmem:[%s25432_s5 + $0x188] sm:$0xff]  ;;  %v3317_v53 = vld [vmem:[%s25433_s6 + $0x218] sm:$0xff] }
 0x20a   : > { %v14435_v15 = vpack.c.bf16 %v2981_v62, %v2979_v60  ;;  %v14563_v35 = vpack.c.bf16 %v3317_v53, %v3315_v49  ;;  %v3002_v49 = vld [vmem:[%s25432_s5 + $0x240] sm:$0xff] }
 0x20b   : > { %14526 = vmatpush1.bf16.msra.mxu1 %v14525_v13  ;;  %v2978_v13 = vld [vmem:[%s25432_s5 + $0x180] sm:$0xff] }
 0x20c   : > { %14528 = vmatprep.subr.bf16.mxu1 %v14527_v18  ;;  %14418 = vmatpush1.bf16.msra.mxu0 %v14417_v6  ;;  %v2980_v18 = vld [vmem:[%s25432_s5 + $0x190] sm:$0xff]  ;;  %v3298_v6 = vld [vmem:[%s25433_s6 + $0x180] sm:$0xff] }
 0x20d   : > { %14420 = vmatprep.subr.bf16.mxu0 %v14419_v33  ;;  %v14437_v21 = vpack.c.bf16 %v2980_v18, %v2978_v13  ;;  %v14549_v24 = vpack.c.bf16 %v3300_v23, %v3298_v6  ;;  %v2983_v33 = vld [vmem:[%s25432_s5 + $0x1a8] sm:$0xff] }
 0x20e   : > { %v14439_v17 = vpack.c.bf16 %v2985_v16, %v2983_v33 }
 0x20f   : > { %14530 = vmatpush1.bf16.msra.mxu1 %v14529_v36  ;;  %v2982_v36 = vld [vmem:[%s25432_s5 + $0x1a0] sm:$0xff] }
 0x210   : > { %14532 = vmatprep.subr.bf16.mxu1 %v14531_v3  ;;  %14422 = vmatpush1.bf16.msra.mxu0 %v14421_v39  ;;  %v2984_v3 = vld [vmem:[%s25432_s5 + $0x1b0] sm:$0xff]  ;;  %v3302_v39 = vld [vmem:[%s25433_s6 + $0x1a0] sm:$0xff] }
 0x211   : > { %14424 = vmatprep.subr.bf16.mxu0 %v14423_v9  ;;  %v14441_v50 = vpack.c.bf16 %v2984_v3, %v2982_v36  ;;  %v14553_v8 = vpack.c.bf16 %v3304_v2, %v3302_v39  ;;  %v2987_v9 = vld [vmem:[%s25432_s5 + $0x1c8] sm:$0xff] }
 0x212   : > { %v14443_v38 = vpack.c.bf16 %v2989_v11, %v2987_v9  ;;  %v2999_v36 = vld [vmem:[%s25432_s5 + $0x228] sm:$0xff] }
 0x213   : > { %14534 = vmatpush1.bf16.msra.mxu1 %v14533_v12  ;;  %v2986_v12 = vld [vmem:[%s25432_s5 + $0x1c0] sm:$0xff]  ;;  %v3319_v2 = vld [vmem:[%s25433_s6 + $0x228] sm:$0xff] }
 0x214   : > { %14536 = vmatprep.subr.bf16.mxu1 %v14535_v19  ;;  %14426 = vmatpush1.bf16.msra.mxu0 %v14425_v22  ;;  %v2988_v19 = vld [vmem:[%s25432_s5 + $0x1d0] sm:$0xff]  ;;  %v3306_v22 = vld [vmem:[%s25433_s6 + $0x1c0] sm:$0xff] }
 0x215   : > { %14428 = vmatprep.subr.bf16.mxu0 %v14427_v28  ;;  %v14445_v61 = vpack.c.bf16 %v2988_v19, %v2986_v12  ;;  %v14557_v28 = vpack.c.bf16 %v3308_v14, %v3306_v22  ;;  %v2998_v12 = vld [vmem:[%s25432_s5 + $0x220] sm:$0xff]  ;;  %v3000_v19 = vld [vmem:[%s25432_s5 + $0x230] sm:$0xff] }
 0x216   : > { %v3318_v14 = vld [vmem:[%s25433_s6 + $0x220] sm:$0xff] }
 0x217   : > { %14538 = vmatpush1.bf16.msra.mxu1 %v14537_v51  ;;  %v3311_v51 = vld [vmem:[%s25433_s6 + $0x1e8] sm:$0xff] }
 0x218   : > { %14540 = vmatprep.subr.bf16.mxu1 %v14539_v29  ;;  %14430 = vmatpush1.bf16.msra.mxu0 %v14429_v42  ;;  %v14447_v29 = vpack.c.bf16 %v2993_v40, %v2991_v44  ;;  %v14559_v42 = vpack.c.bf16 %v3313_v34, %v3311_v51  ;;  %v3003_v44 = vld [vmem:[%s25432_s5 + $0x248] sm:$0xff] }
 0x219   : > { %14432 = vmatprep.subr.bf16.mxu0 %v14431_v5  ;;  %v2997_v5 = vld [vmem:[%s25432_s5 + $0x218] sm:$0xff]  ;;  %v3323_v34 = vld [vmem:[%s25433_s6 + $0x248] sm:$0xff] }
 0x21b   : > { %14542 = vmatpush1.bf16.msra.mxu1 %v14541_v45  ;;  %v3310_v45 = vld [vmem:[%s25433_s6 + $0x1e0] sm:$0xff] }
 0x21c   : > { %14544 = vmatprep.subr.bf16.mxu1 %v14543_v52  ;;  %14434 = vmatpush1.bf16.msra.mxu0 %v14433_v57  ;;  %v14561_v47 = vpack.c.bf16 %v3312_v46, %v3310_v45  ;;  %v14451_v52 = vpack.c.bf16 %v2997_v5, %v2995_v48  ;;  %v14457_v48 = vpack.c.bf16 %v3000_v19, %v2998_v12  ;;  %v3013_v19 = vld [vmem:[%s25432_s5 + $0x298] sm:$0xff] }
 0x21d   : > { %14436 = vmatprep.subr.bf16.mxu0 %v14435_v15 }
 0x21f   : > { %14546 = vmatpush1.bf16.msra.mxu1 %v14545_v59 }
 0x220   : > { %14548 = vmatprep.subr.bf16.mxu1 %v14547_v10  ;;  %14438 = vmatpush1.bf16.msra.mxu0 %v14437_v21 }
 0x221   : > { %14440 = vmatprep.subr.bf16.mxu0 %v14439_v17  ;;  %v2996_v17 = vld [vmem:[%s25432_s5 + $0x210] sm:$0xff] }
 0x222   : > { %v14453_v20 = vpack.c.bf16 %v2996_v17, %v2994_v0  ;;  %v3327_v0 = vld [vmem:[%s25433_s6 + $0x268] sm:$0xff]  ;;  %v3329_v17 = vld [vmem:[%s25433_s6 + $0x278] sm:$0xff] }
 0x223   : > { %14550 = vmatpush1.bf16.msra.mxu1 %v14549_v24 }
 0x224   : > { %14552 = vmatprep.subr.bf16.mxu1 %v14551_v37  ;;  %14442 = vmatpush1.bf16.msra.mxu0 %v14441_v50  ;;  %v3316_v37 = vld [vmem:[%s25433_s6 + $0x210] sm:$0xff]  ;;  %v3001_v50 = vld [vmem:[%s25432_s5 + $0x238] sm:$0xff] }
 0x225   : > { %14444 = vmatprep.subr.bf16.mxu0 %v14443_v38  ;;  %v14455_v22 = vpack.c.bf16 %v3001_v50, %v2999_v36 }
 0x227   : > { %14554 = vmatpush1.bf16.msra.mxu1 %v14553_v8  ;;  %v3321_v8 = vld [vmem:[%s25433_s6 + $0x238] sm:$0xff] }
 0x228   : > { %14556 = vmatprep.subr.bf16.mxu1 %v14555_v58  ;;  %14446 = vmatpush1.bf16.msra.mxu0 %v14445_v61  ;;  %v14565_v58 = vpack.c.bf16 %v3316_v37, %v3314_v1  ;;  %v14567_v61 = vpack.c.bf16 %v3321_v8, %v3319_v2 }
 0x229   : > { %14448 = vmatprep.subr.bf16.mxu0 %v14447_v29  ;;  %v3005_v29 = vld [vmem:[%s25432_s5 + $0x258] sm:$0xff] }
 0x22a   : > { %v14459_v53 = vpack.c.bf16 %v3005_v29, %v3003_v44 }
 0x22b   : > { %14558 = vmatpush1.bf16.msra.mxu1 %v14557_v28  ;;  %v3320_v28 = vld [vmem:[%s25433_s6 + $0x230] sm:$0xff] }
 0x22c   : > { %14560 = vmatprep.subr.bf16.mxu1 %v14559_v42  ;;  %14450 = vmatpush1.bf16.msra.mxu0 %v14449_v43  ;;  %v14569_v5 = vpack.c.bf16 %v3320_v28, %v3318_v14 }
 0x22d   : > { %14452 = vmatprep.subr.bf16.mxu0 %v14451_v52  ;;  %v3004_v52 = vld [vmem:[%s25432_s5 + $0x250] sm:$0xff] }
 0x22e   : > { %v14461_v8 = vpack.c.bf16 %v3004_v52, %v3002_v49  ;;  %v3335_v49 = vld [vmem:[%s25433_s6 + $0x2a8] sm:$0xff]  ;;  %v3337_v52 = vld [vmem:[%s25433_s6 + $0x2b8] sm:$0xff] }
 0x22f   : > { %14562 = vmatpush1.bf16.msra.mxu1 %v14561_v47 }
 0x230   : > { %14564 = vmatprep.subr.bf16.mxu1 %v14563_v35  ;;  %v14571_v35 = vpack.c.bf16 %v3325_v56, %v3323_v34 }
 0x2ad   : > { %v2576_v55 = vpop.f32.mrb[20].mxu0 }
 0x2ae   : > { %v2578_v57 = vpop.f32.mrb[21].mxu0  ;;  %v2671_v26 = vpop.f32.mrb[20].mxu1 }
 0x2af   : > { %v2673_v59 = vpop.f32.mrb[21].mxu1 }
 0x2b1   : > { %v2582_v60 = vpop.f32.mrb[22].mxu0 }
 0x2b2   : > { %v2584_v62 = vpop.f32.mrb[23].mxu0 }
 0x2b4   : > { %v18675_v63 = vpop.f32.mrb[22].mxu1 }
 0x2b5   : > { %v18677_v15 = vpop.f32.mrb[24].mxu0  ;;  %v18679_v4 = vpop.f32.mrb[23].mxu1 }
 0x2b6   : > { %v18681_v10 = vpop.f32.mrb[25].mxu0 }
 0x2b8   : > { %v18683_v13 = vpop.f32.mrb[24].mxu1 }
 0x2b9   : > { %v18685_v18 = vpop.f32.mrb[26].mxu0  ;;  %v18687_v6 = vpop.f32.mrb[25].mxu1 }
 0x2ba   : > { %v18689_v21 = vpop.f32.mrb[27].mxu0 }
 0x2bc   : > { %v18691_v23 = vpop.f32.mrb[26].mxu1 }
 0x2bd   : > { %v18693_v24 = vpop.f32.mrb[28].mxu0  ;;  %v18695_v33 = vpop.f32.mrb[27].mxu1 }
 0x2be   : > { %v18697_v16 = vpop.f32.mrb[29].mxu0 }
 0x2c0   : > { %v18714_v3 = vpop.f32.mrb[28].mxu1 }
 0x2c1   : > { %v2786_v39 = vpop.f32.mrb[30].mxu0  ;;  %v18725_v9 = vpop.f32.mrb[29].mxu1 }
 0x2c2   : > { %v2910_v11 = vmax.f32 %v2576_v55, %v2786_v39  ;;  %v2788_v54 = vpop.f32.mrb[31].mxu0  ;;  %v3322_v55 = vld [vmem:[%s25433_s6 + $0x240] sm:$0xff] }
 0x2c3   : > { %v2911_v38 = vmax.f32 %v2578_v57, %v2788_v54  ;;  %v3324_v57 = vld [vmem:[%s25433_s6 + $0x250] sm:$0xff] }
 0x2c4   : > { %v2881_v40 = vpop.f32.mrb[30].mxu1 }
 0x2c5   : > { %v2792_v51 = vpop.f32.mrb[32].mxu0  ;;  %3124 = vmatprep.mubr.f32.mxu0 %v2911_v38  ;;  %3428 = vmatprep.mubr.f32.mxu1 %v2911_v38  ;;  %v18751_v41 = vmax.f32 %v2671_v26, %v2881_v40  ;;  %v2883_v42 = vpop.f32.mrb[31].mxu1  ;;  %v3007_v26 = vld [vmem:[%s25432_s5 + $0x268] sm:$0xff]  ;;  %v14575_v38 = vpack.c.bf16 %v3329_v17, %v3327_v0  ;;  %v14583_v17 = vpack.c.bf16 %v3337_v52, %v3335_v49  ;;  %v3346_v52 = vld [vmem:[%s25433_s6 + $0x300] sm:$0xff] }
 0x2c6   : > { %v2914_v43 = vmax.f32 %v2582_v60, %v2792_v51  ;;  %v2794_v45 = vpop.f32.mrb[33].mxu0  ;;  %3125 = vmatmul.mubr.f32.vlgmr.msra.gmra.mrb[40].mxu0 %v2910_v11  ;;  %3429 = vmatmul.mubr.f32.vlgmr.msra.gmra.mrb[40].mxu1 %v2910_v11  ;;  %v18753_v46 = vmax.f32 %v2673_v59, %v2883_v42  ;;  %v14573_v11 = vpack.c.bf16 %v3324_v57, %v3322_v55 }
 0x2c7   : > { %v2915_v47 = vmax.f32 %v2584_v62, %v2794_v45  ;;  %14454 = vmatpush1.bf16.msra.mxu0 %v14453_v20  ;;  %14566 = vmatpush1.bf16.msra.mxu1 %v14565_v58  ;;  %v3009_v62 = vld [vmem:[%s25432_s5 + $0x278] sm:$0xff]  ;;  %v3011_v20 = vld [vmem:[%s25432_s5 + $0x288] sm:$0xff] }
 0x2c8   : > { %14456 = vmatprep.subr.bf16.mxu0 %v14455_v22  ;;  %14568 = vmatprep.subr.bf16.mxu1 %v14567_v61  ;;  %v2887_v59 = vpop.f32.mrb[32].mxu1  ;;  %v14463_v54 = vpack.c.bf16 %v3009_v62, %v3007_v26  ;;  %v3331_v22 = vld [vmem:[%s25433_s6 + $0x288] sm:$0xff]  ;;  %v3333_v61 = vld [vmem:[%s25433_s6 + $0x298] sm:$0xff]  ;;  %v14467_v42 = vpack.c.bf16 %v3013_v19, %v3011_v20 }
 0x2c9   : > { %v2798_v60 = vpop.f32.mrb[34].mxu0  ;;  %3130 = vmatprep.mubr.f32.mxu0 %v2915_v47  ;;  %3434 = vmatprep.mubr.f32.mxu1 %v2915_v47  ;;  %v18780_v1 = vmax.f32 %v18675_v63, %v2887_v59  ;;  %v2889_v37 = vpop.f32.mrb[33].mxu1  ;;  %v3006_v63 = vld [vmem:[%s25432_s5 + $0x260] sm:$0xff]  ;;  %v3015_v45 = vld [vmem:[%s25432_s5 + $0x2a8] sm:$0xff]  ;;  %v3025_v19 = vld [vmem:[%s25432_s5 + $0x2f8] sm:$0xff] }
 0x2ca   : > { %v2918_v36 = vmax.f32 %v18677_v15, %v2798_v60  ;;  %v2800_v39 = vpop.f32.mrb[35].mxu0  ;;  %3131 = vmatmul.mubr.f32.gmra.mrb[42].mxu0 %v2914_v43  ;;  %3435 = vmatmul.mubr.f32.gmra.mrb[42].mxu1 %v2914_v43  ;;  %v18784_v50 = vmax.f32 %v18679_v4, %v2889_v37  ;;  %v3008_v15 = vld [vmem:[%s25432_s5 + $0x270] sm:$0xff]  ;;  %v3326_v4 = vld [vmem:[%s25433_s6 + $0x260] sm:$0xff]  ;;  %v14579_v43 = vpack.c.bf16 %v3333_v61, %v3331_v22  ;;  %v3019_v37 = vld [vmem:[%s25432_s5 + $0x2c8] sm:$0xff] }
 0x2cb   : > { %v2919_v2 = vmax.f32 %v18681_v10, %v2800_v39  ;;  %14458 = vmatpush1.bf16.msra.mxu0 %v14457_v48  ;;  %14570 = vmatpush1.bf16.msra.mxu1 %v14569_v5  ;;  %v3328_v10 = vld [vmem:[%s25433_s6 + $0x270] sm:$0xff]  ;;  %v14465_v34 = vpack.c.bf16 %v3008_v15, %v3006_v63  ;;  %v3017_v5 = vld [vmem:[%s25432_s5 + $0x2b8] sm:$0xff]  ;;  %v3343_v22 = vld [vmem:[%s25433_s6 + $0x2e8] sm:$0xff] }
 0x2cc   : > { %14460 = vmatprep.subr.bf16.mxu0 %v14459_v53  ;;  %14572 = vmatprep.subr.bf16.mxu1 %v14571_v35  ;;  %v2893_v58 = vpop.f32.mrb[34].mxu1  ;;  %v14577_v56 = vpack.c.bf16 %v3328_v10, %v3326_v4  ;;  %v14471_v0 = vpack.c.bf16 %v3017_v5, %v3015_v45  ;;  %v3021_v39 = vld [vmem:[%s25432_s5 + $0x2d8] sm:$0xff]  ;;  %v3018_v4 = vld [vmem:[%s25432_s5 + $0x2c0] sm:$0xff] }
 0x2cd   : > { %v2804_v12 = vpop.f32.mrb[36].mxu0  ;;  %3136 = vmatprep.mubr.f32.mxu0 %v2919_v2  ;;  %3440 = vmatprep.mubr.f32.mxu1 %v2919_v2  ;;  %v18812_v14 = vmax.f32 %v18683_v13, %v2893_v58  ;;  %v2895_v28 = vpop.f32.mrb[35].mxu1  ;;  %v3010_v13 = vld [vmem:[%s25432_s5 + $0x280] sm:$0xff]  ;;  %v3339_v2 = vld [vmem:[%s25433_s6 + $0x2c8] sm:$0xff]  ;;  %v14475_v10 = vpack.c.bf16 %v3021_v39, %v3019_v37  ;;  %v3340_v58 = vld [vmem:[%s25433_s6 + $0x2d0] sm:$0xff] }
 0x2ce   : > { %v2922_v44 = vmax.f32 %v18685_v18, %v2804_v12  ;;  %v2806_v40 = vpop.f32.mrb[37].mxu0  ;;  %3137 = vmatmul.mubr.f32.gmra.mrb[44].mxu0 %v2918_v36  ;;  %3441 = vmatmul.mubr.f32.gmra.mrb[44].mxu1 %v2918_v36  ;;  %v18816_v51 = vmax.f32 %v18687_v6, %v2895_v28  ;;  %v3012_v18 = vld [vmem:[%s25432_s5 + $0x290] sm:$0xff]  ;;  %v3330_v6 = vld [vmem:[%s25433_s6 + $0x280] sm:$0xff]  ;;  %v3023_v12 = vld [vmem:[%s25432_s5 + $0x2e8] sm:$0xff] }
 0x2cf   : > { %v2923_v29 = vmax.f32 %v18689_v21, %v2806_v40  ;;  %14462 = vmatpush1.bf16.msra.mxu0 %v14461_v8  ;;  %14574 = vmatpush1.bf16.msra.mxu1 %v14573_v11  ;;  %v3332_v21 = vld [vmem:[%s25433_s6 + $0x290] sm:$0xff]  ;;  %v14469_v60 = vpack.c.bf16 %v3012_v18, %v3010_v13  ;;  %v3341_v8 = vld [vmem:[%s25433_s6 + $0x2d8] sm:$0xff]  ;;  %v3022_v40 = vld [vmem:[%s25432_s5 + $0x2e0] sm:$0xff] }
 0x2d0   : > { %14464 = vmatprep.subr.bf16.mxu0 %v14463_v54  ;;  %14576 = vmatprep.subr.bf16.mxu1 %v14575_v38  ;;  %v2899_v47 = vpop.f32.mrb[36].mxu1  ;;  %v14581_v62 = vpack.c.bf16 %v3332_v21, %v3330_v6  ;;  %v14587_v20 = vpack.c.bf16 %v3341_v8, %v3339_v2  ;;  %v3345_v61 = vld [vmem:[%s25433_s6 + $0x2f8] sm:$0xff]  ;;  %v3344_v13 = vld [vmem:[%s25433_s6 + $0x2f0] sm:$0xff]  ;;  %v3027_v18 = vld [vmem:[%s25432_s5 + $0x308] sm:$0xff] }
 0x2d1   : > { %v2810_v48 = vpop.f32.mrb[38].mxu0  ;;  %3142 = vmatprep.mubr.f32.mxu0 %v2923_v29  ;;  %3446 = vmatprep.mubr.f32.mxu1 %v2923_v29  ;;  %v18844_v53 = vmax.f32 %v18691_v23, %v2899_v47  ;;  %v2901_v35 = vpop.f32.mrb[37].mxu1  ;;  %v3014_v23 = vld [vmem:[%s25432_s5 + $0x2a0] sm:$0xff]  ;;  %v3024_v29 = vld [vmem:[%s25432_s5 + $0x2f0] sm:$0xff]  ;;  %v3349_v6 = vld [vmem:[%s25433_s6 + $0x318] sm:$0xff] }
 0x2d2   : > { %v2926_v55 = vmax.f32 %v18693_v24, %v2810_v48  ;;  %v2812_v57 = vpop.f32.mrb[39].mxu0  ;;  %3143 = vmatmul.mubr.f32.gmra.mrb[46].mxu0 %v2922_v44  ;;  %3447 = vmatmul.mubr.f32.gmra.mrb[46].mxu1 %v2922_v44  ;;  %v18848_v26 = vmax.f32 %v18695_v33, %v2901_v35  ;;  %v3016_v24 = vld [vmem:[%s25432_s5 + $0x2b0] sm:$0xff]  ;;  %v3334_v33 = vld [vmem:[%s25433_s6 + $0x2a0] sm:$0xff]  ;;  %v14481_v21 = vpack.c.bf16 %v3024_v29, %v3022_v40  ;;  %v3037_v39 = vld [vmem:[%s25432_s5 + $0x358] sm:$0xff] }
 0x2d3   : > { %v2927_v59 = vmax.f32 %v18697_v16, %v2812_v57  ;;  %14466 = vmatpush1.bf16.msra.mxu0 %v14465_v34  ;;  %14578 = vmatpush1.bf16.msra.mxu1 %v14577_v56  ;;  %v3336_v16 = vld [vmem:[%s25433_s6 + $0x2b0] sm:$0xff]  ;;  %v14473_v54 = vpack.c.bf16 %v3016_v24, %v3014_v23  ;;  %v14479_v34 = vpack.c.bf16 %v3025_v19, %v3023_v12  ;;  %v3026_v47 = vld [vmem:[%s25432_s5 + $0x300] sm:$0xff]  ;;  %v3033_v57 = vld [vmem:[%s25432_s5 + $0x338] sm:$0xff] }
 0x2d4   : > { %14468 = vmatprep.subr.bf16.mxu0 %v14467_v42  ;;  %14580 = vmatprep.subr.bf16.mxu1 %v14579_v43  ;;  %v2905_v36 = vpop.f32.mrb[38].mxu1  ;;  %v14585_v38 = vpack.c.bf16 %v3336_v16, %v3334_v33  ;;  %v14591_v56 = vpack.c.bf16 %v3345_v61, %v3343_v22  ;;  %v3029_v42 = vld [vmem:[%s25432_s5 + $0x318] sm:$0xff]  ;;  %v3347_v43 = vld [vmem:[%s25433_s6 + $0x308] sm:$0xff]  ;;  %v3028_v48 = vld [vmem:[%s25432_s5 + $0x310] sm:$0xff] }
 0x2d5   : > { %3148 = vmatprep.mubr.f32.mxu0 %v2927_v59  ;;  %3452 = vmatprep.mubr.f32.mxu1 %v2927_v59  ;;  %v18876_v11 = vmax.f32 %v18714_v3, %v2905_v36  ;;  %v2907_v63 = vpop.f32.mrb[39].mxu1  ;;  %v3020_v3 = vld [vmem:[%s25432_s5 + $0x2d0] sm:$0xff]  ;;  %v14483_v5 = vpack.c.bf16 %v3029_v42, %v3027_v18  ;;  %v14595_v49 = vpack.c.bf16 %v3349_v6, %v3347_v43  ;;  %v3351_v59 = vld [vmem:[%s25433_s6 + $0x328] sm:$0xff]  ;;  %v3030_v24 = vld [vmem:[%s25432_s5 + $0x320] sm:$0xff] }
 0x2d6   : > { %3149 = vmatmul.mubr.f32.gmra.mrb[48].mxu0 %v2926_v55  ;;  %3453 = vmatmul.mubr.f32.gmra.mrb[48].mxu1 %v2926_v55  ;;  %v18879_v15 = vmax.f32 %v18725_v9, %v2907_v63  ;;  %v3338_v9 = vld [vmem:[%s25433_s6 + $0x2c0] sm:$0xff]  ;;  %v14477_v28 = vpack.c.bf16 %v3020_v3, %v3018_v4  ;;  %v3348_v35 = vld [vmem:[%s25433_s6 + $0x310] sm:$0xff]  ;;  %v3031_v55 = vld [vmem:[%s25432_s5 + $0x328] sm:$0xff] }
 0x2d7   : > { %14470 = vmatpush1.bf16.msra.mxu0 %v14469_v60  ;;  %14582 = vmatpush1.bf16.msra.mxu1 %v14581_v62  ;;  %v14589_v44 = vpack.c.bf16 %v3340_v58, %v3338_v9  ;;  %v3353_v60 = vld [vmem:[%s25433_s6 + $0x338] sm:$0xff]  ;;  %v14485_v62 = vpack.c.bf16 %v3028_v48, %v3026_v47  ;;  %v14597_v23 = vpack.c.bf16 %v3348_v35, %v3346_v52  ;;  %v3350_v16 = vld [vmem:[%s25433_s6 + $0x320] sm:$0xff]  ;;  %v3352_v37 = vld [vmem:[%s25433_s6 + $0x330] sm:$0xff] }
 0x2d8   : > { %14472 = vmatprep.subr.bf16.mxu0 %v14471_v0  ;;  %14584 = vmatprep.subr.bf16.mxu1 %v14583_v17  ;;  %v3032_v0 = vld [vmem:[%s25432_s5 + $0x330] sm:$0xff]  ;;  %v14487_v17 = vpack.c.bf16 %v3033_v57, %v3031_v55  ;;  %v14599_v33 = vpack.c.bf16 %v3353_v60, %v3351_v59  ;;  %v3035_v36 = vld [vmem:[%s25432_s5 + $0x348] sm:$0xff]  ;;  %v3357_v8 = vld [vmem:[%s25433_s6 + $0x358] sm:$0xff] }
 0x2d9   : > { %11685 = vmatprep.mubr.msk.f32.mxu0 %vm3044_vm8, %v18753_v46  ;;  %11690 = vmatprep.mubr.msk.f32.mxu1 %vm3044_vm8, %v18753_v46  ;;  %v3342_v46 = vld [vmem:[%s25433_s6 + $0x2e0] sm:$0xff]  ;;  %v3355_v2 = vld [vmem:[%s25433_s6 + $0x348] sm:$0xff]  ;;  %v14489_v63 = vpack.c.bf16 %v3032_v0, %v3030_v24  ;;  %v3036_v4 = vld [vmem:[%s25432_s5 + $0x350] sm:$0xff]  ;;  %v14491_v3 = vpack.c.bf16 %v3037_v39, %v3035_v36 }
 0x2da   : > { %v14593_v45 = vpack.c.bf16 %v3344_v13, %v3342_v46  ;;  %v3356_v9 = vld [vmem:[%s25433_s6 + $0x350] sm:$0xff]  ;;  %v3039_v58 = vld [vmem:[%s25432_s5 + $0x368] sm:$0xff]  ;;  %v3041_v12 = vld [vmem:[%s25432_s5 + $0x378] sm:$0xff] }
 0x2db   : > { %14474 = vmatpush1.bf16.msra.mxu0 %v14473_v54  ;;  %14586 = vmatpush1.bf16.msra.mxu1 %v14585_v38  ;;  %v14601_v54 = vpack.c.bf16 %v3352_v37, %v3350_v16  ;;  %v3034_v38 = vld [vmem:[%s25432_s5 + $0x340] sm:$0xff]  ;;  %v3359_v19 = vld [vmem:[%s25433_s6 + $0x368] sm:$0xff]  ;;  %v3361_v22 = vld [vmem:[%s25433_s6 + $0x378] sm:$0xff]  ;;  %v14495_v40 = vpack.c.bf16 %v3041_v12, %v3039_v58 }
 0x2dc   : > { %14476 = vmatprep.subr.bf16.mxu0 %v14475_v10  ;;  %14588 = vmatprep.subr.bf16.mxu1 %v14587_v20  ;;  %v14603_v10 = vpack.c.bf16 %v3357_v8, %v3355_v2  ;;  %v3354_v20 = vld [vmem:[%s25433_s6 + $0x340] sm:$0xff]  ;;  %v14493_v61 = vpack.c.bf16 %v3036_v4, %v3034_v38  ;;  %v14607_v29 = vpack.c.bf16 %v3361_v22, %v3359_v19  ;;  %v3360_v46 = vld [vmem:[%s25433_s6 + $0x370] sm:$0xff]  ;;  %v3043_v42 = vld [vmem:[%s25432_s5 + $0x388] sm:$0xff] }
 0x2dd   : > { %v3363_v43 = vld [vmem:[%s25433_s6 + $0x388] sm:$0xff]  ;;  %v3042_v6 = vld [vmem:[%s25432_s5 + $0x380] sm:$0xff]  ;;  %v11701_v47 = vld [vmem:[%s25434_s7 + $0x4b8] sm:$0xff] }
 0x2de   : > { %v11698_v48 = vld [vmem:[%s25434_s7 + $0x4a0] sm:$0xff]  ;;  %v11700_v52 = vld [vmem:[%s25434_s7 + $0x4b0] sm:$0xff]  ;;  %v11697_v35 = vld [vmem:[%s25434_s7 + $0x498] sm:$0xff] }
 0x2df   : > { %14478 = vmatpush1.bf16.msra.mxu0 %v14477_v28  ;;  %14590 = vmatpush1.bf16.msra.mxu1 %v14589_v44  ;;  %v14605_v28 = vpack.c.bf16 %v3356_v9, %v3354_v20  ;;  %v3038_v44 = vld [vmem:[%s25432_s5 + $0x360] sm:$0xff]  ;;  %v11708_v0 = vld [vmem:[%s25434_s7 + $0x4f0] sm:$0xff]  ;;  %v11707_v37 = vld [vmem:[%s25434_s7 + $0x4e8] sm:$0xff] }
 0x2e0   : > { %14480 = vmatprep.subr.bf16.mxu0 %v14479_v34  ;;  %14592 = vmatprep.subr.bf16.mxu1 %v14591_v56  ;;  %v3040_v34 = vld [vmem:[%s25432_s5 + $0x370] sm:$0xff]  ;;  %v3358_v56 = vld [vmem:[%s25433_s6 + $0x360] sm:$0xff]  ;;  %v11721_v8 = vld [vmem:[%s25434_s7 + $0x558] sm:$0xff] }
 0x2e1   : > { %v14497_v13 = vpack.c.bf16 %v3040_v34, %v3038_v44  ;;  %v14609_v18 = vpack.c.bf16 %v3360_v46, %v3358_v56  ;;  %v11702_v55 = vld [vmem:[%s25434_s7 + $0x4c0] sm:$0xff]  ;;  %v11712_v36 = vld [vmem:[%s25434_s7 + $0x510] sm:$0xff]  ;;  %v11723_v38 = vld [vmem:[%s25434_s7 + $0x568] sm:$0xff] }
 0x2e2   : > { %v11706_v60 = vld [vmem:[%s25434_s7 + $0x4e0] sm:$0xff]  ;;  %v14669_v24 = vpack.c.bf16 %v11702_v55, %v11697_v35  ;;  %v11716_v2 = vld [vmem:[%s25434_s7 + $0x530] sm:$0xff]  ;;  %v11715_v4 = vld [vmem:[%s25434_s7 + $0x528] sm:$0xff] }
 0x2e3   : > { %14482 = vmatpush1.bf16.msra.mxu0 %v14481_v21  ;;  %14594 = vmatpush1.bf16.msra.mxu1 %v14593_v45  ;;  %v3362_v21 = vld [vmem:[%s25433_s6 + $0x380] sm:$0xff]  ;;  %v11696_v45 = vld [vmem:[%s25434_s7 + $0x490] sm:$0xff]  ;;  %v11731_v12 = vld [vmem:[%s25434_s7 + $0x5a8] sm:$0xff] }
 0x2e4   : > { %14484 = vmatprep.subr.bf16.mxu0 %v14483_v5  ;;  %14596 = vmatprep.subr.bf16.mxu1 %v14595_v49  ;;  %v11703_v5 = vld [vmem:[%s25434_s7 + $0x4c8] sm:$0xff]  ;;  %v14611_v57 = vpack.c.bf16 %v11701_v47, %v11696_v45  ;;  %v11710_v16 = vld [vmem:[%s25434_s7 + $0x500] sm:$0xff]  ;;  %v11741_v46 = vld [vmem:[%s25434_s7 + $0x5f8] sm:$0xff] }
 0x2e5   : > { %v11695_v49 = vld [vmem:[%s25434_s7 + $0x488] sm:$0xff]  ;;  %v14667_v59 = vpack.c.bf16 %v11703_v5, %v11698_v48  ;;  %v11722_v20 = vld [vmem:[%s25434_s7 + $0x560] sm:$0xff]  ;;  %v11745_v55 = vld [vmem:[%s25434_s7 + $0x618] sm:$0xff] }
 0x2e6   : > { %v11726_v58 = vld [vmem:[%s25434_s7 + $0x580] sm:$0xff]  ;;  %v11751_v5 = vld [vmem:[%s25434_s7 + $0x648] sm:$0xff] }
 0x2e7   : > { %14486 = vmatpush1.bf16.msra.mxu0 %v14485_v62  ;;  %14598 = vmatpush1.bf16.msra.mxu1 %v14597_v23  ;;  %v11711_v62 = vld [vmem:[%s25434_s7 + $0x508] sm:$0xff]  ;;  %v14613_v23 = vpack.c.bf16 %v11700_v52, %v11695_v49  ;;  %v11730_v44 = vld [vmem:[%s25434_s7 + $0x5a0] sm:$0xff]  ;;  %v14623_v34 = vpack.c.bf16 %v11731_v12, %v11726_v58  ;;  %v11748_v49 = vld [vmem:[%s25434_s7 + $0x630] sm:$0xff] }
 0x2e8   : > { %14488 = vmatprep.subr.bf16.mxu0 %v14487_v17  ;;  %14600 = vmatprep.subr.bf16.mxu1 %v14599_v33  ;;  %v11713_v17 = vld [vmem:[%s25434_s7 + $0x518] sm:$0xff]  ;;  %v11742_v45 = vld [vmem:[%s25434_s7 + $0x600] sm:$0xff]  ;;  %v11767_v58 = vld [vmem:[%s25434_s7 + $0x6c8] sm:$0xff] }
 0x2e9   : > { %v11705_v33 = vld [vmem:[%s25434_s7 + $0x4d8] sm:$0xff]  ;;  %v14671_v39 = vpack.c.bf16 %v11713_v17, %v11708_v0  ;;  %v11746_v47 = vld [vmem:[%s25434_s7 + $0x620] sm:$0xff]  ;;  %v11763_v17 = vld [vmem:[%s25434_s7 + $0x6a8] sm:$0xff] }
 0x2ea   : > { %v11753_v52 = vld [vmem:[%s25434_s7 + $0x658] sm:$0xff]  ;;  %v11758_v0 = vld [vmem:[%s25434_s7 + $0x680] sm:$0xff]  ;;  %v11772_v12 = vld [vmem:[%s25434_s7 + $0x6f0] sm:$0xff] }
 0x2eb   : > { %14490 = vmatpush1.bf16.msra.mxu0 %v14489_v63  ;;  %14602 = vmatpush1.bf16.msra.mxu1 %v14601_v54  ;;  %v14617_v63 = vpack.c.bf16 %v11710_v16, %v11705_v33  ;;  %v14673_v54 = vpack.c.bf16 %v11712_v36, %v11707_v37  ;;  %v11755_v37 = vld [vmem:[%s25434_s7 + $0x668] sm:$0xff]  ;;  %v11760_v36 = vld [vmem:[%s25434_s7 + $0x690] sm:$0xff] }
 0x2ec   : > { %14492 = vmatprep.subr.bf16.mxu0 %v14491_v3  ;;  %14604 = vmatprep.subr.bf16.mxu1 %v14603_v10  ;;  %v11720_v3 = vld [vmem:[%s25434_s7 + $0x550] sm:$0xff]  ;;  %v11717_v10 = vld [vmem:[%s25434_s7 + $0x538] sm:$0xff] }
 0x2ed   : > { %v14621_v19 = vpack.c.bf16 %v11720_v3, %v11715_v4  ;;  %v14677_v22 = vpack.c.bf16 %v11722_v20, %v11717_v10  ;;  %v14637_v4 = vpack.c.bf16 %v11760_v36, %v11755_v37  ;;  %v11765_v10 = vld [vmem:[%s25434_s7 + $0x6b8] sm:$0xff]  ;;  %v11770_v20 = vld [vmem:[%s25434_s7 + $0x6e0] sm:$0xff] }
 0x2ef   : > { %14494 = vmatpush1.bf16.msra.mxu0 %v14493_v61  ;;  %14606 = vmatpush1.bf16.msra.mxu1 %v14605_v28  ;;  %v11733_v61 = vld [vmem:[%s25434_s7 + $0x5b8] sm:$0xff] }
 0x2f0   : > { %14496 = vmatprep.subr.bf16.mxu0 %v14495_v40  ;;  %14608 = vmatprep.subr.bf16.mxu1 %v14607_v29  ;;  %v11725_v28 = vld [vmem:[%s25434_s7 + $0x578] sm:$0xff]  ;;  %v11727_v40 = vld [vmem:[%s25434_s7 + $0x588] sm:$0xff]  ;;  %v11732_v29 = vld [vmem:[%s25434_s7 + $0x5b0] sm:$0xff] }
 0x2f3   : > { %14498 = vmatpush1.bf16.msra.mxu0 %v14497_v13  ;;  %14610 = vmatpush1.bf16.msra.mxu1 %v14609_v18  ;;  %v11738_v13 = vld [vmem:[%s25434_s7 + $0x5e0] sm:$0xff]  ;;  %v14625_v18 = vpack.c.bf16 %v11730_v44, %v11725_v28  ;;  %v14641_v28 = vpack.c.bf16 %v11770_v20, %v11765_v10  ;;  %v14697_v44 = vpack.c.bf16 %v11772_v12, %v11767_v58  ;;  %v11820_v58 = vld [vmem:[%s25434_s7 + $0x870] sm:$0xff] }
 0x2f4   : > { %3203 = vmatprep.subr.mxu0 %v3043_v42  ;;  %3507 = vmatprep.subr.mxu1 %v3363_v43  ;;  %v14681_v42 = vpack.c.bf16 %v11732_v29, %v11727_v40  ;;  %v11735_v43 = vld [vmem:[%s25434_s7 + $0x5c8] sm:$0xff]  ;;  %v11780_v29 = vld [vmem:[%s25434_s7 + $0x730] sm:$0xff]  ;;  %v11818_v10 = vld [vmem:[%s25434_s7 + $0x860] sm:$0xff] }
 0x2f5   : > { %v11775_v40 = vld [vmem:[%s25434_s7 + $0x708] sm:$0xff] }
 0x2f7   : > { %3204 = vmatpush1.msra.mxu0 %v3042_v6  ;;  %3508 = vmatpush1.msra.mxu1 %v3362_v21  ;;  %v11740_v6 = vld [vmem:[%s25434_s7 + $0x5f0] sm:$0xff]  ;;  %v11737_v21 = vld [vmem:[%s25434_s7 + $0x5d8] sm:$0xff] }
 0x2f8   : > { %3220 = vmatmul.mubr.f32.vlgmr.msra.gmra.mrb[40].mxu0 %v18751_v41  ;;  %3524 = vmatmul.mubr.f32.vlgmr.msra.gmra.mrb[40].mxu1 %v18751_v41  ;;  %v14615_v41 = vpack.c.bf16 %v11711_v62, %v11706_v60  ;;  %v14629_v35 = vpack.c.bf16 %v11740_v6, %v11735_v43  ;;  %v14687_v60 = vpack.c.bf16 %v11753_v52, %v11748_v49  ;;  %v11747_v62 = vld [vmem:[%s25434_s7 + $0x628] sm:$0xff]  ;;  %v11796_v49 = vld [vmem:[%s25434_s7 + $0x7b0] sm:$0xff]  ;;  %v11801_v52 = vld [vmem:[%s25434_s7 + $0x7d8] sm:$0xff] }
 0x2f9   : > { %11686 = vmatprep.mubr.msk.f32.mxu0 %vm3044_vm8, %v18784_v50  ;;  %11691 = vmatprep.mubr.msk.f32.mxu1 %vm3044_vm8, %v18784_v50  ;;  %v11718_v50 = vld [vmem:[%s25434_s7 + $0x540] sm:$0xff]  ;;  %v14645_v43 = vpack.c.bf16 %v11780_v29, %v11775_v40  ;;  %v11828_v40 = vld [vmem:[%s25434_s7 + $0x8b0] sm:$0xff] }
 0x2fa   : > { %14612 = vmatprep.subr.bf16.mxu0 %v14611_v57  ;;  %14668 = vmatprep.subr.bf16.mxu1 %v14667_v59  ;;  %v14675_v9 = vpack.c.bf16 %v11723_v38, %v11718_v50  ;;  %v11750_v57 = vld [vmem:[%s25434_s7 + $0x640] sm:$0xff]  ;;  %v14631_v59 = vpack.c.bf16 %v11751_v5, %v11746_v47  ;;  %v11768_v50 = vld [vmem:[%s25434_s7 + $0x6d0] sm:$0xff]  ;;  %v11773_v38 = vld [vmem:[%s25434_s7 + $0x6f8] sm:$0xff] }
 0x2fb   : > { %14614 = vmatpush1.bf16.msra.mxu0 %v14613_v23  ;;  %14670 = vmatpush1.bf16.msra.mxu1 %v14669_v24  ;;  %v11752_v23 = vld [vmem:[%s25434_s7 + $0x650] sm:$0xff]  ;;  %v14633_v33 = vpack.c.bf16 %v11750_v57, %v11745_v55 }
 0x2fc   : > { %3226 = vmatmul.mubr.f32.gmra.mrb[42].mxu0 %v18780_v1  ;;  %3530 = vmatmul.mubr.f32.gmra.mrb[42].mxu1 %v18780_v1  ;;  %v14619_v1 = vpack.c.bf16 %v11721_v8, %v11716_v2  ;;  %v11756_v24 = vld [vmem:[%s25434_s7 + $0x670] sm:$0xff]  ;;  %v14689_v16 = vpack.c.bf16 %v11752_v23, %v11747_v62  ;;  %v11757_v2 = vld [vmem:[%s25434_s7 + $0x678] sm:$0xff]  ;;  %v11762_v8 = vld [vmem:[%s25434_s7 + $0x6a0] sm:$0xff]  ;;  %v14651_v62 = vpack.c.bf16 %v11801_v52, %v11796_v49 }
 0x2fd   : > { %11687 = vmatprep.mubr.msk.f32.mxu0 %vm3044_vm8, %v18816_v51  ;;  %11692 = vmatprep.mubr.msk.f32.mxu1 %vm3044_vm8, %v18816_v51  ;;  %v11728_v51 = vld [vmem:[%s25434_s7 + $0x590] sm:$0xff]  ;;  %v14693_v3 = vpack.c.bf16 %v11762_v8, %v11757_v2  ;;  %v11810_v8 = vld [vmem:[%s25434_s7 + $0x820] sm:$0xff] }
 0x2fe   : > { %14616 = vmatprep.subr.bf16.mxu0 %v14615_v41  ;;  %14672 = vmatprep.subr.bf16.mxu1 %v14671_v39  ;;  %v14679_v56 = vpack.c.bf16 %v11733_v61, %v11728_v51  ;;  %v14691_v39 = vpack.c.bf16 %v11763_v17, %v11758_v0  ;;  %v11778_v51 = vld [vmem:[%s25434_s7 + $0x720] sm:$0xff]  ;;  %v11783_v61 = vld [vmem:[%s25434_s7 + $0x748] sm:$0xff]  ;;  %v11792_v5 = vld [vmem:[%s25434_s7 + $0x790] sm:$0xff] }
 0x2ff   : > { %14618 = vmatpush1.bf16.msra.mxu0 %v14617_v63  ;;  %14674 = vmatpush1.bf16.msra.mxu1 %v14673_v54  ;;  %v11766_v63 = vld [vmem:[%s25434_s7 + $0x6c0] sm:$0xff]  ;;  %v11771_v54 = vld [vmem:[%s25434_s7 + $0x6e8] sm:$0xff] }
 0x300   : > { %3232 = vmatmul.mubr.f32.gmra.mrb[44].mxu0 %v18812_v14  ;;  %3536 = vmatmul.mubr.f32.gmra.mrb[44].mxu1 %v18812_v14  ;;  %v11736_v14 = vld [vmem:[%s25434_s7 + $0x5d0] sm:$0xff]  ;;  %v11806_v0 = vld [vmem:[%s25434_s7 + $0x800] sm:$0xff]  ;;  %v11811_v17 = vld [vmem:[%s25434_s7 + $0x828] sm:$0xff] }
 0x301   : > { %11688 = vmatprep.mubr.msk.f32.mxu0 %vm3044_vm8, %v18848_v26  ;;  %11693 = vmatprep.mubr.msk.f32.mxu1 %vm3044_vm8, %v18848_v26  ;;  %v11743_v26 = vld [vmem:[%s25434_s7 + $0x608] sm:$0xff]  ;;  %v14627_v48 = vpack.c.bf16 %v11741_v46, %v11736_v14  ;;  %v11782_v46 = vld [vmem:[%s25434_s7 + $0x740] sm:$0xff] }
 0x302   : > { %14620 = vmatprep.subr.bf16.mxu0 %v14619_v1  ;;  %14676 = vmatprep.subr.bf16.mxu1 %v14675_v9  ;;  %v14639_v1 = vpack.c.bf16 %v11771_v54, %v11766_v63  ;;  %v14695_v9 = vpack.c.bf16 %v11773_v38, %v11768_v50  ;;  %v11807_v63 = vld [vmem:[%s25434_s7 + $0x808] sm:$0xff]  ;;  %v11812_v54 = vld [vmem:[%s25434_s7 + $0x830] sm:$0xff] }
 0x303   : > { %14622 = vmatpush1.bf16.msra.mxu0 %v14621_v19  ;;  %14678 = vmatpush1.bf16.msra.mxu1 %v14677_v22  ;;  %v11776_v19 = vld [vmem:[%s25434_s7 + $0x710] sm:$0xff]  ;;  %v11781_v22 = vld [vmem:[%s25434_s7 + $0x738] sm:$0xff]  ;;  %v14713_v38 = vpack.c.bf16 %v11812_v54, %v11807_v63 }
 0x304   : > { %3238 = vmatmul.mubr.f32.gmra.mrb[46].mxu0 %v18844_v53  ;;  %3542 = vmatmul.mubr.f32.gmra.mrb[46].mxu1 %v18844_v53  ;;  %v14683_v53 = vpack.c.bf16 %v11743_v26, %v11738_v13  ;;  %v14643_v14 = vpack.c.bf16 %v11781_v22, %v11776_v19  ;;  %v11786_v13 = vld [vmem:[%s25434_s7 + $0x760] sm:$0xff]  ;;  %v11791_v26 = vld [vmem:[%s25434_s7 + $0x788] sm:$0xff]  ;;  %v11817_v22 = vld [vmem:[%s25434_s7 + $0x858] sm:$0xff] }
 0x305   : > { %11689 = vmatprep.mubr.msk.f32.mxu0 %vm3044_vm8, %v18879_v15  ;;  %11694 = vmatprep.mubr.msk.f32.mxu1 %vm3044_vm8, %v18879_v15  ;;  %v14685_v15 = vpack.c.bf16 %v11742_v45, %v11737_v21  ;;  %v11785_v21 = vld [vmem:[%s25434_s7 + $0x758] sm:$0xff]  ;;  %v11790_v45 = vld [vmem:[%s25434_s7 + $0x780] sm:$0xff]  ;;  %v14647_v47 = vpack.c.bf16 %v11791_v26, %v11786_v13  ;;  %v11827_v26 = vld [vmem:[%s25434_s7 + $0x8a8] sm:$0xff] }
 0x306   : > { %14624 = vmatprep.subr.bf16.mxu0 %v14623_v34  ;;  %14680 = vmatprep.subr.bf16.mxu1 %v14679_v56  ;;  %v14699_v34 = vpack.c.bf16 %v11783_v61, %v11778_v51  ;;  %v11777_v56 = vld [vmem:[%s25434_s7 + $0x718] sm:$0xff]  ;;  %v14649_v55 = vpack.c.bf16 %v11790_v45, %v11785_v21  ;;  %v11822_v51 = vld [vmem:[%s25434_s7 + $0x880] sm:$0xff]  ;;  %v11835_v45 = vld [vmem:[%s25434_s7 + $0x8e8] sm:$0xf] }
 0x307   : > { %14626 = vmatpush1.bf16.msra.mxu0 %v14625_v18  ;;  %14682 = vmatpush1.bf16.msra.mxu1 %v14681_v42  ;;  %v11788_v18 = vld [vmem:[%s25434_s7 + $0x770] sm:$0xff]  ;;  %v11793_v42 = vld [vmem:[%s25434_s7 + $0x798] sm:$0xff]  ;;  %v14701_v6 = vpack.c.bf16 %v11782_v46, %v11777_v56  ;;  %v14717_v61 = vpack.c.bf16 %v11822_v51, %v11817_v22  ;;  %v11830_v56 = vld [vmem:[%s25434_s7 + $0x8c0] sm:$0xff] }
 0x308   : > { %3244 = vmatmul.mubr.f32.gmra.mrb[48].mxu0 %v18876_v11  ;;  %3548 = vmatmul.mubr.f32.gmra.mrb[48].mxu1 %v18876_v11  ;;  %v11761_v11 = vld [vmem:[%s25434_s7 + $0x698] sm:$0xff]  ;;  %v3581_v22 = vld [vmem:[%s25434_s7 + $0x88] sm:$0xff] }
 0x309   : > { %14628 = vmatprep.subr.bf16.mxu0 %v14627_v48  ;;  %14684 = vmatprep.subr.bf16.mxu1 %v14683_v53  ;;  %v14635_v41 = vpack.c.bf16 %v11761_v11, %v11756_v24  ;;  %v14703_v48 = vpack.c.bf16 %v11793_v42, %v11788_v18  ;;  %v11787_v53 = vld [vmem:[%s25434_s7 + $0x768] sm:$0xff]  ;;  %v11797_v24 = vld [vmem:[%s25434_s7 + $0x7b8] sm:$0xff]  ;;  %v11802_v11 = vld [vmem:[%s25434_s7 + $0x7e0] sm:$0xff] }
 0x30a   : > { %v14705_v57 = vpack.c.bf16 %v11792_v5, %v11787_v53  ;;  %v14709_v36 = vpack.c.bf16 %v11802_v11, %v11797_v24  ;;  %v11832_v18 = vld [vmem:[%s25434_s7 + $0x8d0] sm:$0xff]  ;;  %v3567_v21 = vld [vmem:[%s25434_s7 + $0x18] sm:$0xff]  ;;  %v16916_v5 = vmov 0.0|0.0   ;;  %v11699_v11 = vld [vmem:[%s25434_s7 + $0x4a8] sm:$0xff] }
 0x30b   : > { %14630 = vmatpush1.bf16.msra.mxu0 %v14629_v35  ;;  %14686 = vmatpush1.bf16.msra.mxu1 %v14685_v15  ;;  %v11798_v35 = vld [vmem:[%s25434_s7 + $0x7c0] sm:$0xff]  ;;  %v11803_v15 = vld [vmem:[%s25434_s7 + $0x7e8] sm:$0xff]  ;;  %v14721_v42 = vpack.c.bf16 %v11832_v18, %v11827_v26 }
 0x30c   : > { %14632 = vmatprep.subr.bf16.mxu0 %v14631_v59  ;;  %14688 = vmatprep.subr.bf16.mxu1 %v14687_v60  ;;  %v11795_v59 = vld [vmem:[%s25434_s7 + $0x7a8] sm:$0xff]  ;;  %v11800_v60 = vld [vmem:[%s25434_s7 + $0x7d0] sm:$0xff]  ;;  %v14707_v23 = vpack.c.bf16 %v11803_v15, %v11798_v35 }
 0x30d   : > { %v14653_v37 = vpack.c.bf16 %v11800_v60, %v11795_v59  ;;  %v11719_v18 = vld [vmem:[%s25434_s7 + $0x548] sm:$0xff] }
 0x30f   : > { %14634 = vmatpush1.bf16.msra.mxu0 %v14633_v33  ;;  %14690 = vmatpush1.bf16.msra.mxu1 %v14689_v16  ;;  %v11808_v33 = vld [vmem:[%s25434_s7 + $0x810] sm:$0xff]  ;;  %v11813_v16 = vld [vmem:[%s25434_s7 + $0x838] sm:$0xff] }
 0x310   : > { %14636 = vmatprep.subr.bf16.mxu0 %v14635_v41  ;;  %14692 = vmatprep.subr.bf16.mxu1 %v14691_v39  ;;  %v11805_v41 = vld [vmem:[%s25434_s7 + $0x7f8] sm:$0xff]  ;;  %v14655_v39 = vpack.c.bf16 %v11811_v17, %v11806_v0  ;;  %v14711_v2 = vpack.c.bf16 %v11813_v16, %v11808_v33  ;;  %v11704_v17 = vld [vmem:[%s25434_s7 + $0x4d0] sm:$0xff] }
 0x311   : > { %v14657_v50 = vpack.c.bf16 %v11810_v8, %v11805_v41  ;;  %v3566_v33 = vld [vmem:[%s25434_s7 + $0x10] sm:$0xff]  ;;  %v3571_v16 = vld [vmem:[%s25434_s7 + $0x38] sm:$0xff] }
 0x312   : > { %v3582_v41 = vld [vmem:[%s25434_s7 + $0x90] sm:$0xff] }
 0x313   : > { %14638 = vmatpush1.bf16.msra.mxu0 %v14637_v4  ;;  %14694 = vmatpush1.bf16.msra.mxu1 %v14693_v3  ;;  %v11816_v4 = vld [vmem:[%s25434_s7 + $0x850] sm:$0xff]  ;;  %v11821_v3 = vld [vmem:[%s25434_s7 + $0x878] sm:$0xff] }
 0x314   : > { %14640 = vmatprep.subr.bf16.mxu0 %v14639_v1  ;;  %14696 = vmatprep.subr.bf16.mxu1 %v14695_v9  ;;  %v14659_v20 = vpack.c.bf16 %v11821_v3, %v11816_v4  ;;  %v11823_v1 = vld [vmem:[%s25434_s7 + $0x888] sm:$0xff]  ;;  %v14724_v3 = vpack.c.bf16 %v11704_v17, %v11699_v11 }
 0x315   : > { %v11815_v9 = vld [vmem:[%s25434_s7 + $0x848] sm:$0xff]  ;;  %v14715_v12 = vpack.c.bf16 %v11823_v1, %v11818_v10  ;;  %v14823_v10 = vpack.c.bf16 %v3571_v16, %v3566_v33  ;;  %v11729_v33 = vld [vmem:[%s25434_s7 + $0x598] sm:$0xff] }
 0x316   : > { %v14661_v19 = vpack.c.bf16 %v11820_v58, %v11815_v9 }
 0x317   : > { %14642 = vmatpush1.bf16.msra.mxu0 %v14641_v28  ;;  %14698 = vmatpush1.bf16.msra.mxu1 %v14697_v44  ;;  %v11826_v28 = vld [vmem:[%s25434_s7 + $0x8a0] sm:$0xff]  ;;  %v11831_v44 = vld [vmem:[%s25434_s7 + $0x8c8] sm:$0xff] }
 0x318   : > { %14644 = vmatprep.subr.bf16.mxu0 %v14643_v14  ;;  %14700 = vmatprep.subr.bf16.mxu1 %v14699_v34  ;;  %v14663_v29 = vpack.c.bf16 %v11831_v44, %v11826_v28  ;;  %v11833_v14 = vld [vmem:[%s25434_s7 + $0x8d8] sm:$0xff]  ;;  %v3592_v44 = vld [vmem:[%s25434_s7 + $0xe0] sm:$0xff] }
 0x319   : > { %v11825_v34 = vld [vmem:[%s25434_s7 + $0x898] sm:$0xff]  ;;  %v14719_v46 = vpack.c.bf16 %v11833_v14, %v11828_v40 }
 0x31a   : > { %v14665_v13 = vpack.c.bf16 %v11830_v56, %v11825_v34  ;;  %v3587_v28 = vld [vmem:[%s25434_s7 + $0xb8] sm:$0xff] }
 0x31b   : > { %14646 = vmatpush1.bf16.msra.mxu0 %v14645_v43  ;;  %14702 = vmatpush1.bf16.msra.mxu1 %v14701_v6  ;;  %v11836_v43 = vld [vmem:[%s25434_s7 + $0x8f0] sm:$0xf]  ;;  %v11838_v6 = vld [vmem:[%s25434_s7 + $0x900] sm:$0xf] }
 0x31c   : > { %14648 = vmatprep.subr.bf16.mxu0 %v14647_v47  ;;  %14704 = vmatprep.subr.bf16.mxu1 %v14703_v48  ;;  %v11837_v47 = vld [vmem:[%s25434_s7 + $0x8f8] sm:$0xf]  ;;  %v3572_v48 = vld [vmem:[%s25434_s7 + $0x40] sm:$0xff] }
 0x31d   : > { %v14821_v53 = vpack.c.bf16 %v3572_v48, %v3567_v21  ;;  %v11724_v21 = vld [vmem:[%s25434_s7 + $0x570] sm:$0xff] }
 0x31e   : > { %v14730_v11 = vpack.c.bf16 %v11724_v21, %v11719_v18  ;;  %v3632_v21 = vld [vmem:[%s25434_s7 + $0x220] sm:$0xff] }
 0x31f   : > { %14650 = vmatpush1.bf16.msra.mxu0 %v14649_v55  ;;  %14706 = vmatpush1.bf16.msra.mxu1 %v14705_v57 }
 0x320   : > { %14652 = vmatprep.subr.bf16.mxu0 %v14651_v62  ;;  %14708 = vmatprep.subr.bf16.mxu1 %v14707_v23 }
 0x323   : > { %14654 = vmatpush1.bf16.msra.mxu0 %v14653_v37  ;;  %14710 = vmatpush1.bf16.msra.mxu1 %v14709_v36  ;;  %v3577_v36 = vld [vmem:[%s25434_s7 + $0x68] sm:$0xff] }
 0x324   : > { %14656 = vmatprep.subr.bf16.mxu0 %v14655_v39  ;;  %14712 = vmatprep.subr.bf16.mxu1 %v14711_v2  ;;  %v14825_v58 = vpack.c.bf16 %v3582_v41, %v3577_v36  ;;  %v11734_v41 = vld [vmem:[%s25434_s7 + $0x5c0] sm:$0xff] }
 0x327   : > { %14658 = vmatpush1.bf16.msra.mxu0 %v14657_v50  ;;  %14714 = vmatpush1.bf16.msra.mxu1 %v14713_v38 }
 0x328   : > { %14660 = vmatprep.subr.bf16.mxu0 %v14659_v20  ;;  %14716 = vmatprep.subr.bf16.mxu1 %v14715_v12  ;;  %v11709_v20 = vld [vmem:[%s25434_s7 + $0x4f8] sm:$0xff]  ;;  %v11714_v12 = vld [vmem:[%s25434_s7 + $0x520] sm:$0xff] }
 0x32b   : > { %14662 = vmatpush1.bf16.msra.mxu0 %v14661_v19  ;;  %14718 = vmatpush1.bf16.msra.mxu1 %v14717_v61  ;;  %v3576_v19 = vld [vmem:[%s25434_s7 + $0x60] sm:$0xff] }
 0x32c   : > { %14664 = vmatprep.subr.bf16.mxu0 %v14663_v29  ;;  %14720 = vmatprep.subr.bf16.mxu1 %v14719_v46  ;;  %v14827_v26 = vpack.c.bf16 %v3581_v22, %v3576_v19  ;;  %v3606_v19 = vld [vmem:[%s25434_s7 + $0x150] sm:$0xff]  ;;  %v3611_v22 = vld [vmem:[%s25434_s7 + $0x178] sm:$0xff] }
 0x32f   : > { %14666 = vmatpush1.bf16.msra.mxu0 %v14665_v13  ;;  %14722 = vmatpush1.bf16.msra.mxu1 %v14721_v42  ;;  %v14727_v13 = vpack.c.bf16 %v11714_v12, %v11709_v20  ;;  %v11739_v20 = vld [vmem:[%s25434_s7 + $0x5e8] sm:$0xff]  ;;  %v11744_v12 = vld [vmem:[%s25434_s7 + $0x610] sm:$0xff] }
 0x330   : > { %11840 = vmatprep.subr.msk.mxu0 %vm2045_vm4, %v11836_v43  ;;  %11847 = vmatprep.subr.msk.mxu1 %vm2045_vm4, %v11838_v6  ;;  %v14829_v6 = vpack.c.bf16 %v3592_v44, %v3587_v28  ;;  %v3617_v44 = vld [vmem:[%s25434_s7 + $0x1a8] sm:$0xff] }
 0x333   : > { %11841 = vmatpush1.msk.msra.mxu0 %vm2045_vm4, %v11835_v45  ;;  %11848 = vmatpush1.msk.msra.mxu1 %vm2045_vm4, %v11837_v47  ;;  %v3586_v45 = vld [vmem:[%s25434_s7 + $0xb0] sm:$0xff]  ;;  %v3591_v47 = vld [vmem:[%s25434_s7 + $0xd8] sm:$0xff] }
 0x334   : > { %14723 = vmatprep.subr.bf16.mxu0 %v16916_v5  ;;  %14822 = vmatprep.subr.bf16.mxu1 %v14821_v53  ;;  %v14831_v17 = vpack.c.bf16 %v3591_v47, %v3586_v45 }
 0x3cb   : > { %v3221_v49 = vpop.f32.mrb[40].mxu0  ;;  %v3525_v52 = vpop.f32.mrb[40].mxu1 }
 0x3cc   : > { %v19414_v35 = vmax.f32 %v3221_v49, %v3525_v52  ;;  %v3223_v15 = vpop.f32.mrb[41].mxu0  ;;  %v3527_v55 = vpop.f32.mrb[41].mxu1  ;;  %v3597_v49 = vld [vmem:[%s25434_s7 + $0x108] sm:$0xff]  ;;  %v3602_v52 = vld [vmem:[%s25434_s7 + $0x130] sm:$0xff] }
 0x3cd   : > { %v19416_v57 = vmax.f32 %v3223_v15, %v3527_v55  ;;  %v14833_v36 = vpack.c.bf16 %v3602_v52, %v3597_v49  ;;  %v11764_v52 = vld [vmem:[%s25434_s7 + $0x6b0] sm:$0xff] }
 0x3ce   : > { %v3865_v4 = vrot.slane %v19414_v35, 1 }
 0x3cf   : > { %v3227_v59 = vpop.f32.mrb[42].mxu0  ;;  %v3531_v60 = vpop.f32.mrb[42].mxu1  ;;  %v3868_v8 = vrot.slane %v19416_v57, 1 }
 0x3d0   : > { %v19418_v62 = vmax.f32 %v3227_v59, %v3531_v60  ;;  %v3229_v23 = vpop.f32.mrb[43].mxu0  ;;  %v3533_v24 = vpop.f32.mrb[43].mxu1 }
 0x3d1   : > { %v19423_v0 = vmax.f32 %v3229_v23, %v3533_v24 }
 0x3d2   : > { %v3866_v37 = vrot.slane %v19418_v62, 1 }
 0x3d3   : > { %v3233_v39 = vpop.f32.mrb[44].mxu0  ;;  %v3537_v2 = vpop.f32.mrb[44].mxu1  ;;  %v3869_v63 = vrot.slane %v19423_v0, 1 }
 0x3d4   : > { %v19443_v54 = vmax.f32 %v3233_v39, %v3537_v2  ;;  %v3235_v50 = vpop.f32.mrb[45].mxu0  ;;  %v3539_v38 = vpop.f32.mrb[45].mxu1  ;;  %v19468_v51 = vsel %vm701_vm1, %v3865_v4, %v3866_v37  ;;  %v3596_v39 = vld [vmem:[%s25434_s7 + $0x100] sm:$0xff]  ;;  %v3601_v2 = vld [vmem:[%s25434_s7 + $0x128] sm:$0xff] }
 0x3d5   : > { %v19449_v1 = vmax.f32 %v3235_v50, %v3539_v38  ;;  %v19452_v9 = vsel %vm701_vm1, %v3868_v8, %v3869_v63  ;;  %v3607_v38 = vld [vmem:[%s25434_s7 + $0x158] sm:$0xff]  ;;  %v3612_v4 = vld [vmem:[%s25434_s7 + $0x180] sm:$0xff] }
 0x3d6   : > { %11842 = vmatprep.mubr.msk.f32.mxu0 %vm3888_vm9, %v19452_v9  ;;  %11849 = vmatprep.mubr.msk.f32.mxu1 %vm3888_vm9, %v19452_v9  ;;  %v3871_v61 = vrot.slane %v19443_v54, 1  ;;  %v14837_v28 = vpack.c.bf16 %v3612_v4, %v3607_v38 }
 0x3d7   : > { %v3239_v40 = vpop.f32.mrb[46].mxu0  ;;  %v3543_v29 = vpop.f32.mrb[46].mxu1  ;;  %3979 = vmatmul.mubr.f32.vlgmr.msra.gmra.mrb[50].mxu0 %v19468_v51  ;;  %4074 = vmatmul.mubr.f32.vlgmr.msra.gmra.mrb[50].mxu1 %v19468_v51  ;;  %v3873_v14 = vrot.slane %v19449_v1, 1 }
 0x3d8   : > { %v19480_v34 = vmax.f32 %v3239_v40, %v3543_v29  ;;  %14725 = vmatpush1.bf16.msra.mxu0 %v14724_v3  ;;  %14824 = vmatpush1.bf16.msra.mxu1 %v14823_v10  ;;  %v3241_v56 = vpop.f32.mrb[47].mxu0  ;;  %v3545_v46 = vpop.f32.mrb[47].mxu1  ;;  %v19505_v48 = vsel %vm701_vm1, %v3866_v37, %v3871_v61  ;;  %v14733_v3 = vpack.c.bf16 %v11734_v41, %v11729_v33  ;;  %v3622_v40 = vld [vmem:[%s25434_s7 + $0x1d0] sm:$0xff]  ;;  %v11774_v33 = vld [vmem:[%s25434_s7 + $0x700] sm:$0xff]  ;;  %v3641_v41 = vld [vmem:[%s25434_s7 + $0x268] sm:$0xff] }
 0x3d9   : > { %v19485_v42 = vmax.f32 %v3241_v56, %v3545_v46  ;;  %v19488_v43 = vsel %vm701_vm1, %v3869_v63, %v3873_v14  ;;  %14726 = vmatprep.subr.bf16.mxu0 %v16916_v5  ;;  %14826 = vmatprep.subr.bf16.mxu1 %v14825_v58  ;;  %v14835_v10 = vpack.c.bf16 %v3601_v2, %v3596_v39  ;;  %v11749_v56 = vld [vmem:[%s25434_s7 + $0x638] sm:$0xff]  ;;  %v11754_v46 = vld [vmem:[%s25434_s7 + $0x660] sm:$0xff] }
 0x3da   : > { %11843 = vmatprep.mubr.msk.f32.mxu0 %vm3888_vm9, %v19488_v43  ;;  %11850 = vmatprep.mubr.msk.f32.mxu1 %vm3888_vm9, %v19488_v43  ;;  %v3875_v53 = vrot.slane %v19480_v34, 1  ;;  %v14736_v29 = vpack.c.bf16 %v11744_v12, %v11739_v20  ;;  %v14841_v18 = vpack.c.bf16 %v3622_v40, %v3617_v44  ;;  %v14739_v45 = vpack.c.bf16 %v11754_v46, %v11749_v56  ;;  %v3647_v39 = vld [vmem:[%s25434_s7 + $0x298] sm:$0xff]  ;;  %v3652_v2 = vld [vmem:[%s25434_s7 + $0x2c0] sm:$0xff]  ;;  %v11784_v20 = vld [vmem:[%s25434_s7 + $0x750] sm:$0xff] }
 0x3db   : > { %v3245_v15 = vpop.f32.mrb[48].mxu0  ;;  %v3549_v55 = vpop.f32.mrb[48].mxu1  ;;  %3985 = vmatmul.mubr.f32.gmra.mrb[52].mxu0 %v19505_v48  ;;  %4080 = vmatmul.mubr.f32.gmra.mrb[52].mxu1 %v19505_v48  ;;  %v3877_v59 = vrot.slane %v19485_v42, 1  ;;  %v3646_v12 = vld [vmem:[%s25434_s7 + $0x290] sm:$0xff]  ;;  %v11794_v56 = vld [vmem:[%s25434_s7 + $0x7a0] sm:$0xff] }
 0x3dc   : > { %v19517_v60 = vmax.f32 %v3245_v15, %v3549_v55  ;;  %14728 = vmatpush1.bf16.msra.mxu0 %v14727_v13  ;;  %14828 = vmatpush1.bf16.msra.mxu1 %v14827_v26  ;;  %v3247_v23 = vpop.f32.mrb[49].mxu0  ;;  %v3551_v24 = vpop.f32.mrb[49].mxu1  ;;  %v19542_v8 = vsel %vm701_vm1, %v3871_v61, %v3875_v53  ;;  %v3616_v13 = vld [vmem:[%s25434_s7 + $0x1a0] sm:$0xff]  ;;  %v3621_v26 = vld [vmem:[%s25434_s7 + $0x1c8] sm:$0xff]  ;;  %v3626_v15 = vld [vmem:[%s25434_s7 + $0x1f0] sm:$0xff] }
 0x3dd   : > { %v19522_v16 = vmax.f32 %v3247_v23, %v3551_v24  ;;  %v19525_v37 = vsel %vm701_vm1, %v3873_v14, %v3877_v59  ;;  %14729 = vmatprep.subr.bf16.mxu0 %v16916_v5  ;;  %14830 = vmatprep.subr.bf16.mxu1 %v14829_v6  ;;  %v14839_v14 = vpack.c.bf16 %v3611_v22, %v3606_v19  ;;  %v3627_v6 = vld [vmem:[%s25434_s7 + $0x1f8] sm:$0xff]  ;;  %v3657_v22 = vld [vmem:[%s25434_s7 + $0x2e8] sm:$0xff]  ;;  %v3656_v46 = vld [vmem:[%s25434_s7 + $0x2e0] sm:$0xff] }
 0x3de   : > { %11844 = vmatprep.mubr.msk.f32.mxu0 %vm3888_vm9, %v19525_v37  ;;  %11851 = vmatprep.mubr.msk.f32.mxu1 %vm3888_vm9, %v19525_v37  ;;  %v19545_v63 = vrot.slane %v19517_v60, 1  ;;  %v14843_v47 = vpack.c.bf16 %v3621_v26, %v3616_v13  ;;  %v14845_v49 = vpack.c.bf16 %v3632_v21, %v3627_v6  ;;  %v3631_v55 = vld [vmem:[%s25434_s7 + $0x218] sm:$0xff]  ;;  %v3661_v13 = vld [vmem:[%s25434_s7 + $0x308] sm:$0xff] }
 0x3df   : > { %3991 = vmatmul.mubr.f32.gmra.mrb[54].mxu0 %v19542_v8  ;;  %4086 = vmatmul.mubr.f32.gmra.mrb[54].mxu1 %v19542_v8  ;;  %v19550_v50 = vrot.slane %v19522_v16, 1  ;;  %v14847_v24 = vpack.c.bf16 %v3631_v55, %v3626_v15  ;;  %v3651_v19 = vld [vmem:[%s25434_s7 + $0x2b8] sm:$0xff]  ;;  %v14859_v21 = vpack.c.bf16 %v3661_v13, %v3656_v46  ;;  %v3677_v15 = vld [vmem:[%s25434_s7 + $0x388] sm:$0xff]  ;;  %v3682_v55 = vld [vmem:[%s25434_s7 + $0x3b0] sm:$0xff] }
 0x3e0   : > { %14731 = vmatpush1.bf16.msra.mxu0 %v14730_v11  ;;  %14832 = vmatpush1.bf16.msra.mxu1 %v14831_v17  ;;  %v19581_v61 = vsel %vm701_vm1, %v3875_v53, %v19545_v63  ;;  %v11759_v53 = vld [vmem:[%s25434_s7 + $0x688] sm:$0xff]  ;;  %v11769_v11 = vld [vmem:[%s25434_s7 + $0x6d8] sm:$0xff]  ;;  %v14855_v40 = vpack.c.bf16 %v3651_v19, %v3646_v12  ;;  %v3702_v19 = vld [vmem:[%s25434_s7 + $0x450] sm:$0xff] }
 0x3e1   : > { %v19563_v58 = vsel %vm701_vm1, %v3877_v59, %v19550_v50  ;;  %14732 = vmatprep.subr.bf16.mxu0 %v16916_v5  ;;  %14834 = vmatprep.subr.bf16.mxu1 %v14833_v36  ;;  %v3642_v59 = vld [vmem:[%s25434_s7 + $0x270] sm:$0xff]  ;;  %v14742_v23 = vpack.c.bf16 %v11764_v52, %v11759_v53  ;;  %v3636_v36 = vld [vmem:[%s25434_s7 + $0x240] sm:$0xff]  ;;  %v14745_v38 = vpack.c.bf16 %v11774_v33, %v11769_v11  ;;  %v3667_v26 = vld [vmem:[%s25434_s7 + $0x338] sm:$0xff]  ;;  %vm11311_vm1 = vcmask 8192  }
 0x3e2   : > { %11845 = vmatprep.mubr.msk.f32.mxu0 %vm3888_vm9, %v19563_v58  ;;  %11852 = vmatprep.mubr.msk.f32.mxu1 %vm3888_vm9, %v19563_v58  ;;  %v14851_v4 = vpack.c.bf16 %v3641_v41, %v3636_v36  ;;  %v11804_v53 = vld [vmem:[%s25434_s7 + $0x7f0] sm:$0xff]  ;;  %v3671_v52 = vld [vmem:[%s25434_s7 + $0x358] sm:$0xff]  ;;  %v11814_v11 = vld [vmem:[%s25434_s7 + $0x840] sm:$0xff] }
 0x3e3   : > { %3997 = vmatmul.mubr.f32.gmra.mrb[56].mxu0 %v19581_v61  ;;  %4092 = vmatmul.mubr.f32.gmra.mrb[56].mxu1 %v19581_v61  ;;  %v3681_v33 = vld [vmem:[%s25434_s7 + $0x3a8] sm:$0xff]  ;;  %v3687_v36 = vld [vmem:[%s25434_s7 + $0x3d8] sm:$0xff]  ;;  %v3692_v41 = vld [vmem:[%s25434_s7 + $0x400] sm:$0xff] }
 0x3e4   : > { %14734 = vmatpush1.bf16.msra.mxu0 %v14733_v3  ;;  %14836 = vmatpush1.bf16.msra.mxu1 %v14835_v10  ;;  %v11779_v3 = vld [vmem:[%s25434_s7 + $0x728] sm:$0xff]  ;;  %v14853_v10 = vpack.c.bf16 %v3652_v2, %v3647_v39 }
 0x3e5   : > { %11846 = vmatprep.mubr.msk.f32.mxu0 %vm3888_vm9, %v19550_v50  ;;  %11853 = vmatprep.mubr.msk.f32.mxu1 %vm3888_vm9, %v19550_v50  ;;  %v14748_v44 = vpack.c.bf16 %v11784_v20, %v11779_v3  ;;  %v11824_v3 = vld [vmem:[%s25434_s7 + $0x890] sm:$0xff]  ;;  %v3691_v20 = vld [vmem:[%s25434_s7 + $0x3f8] sm:$0xff]  ;;  %v3697_v12 = vld [vmem:[%s25434_s7 + $0x428] sm:$0xff] }
 0x3e6   : > { %14735 = vmatprep.subr.bf16.mxu0 %v16916_v5  ;;  %14838 = vmatprep.subr.bf16.mxu1 %v14837_v28  ;;  %v3662_v28 = vld [vmem:[%s25434_s7 + $0x310] sm:$0xff] }
 0x3e7   : > { %4003 = vmatmul.mubr.f32.gmra.mrb[58].mxu0 %v19545_v63  ;;  %4098 = vmatmul.mubr.f32.gmra.mrb[58].mxu1 %v19545_v63 }
 0x3e8   : > { %14737 = vmatpush1.bf16.msra.mxu0 %v14736_v29  ;;  %14840 = vmatpush1.bf16.msra.mxu1 %v14839_v14  ;;  %v11789_v29 = vld [vmem:[%s25434_s7 + $0x778] sm:$0xff]  ;;  %v14857_v14 = vpack.c.bf16 %v3662_v28, %v3657_v22 }
 0x3e9   : > { %11855 = vmatprep.mubr.msk.f32.mxu0 %vm3888_vm9, %v19452_v9  ;;  %11869 = vmatprep.mubr.msk.f32.mxu1 %vm3888_vm9, %v19416_v57  ;;  %v3637_v9 = vld [vmem:[%s25434_s7 + $0x248] sm:$0xff]  ;;  %v14751_v6 = vpack.c.bf16 %v11794_v56, %v11789_v29  ;;  %v11834_v29 = vld [vmem:[%s25434_s7 + $0x8e0] sm:$0xff] }
 0x3ea   : > { %14738 = vmatprep.subr.bf16.mxu0 %v16916_v5  ;;  %14842 = vmatprep.subr.bf16.mxu1 %v14841_v18  ;;  %v14849_v17 = vpack.c.bf16 %v3642_v59, %v3637_v9  ;;  %v3672_v18 = vld [vmem:[%s25434_s7 + $0x360] sm:$0xff]  ;;  %v3701_v56 = vld [vmem:[%s25434_s7 + $0x448] sm:$0xff] }
 0x3ec   : > { %14740 = vmatpush1.bf16.msra.mxu0 %v14739_v45  ;;  %14844 = vmatpush1.bf16.msra.mxu1 %v14843_v47  ;;  %v11799_v45 = vld [vmem:[%s25434_s7 + $0x7c8] sm:$0xff]  ;;  %v14861_v47 = vpack.c.bf16 %v3672_v18, %v3667_v26  ;;  %v3707_v26 = vld [vmem:[%s25434_s7 + $0x478] sm:$0xf] }
 0x3ed   : > { %14741 = vmatprep.subr.bf16.mxu0 %v16916_v5  ;;  %14846 = vmatprep.subr.bf16.mxu1 %v14845_v49  ;;  %v3666_v49 = vld [vmem:[%s25434_s7 + $0x330] sm:$0xff]  ;;  %v14754_v9 = vpack.c.bf16 %v11804_v53, %v11799_v45  ;;  %v3565_v18 = vld [vmem:[%s25434_s7 + $0x8] sm:$0xff]  ;;  %v3564_v45 = vld [vmem:[%s25434_s7] sm:$0xff] }
 0x3ee   : > { %v14863_v59 = vpack.c.bf16 %v3671_v52, %v3666_v49  ;;  %v3706_v53 = vld [vmem:[%s25434_s7 + $0x470] sm:$0xf]  ;;  %v3568_v52 = vld [vmem:[%s25434_s7 + $0x20] sm:$0xff] }
 0x3f0   : > { %14743 = vmatpush1.bf16.msra.mxu0 %v14742_v23  ;;  %14848 = vmatpush1.bf16.msra.mxu1 %v14847_v24  ;;  %v11809_v23 = vld [vmem:[%s25434_s7 + $0x818] sm:$0xff]  ;;  %v14865_v24 = vpack.c.bf16 %v3682_v55, %v3677_v15  ;;  %v3573_v15 = vld [vmem:[%s25434_s7 + $0x48] sm:$0xff] }
 0x3f1   : > { %14744 = vmatprep.subr.bf16.mxu0 %v16916_v5  ;;  %14850 = vmatprep.subr.bf16.mxu1 %v14849_v17  ;;  %v3676_v17 = vld [vmem:[%s25434_s7 + $0x380] sm:$0xff]  ;;  %v14757_v39 = vpack.c.bf16 %v11814_v11, %v11809_v23  ;;  %v3575_v55 = vld [vmem:[%s25434_s7 + $0x58] sm:$0xff]  ;;  %v14878_v23 = vpack.c.bf16 %v3573_v15, %v3568_v52  ;;  %v3625_v15 = vld [vmem:[%s25434_s7 + $0x1e8] sm:$0xff] }
 0x3f2   : > { %v14867_v2 = vpack.c.bf16 %v3681_v33, %v3676_v17  ;;  %v3579_v11 = vld [vmem:[%s25434_s7 + $0x78] sm:$0xff]  ;;  %v3578_v33 = vld [vmem:[%s25434_s7 + $0x70] sm:$0xff] }
 0x3f3   : > { %v3623_v52 = vld [vmem:[%s25434_s7 + $0x1d8] sm:$0xff] }
 0x3f4   : > { %14746 = vmatpush1.bf16.msra.mxu0 %v14745_v38  ;;  %14852 = vmatpush1.bf16.msra.mxu1 %v14851_v4  ;;  %v11819_v38 = vld [vmem:[%s25434_s7 + $0x868] sm:$0xff]  ;;  %v14869_v4 = vpack.c.bf16 %v3692_v41, %v3687_v36  ;;  %v3583_v36 = vld [vmem:[%s25434_s7 + $0x98] sm:$0xff] }
 0x3f5   : > { %14747 = vmatprep.subr.bf16.mxu0 %v16916_v5  ;;  %14854 = vmatprep.subr.bf16.mxu1 %v14853_v10  ;;  %v3686_v10 = vld [vmem:[%s25434_s7 + $0x3d0] sm:$0xff]  ;;  %v14760_v22 = vpack.c.bf16 %v11824_v3, %v11819_v38  ;;  %v3585_v41 = vld [vmem:[%s25434_s7 + $0xa8] sm:$0xff]  ;;  %v3584_v38 = vld [vmem:[%s25434_s7 + $0xa0] sm:$0xff] }
 0x3f6   : > { %v14871_v28 = vpack.c.bf16 %v3691_v20, %v3686_v10  ;;  %v3593_v10 = vld [vmem:[%s25434_s7 + $0xe8] sm:$0xff]  ;;  %v3595_v20 = vld [vmem:[%s25434_s7 + $0xf8] sm:$0xff] }
 0x3f8   : > { %14749 = vmatpush1.bf16.msra.mxu0 %v14748_v44  ;;  %14856 = vmatpush1.bf16.msra.mxu1 %v14855_v40  ;;  %v11829_v44 = vld [vmem:[%s25434_s7 + $0x8b8] sm:$0xff]  ;;  %v14873_v40 = vpack.c.bf16 %v3702_v19, %v3697_v12 }
 0x3f9   : > { %14750 = vmatprep.subr.bf16.mxu0 %v16916_v5  ;;  %14858 = vmatprep.subr.bf16.mxu1 %v14857_v14  ;;  %v3696_v14 = vld [vmem:[%s25434_s7 + $0x420] sm:$0xff]  ;;  %v14763_v46 = vpack.c.bf16 %v11834_v29, %v11829_v44  ;;  %v3605_v29 = vld [vmem:[%s25434_s7 + $0x148] sm:$0xff] }
 0x3fa   : > { %v14875_v13 = vpack.c.bf16 %v3701_v56, %v3696_v14 }
 0x3fc   : > { %14752 = vmatpush1.bf16.msra.mxu0 %v14751_v6  ;;  %14860 = vmatpush1.bf16.msra.mxu1 %v14859_v21  ;;  %v3570_v6 = vld [vmem:[%s25434_s7 + $0x30] sm:$0xff]  ;;  %v11839_v21 = vld [vmem:[%s25434_s7 + $0x908] sm:$0xf] }
 0x3fd   : > { %14753 = vmatprep.subr.bf16.mxu0 %v16916_v5  ;;  %14862 = vmatprep.subr.bf16.mxu1 %v14861_v47  ;;  %v3569_v47 = vld [vmem:[%s25434_s7 + $0x28] sm:$0xff]  ;;  %v14765_v49 = vpack.c.bf16 %v3570_v6, %v3565_v18  ;;  %v3615_v6 = vld [vmem:[%s25434_s7 + $0x198] sm:$0xff] }
 0x3fe   : > { %v3613_v18 = vld [vmem:[%s25434_s7 + $0x188] sm:$0xff] }
 0x400   : > { %14755 = vmatpush1.bf16.msra.mxu0 %v14754_v9  ;;  %14864 = vmatpush1.bf16.msra.mxu1 %v14863_v59  ;;  %v3580_v9 = vld [vmem:[%s25434_s7 + $0x80] sm:$0xff]  ;;  %v14767_v59 = vpack.c.bf16 %v3569_v47, %v3564_v45  ;;  %v3614_v47 = vld [vmem:[%s25434_s7 + $0x190] sm:$0xff] }
 0x401   : > { %14756 = vmatprep.subr.bf16.mxu0 %v16916_v5  ;;  %14866 = vmatprep.subr.bf16.mxu1 %v14865_v24  ;;  %v3574_v24 = vld [vmem:[%s25434_s7 + $0x50] sm:$0xff]  ;;  %v14769_v17 = vpack.c.bf16 %v3580_v9, %v3575_v55 }
 0x402   : > { %v3630_v55 = vld [vmem:[%s25434_s7 + $0x210] sm:$0xff] }
 0x404   : > { %14758 = vmatpush1.bf16.msra.mxu0 %v14757_v39  ;;  %14868 = vmatpush1.bf16.msra.mxu1 %v14867_v2  ;;  %v14771_v39 = vpack.c.bf16 %v3579_v11, %v3574_v24  ;;  %v14881_v2 = vpack.c.bf16 %v3583_v36, %v3578_v33  ;;  %v3629_v24 = vld [vmem:[%s25434_s7 + $0x208] sm:$0xff]  ;;  %v3628_v11 = vld [vmem:[%s25434_s7 + $0x200] sm:$0xff]  ;;  %v3635_v33 = vld [vmem:[%s25434_s7 + $0x238] sm:$0xff] }
 0x405   : > { %14759 = vmatprep.subr.bf16.mxu0 %v16916_v5  ;;  %14870 = vmatprep.subr.bf16.mxu1 %v14869_v4  ;;  %v3589_v4 = vld [vmem:[%s25434_s7 + $0xc8] sm:$0xff]  ;;  %v3640_v36 = vld [vmem:[%s25434_s7 + $0x260] sm:$0xff] }
 0x406   : > { %v14775_v12 = vpack.c.bf16 %v3589_v4, %v3584_v38  ;;  %v3639_v38 = vld [vmem:[%s25434_s7 + $0x258] sm:$0xff]  ;;  %v3638_v4 = vld [vmem:[%s25434_s7 + $0x250] sm:$0xff] }
 0x408   : > { %14761 = vmatpush1.bf16.msra.mxu0 %v14760_v22  ;;  %14872 = vmatpush1.bf16.msra.mxu1 %v14871_v28  ;;  %v3594_v22 = vld [vmem:[%s25434_s7 + $0xf0] sm:$0xff]  ;;  %v3599_v28 = vld [vmem:[%s25434_s7 + $0x118] sm:$0xff] }
 0x409   : > { %14762 = vmatprep.subr.bf16.mxu0 %v16916_v5  ;;  %14874 = vmatprep.subr.bf16.mxu1 %v14873_v40  ;;  %v3603_v40 = vld [vmem:[%s25434_s7 + $0x138] sm:$0xff]  ;;  %v14779_v14 = vpack.c.bf16 %v3599_v28, %v3594_v22  ;;  %v3649_v22 = vld [vmem:[%s25434_s7 + $0x2a8] sm:$0xff]  ;;  %v3648_v28 = vld [vmem:[%s25434_s7 + $0x2a0] sm:$0xff] }
 0x40c   : > { %14764 = vmatpush1.bf16.msra.mxu0 %v14763_v46  ;;  %14876 = vmatpush1.bf16.msra.mxu1 %v14875_v13  ;;  %v3604_v46 = vld [vmem:[%s25434_s7 + $0x140] sm:$0xff]  ;;  %v3609_v13 = vld [vmem:[%s25434_s7 + $0x168] sm:$0xff] }
 0x40d   : > { %4160 = vmatprep.subr.mxu0 %v16914_v7  ;;  %11867 = vmatprep.subr.msk.mxu1 %vm2045_vm4, %v3707_v26 }
 0x410   : > { %11854 = vmatpush1.msk.msra.mxu0 %vm2045_vm4, %v11839_v21  ;;  %11868 = vmatpush1.msk.msra.mxu1 %vm2045_vm4, %v3706_v53  ;;  %v14783_v21 = vpack.c.bf16 %v3609_v13, %v3604_v46  ;;  %v3619_v53 = vld [vmem:[%s25434_s7 + $0x1b8] sm:$0xff]  ;;  %v3658_v13 = vld [vmem:[%s25434_s7 + $0x2f0] sm:$0xff] }
 0x411   : > { %4169 = vmatmul.mubr.f32.vlgmr.msra.gmra.mrb[60].mxu0 %v19468_v51  ;;  %14766 = vmatprep.subr.bf16.mxu0 %v14765_v49  ;;  %v3590_v51 = vld [vmem:[%s25434_s7 + $0xd0] sm:$0xff]  ;;  %v3659_v46 = vld [vmem:[%s25434_s7 + $0x2f8] sm:$0xff] }
 0x412   : > { %4379 = vmatmul.mubr.f32.vlgmr.msra.gmra.mrb[50].mxu1 %v19414_v35  ;;  %14877 = vmatprep.subr.bf16.mxu1 %v16916_v5  ;;  %v14773_v3 = vpack.c.bf16 %v3590_v51, %v3585_v41  ;;  %v3618_v49 = vld [vmem:[%s25434_s7 + $0x1b0] sm:$0xff] }
 0x413   : > { %11856 = vmatprep.mubr.msk.f32.mxu0 %vm3888_vm9, %v19488_v43  ;;  %14768 = vmatpush1.bf16.msra.mxu0 %v14767_v59  ;;  %v3588_v43 = vld [vmem:[%s25434_s7 + $0xc0] sm:$0xff]  ;;  %v14893_v9 = vpack.c.bf16 %v3623_v52, %v3618_v49  ;;  %v14789_v59 = vpack.c.bf16 %v3630_v55, %v3625_v15  ;;  %v3673_v49 = vld [vmem:[%s25434_s7 + $0x368] sm:$0xff] }
 0x414   : > { %11870 = vmatprep.mubr.msk.f32.mxu1 %vm3888_vm9, %v19423_v0  ;;  %14879 = vmatpush1.bf16.msra.mxu1 %v14878_v23  ;;  %v14884_v19 = vpack.c.bf16 %v3593_v10, %v3588_v43  ;;  %v3624_v23 = vld [vmem:[%s25434_s7 + $0x1e0] sm:$0xff]  ;;  %v3645_v43 = vld [vmem:[%s25434_s7 + $0x288] sm:$0xff]  ;;  %v3650_v10 = vld [vmem:[%s25434_s7 + $0x2b0] sm:$0xff] }
 0x415   : > { %4174 = vmatmul.mubr.f32.gmra.mrb[62].mxu0 %v19505_v48  ;;  %14770 = vmatprep.subr.bf16.mxu0 %v14769_v17  ;;  %v3600_v48 = vld [vmem:[%s25434_s7 + $0x120] sm:$0xff]  ;;  %v3633_v17 = vld [vmem:[%s25434_s7 + $0x228] sm:$0xff]  ;;  %v14791_v41 = vpack.c.bf16 %v3629_v24, %v3624_v23  ;;  %v3678_v23 = vld [vmem:[%s25434_s7 + $0x390] sm:$0xff] }
 0x416   : > { %4385 = vmatmul.mubr.f32.gmra.mrb[52].mxu1 %v19418_v62  ;;  %14880 = vmatprep.subr.bf16.mxu1 %v16916_v5  ;;  %v14777_v44 = vpack.c.bf16 %v3600_v48, %v3595_v20  ;;  %v14896_v51 = vpack.c.bf16 %v3633_v17, %v3628_v11  ;;  %v3680_v52 = vld [vmem:[%s25434_s7 + $0x3a0] sm:$0xff]  ;;  %v3683_v24 = vld [vmem:[%s25434_s7 + $0x3b8] sm:$0xff]  ;;  %v3685_v11 = vld [vmem:[%s25434_s7 + $0x3c8] sm:$0xff] }
 0x417   : > { %11857 = vmatprep.mubr.msk.f32.mxu0 %vm3888_vm9, %v19525_v37  ;;  %14772 = vmatpush1.bf16.msra.mxu0 %v14771_v39  ;;  %v3598_v37 = vld [vmem:[%s25434_s7 + $0x110] sm:$0xff]  ;;  %v14793_v39 = vpack.c.bf16 %v3640_v36, %v3635_v33  ;;  %v14911_v36 = vpack.c.bf16 %v3683_v24, %v3678_v23  ;;  %v11901_v23 = vld [vmem:[%s25434_s7 + $0x9b8] sm:$0xff]  ;;  %v11906_v24 = vld [vmem:[%s25434_s7 + $0x9e0] sm:$0xff] }
 0x418   : > { %11871 = vmatprep.mubr.msk.f32.mxu1 %vm3888_vm9, %v19449_v1  ;;  %14882 = vmatpush1.bf16.msra.mxu1 %v14881_v2  ;;  %v14887_v56 = vpack.c.bf16 %v3603_v40, %v3598_v37  ;;  %v3634_v2 = vld [vmem:[%s25434_s7 + $0x230] sm:$0xff]  ;;  %v3655_v37 = vld [vmem:[%s25434_s7 + $0x2d8] sm:$0xff]  ;;  %v3660_v40 = vld [vmem:[%s25434_s7 + $0x300] sm:$0xff] }
 0x419   : > { %4179 = vmatmul.mubr.f32.gmra.mrb[64].mxu0 %v19542_v8  ;;  %14774 = vmatprep.subr.bf16.mxu0 %v14773_v3  ;;  %v3610_v8 = vld [vmem:[%s25434_s7 + $0x170] sm:$0xff]  ;;  %v3643_v3 = vld [vmem:[%s25434_s7 + $0x278] sm:$0xff]  ;;  %v14795_v20 = vpack.c.bf16 %v3639_v38, %v3634_v2  ;;  %v3688_v2 = vld [vmem:[%s25434_s7 + $0x3e0] sm:$0xff] }
 0x41a   : > { %4391 = vmatmul.mubr.f32.gmra.mrb[54].mxu1 %v19443_v54  ;;  %14883 = vmatprep.subr.bf16.mxu1 %v16916_v5  ;;  %v14781_v26 = vpack.c.bf16 %v3610_v8, %v3605_v29  ;;  %v14899_v48 = vpack.c.bf16 %v3643_v3, %v3638_v4  ;;  %v3690_v17 = vld [vmem:[%s25434_s7 + $0x3f0] sm:$0xff]  ;;  %v3693_v38 = vld [vmem:[%s25434_s7 + $0x408] sm:$0xff]  ;;  %v3695_v4 = vld [vmem:[%s25434_s7 + $0x418] sm:$0xff] }
 0x41b   : > { %11858 = vmatprep.mubr.msk.f32.mxu0 %vm3888_vm9, %v19563_v58  ;;  %14776 = vmatpush1.bf16.msra.mxu0 %v14775_v12  ;;  %v3608_v58 = vld [vmem:[%s25434_s7 + $0x160] sm:$0xff]  ;;  %v14797_v12 = vpack.c.bf16 %v3650_v10, %v3645_v43  ;;  %v14914_v10 = vpack.c.bf16 %v3693_v38, %v3688_v2  ;;  %v11907_v38 = vld [vmem:[%s25434_s7 + $0x9e8] sm:$0xff] }
 0x41c   : > { %11872 = vmatprep.mubr.msk.f32.mxu1 %vm3888_vm9, %v19485_v42  ;;  %14885 = vmatpush1.bf16.msra.mxu1 %v14884_v19  ;;  %v14890_v45 = vpack.c.bf16 %v3613_v18, %v3608_v58  ;;  %v3644_v19 = vld [vmem:[%s25434_s7 + $0x280] sm:$0xff]  ;;  %v3665_v58 = vld [vmem:[%s25434_s7 + $0x328] sm:$0xff]  ;;  %v3670_v18 = vld [vmem:[%s25434_s7 + $0x350] sm:$0xff] }
 0x41d   : > { %4184 = vmatmul.mubr.f32.gmra.mrb[66].mxu0 %v19581_v61  ;;  %14778 = vmatprep.subr.bf16.mxu0 %v14777_v44  ;;  %v3620_v61 = vld [vmem:[%s25434_s7 + $0x1c0] sm:$0xff]  ;;  %v3653_v44 = vld [vmem:[%s25434_s7 + $0x2c8] sm:$0xff]  ;;  %v14799_v29 = vpack.c.bf16 %v3649_v22, %v3644_v19  ;;  %v3698_v19 = vld [vmem:[%s25434_s7 + $0x430] sm:$0xff] }
 0x41e   : > { %4397 = vmatmul.mubr.f32.gmra.mrb[56].mxu1 %v19480_v34  ;;  %14886 = vmatprep.subr.bf16.mxu1 %v16916_v5  ;;  %v14902_v8 = vpack.c.bf16 %v3653_v44, %v3648_v28  ;;  %v3700_v3 = vld [vmem:[%s25434_s7 + $0x440] sm:$0xff]  ;;  %v3703_v22 = vld [vmem:[%s25434_s7 + $0x458] sm:$0xff] }
 0x41f   : > { %11859 = vmatprep.mubr.msk.f32.mxu0 %vm3888_vm9, %v19550_v50  ;;  %14780 = vmatpush1.bf16.msra.mxu0 %v14779_v14  ;;  %v14785_v50 = vpack.c.bf16 %v3620_v61, %v3615_v6  ;;  %v14801_v14 = vpack.c.bf16 %v3660_v40, %v3655_v37  ;;  %v14917_v44 = vpack.c.bf16 %v3703_v22, %v3698_v19  ;;  %v3705_v37 = vld [vmem:[%s25434_s7 + $0x468] sm:$0xf]  ;;  %v11881_v40 = vld [vmem:[%s25434_s7 + $0x918] sm:$0xff]  ;;  %v11902_v2 = vld [vmem:[%s25434_s7 + $0x9c0] sm:$0xff] }
 0x420   : > { %11873 = vmatprep.mubr.msk.f32.mxu1 %vm3888_vm9, %v19522_v16  ;;  %14888 = vmatpush1.bf16.msra.mxu1 %v14887_v56  ;;  %v3654_v56 = vld [vmem:[%s25434_s7 + $0x2d0] sm:$0xff]  ;;  %v11910_v19 = vld [vmem:[%s25434_s7 + $0xa00] sm:$0xff]  ;;  %v11915_v22 = vld [vmem:[%s25434_s7 + $0xa28] sm:$0xff] }
 0x421   : > { %4189 = vmatmul.mubr.f32.gmra.mrb[68].mxu0 %v19545_v63  ;;  %14782 = vmatprep.subr.bf16.mxu0 %v14781_v26  ;;  %v14787_v63 = vpack.c.bf16 %v3619_v53, %v3614_v47  ;;  %v3663_v26 = vld [vmem:[%s25434_s7 + $0x318] sm:$0xff]  ;;  %v14803_v6 = vpack.c.bf16 %v3659_v46, %v3654_v56  ;;  %v3669_v47 = vld [vmem:[%s25434_s7 + $0x348] sm:$0xff]  ;;  %v3668_v53 = vld [vmem:[%s25434_s7 + $0x340] sm:$0xff] }
 0x422   : > { %4403 = vmatmul.mubr.f32.gmra.mrb[58].mxu1 %v19517_v60  ;;  %14889 = vmatprep.subr.bf16.mxu1 %v16916_v5  ;;  %v14905_v61 = vpack.c.bf16 %v3663_v26, %v3658_v13  ;;  %v14908_v55 = vpack.c.bf16 %v3673_v49, %v3668_v53  ;;  %v3704_v56 = vld [vmem:[%s25434_s7 + $0x460] sm:$0xf]  ;;  %v11880_v46 = vld [vmem:[%s25434_s7 + $0x910] sm:$0xff]  ;;  %v11885_v13 = vld [vmem:[%s25434_s7 + $0x938] sm:$0xff] }
 0x423   : > { %14784 = vmatpush1.bf16.msra.mxu0 %v14783_v21  ;;  %11862 = vmatprep.mubr.msk.f32.mxu0 %vm3888_vm9, %v19416_v57  ;;  %v14805_v21 = vpack.c.bf16 %v3670_v18, %v3665_v58  ;;  %v3708_v26 = vld [vmem:[%s25434_s7 + $0x480] sm:$0xf]  ;;  %v11893_v53 = vld [vmem:[%s25434_s7 + $0x978] sm:$0xff] }
 0x424   : > { %14891 = vmatpush1.bf16.msra.mxu1 %v14890_v45  ;;  %11875 = vmatprep.mubr.msk.f32.mxu1 %vm3888_vm9, %v19416_v57  ;;  %v3664_v45 = vld [vmem:[%s25434_s7 + $0x320] sm:$0xff] }
 0x425   : > { %14786 = vmatprep.subr.bf16.mxu0 %v14785_v50  ;;  %14892 = vmatprep.subr.bf16.mxu1 %v16916_v5  ;;  %v3675_v50 = vld [vmem:[%s25434_s7 + $0x378] sm:$0xff]  ;;  %v14807_v15 = vpack.c.bf16 %v3669_v47, %v3664_v45  ;;  %v11882_v18 = vld [vmem:[%s25434_s7 + $0x920] sm:$0xff]  ;;  %v11896_v45 = vld [vmem:[%s25434_s7 + $0x990] sm:$0xff]  ;;  %v14921_v47 = vpack.c.bf16 %v11885_v13, %v11880_v46 }
 0x426   : > { %v11898_v49 = vld [vmem:[%s25434_s7 + $0x9a0] sm:$0xff]  ;;  %v11928_v46 = vld [vmem:[%s25434_s7 + $0xa90] sm:$0xff] }
 0x427   : > { %14788 = vmatpush1.bf16.msra.mxu0 %v14787_v63  ;;  %v14809_v63 = vpack.c.bf16 %v3680_v52, %v3675_v50  ;;  %v11890_v52 = vld [vmem:[%s25434_s7 + $0x960] sm:$0xff] }
 0x428   : > { %14894 = vmatpush1.bf16.msra.mxu1 %v14893_v9  ;;  %14790 = vmatprep.subr.bf16.mxu0 %v14789_v59  ;;  %v3674_v9 = vld [vmem:[%s25434_s7 + $0x370] sm:$0xff]  ;;  %v3679_v59 = vld [vmem:[%s25434_s7 + $0x398] sm:$0xff] }
 0x429   : > { %14895 = vmatprep.subr.bf16.mxu1 %v16916_v5  ;;  %v14811_v33 = vpack.c.bf16 %v3679_v59, %v3674_v9  ;;  %v11897_v9 = vld [vmem:[%s25434_s7 + $0x998] sm:$0xff]  ;;  %v14979_v59 = vpack.c.bf16 %v11898_v49, %v11893_v53 }
 0x42a   : > { %v11933_v49 = vld [vmem:[%s25434_s7 + $0xab8] sm:$0xff] }
 0x42b   : > { %14792 = vmatpush1.bf16.msra.mxu0 %v14791_v41  ;;  %v14813_v41 = vpack.c.bf16 %v3690_v17, %v3685_v11  ;;  %v11903_v17 = vld [vmem:[%s25434_s7 + $0x9c8] sm:$0xff] }
 0x42c   : > { %14897 = vmatpush1.bf16.msra.mxu1 %v14896_v51  ;;  %14794 = vmatprep.subr.bf16.mxu0 %v14793_v39  ;;  %v3684_v51 = vld [vmem:[%s25434_s7 + $0x3c0] sm:$0xff]  ;;  %v3689_v39 = vld [vmem:[%s25434_s7 + $0x3e8] sm:$0xff] }
 0x42d   : > { %14898 = vmatprep.subr.bf16.mxu1 %v16916_v5  ;;  %v14815_v43 = vpack.c.bf16 %v3689_v39, %v3684_v51  ;;  %v11905_v51 = vld [vmem:[%s25434_s7 + $0x9d8] sm:$0xff]  ;;  %v14927_v39 = vpack.c.bf16 %v11906_v24, %v11901_v23  ;;  %v11932_v23 = vld [vmem:[%s25434_s7 + $0xab0] sm:$0xff] }
 0x42f   : > { %14796 = vmatpush1.bf16.msra.mxu0 %v14795_v20  ;;  %v14817_v20 = vpack.c.bf16 %v3700_v3, %v3695_v4  ;;  %v11911_v3 = vld [vmem:[%s25434_s7 + $0xa08] sm:$0xff] }
 0x430   : > { %14900 = vmatpush1.bf16.msra.mxu1 %v14899_v48  ;;  %14798 = vmatprep.subr.bf16.mxu0 %v14797_v12  ;;  %v3694_v48 = vld [vmem:[%s25434_s7 + $0x410] sm:$0xff]  ;;  %v3699_v12 = vld [vmem:[%s25434_s7 + $0x438] sm:$0xff] }
 0x431   : > { %14901 = vmatprep.subr.bf16.mxu1 %v16916_v5  ;;  %v14819_v28 = vpack.c.bf16 %v3699_v12, %v3694_v48  ;;  %v11918_v48 = vld [vmem:[%s25434_s7 + $0xa40] sm:$0xff]  ;;  %v14985_v12 = vpack.c.bf16 %v11907_v38, %v11902_v2 }
 0x433   : > { %14800 = vmatpush1.bf16.msra.mxu0 %v14799_v29  ;;  %v11886_v29 = vld [vmem:[%s25434_s7 + $0x940] sm:$0xff] }
 0x434   : > { %14903 = vmatpush1.bf16.msra.mxu1 %v14902_v8  ;;  %14802 = vmatprep.subr.bf16.mxu0 %v14801_v14  ;;  %v11883_v8 = vld [vmem:[%s25434_s7 + $0x928] sm:$0xff]  ;;  %v11888_v14 = vld [vmem:[%s25434_s7 + $0x950] sm:$0xff]  ;;  %v14919_v58 = vpack.c.bf16 %v11886_v29, %v11881_v40  ;;  %v11921_v29 = vld [vmem:[%s25434_s7 + $0xa58] sm:$0xff] }
 0x435   : > { %14904 = vmatprep.subr.bf16.mxu1 %v16916_v5 }
 0x437   : > { %14804 = vmatpush1.bf16.msra.mxu0 %v14803_v6  ;;  %v11887_v6 = vld [vmem:[%s25434_s7 + $0x948] sm:$0xff] }
 0x438   : > { %14906 = vmatpush1.bf16.msra.mxu1 %v14905_v61  ;;  %14806 = vmatprep.subr.bf16.mxu0 %v14805_v21  ;;  %v14975_v61 = vpack.c.bf16 %v11888_v14, %v11883_v8  ;;  %v11891_v21 = vld [vmem:[%s25434_s7 + $0x968] sm:$0xff]  ;;  %v14977_v50 = vpack.c.bf16 %v11887_v6, %v11882_v18  ;;  %v11926_v8 = vld [vmem:[%s25434_s7 + $0xa80] sm:$0xff]  ;;  %v14933_v14 = vpack.c.bf16 %v11915_v22, %v11910_v19  ;;  %v11953_v19 = vld [vmem:[%s25434_s7 + $0xb58] sm:$0xff] }
 0x439   : > { %14907 = vmatprep.subr.bf16.mxu1 %v16916_v5  ;;  %v11922_v18 = vld [vmem:[%s25434_s7 + $0xa60] sm:$0xff]  ;;  %v14935_v6 = vpack.c.bf16 %v11926_v8, %v11921_v29  ;;  %v11955_v29 = vld [vmem:[%s25434_s7 + $0xb68] sm:$0xff]  ;;  %v11952_v8 = vld [vmem:[%s25434_s7 + $0xb50] sm:$0xff] }
 0x43a   : > { %v11958_v22 = vld [vmem:[%s25434_s7 + $0xb80] sm:$0xff] }
 0x43b   : > { %14808 = vmatpush1.bf16.msra.mxu0 %v14807_v15  ;;  %v11895_v15 = vld [vmem:[%s25434_s7 + $0x988] sm:$0xff] }
 0x43c   : > { %14909 = vmatpush1.bf16.msra.mxu1 %v14908_v55  ;;  %14810 = vmatprep.subr.bf16.mxu0 %v14809_v63  ;;  %v14923_v55 = vpack.c.bf16 %v11896_v45, %v11891_v21  ;;  %v11892_v63 = vld [vmem:[%s25434_s7 + $0x970] sm:$0xff]  ;;  %v14925_v11 = vpack.c.bf16 %v11895_v15, %v11890_v52  ;;  %v11927_v21 = vld [vmem:[%s25434_s7 + $0xa88] sm:$0xff]  ;;  %v4648_v15 = vrot.slane %v19416_v57, 2 }
 0x43d   : > { %14910 = vmatprep.subr.bf16.mxu1 %v16916_v5  ;;  %v11931_v45 = vld [vmem:[%s25434_s7 + $0xaa8] sm:$0xff] }
 0x43f   : > { %14812 = vmatpush1.bf16.msra.mxu0 %v14811_v33  ;;  %v11908_v33 = vld [vmem:[%s25434_s7 + $0x9f0] sm:$0xff] }
 0x440   : > { %14912 = vmatpush1.bf16.msra.mxu1 %v14911_v36  ;;  %14814 = vmatprep.subr.bf16.mxu0 %v14813_v41  ;;  %v14981_v36 = vpack.c.bf16 %v11897_v9, %v11892_v63  ;;  %v11900_v41 = vld [vmem:[%s25434_s7 + $0x9b0] sm:$0xff]  ;;  %v14983_v4 = vpack.c.bf16 %v11908_v33, %v11903_v17  ;;  %v11930_v9 = vld [vmem:[%s25434_s7 + $0xaa0] sm:$0xff]  ;;  %v11937_v17 = vld [vmem:[%s25434_s7 + $0xad8] sm:$0xff] }
 0x441   : > { %14913 = vmatprep.subr.bf16.mxu1 %v16916_v5  ;;  %v11941_v33 = vld [vmem:[%s25434_s7 + $0xaf8] sm:$0xff]  ;;  %v14997_v2 = vpack.c.bf16 %v11937_v17, %v11932_v23  ;;  %v11975_v17 = vld [vmem:[%s25434_s7 + $0xc08] sm:$0xff] }
 0x443   : > { %14816 = vmatpush1.bf16.msra.mxu0 %v14815_v43  ;;  %v11916_v43 = vld [vmem:[%s25434_s7 + $0xa30] sm:$0xff] }
 0x444   : > { %14915 = vmatpush1.bf16.msra.mxu1 %v14914_v10  ;;  %14818 = vmatprep.subr.bf16.mxu0 %v14817_v20  ;;  %v14929_v10 = vpack.c.bf16 %v11905_v51, %v11900_v41  ;;  %v11913_v20 = vld [vmem:[%s25434_s7 + $0xa18] sm:$0xff]  ;;  %v11943_v41 = vld [vmem:[%s25434_s7 + $0xb08] sm:$0xff]  ;;  %v11948_v51 = vld [vmem:[%s25434_s7 + $0xb30] sm:$0xff] }
 0x445   : > { %14916 = vmatprep.subr.bf16.mxu1 %v16916_v5  ;;  %v14987_v40 = vpack.c.bf16 %v11918_v48, %v11913_v20  ;;  %v11947_v20 = vld [vmem:[%s25434_s7 + $0xb28] sm:$0xff] }
 0x446   : > { %v11951_v48 = vld [vmem:[%s25434_s7 + $0xb48] sm:$0xff] }
 0x447   : > { %14820 = vmatpush1.bf16.msra.mxu0 %v14819_v28  ;;  %v14931_v28 = vpack.c.bf16 %v11916_v43, %v11911_v3  ;;  %v11945_v3 = vld [vmem:[%s25434_s7 + $0xb18] sm:$0xff]  ;;  %v11942_v43 = vld [vmem:[%s25434_s7 + $0xb00] sm:$0xff] }
 0x448   : > { %14918 = vmatpush1.bf16.msra.mxu1 %v14917_v44  ;;  %11860 = vmatprep.subr.msk.mxu0 %vm2045_vm4, %v3705_v37  ;;  %v11912_v44 = vld [vmem:[%s25434_s7 + $0xa10] sm:$0xff]  ;;  %v11917_v37 = vld [vmem:[%s25434_s7 + $0xa38] sm:$0xff] }
 0x449   : > { %4465 = vmatprep.subr.mxu1 %v16914_v7  ;;  %v14989_v13 = vpack.c.bf16 %v11917_v37, %v11912_v44  ;;  %v15001_v44 = vpack.c.bf16 %v11947_v20, %v11942_v43  ;;  %v11985_v20 = vld [vmem:[%s25434_s7 + $0xc58] sm:$0xff] }
 0x44b   : > { %11861 = vmatpush1.msk.msra.mxu0 %vm2045_vm4, %v3704_v56  ;;  %v11923_v56 = vld [vmem:[%s25434_s7 + $0xa68] sm:$0xff] }
 0x44c   : > { %11874 = vmatpush1.msk.msra.mxu1 %vm2045_vm4, %v3708_v26  ;;  %4284 = vmatmul.mubr.f32.vlgmr.msra.gmra.mrb[50].mxu0 %v19414_v35  ;;  %v11920_v26 = vld [vmem:[%s25434_s7 + $0xa50] sm:$0xff]  ;;  %v14991_v53 = vpack.c.bf16 %v11928_v46, %v11923_v56  ;;  %v11957_v56 = vld [vmem:[%s25434_s7 + $0xb78] sm:$0xff] }
 0x44d   : > { %4474 = vmatmul.mubr.f32.vlgmr.msra.gmra.mrb[60].mxu1 %v19414_v35  ;;  %14920 = vmatprep.subr.bf16.mxu0 %v14919_v58  ;;  %v11925_v58 = vld [vmem:[%s25434_s7 + $0xa78] sm:$0xff] }
 0x44e   : > { %14976 = vmatprep.subr.bf16.mxu1 %v14975_v61  ;;  %11863 = vmatprep.mubr.msk.f32.mxu0 %vm3888_vm9, %v19423_v0  ;;  %v4649_v61 = vrot.slane %v19423_v0, 2  ;;  %v14937_v52 = vpack.c.bf16 %v11925_v58, %v11920_v26  ;;  %v11961_v46 = vld [vmem:[%s25434_s7 + $0xb98] sm:$0xff]  ;;  %v11963_v26 = vld [vmem:[%s25434_s7 + $0xba8] sm:$0xff]  ;;  %v11968_v58 = vld [vmem:[%s25434_s7 + $0xbd0] sm:$0xff] }
 0x44f   : > { %11876 = vmatprep.mubr.msk.f32.mxu1 %vm3888_vm9, %v19423_v0  ;;  %14922 = vmatpush1.bf16.msra.mxu0 %v14921_v47  ;;  %v11936_v47 = vld [vmem:[%s25434_s7 + $0xad0] sm:$0xff] }
 0x450   : > { %14978 = vmatpush1.bf16.msra.mxu1 %v14977_v50  ;;  %4290 = vmatmul.mubr.f32.gmra.mrb[52].mxu0 %v19418_v62  ;;  %v11938_v50 = vld [vmem:[%s25434_s7 + $0xae0] sm:$0xff]  ;;  %v14939_v63 = vpack.c.bf16 %v11936_v47, %v11931_v45  ;;  %v20261_v24 = vsel %vm1303_vm0, %v4648_v15, %v4649_v61  ;;  %v11960_v45 = vld [vmem:[%s25434_s7 + $0xb90] sm:$0xff]  ;;  %v11965_v47 = vld [vmem:[%s25434_s7 + $0xbb8] sm:$0xff] }
 0x451   : > { %4479 = vmatmul.mubr.f32.gmra.mrb[62].mxu1 %v19418_v62  ;;  %14924 = vmatprep.subr.bf16.mxu0 %v14923_v55  ;;  %v14993_v55 = vpack.c.bf16 %v11927_v21, %v11922_v18  ;;  %v11976_v15 = vld [vmem:[%s25434_s7 + $0xc10] sm:$0xff] }
 0x452   : > { %14980 = vmatprep.subr.bf16.mxu1 %v14979_v59  ;;  %11864 = vmatprep.mubr.msk.f32.mxu0 %vm3888_vm9, %v19449_v1  ;;  %v11935_v59 = vld [vmem:[%s25434_s7 + $0xac8] sm:$0xff] }
 0x453   : > { %11877 = vmatprep.mubr.msk.f32.mxu1 %vm3888_vm9, %v19449_v1  ;;  %14926 = vmatpush1.bf16.msra.mxu0 %v14925_v11  ;;  %v14995_v11 = vpack.c.bf16 %v11938_v50, %v11933_v49  ;;  %v15007_v49 = vpack.c.bf16 %v11968_v58, %v11963_v26  ;;  %v11967_v50 = vld [vmem:[%s25434_s7 + $0xbc8] sm:$0xff]  ;;  %v11997_v26 = vld [vmem:[%s25434_s7 + $0xcb8] sm:$0xff] }
 0x454   : > { %14982 = vmatpush1.bf16.msra.mxu1 %v14981_v36  ;;  %4296 = vmatmul.mubr.f32.gmra.mrb[54].mxu0 %v19443_v54  ;;  %v11946_v36 = vld [vmem:[%s25434_s7 + $0xb20] sm:$0xff]  ;;  %v12001_v58 = vld [vmem:[%s25434_s7 + $0xcd8] sm:$0xff] }
 0x455   : > { %4484 = vmatmul.mubr.f32.gmra.mrb[64].mxu1 %v19443_v54  ;;  %14928 = vmatprep.subr.bf16.mxu0 %v14927_v39  ;;  %v14941_v39 = vpack.c.bf16 %v11935_v59, %v11930_v9  ;;  %v14943_v38 = vpack.c.bf16 %v11946_v36, %v11941_v33  ;;  %v14953_v9 = vpack.c.bf16 %v11965_v47, %v11960_v45  ;;  %v11972_v33 = vld [vmem:[%s25434_s7 + $0xbf0] sm:$0xff] }
 0x456   : > { %14984 = vmatprep.subr.bf16.mxu1 %v14983_v4  ;;  %11865 = vmatprep.mubr.msk.f32.mxu0 %vm3888_vm9, %v19485_v42  ;;  %v11940_v4 = vld [vmem:[%s25434_s7 + $0xaf0] sm:$0xff] }
 0x457   : > { %11878 = vmatprep.mubr.msk.f32.mxu1 %vm3888_vm9, %v19485_v42  ;;  %14930 = vmatpush1.bf16.msra.mxu0 %v14929_v10  ;;  %v14999_v10 = vpack.c.bf16 %v11948_v51, %v11943_v41  ;;  %v11977_v41 = vld [vmem:[%s25434_s7 + $0xc18] sm:$0xff] }
 0x458   : > { %14986 = vmatpush1.bf16.msra.mxu1 %v14985_v12  ;;  %4302 = vmatmul.mubr.f32.gmra.mrb[56].mxu0 %v19480_v34  ;;  %v11956_v12 = vld [vmem:[%s25434_s7 + $0xb70] sm:$0xff]  ;;  %v11981_v51 = vld [vmem:[%s25434_s7 + $0xc38] sm:$0xff] }
 0x459   : > { %4489 = vmatmul.mubr.f32.gmra.mrb[66].mxu1 %v19480_v34  ;;  %14932 = vmatprep.subr.bf16.mxu0 %v14931_v28  ;;  %v14945_v28 = vpack.c.bf16 %v11945_v3, %v11940_v4  ;;  %v14947_v37 = vpack.c.bf16 %v11956_v12, %v11951_v48  ;;  %v15013_v3 = vpack.c.bf16 %v11977_v41, %v11972_v33  ;;  %v11982_v48 = vld [vmem:[%s25434_s7 + $0xc40] sm:$0xff]  ;;  %v12015_v41 = vld [vmem:[%s25434_s7 + $0xd48] sm:$0xff] }
 0x45a   : > { %14988 = vmatprep.subr.bf16.mxu1 %v14987_v40  ;;  %11866 = vmatprep.mubr.msk.f32.mxu0 %vm3888_vm9, %v19522_v16  ;;  %v11950_v40 = vld [vmem:[%s25434_s7 + $0xb40] sm:$0xff] }
 0x45b   : > { %11879 = vmatprep.mubr.msk.f32.mxu1 %vm3888_vm9, %v19522_v16  ;;  %14934 = vmatpush1.bf16.msra.mxu0 %v14933_v14  ;;  %v15003_v14 = vpack.c.bf16 %v11958_v22, %v11953_v19  ;;  %v14949_v18 = vpack.c.bf16 %v11955_v29, %v11950_v40  ;;  %v11987_v19 = vld [vmem:[%s25434_s7 + $0xc68] sm:$0xff] }
 0x45c   : > { %14990 = vmatpush1.bf16.msra.mxu1 %v14989_v13  ;;  %4308 = vmatmul.mubr.f32.gmra.mrb[58].mxu0 %v19517_v60  ;;  %v11966_v13 = vld [vmem:[%s25434_s7 + $0xbc0] sm:$0xff]  ;;  %v11991_v22 = vld [vmem:[%s25434_s7 + $0xc88] sm:$0xff]  ;;  %v15017_v29 = vpack.c.bf16 %v11987_v19, %v11982_v48  ;;  %v12053_v48 = vld [vmem:[%s25434_s7 + $0xdd8] sm:$0xff] }
 0x45d   : > { %4494 = vmatmul.mubr.f32.gmra.mrb[68].mxu1 %v19517_v60  ;;  %14936 = vmatprep.subr.bf16.mxu0 %v14935_v6  ;;  %v15005_v6 = vpack.c.bf16 %v11957_v56, %v11952_v8  ;;  %v14951_v21 = vpack.c.bf16 %v11966_v13, %v11961_v46  ;;  %v11995_v56 = vld [vmem:[%s25434_s7 + $0xca8] sm:$0xff]  ;;  %v11992_v46 = vld [vmem:[%s25434_s7 + $0xc90] sm:$0xff] }
 0x45e   : > { %14992 = vmatprep.subr.bf16.mxu1 %v14991_v53  ;;  %12027 = vmatprep.mubr.msk.f32.mxu0 %vm3888_vm9, %v20261_v24  ;;  %v11962_v53 = vld [vmem:[%s25434_s7 + $0xba0] sm:$0xff]  ;;  %v15021_v47 = vpack.c.bf16 %v11997_v26, %v11992_v46  ;;  %v11884_v19 = vld [vmem:[%s25434_s7 + $0x930] sm:$0xff]  ;;  %v4651_v46 = vrot.slane %v19443_v54, 2  ;;  %v12063_v26 = vld [vmem:[%s25434_s7 + $0xe28] sm:$0xff] }
 0x45f   : > { %14938 = vmatpush1.bf16.msra.mxu0 %v14937_v52  ;;  %12034 = vmatprep.mubr.msk.f32.mxu1 %vm3888_vm9, %v20261_v24  ;;  %v11971_v52 = vld [vmem:[%s25434_s7 + $0xbe8] sm:$0xff]  ;;  %v15009_v59 = vpack.c.bf16 %v11967_v50, %v11962_v53  ;;  %v12005_v50 = vld [vmem:[%s25434_s7 + $0xcf8] sm:$0xff] }
 0x460   : > { %14994 = vmatpush1.bf16.msra.mxu1 %v14993_v55  ;;  %14940 = vmatprep.subr.bf16.mxu0 %v14939_v63  ;;  %v11973_v55 = vld [vmem:[%s25434_s7 + $0xbf8] sm:$0xff]  ;;  %v11978_v63 = vld [vmem:[%s25434_s7 + $0xc20] sm:$0xff]  ;;  %v14955_v23 = vpack.c.bf16 %v11976_v15, %v11971_v52 }
 0x461   : > { %14996 = vmatprep.subr.bf16.mxu1 %v14995_v11  ;;  %v11970_v11 = vld [vmem:[%s25434_s7 + $0xbe0] sm:$0xff]  ;;  %v15011_v36 = vpack.c.bf16 %v11978_v63, %v11973_v55  ;;  %v12007_v55 = vld [vmem:[%s25434_s7 + $0xd08] sm:$0xff] }
 0x462   : > { %v14957_v4 = vpack.c.bf16 %v11975_v17, %v11970_v11  ;;  %v12002_v52 = vld [vmem:[%s25434_s7 + $0xce0] sm:$0xff]  ;;  %v12011_v63 = vld [vmem:[%s25434_s7 + $0xd28] sm:$0xff] }
 0x463   : > { %14942 = vmatpush1.bf16.msra.mxu0 %v14941_v39  ;;  %v11986_v39 = vld [vmem:[%s25434_s7 + $0xc60] sm:$0xff]  ;;  %v15025_v17 = vpack.c.bf16 %v12007_v55, %v12002_v52  ;;  %v4655_v52 = vrot.slane %v19480_v34, 2  ;;  %v12073_v55 = vld [vmem:[%s25434_s7 + $0xe78] sm:$0xff] }
 0x464   : > { %14998 = vmatpush1.bf16.msra.mxu1 %v14997_v2  ;;  %14944 = vmatprep.subr.bf16.mxu0 %v14943_v38  ;;  %v11983_v2 = vld [vmem:[%s25434_s7 + $0xc48] sm:$0xff]  ;;  %v11988_v38 = vld [vmem:[%s25434_s7 + $0xc70] sm:$0xff]  ;;  %v14959_v43 = vpack.c.bf16 %v11986_v39, %v11981_v51 }
 0x465   : > { %15000 = vmatprep.subr.bf16.mxu1 %v14999_v10  ;;  %v11980_v10 = vld [vmem:[%s25434_s7 + $0xc30] sm:$0xff]  ;;  %v15015_v12 = vpack.c.bf16 %v11988_v38, %v11983_v2  ;;  %v12017_v2 = vld [vmem:[%s25434_s7 + $0xd58] sm:$0xff] }
 0x466   : > { %v14961_v40 = vpack.c.bf16 %v11985_v20, %v11980_v10  ;;  %v12012_v39 = vld [vmem:[%s25434_s7 + $0xd30] sm:$0xff]  ;;  %v4646_v10 = vrot.slane %v19418_v62, 2 }
 0x467   : > { %14946 = vmatpush1.bf16.msra.mxu0 %v14945_v28  ;;  %v11996_v28 = vld [vmem:[%s25434_s7 + $0xcb0] sm:$0xff] }
 0x468   : > { %15002 = vmatpush1.bf16.msra.mxu1 %v15001_v44  ;;  %14948 = vmatprep.subr.bf16.mxu0 %v14947_v37  ;;  %v11993_v44 = vld [vmem:[%s25434_s7 + $0xc98] sm:$0xff]  ;;  %v11998_v37 = vld [vmem:[%s25434_s7 + $0xcc0] sm:$0xff]  ;;  %v14963_v8 = vpack.c.bf16 %v11996_v28, %v11991_v22  ;;  %v12048_v20 = vld [vmem:[%s25434_s7 + $0xdb0] sm:$0xff] }
 0x469   : > { %15004 = vmatprep.subr.bf16.mxu1 %v15003_v14  ;;  %v11990_v14 = vld [vmem:[%s25434_s7 + $0xc80] sm:$0xff]  ;;  %v15019_v13 = vpack.c.bf16 %v11998_v37, %v11993_v44  ;;  %v11889_v22 = vld [vmem:[%s25434_s7 + $0x958] sm:$0xff]  ;;  %v4645_v44 = vrot.slane %v19414_v35, 2  ;;  %v4653_v37 = vrot.slane %v19449_v1, 2 }
 0x46a   : > { %v14965_v45 = vpack.c.bf16 %v11995_v56, %v11990_v14  ;;  %v12022_v28 = vld [vmem:[%s25434_s7 + $0xd80] sm:$0xf]  ;;  %v15032_v56 = vpack.c.bf16 %v11889_v22, %v11884_v19 }
 0x46b   : > { %14950 = vmatpush1.bf16.msra.mxu0 %v14949_v18  ;;  %v12006_v18 = vld [vmem:[%s25434_s7 + $0xd00] sm:$0xff]  ;;  %v20499_v14 = vsel %vm1303_vm0, %v4645_v44, %v4646_v10  ;;  %v12093_v44 = vld [vmem:[%s25434_s7 + $0xf18] sm:$0xff] }
 0x46c   : > { %15006 = vmatpush1.bf16.msra.mxu1 %v15005_v6  ;;  %14952 = vmatprep.subr.bf16.mxu0 %v14951_v21  ;;  %v12003_v6 = vld [vmem:[%s25434_s7 + $0xce8] sm:$0xff]  ;;  %v12008_v21 = vld [vmem:[%s25434_s7 + $0xd10] sm:$0xff]  ;;  %v14967_v53 = vpack.c.bf16 %v12006_v18, %v12001_v58  ;;  %v11894_v18 = vld [vmem:[%s25434_s7 + $0x980] sm:$0xff] }
 0x46d   : > { %15008 = vmatprep.subr.bf16.mxu1 %v15007_v49  ;;  %v12000_v49 = vld [vmem:[%s25434_s7 + $0xcd0] sm:$0xff]  ;;  %v15023_v15 = vpack.c.bf16 %v12008_v21, %v12003_v6  ;;  %v11899_v6 = vld [vmem:[%s25434_s7 + $0x9a8] sm:$0xff]  ;;  %v20521_v21 = vsel %vm1303_vm0, %v4649_v61, %v4653_v37  ;;  %v20535_v61 = vsel %vm1303_vm0, %v4646_v10, %v4651_v46 }
 0x46e   : > { %v14969_v11 = vpack.c.bf16 %v12005_v50, %v12000_v49  ;;  %v15035_v50 = vpack.c.bf16 %v11899_v6, %v11894_v18 }
 0x46f   : > { %14954 = vmatpush1.bf16.msra.mxu0 %v14953_v9  ;;  %v12016_v9 = vld [vmem:[%s25434_s7 + $0xd50] sm:$0xff] }
 0x470   : > { %15010 = vmatpush1.bf16.msra.mxu1 %v15009_v59  ;;  %14956 = vmatprep.subr.bf16.mxu0 %v14955_v23  ;;  %v12013_v59 = vld [vmem:[%s25434_s7 + $0xd38] sm:$0xff]  ;;  %v12018_v23 = vld [vmem:[%s25434_s7 + $0xd60] sm:$0xff]  ;;  %v14971_v33 = vpack.c.bf16 %v12016_v9, %v12011_v63  ;;  %v11904_v9 = vld [vmem:[%s25434_s7 + $0x9d0] sm:$0xff] }
 0x471   : > { %15012 = vmatprep.subr.bf16.mxu1 %v15011_v36  ;;  %v12010_v36 = vld [vmem:[%s25434_s7 + $0xd20] sm:$0xff]  ;;  %v15027_v51 = vpack.c.bf16 %v12018_v23, %v12013_v59  ;;  %v11909_v59 = vld [vmem:[%s25434_s7 + $0x9f8] sm:$0xff] }
 0x472   : > { %v14973_v38 = vpack.c.bf16 %v12015_v41, %v12010_v36  ;;  %v20570_v41 = vsel %vm1303_vm0, %v4651_v46, %v4655_v52 }
 0x473   : > { %14958 = vmatpush1.bf16.msra.mxu0 %v14957_v4  ;;  %v15029_v4 = vpack.c.bf16 %v12017_v2, %v12012_v39  ;;  %v20573_v39 = vrot.slane %v19517_v60, 2  ;;  %v12078_v2 = vld [vmem:[%s25434_s7 + $0xea0] sm:$0xff] }
 0x474   : > { %15014 = vmatpush1.bf16.msra.mxu1 %v15013_v3  ;;  %14960 = vmatprep.subr.bf16.mxu0 %v14959_v43  ;;  %v12021_v3 = vld [vmem:[%s25434_s7 + $0xd78] sm:$0xf]  ;;  %v12023_v43 = vld [vmem:[%s25434_s7 + $0xd88] sm:$0xf] }
 0x475   : > { %15016 = vmatprep.subr.bf16.mxu1 %v15015_v12  ;;  %v12020_v12 = vld [vmem:[%s25434_s7 + $0xd70] sm:$0xf]  ;;  %v20606_v19 = vsel %vm1303_vm0, %v4655_v52, %v20573_v39  ;;  %v12102_v52 = vld [vmem:[%s25434_s7 + $0xf60] sm:$0xff] }
 0x477   : > { %14962 = vmatpush1.bf16.msra.mxu0 %v14961_v40  ;;  %v12047_v40 = vld [vmem:[%s25434_s7 + $0xda8] sm:$0xff] }
 0x478   : > { %15018 = vmatpush1.bf16.msra.mxu1 %v15017_v29  ;;  %14964 = vmatprep.subr.bf16.mxu0 %v14963_v8  ;;  %v12052_v29 = vld [vmem:[%s25434_s7 + $0xdd0] sm:$0xff]  ;;  %v15129_v8 = vpack.c.bf16 %v12053_v48, %v12048_v20  ;;  %v12077_v20 = vld [vmem:[%s25434_s7 + $0xe98] sm:$0xff]  ;;  %v12082_v48 = vld [vmem:[%s25434_s7 + $0xec0] sm:$0xff] }
 0x479   : > { %15020 = vmatprep.subr.bf16.mxu1 %v15019_v13  ;;  %v12058_v13 = vld [vmem:[%s25434_s7 + $0xe00] sm:$0xff]  ;;  %v15131_v58 = vpack.c.bf16 %v12052_v29, %v12047_v40  ;;  %v11924_v40 = vld [vmem:[%s25434_s7 + $0xa70] sm:$0xff]  ;;  %v11929_v29 = vld [vmem:[%s25434_s7 + $0xa98] sm:$0xff] }
 0x47a   : > { %v15133_v49 = vpack.c.bf16 %v12063_v26, %v12058_v13  ;;  %v5148_v13 = vrot.slane %v19423_v0, 3  ;;  %v12098_v26 = vld [vmem:[%s25434_s7 + $0xf40] sm:$0xff]  ;;  %v15044_v18 = vpack.c.bf16 %v11929_v29, %v11924_v40  ;;  %v11964_v29 = vld [vmem:[%s25434_s7 + $0xbb0] sm:$0xff] }
 0x47b   : > { %14966 = vmatpush1.bf16.msra.mxu0 %v14965_v45  ;;  %v4657_v45 = vrot.slane %v19485_v42, 2 }
 0x47c   : > { %15022 = vmatpush1.bf16.msra.mxu1 %v15021_v47  ;;  %14968 = vmatprep.subr.bf16.mxu0 %v14967_v53  ;;  %v12057_v47 = vld [vmem:[%s25434_s7 + $0xdf8] sm:$0xff]  ;;  %v12062_v53 = vld [vmem:[%s25434_s7 + $0xe20] sm:$0xff] }
 0x47d   : > { %15024 = vmatprep.subr.bf16.mxu1 %v15023_v15  ;;  %v12068_v15 = vld [vmem:[%s25434_s7 + $0xe50] sm:$0xff]  ;;  %v15135_v63 = vpack.c.bf16 %v12062_v53, %v12057_v47  ;;  %v20554_v23 = vsel %vm1303_vm0, %v4653_v37, %v4657_v45  ;;  %v15143_v37 = vpack.c.bf16 %v12082_v48, %v12077_v20  ;;  %v11934_v47 = vld [vmem:[%s25434_s7 + $0xac0] sm:$0xff]  ;;  %v11939_v53 = vld [vmem:[%s25434_s7 + $0xae8] sm:$0xff] }
 0x47e   : > { %v15137_v36 = vpack.c.bf16 %v12073_v55, %v12068_v15  ;;  %v12108_v55 = vld [vmem:[%s25434_s7 + $0xf90] sm:$0xff]  ;;  %v11959_v20 = vld [vmem:[%s25434_s7 + $0xb88] sm:$0xff] }
 0x47f   : > { %14970 = vmatpush1.bf16.msra.mxu0 %v14969_v11  ;;  %v20557_v11 = vrot.slane %v19522_v16, 2 }
 0x480   : > { %15026 = vmatpush1.bf16.msra.mxu1 %v15025_v17  ;;  %14972 = vmatprep.subr.bf16.mxu0 %v14971_v33  ;;  %v12067_v17 = vld [vmem:[%s25434_s7 + $0xe48] sm:$0xff]  ;;  %v12072_v33 = vld [vmem:[%s25434_s7 + $0xe70] sm:$0xff] }
 0x481   : > { %15028 = vmatprep.subr.bf16.mxu1 %v15027_v51  ;;  %v15038_v51 = vpack.c.bf16 %v11909_v59, %v11904_v9  ;;  %v20592_v10 = vsel %vm1303_vm0, %v4657_v45, %v20557_v11  ;;  %v5147_v45 = vrot.slane %v19416_v57, 3  ;;  %v15047_v9 = vpack.c.bf16 %v11939_v53, %v11934_v47  ;;  %v11944_v59 = vld [vmem:[%s25434_s7 + $0xb10] sm:$0xff]  ;;  %v11974_v47 = vld [vmem:[%s25434_s7 + $0xc00] sm:$0xff]  ;;  %v11979_v53 = vld [vmem:[%s25434_s7 + $0xc28] sm:$0xff] }
 0x482   : > { %vm11234_vm0 = vcmask 687104  }
 0x483   : > { %14974 = vmatpush1.bf16.msra.mxu0 %v14973_v38  ;;  %v12083_v38 = vld [vmem:[%s25434_s7 + $0xec8] sm:$0xff]  ;;  %v20661_v15 = vsel %vm1674_vm3, %v5147_v45, %v5148_v13 }
 0x484   : > { %15030 = vmatpush1.bf16.msra.mxu1 %v15029_v4  ;;  %12025 = vmatprep.subr.msk.mxu0 %vm2045_vm4, %v12021_v3  ;;  %v15139_v4 = vpack.c.bf16 %v12072_v33, %v12067_v17  ;;  %v11914_v3 = vld [vmem:[%s25434_s7 + $0xa20] sm:$0xff]  ;;  %v11949_v17 = vld [vmem:[%s25434_s7 + $0xb38] sm:$0xff] }
 0x485   : > { %12032 = vmatprep.subr.msk.mxu1 %vm2045_vm4, %v12023_v43  ;;  %v11919_v43 = vld [vmem:[%s25434_s7 + $0xa48] sm:$0xff] }
 0x486   : > { %v15041_v22 = vpack.c.bf16 %v11919_v43, %v11914_v3  ;;  %v11954_v43 = vld [vmem:[%s25434_s7 + $0xb60] sm:$0xff] }
 0x487   : > { %12026 = vmatpush1.msk.msra.mxu0 %vm2045_vm4, %v12020_v12  ;;  %v15141_v12 = vpack.c.bf16 %v12083_v38, %v12078_v2  ;;  %v12118_v2 = vld [vmem:[%s25434_s7 + $0xfe0] sm:$0xff]  ;;  %v12123_v38 = vld [vmem:[%s25434_s7 + $0x1008] sm:$0xff] }
 0x488   : > { %12033 = vmatpush1.msk.msra.mxu1 %vm2045_vm4, %v12022_v28  ;;  %4758 = vmatmul.mubr.f32.vlgmr.msra.gmra.mrb[50].mxu0 %v20499_v14  ;;  %v12088_v28 = vld [vmem:[%s25434_s7 + $0xef0] sm:$0xff]  ;;  %v15157_v48 = vpack.c.bf16 %v12123_v38, %v12118_v2  ;;  %v12158_v2 = vld [vmem:[%s25434_s7 + $0x1120] sm:$0xff]  ;;  %v12163_v38 = vld [vmem:[%s25434_s7 + $0x1148] sm:$0xff] }
 0x489   : > { %4853 = vmatmul.mubr.f32.vlgmr.msra.gmra.mrb[50].mxu1 %v20499_v14  ;;  %15031 = vmatprep.subr.bf16.mxu0 %v16916_v5  ;;  %v15145_v46 = vpack.c.bf16 %v12093_v44, %v12088_v28  ;;  %v12128_v28 = vld [vmem:[%s25434_s7 + $0x1030] sm:$0xff]  ;;  %v12133_v44 = vld [vmem:[%s25434_s7 + $0x1058] sm:$0xff] }
 0x48a   : > { %15130 = vmatprep.subr.bf16.mxu1 %v15129_v8  ;;  %12028 = vmatprep.mubr.msk.f32.mxu0 %vm3888_vm9, %v20521_v21  ;;  %v12087_v8 = vld [vmem:[%s25434_s7 + $0xee8] sm:$0xff] }
 0x48b   : > { %12035 = vmatprep.mubr.msk.f32.mxu1 %vm3888_vm9, %v20521_v21  ;;  %15033 = vmatpush1.bf16.msra.mxu0 %v15032_v56  ;;  %v12092_v56 = vld [vmem:[%s25434_s7 + $0xf10] sm:$0xff] }
 0x48c   : > { %15132 = vmatpush1.bf16.msra.mxu1 %v15131_v58  ;;  %4764 = vmatmul.mubr.f32.gmra.mrb[52].mxu0 %v20535_v61  ;;  %v12103_v58 = vld [vmem:[%s25434_s7 + $0xf68] sm:$0xff]  ;;  %v15147_v6 = vpack.c.bf16 %v12092_v56, %v12087_v8  ;;  %v11969_v8 = vld [vmem:[%s25434_s7 + $0xbd8] sm:$0xff]  ;;  %v15161_v56 = vpack.c.bf16 %v12133_v44, %v12128_v28  ;;  %v12168_v28 = vld [vmem:[%s25434_s7 + $0x1170] sm:$0xff] }
 0x48d   : > { %4859 = vmatmul.mubr.f32.gmra.mrb[52].mxu1 %v20535_v61  ;;  %15034 = vmatprep.subr.bf16.mxu0 %v16916_v5  ;;  %v12173_v44 = vld [vmem:[%s25434_s7 + $0x1198] sm:$0xff] }
 0x48e   : > { %15134 = vmatprep.subr.bf16.mxu1 %v15133_v49  ;;  %12029 = vmatprep.mubr.msk.f32.mxu0 %vm3888_vm9, %v20554_v23  ;;  %v15149_v49 = vpack.c.bf16 %v12103_v58, %v12098_v26  ;;  %v12132_v26 = vld [vmem:[%s25434_s7 + $0x1050] sm:$0xff]  ;;  %v12138_v58 = vld [vmem:[%s25434_s7 + $0x1080] sm:$0xff] }
 0x48f   : > { %12036 = vmatprep.mubr.msk.f32.mxu1 %vm3888_vm9, %v20554_v23  ;;  %15036 = vmatpush1.bf16.msra.mxu0 %v15035_v50  ;;  %v12097_v50 = vld [vmem:[%s25434_s7 + $0xf38] sm:$0xff] }
 0x490   : > { %15136 = vmatpush1.bf16.msra.mxu1 %v15135_v63  ;;  %4770 = vmatmul.mubr.f32.gmra.mrb[54].mxu0 %v20570_v41  ;;  %v12113_v63 = vld [vmem:[%s25434_s7 + $0xfb8] sm:$0xff] }
 0x491   : > { %4865 = vmatmul.mubr.f32.gmra.mrb[54].mxu1 %v20570_v41  ;;  %15037 = vmatprep.subr.bf16.mxu0 %v16916_v5  ;;  %v15153_v33 = vpack.c.bf16 %v12113_v63, %v12108_v55  ;;  %v12148_v55 = vld [vmem:[%s25434_s7 + $0x10d0] sm:$0xff]  ;;  %v12153_v63 = vld [vmem:[%s25434_s7 + $0x10f8] sm:$0xff] }
 0x492   : > { %15138 = vmatprep.subr.bf16.mxu1 %v15137_v36  ;;  %12030 = vmatprep.mubr.msk.f32.mxu0 %vm3888_vm9, %v20592_v10  ;;  %v12107_v36 = vld [vmem:[%s25434_s7 + $0xf88] sm:$0xff] }
 0x493   : > { %12037 = vmatprep.mubr.msk.f32.mxu1 %vm3888_vm9, %v20592_v10  ;;  %15039 = vmatpush1.bf16.msra.mxu0 %v15038_v51  ;;  %v12112_v51 = vld [vmem:[%s25434_s7 + $0xfb0] sm:$0xff] }
 0x494   : > { %15140 = vmatpush1.bf16.msra.mxu1 %v15139_v4  ;;  %4776 = vmatmul.mubr.f32.gmra.mrb[56].mxu0 %v20606_v19  ;;  %v15050_v4 = vpack.c.bf16 %v11949_v17, %v11944_v59  ;;  %v15155_v3 = vpack.c.bf16 %v12112_v51, %v12107_v36  ;;  %v11984_v59 = vld [vmem:[%s25434_s7 + $0xc50] sm:$0xff]  ;;  %v11989_v17 = vld [vmem:[%s25434_s7 + $0xc78] sm:$0xff]  ;;  %v12147_v36 = vld [vmem:[%s25434_s7 + $0x10c8] sm:$0xff] }
 0x495   : > { %4871 = vmatmul.mubr.f32.gmra.mrb[56].mxu1 %v20606_v19  ;;  %15040 = vmatprep.subr.bf16.mxu0 %v16916_v5  ;;  %v12152_v51 = vld [vmem:[%s25434_s7 + $0x10f0] sm:$0xff] }
 0x496   : > { %15142 = vmatprep.subr.bf16.mxu1 %v15141_v12  ;;  %12031 = vmatprep.mubr.msk.f32.mxu0 %vm3888_vm9, %v20557_v11  ;;  %v12117_v12 = vld [vmem:[%s25434_s7 + $0xfd8] sm:$0xff] }
 0x497   : > { %12038 = vmatprep.mubr.msk.f32.mxu1 %vm3888_vm9, %v20557_v11  ;;  %15042 = vmatpush1.bf16.msra.mxu0 %v15041_v22  ;;  %v12122_v22 = vld [vmem:[%s25434_s7 + $0x1000] sm:$0xff] }
 0x498   : > { %15144 = vmatpush1.bf16.msra.mxu1 %v15143_v37  ;;  %4782 = vmatmul.mubr.f32.gmra.mrb[58].mxu0 %v20573_v39  ;;  %v15053_v37 = vpack.c.bf16 %v11959_v20, %v11954_v43  ;;  %v15159_v40 = vpack.c.bf16 %v12122_v22, %v12117_v12  ;;  %v11994_v43 = vld [vmem:[%s25434_s7 + $0xca0] sm:$0xff]  ;;  %v11999_v20 = vld [vmem:[%s25434_s7 + $0xcc8] sm:$0xff]  ;;  %v12157_v12 = vld [vmem:[%s25434_s7 + $0x1118] sm:$0xff] }
 0x499   : > { %4877 = vmatmul.mubr.f32.gmra.mrb[58].mxu1 %v20573_v39  ;;  %15043 = vmatprep.subr.bf16.mxu0 %v16916_v5  ;;  %v12162_v22 = vld [vmem:[%s25434_s7 + $0x1140] sm:$0xff] }
 0x49a   : > { %15146 = vmatprep.subr.bf16.mxu1 %v15145_v46  ;;  %12040 = vmatprep.mubr.msk.f32.mxu0 %vm3888_vm9, %v20261_v24  ;;  %v15151_v24 = vpack.c.bf16 %v12102_v52, %v12097_v50  ;;  %v12127_v46 = vld [vmem:[%s25434_s7 + $0x1028] sm:$0xff]  ;;  %v12137_v50 = vld [vmem:[%s25434_s7 + $0x1078] sm:$0xff]  ;;  %v12142_v52 = vld [vmem:[%s25434_s7 + $0x10a0] sm:$0xff] }
 0x49b   : > { %15045 = vmatpush1.bf16.msra.mxu0 %v15044_v18  ;;  %12199 = vmatprep.mubr.msk.f32.mxu1 %vm3888_vm9, %v20661_v15  ;;  %v12143_v18 = vld [vmem:[%s25434_s7 + $0x10a8] sm:$0xff]  ;;  %v15163_v45 = vpack.c.bf16 %v12132_v26, %v12127_v46  ;;  %v12172_v26 = vld [vmem:[%s25434_s7 + $0x1190] sm:$0xff] }
 0x49c   : > { %15148 = vmatpush1.bf16.msra.mxu1 %v15147_v6  ;;  %15046 = vmatprep.subr.bf16.mxu0 %v16916_v5  ;;  %v15056_v6 = vpack.c.bf16 %v11969_v8, %v11964_v29  ;;  %v12004_v29 = vld [vmem:[%s25434_s7 + $0xcf0] sm:$0xff]  ;;  %v12009_v8 = vld [vmem:[%s25434_s7 + $0xd18] sm:$0xff]  ;;  %v12167_v46 = vld [vmem:[%s25434_s7 + $0x1168] sm:$0xff] }
 0x49d   : > { %15150 = vmatprep.subr.bf16.mxu1 %v15149_v49  ;;  %v15165_v49 = vpack.c.bf16 %v12143_v18, %v12138_v58  ;;  %v12178_v58 = vld [vmem:[%s25434_s7 + $0x11c0] sm:$0xff]  ;;  %v12183_v18 = vld [vmem:[%s25434_s7 + $0x11e8] sm:$0xff] }
 0x49f   : > { %15048 = vmatpush1.bf16.msra.mxu0 %v15047_v9  ;;  %v15059_v9 = vpack.c.bf16 %v11979_v53, %v11974_v47  ;;  %v12014_v47 = vld [vmem:[%s25434_s7 + $0xd40] sm:$0xff]  ;;  %v12019_v53 = vld [vmem:[%s25434_s7 + $0xd68] sm:$0xff] }
 0x4a0   : > { %15152 = vmatpush1.bf16.msra.mxu1 %v15151_v24  ;;  %15049 = vmatprep.subr.bf16.mxu0 %v16916_v5  ;;  %v15167_v24 = vpack.c.bf16 %v12142_v52, %v12137_v50  ;;  %v12177_v50 = vld [vmem:[%s25434_s7 + $0x11b8] sm:$0xff]  ;;  %v12182_v52 = vld [vmem:[%s25434_s7 + $0x11e0] sm:$0xff] }
 0x4a1   : > { %15154 = vmatprep.subr.bf16.mxu1 %v15153_v33  ;;  %v15169_v33 = vpack.c.bf16 %v12153_v63, %v12148_v55  ;;  %v15071_v55 = vpack.c.bf16 %v12019_v53, %v12014_v47  ;;  %v15183_v63 = vpack.c.bf16 %v12182_v52, %v12177_v50  ;;  %v12065_v47 = vld [vmem:[%s25434_s7 + $0xe38] sm:$0xff]  ;;  %v12070_v53 = vld [vmem:[%s25434_s7 + $0xe60] sm:$0xff] }
 0x4a2   : > { %v12074_v50 = vld [vmem:[%s25434_s7 + $0xe80] sm:$0xff] }
 0x4a3   : > { %15051 = vmatpush1.bf16.msra.mxu0 %v15050_v4  ;;  %v15062_v4 = vpack.c.bf16 %v11989_v17, %v11984_v59  ;;  %v12051_v59 = vld [vmem:[%s25434_s7 + $0xdc8] sm:$0xff]  ;;  %v12024_v17 = vld [vmem:[%s25434_s7 + $0xd90] sm:$0xf] }
 0x4a4   : > { %15156 = vmatpush1.bf16.msra.mxu1 %v15155_v3  ;;  %15052 = vmatprep.subr.bf16.mxu0 %v16916_v5  ;;  %v15171_v3 = vpack.c.bf16 %v12152_v51, %v12147_v36  ;;  %v12045_v36 = vld [vmem:[%s25434_s7 + $0xd98] sm:$0xff]  ;;  %v12050_v51 = vld [vmem:[%s25434_s7 + $0xdc0] sm:$0xff] }
 0x4a5   : > { %15158 = vmatprep.subr.bf16.mxu1 %v15157_v48  ;;  %v15173_v48 = vpack.c.bf16 %v12163_v38, %v12158_v2  ;;  %v12187_v2 = vld [vmem:[%s25434_s7 + $0x1208] sm:$0xf] }
 0x4a7   : > { %15054 = vmatpush1.bf16.msra.mxu0 %v15053_v37  ;;  %v15065_v37 = vpack.c.bf16 %v11999_v20, %v11994_v43  ;;  %v5144_v43 = vrot.slane %v19414_v35, 3  ;;  %v5152_v20 = vrot.slane %v19449_v1, 3 }
 0x4a8   : > { %15160 = vmatpush1.bf16.msra.mxu1 %v15159_v40  ;;  %15055 = vmatprep.subr.bf16.mxu0 %v16916_v5  ;;  %v15175_v40 = vpack.c.bf16 %v12162_v22, %v12157_v12  ;;  %v12061_v12 = vld [vmem:[%s25434_s7 + $0xe18] sm:$0xff]  ;;  %v15075_v22 = vpack.c.bf16 %v12050_v51, %v12045_v36  ;;  %v12080_v36 = vld [vmem:[%s25434_s7 + $0xeb0] sm:$0xff] }
 0x4a9   : > { %15162 = vmatprep.subr.bf16.mxu1 %v15161_v56  ;;  %v15177_v56 = vpack.c.bf16 %v12173_v44, %v12168_v28 }
 0x4ab   : > { %15057 = vmatpush1.bf16.msra.mxu0 %v15056_v6  ;;  %v15068_v6 = vpack.c.bf16 %v12009_v8, %v12004_v29  ;;  %v12060_v29 = vld [vmem:[%s25434_s7 + $0xe10] sm:$0xff] }
 0x4ac   : > { %15164 = vmatpush1.bf16.msra.mxu1 %v15163_v45  ;;  %15058 = vmatprep.subr.bf16.mxu0 %v16916_v5  ;;  %v15179_v45 = vpack.c.bf16 %v12172_v26, %v12167_v46  ;;  %v20882_v46 = vsel %vm1674_vm3, %v5148_v13, %v5152_v20  ;;  %v5156_v26 = vrot.slane %v19485_v42, 3 }
 0x4ad   : > { %15166 = vmatprep.subr.bf16.mxu1 %v15165_v49  ;;  %v15181_v49 = vpack.c.bf16 %v12183_v18, %v12178_v58  ;;  %v12066_v58 = vld [vmem:[%s25434_s7 + $0xe40] sm:$0xff]  ;;  %v12071_v18 = vld [vmem:[%s25434_s7 + $0xe68] sm:$0xff] }
 0x4ae   : > { %v20915_v52 = vsel %vm1674_vm3, %v5152_v20, %v5156_v26 }
 0x4af   : > { %15060 = vmatpush1.bf16.msra.mxu0 %v15059_v9  ;;  %v12188_v9 = vld [vmem:[%s25434_s7 + $0x1210] sm:$0xf] }
 0x4b0   : > { %15168 = vmatpush1.bf16.msra.mxu1 %v15167_v24  ;;  %15061 = vmatprep.subr.bf16.mxu0 %v16916_v5  ;;  %v12046_v24 = vld [vmem:[%s25434_s7 + $0xda0] sm:$0xff] }
 0x4b1   : > { %15170 = vmatprep.subr.bf16.mxu1 %v15169_v33  ;;  %v5145_v33 = vrot.slane %v19418_v62, 3  ;;  %v15073_v38 = vpack.c.bf16 %v12051_v59, %v12046_v24  ;;  %v15083_v24 = vpack.c.bf16 %v12070_v53, %v12065_v47  ;;  %v12105_v47 = vld [vmem:[%s25434_s7 + $0xf78] sm:$0xff]  ;;  %v12110_v53 = vld [vmem:[%s25434_s7 + $0xfa0] sm:$0xff] }
 0x4b3   : > { %15063 = vmatpush1.bf16.msra.mxu0 %v15062_v4  ;;  %v12049_v4 = vld [vmem:[%s25434_s7 + $0xdb8] sm:$0xff]  ;;  %v20860_v28 = vsel %vm1674_vm3, %v5144_v43, %v5145_v33 }
 0x4b4   : > { %15172 = vmatpush1.bf16.msra.mxu1 %v15171_v3  ;;  %15064 = vmatprep.subr.bf16.mxu0 %v16916_v5  ;;  %v12054_v3 = vld [vmem:[%s25434_s7 + $0xde0] sm:$0xff] }
 0x4b5   : > { %15174 = vmatprep.subr.bf16.mxu1 %v15173_v48  ;;  %v12056_v48 = vld [vmem:[%s25434_s7 + $0xdf0] sm:$0xff]  ;;  %v15186_v44 = vpack.c.bf16 %v12054_v3, %v12049_v4  ;;  %v12086_v4 = vld [vmem:[%s25434_s7 + $0xee0] sm:$0xff]  ;;  %v12091_v3 = vld [vmem:[%s25434_s7 + $0xf08] sm:$0xff] }
 0x4b6   : > { %v15077_v8 = vpack.c.bf16 %v12061_v12, %v12056_v48  ;;  %v12085_v48 = vld [vmem:[%s25434_s7 + $0xed8] sm:$0xff]  ;;  %v12090_v12 = vld [vmem:[%s25434_s7 + $0xf00] sm:$0xff] }
 0x4b7   : > { %15066 = vmatpush1.bf16.msra.mxu0 %v15065_v37  ;;  %v5150_v37 = vrot.slane %v19443_v54, 3 }
 0x4b8   : > { %15176 = vmatpush1.bf16.msra.mxu1 %v15175_v40  ;;  %15067 = vmatprep.subr.bf16.mxu0 %v16916_v5  ;;  %v12055_v40 = vld [vmem:[%s25434_s7 + $0xde8] sm:$0xff] }
 0x4b9   : > { %15178 = vmatprep.subr.bf16.mxu1 %v15177_v56  ;;  %v12064_v56 = vld [vmem:[%s25434_s7 + $0xe30] sm:$0xff]  ;;  %v20895_v13 = vsel %vm1674_vm3, %v5145_v33, %v5150_v37  ;;  %v12075_v33 = vld [vmem:[%s25434_s7 + $0xe88] sm:$0xff] }
 0x4ba   : > { %v15087_v43 = vpack.c.bf16 %v12080_v36, %v12075_v33  ;;  %v12120_v33 = vld [vmem:[%s25434_s7 + $0xff0] sm:$0xff]  ;;  %v12119_v36 = vld [vmem:[%s25434_s7 + $0xfe8] sm:$0xff] }
 0x4bb   : > { %15069 = vmatpush1.bf16.msra.mxu0 %v15068_v6 }
 0x4bc   : > { %15180 = vmatpush1.bf16.msra.mxu1 %v15179_v45  ;;  %15070 = vmatprep.subr.bf16.mxu0 %v16916_v5  ;;  %v5154_v45 = vrot.slane %v19480_v34, 3 }
 0x4bd   : > { %15182 = vmatprep.subr.bf16.mxu1 %v15181_v49  ;;  %v15081_v49 = vpack.c.bf16 %v12071_v18, %v12066_v58  ;;  %v12106_v58 = vld [vmem:[%s25434_s7 + $0xf80] sm:$0xff]  ;;  %v12111_v18 = vld [vmem:[%s25434_s7 + $0xfa8] sm:$0xff] }
 0x4bf   : > { %15072 = vmatpush1.bf16.msra.mxu0 %v15071_v55  ;;  %v20918_v55 = vrot.slane %v19522_v16, 3 }
 0x4c0   : > { %15184 = vmatpush1.bf16.msra.mxu1 %v15183_v63  ;;  %4939 = vmatprep.subr.mxu0 %v16914_v7  ;;  %v12076_v63 = vld [vmem:[%s25434_s7 + $0xe90] sm:$0xff] }
 0x4c1   : > { %12197 = vmatprep.subr.msk.mxu1 %vm2045_vm4, %v12188_v9  ;;  %v12081_v9 = vld [vmem:[%s25434_s7 + $0xeb8] sm:$0xff] }
 0x4c2   : > { %v15085_v51 = vpack.c.bf16 %v12081_v9, %v12076_v63  ;;  %v15099_v63 = vpack.c.bf16 %v12110_v53, %v12105_v47  ;;  %v12145_v53 = vld [vmem:[%s25434_s7 + $0x10b8] sm:$0xff] }
 0x4c3   : > { %12039 = vmatpush1.msk.msra.mxu0 %vm2045_vm4, %v12024_v17  ;;  %v20933_v17 = vrot.slane %v19517_v60, 3 }
 0x4c4   : > { %12198 = vmatpush1.msk.msra.mxu1 %vm2045_vm4, %v12187_v2  ;;  %4948 = vmatmul.mubr.f32.vlgmr.msra.gmra.mrb[70].mxu0 %v20499_v14  ;;  %v12059_v14 = vld [vmem:[%s25434_s7 + $0xe08] sm:$0xff]  ;;  %v12084_v2 = vld [vmem:[%s25434_s7 + $0xed0] sm:$0xff] }
 0x4c5   : > { %15074 = vmatprep.subr.bf16.mxu0 %v15073_v38  ;;  %5352 = vmatmul.mubr.f32.vlgmr.msra.gmra.mrb[50].mxu1 %v20860_v28  ;;  %v15189_v6 = vpack.c.bf16 %v12064_v56, %v12059_v14  ;;  %v20953_v38 = vsel %vm1674_vm3, %v5156_v26, %v20918_v55  ;;  %v12095_v56 = vld [vmem:[%s25434_s7 + $0xf28] sm:$0xff]  ;;  %v12100_v26 = vld [vmem:[%s25434_s7 + $0xf50] sm:$0xff] }
 0x4c6   : > { %15185 = vmatprep.subr.bf16.mxu1 %v16916_v5  ;;  %12041 = vmatprep.mubr.msk.f32.mxu0 %vm3888_vm9, %v20521_v21  ;;  %v15079_v21 = vpack.c.bf16 %v12060_v29, %v12055_v40  ;;  %v12101_v40 = vld [vmem:[%s25434_s7 + $0xf58] sm:$0xff]  ;;  %v15091_v29 = vpack.c.bf16 %v12090_v12, %v12085_v48  ;;  %v12130_v48 = vld [vmem:[%s25434_s7 + $0x1040] sm:$0xff] }
 0x4c7   : > { %15076 = vmatpush1.bf16.msra.mxu0 %v15075_v22  ;;  %12200 = vmatprep.mubr.msk.f32.mxu1 %vm3888_vm9, %v20882_v46  ;;  %v12089_v22 = vld [vmem:[%s25434_s7 + $0xef8] sm:$0xff] }
 0x4c8   : > { %15187 = vmatpush1.bf16.msra.mxu1 %v15186_v44  ;;  %4953 = vmatmul.mubr.f32.gmra.mrb[72].mxu0 %v20535_v61  ;;  %v12069_v61 = vld [vmem:[%s25434_s7 + $0xe58] sm:$0xff]  ;;  %v12094_v44 = vld [vmem:[%s25434_s7 + $0xf20] sm:$0xff] }
 0x4c9   : > { %15078 = vmatprep.subr.bf16.mxu0 %v15077_v8  ;;  %5358 = vmatmul.mubr.f32.gmra.mrb[52].mxu1 %v20895_v13  ;;  %v15192_v59 = vpack.c.bf16 %v12074_v50, %v12069_v61  ;;  %v15198_v8 = vpack.c.bf16 %v12094_v44, %v12089_v22  ;;  %v12116_v61 = vld [vmem:[%s25434_s7 + $0xfd0] sm:$0xff]  ;;  %v12121_v50 = vld [vmem:[%s25434_s7 + $0xff8] sm:$0xff]  ;;  %v12134_v22 = vld [vmem:[%s25434_s7 + $0x1060] sm:$0xff] }
 0x4ca   : > { %15188 = vmatprep.subr.bf16.mxu1 %v16916_v5  ;;  %12042 = vmatprep.mubr.msk.f32.mxu0 %vm3888_vm9, %v20554_v23  ;;  %v20930_v23 = vsel %vm1674_vm3, %v5150_v37, %v5154_v45  ;;  %v12096_v37 = vld [vmem:[%s25434_s7 + $0xf30] sm:$0xff]  ;;  %v12129_v12 = vld [vmem:[%s25434_s7 + $0x1038] sm:$0xff] }
 0x4cb   : > { %15080 = vmatpush1.bf16.msra.mxu0 %v15079_v21  ;;  %12201 = vmatprep.mubr.msk.f32.mxu1 %vm3888_vm9, %v20915_v52  ;;  %v15093_v14 = vpack.c.bf16 %v12101_v40, %v12096_v37  ;;  %v15095_v21 = vpack.c.bf16 %v12100_v26, %v12095_v56  ;;  %v12141_v44 = vld [vmem:[%s25434_s7 + $0x1098] sm:$0xff]  ;;  %v15210_v40 = vpack.c.bf16 %v12134_v22, %v12129_v12  ;;  %v12140_v56 = vld [vmem:[%s25434_s7 + $0x1090] sm:$0xff]  ;;  %v12139_v26 = vld [vmem:[%s25434_s7 + $0x1088] sm:$0xff] }
 0x4cc   : > { %15190 = vmatpush1.bf16.msra.mxu1 %v15189_v6  ;;  %4958 = vmatmul.mubr.f32.gmra.mrb[74].mxu0 %v20570_v41  ;;  %v12079_v41 = vld [vmem:[%s25434_s7 + $0xea8] sm:$0xff] }
 0x4cd   : > { %15082 = vmatprep.subr.bf16.mxu0 %v15081_v49  ;;  %5364 = vmatmul.mubr.f32.gmra.mrb[54].mxu1 %v20930_v23  ;;  %v15195_v20 = vpack.c.bf16 %v12084_v2, %v12079_v41  ;;  %v12109_v49 = vld [vmem:[%s25434_s7 + $0xf98] sm:$0xff]  ;;  %v12126_v41 = vld [vmem:[%s25434_s7 + $0x1020] sm:$0xff]  ;;  %v12131_v2 = vld [vmem:[%s25434_s7 + $0x1048] sm:$0xff] }
 0x4ce   : > { %15191 = vmatprep.subr.bf16.mxu1 %v16916_v5  ;;  %12043 = vmatprep.mubr.msk.f32.mxu0 %vm3888_vm9, %v20592_v10  ;;  %v20966_v10 = vsel %vm1674_vm3, %v5154_v45, %v20933_v17  ;;  %v15097_v45 = vpack.c.bf16 %v12111_v18, %v12106_v58  ;;  %v12146_v58 = vld [vmem:[%s25434_s7 + $0x10c0] sm:$0xff]  ;;  %v12151_v18 = vld [vmem:[%s25434_s7 + $0x10e8] sm:$0xff] }
 0x4cf   : > { %15084 = vmatpush1.bf16.msra.mxu0 %v15083_v24  ;;  %12202 = vmatprep.mubr.msk.f32.mxu1 %vm3888_vm9, %v20953_v38  ;;  %v15101_v24 = vpack.c.bf16 %v12121_v50, %v12116_v61  ;;  %v12154_v61 = vld [vmem:[%s25434_s7 + $0x1100] sm:$0xff] }
 0x4d0   : > { %15193 = vmatpush1.bf16.msra.mxu1 %v15192_v59  ;;  %4963 = vmatmul.mubr.f32.gmra.mrb[76].mxu0 %v20606_v19  ;;  %v15089_v19 = vpack.c.bf16 %v12091_v3, %v12086_v4  ;;  %v12115_v59 = vld [vmem:[%s25434_s7 + $0xfc8] sm:$0xff] }
 0x4d1   : > { %15086 = vmatprep.subr.bf16.mxu0 %v15085_v51  ;;  %5370 = vmatmul.mubr.f32.gmra.mrb[56].mxu1 %v20966_v10  ;;  %v12124_v51 = vld [vmem:[%s25434_s7 + $0x1010] sm:$0xff]  ;;  %v15103_v4 = vpack.c.bf16 %v12120_v33, %v12115_v59 }
 0x4d2   : > { %15194 = vmatprep.subr.bf16.mxu1 %v16916_v5  ;;  %12044 = vmatprep.mubr.msk.f32.mxu0 %vm3888_vm9, %v20557_v11  ;;  %v12099_v11 = vld [vmem:[%s25434_s7 + $0xf48] sm:$0xff]  ;;  %v15207_v3 = vpack.c.bf16 %v12124_v51, %v12119_v36 }
 0x4d3   : > { %15088 = vmatpush1.bf16.msra.mxu0 %v15087_v43  ;;  %12203 = vmatprep.mubr.msk.f32.mxu1 %vm3888_vm9, %v20918_v55  ;;  %v15105_v43 = vpack.c.bf16 %v12131_v2, %v12126_v41  ;;  %v12155_v51 = vld [vmem:[%s25434_s7 + $0x1108] sm:$0xff]  ;;  %v12160_v41 = vld [vmem:[%s25434_s7 + $0x1130] sm:$0xff] }
 0x4d4   : > { %15196 = vmatpush1.bf16.msra.mxu1 %v15195_v20  ;;  %4968 = vmatmul.mubr.f32.gmra.mrb[78].mxu0 %v20573_v39  ;;  %v12104_v39 = vld [vmem:[%s25434_s7 + $0xf70] sm:$0xff]  ;;  %v12125_v20 = vld [vmem:[%s25434_s7 + $0x1018] sm:$0xff]  ;;  %v12159_v2 = vld [vmem:[%s25434_s7 + $0x1128] sm:$0xff] }
 0x4d5   : > { %15090 = vmatprep.subr.bf16.mxu0 %v15089_v19  ;;  %5376 = vmatmul.mubr.f32.gmra.mrb[58].mxu1 %v20933_v17  ;;  %v15201_v6 = vpack.c.bf16 %v12104_v39, %v12099_v11  ;;  %v12136_v19 = vld [vmem:[%s25434_s7 + $0x1070] sm:$0xff]  ;;  %v15107_v37 = vpack.c.bf16 %v12130_v48, %v12125_v20  ;;  %v12171_v20 = vld [vmem:[%s25434_s7 + $0x1188] sm:$0xff]  ;;  %v15119_v48 = vpack.c.bf16 %v12160_v41, %v12155_v51  ;;  %v12210_v51 = vld [vmem:[%s25434_s7 + $0x1220] sm:$0xff] }
 0x4d6   : > { %15197 = vmatprep.subr.bf16.mxu1 %v16916_v5  ;;  %12192 = vmatprep.mubr.msk.f32.mxu0 %vm3888_vm9, %v20661_v15  ;;  %v12144_v11 = vld [vmem:[%s25434_s7 + $0x10b0] sm:$0xff]  ;;  %v12215_v41 = vld [vmem:[%s25434_s7 + $0x1248] sm:$0xff] }
 0x4d7   : > { %15092 = vmatpush1.bf16.msra.mxu0 %v15091_v29  ;;  %12205 = vmatprep.mubr.msk.f32.mxu1 %vm3888_vm9, %v20661_v15  ;;  %v12114_v15 = vld [vmem:[%s25434_s7 + $0xfc0] sm:$0xff]  ;;  %v15109_v29 = vpack.c.bf16 %v12141_v44, %v12136_v19  ;;  %v12165_v44 = vld [vmem:[%s25434_s7 + $0x1158] sm:$0xff] }
 0x4d8   : > { %15199 = vmatpush1.bf16.msra.mxu1 %v15198_v8  ;;  %15094 = vmatprep.subr.bf16.mxu0 %v15093_v14  ;;  %v15204_v9 = vpack.c.bf16 %v12114_v15, %v12109_v49  ;;  %v12135_v14 = vld [vmem:[%s25434_s7 + $0x1068] sm:$0xff]  ;;  %v12150_v49 = vld [vmem:[%s25434_s7 + $0x10e0] sm:$0xff]  ;;  %v12149_v15 = vld [vmem:[%s25434_s7 + $0x10d8] sm:$0xff] }
 0x4d9   : > { %15200 = vmatprep.subr.bf16.mxu1 %v16916_v5  ;;  %v15216_v59 = vpack.c.bf16 %v12154_v61, %v12149_v15 }
 0x4db   : > { %15096 = vmatpush1.bf16.msra.mxu0 %v15095_v21  ;;  %v15111_v21 = vpack.c.bf16 %v12140_v56, %v12135_v14  ;;  %v12176_v56 = vld [vmem:[%s25434_s7 + $0x11b0] sm:$0xff] }
 0x4dc   : > { %15202 = vmatpush1.bf16.msra.mxu1 %v15201_v6  ;;  %15098 = vmatprep.subr.bf16.mxu0 %v15097_v45  ;;  %v15213_v6 = vpack.c.bf16 %v12144_v11, %v12139_v26  ;;  %v15113_v45 = vpack.c.bf16 %v12151_v18, %v12146_v58  ;;  %v12181_v26 = vld [vmem:[%s25434_s7 + $0x11d8] sm:$0xff] }
 0x4dd   : > { %15203 = vmatprep.subr.bf16.mxu1 %v16916_v5  ;;  %v15125_v58 = vpack.c.bf16 %v12181_v26, %v12176_v56  ;;  %v12222_v26 = vld [vmem:[%s25434_s7 + $0x1280] sm:$0xff] }
 0x4df   : > { %15100 = vmatpush1.bf16.msra.mxu0 %v15099_v63  ;;  %v12156_v63 = vld [vmem:[%s25434_s7 + $0x1110] sm:$0xff] }
 0x4e0   : > { %15205 = vmatpush1.bf16.msra.mxu1 %v15204_v9  ;;  %15102 = vmatprep.subr.bf16.mxu0 %v15101_v24  ;;  %v12161_v9 = vld [vmem:[%s25434_s7 + $0x1138] sm:$0xff]  ;;  %v15115_v24 = vpack.c.bf16 %v12150_v49, %v12145_v53  ;;  %v12184_v53 = vld [vmem:[%s25434_s7 + $0x11f0] sm:$0xff] }
 0x4e1   : > { %15206 = vmatprep.subr.bf16.mxu1 %v16916_v5  ;;  %v15117_v33 = vpack.c.bf16 %v12161_v9, %v12156_v63  ;;  %v12211_v63 = vld [vmem:[%s25434_s7 + $0x1228] sm:$0xff]  ;;  %v12216_v9 = vld [vmem:[%s25434_s7 + $0x1250] sm:$0xff] }
 0x4e3   : > { %15104 = vmatpush1.bf16.msra.mxu0 %v15103_v4  ;;  %v12164_v4 = vld [vmem:[%s25434_s7 + $0x1150] sm:$0xff] }
 0x4e4   : > { %15208 = vmatpush1.bf16.msra.mxu1 %v15207_v3  ;;  %15106 = vmatprep.subr.bf16.mxu0 %v15105_v43  ;;  %v21074_v8 = vpop.f32.mrb[60].mxu0  ;;  %v12166_v43 = vld [vmem:[%s25434_s7 + $0x1160] sm:$0xff]  ;;  %v15219_v12 = vpack.c.bf16 %v12164_v4, %v12159_v2  ;;  %v12189_v2 = vld [vmem:[%s25434_s7 + $0x1218] sm:$0xf]  ;;  %v15227_v4 = vpack.c.bf16 %v12216_v9, %v12211_v63 }
 0x4e5   : > { %15209 = vmatprep.subr.bf16.mxu1 %v16916_v5  ;;  %v4172_v39 = vpop.f32.mrb[61].mxu0  ;;  %v15121_v22 = vpack.c.bf16 %v12171_v20, %v12166_v43  ;;  %v12217_v43 = vld [vmem:[%s25434_s7 + $0x1258] sm:$0xff] }
 0x4e6   : > { %v12241_v9 = vld [vmem:[%s25434_s7 + $0x1318] sm:$0xff] }
 0x4e7   : > { %15108 = vmatpush1.bf16.msra.mxu0 %v15107_v37  ;;  %v12170_v37 = vld [vmem:[%s25434_s7 + $0x1180] sm:$0xff] }
 0x4e8   : > { %15211 = vmatpush1.bf16.msra.mxu1 %v15210_v40  ;;  %15110 = vmatprep.subr.bf16.mxu0 %v15109_v29  ;;  %v21095_v47 = vpop.f32.mrb[62].mxu0  ;;  %v12169_v40 = vld [vmem:[%s25434_s7 + $0x1178] sm:$0xff]  ;;  %v12174_v29 = vld [vmem:[%s25434_s7 + $0x11a0] sm:$0xff]  ;;  %v15123_v11 = vpack.c.bf16 %v12170_v37, %v12165_v44  ;;  %v12223_v44 = vld [vmem:[%s25434_s7 + $0x1288] sm:$0xff] }
 0x4e9   : > { %15212 = vmatprep.subr.bf16.mxu1 %v16916_v5  ;;  %v4177_v50 = vpop.f32.mrb[63].mxu0  ;;  %v15222_v39 = vpack.c.bf16 %v12174_v29, %v12169_v40  ;;  %v12228_v37 = vld [vmem:[%s25434_s7 + $0x12b0] sm:$0xff] }
 0x4ea   : > { %v12186_v50 = vld [vmem:[%s25434_s7 + $0x1200] sm:$0xf]  ;;  %v12220_v29 = vld [vmem:[%s25434_s7 + $0x1270] sm:$0xff] }
 0x4eb   : > { %15112 = vmatpush1.bf16.msra.mxu0 %v15111_v21  ;;  %v12175_v21 = vld [vmem:[%s25434_s7 + $0x11a8] sm:$0xff] }
 0x4ec   : > { %15214 = vmatpush1.bf16.msra.mxu1 %v15213_v6  ;;  %15114 = vmatprep.subr.bf16.mxu0 %v15113_v45  ;;  %v21116_v36 = vpop.f32.mrb[64].mxu0  ;;  %v12180_v6 = vld [vmem:[%s25434_s7 + $0x11d0] sm:$0xff]  ;;  %v12179_v45 = vld [vmem:[%s25434_s7 + $0x11c8] sm:$0xff] }
 0x4ed   : > { %15215 = vmatprep.subr.bf16.mxu1 %v16916_v5  ;;  %v4182_v3 = vpop.f32.mrb[65].mxu0  ;;  %v15127_v15 = vpack.c.bf16 %v12180_v6, %v12175_v21  ;;  %v15225_v61 = vpack.c.bf16 %v12184_v53, %v12179_v45  ;;  %v12233_v6 = vld [vmem:[%s25434_s7 + $0x12d8] sm:$0xff]  ;;  %v12238_v45 = vld [vmem:[%s25434_s7 + $0x1300] sm:$0xff] }
 0x4ee   : > { %v12212_v3 = vld [vmem:[%s25434_s7 + $0x1230] sm:$0xff]  ;;  %v15291_v63 = vpack.c.bf16 %v12238_v45, %v12233_v6 }
 0x4ef   : > { %15116 = vmatpush1.bf16.msra.mxu0 %v15115_v24  ;;  %v12213_v24 = vld [vmem:[%s25434_s7 + $0x1238] sm:$0xff]  ;;  %v15285_v40 = vpack.c.bf16 %v12217_v43, %v12212_v3  ;;  %v12247_v3 = vld [vmem:[%s25434_s7 + $0x1348] sm:$0xff] }
 0x4f0   : > { %15217 = vmatpush1.bf16.msra.mxu1 %v15216_v59  ;;  %15118 = vmatprep.subr.bf16.mxu0 %v15117_v33  ;;  %v21137_v19 = vpop.f32.mrb[66].mxu0  ;;  %v12218_v59 = vld [vmem:[%s25434_s7 + $0x1260] sm:$0xff]  ;;  %v12185_v33 = vld [vmem:[%s25434_s7 + $0x11f8] sm:$0xf] }
 0x4f1   : > { %15218 = vmatprep.subr.bf16.mxu1 %v16916_v5  ;;  %v4187_v14 = vpop.f32.mrb[67].mxu0  ;;  %v15283_v20 = vpack.c.bf16 %v12218_v59, %v12213_v24  ;;  %v12243_v59 = vld [vmem:[%s25434_s7 + $0x1328] sm:$0xff] }
 0x4f2   : > { %v12225_v14 = vld [vmem:[%s25434_s7 + $0x1298] sm:$0xff] }
 0x4f3   : > { %15120 = vmatpush1.bf16.msra.mxu0 %v15119_v48  ;;  %v12221_v48 = vld [vmem:[%s25434_s7 + $0x1278] sm:$0xff]  ;;  %v15233_v21 = vpack.c.bf16 %v12225_v14, %v12220_v29  ;;  %v5647_v14 = vrot.slane %v19423_v0, 4 }
 0x4f4   : > { %15220 = vmatpush1.bf16.msra.mxu1 %v15219_v12  ;;  %15122 = vmatprep.subr.bf16.mxu0 %v15121_v22  ;;  %v21158_v18 = vpop.f32.mrb[68].mxu0  ;;  %v12226_v12 = vld [vmem:[%s25434_s7 + $0x12a0] sm:$0xff]  ;;  %v15229_v22 = vpack.c.bf16 %v12215_v41, %v12210_v51  ;;  %v12240_v41 = vld [vmem:[%s25434_s7 + $0x1310] sm:$0xff] }
 0x4f5   : > { %15221 = vmatprep.subr.bf16.mxu1 %v16916_v5  ;;  %v4192_v49 = vpop.f32.mrb[69].mxu0  ;;  %v15231_v56 = vpack.c.bf16 %v12226_v12, %v12221_v48  ;;  %v12253_v12 = vld [vmem:[%s25434_s7 + $0x1378] sm:$0xff] }
 0x4f6   : > { %v12230_v49 = vld [vmem:[%s25434_s7 + $0x12c0] sm:$0xff] }
 0x4f7   : > { %15124 = vmatpush1.bf16.msra.mxu0 %v15123_v11  ;;  %v12227_v11 = vld [vmem:[%s25434_s7 + $0x12a8] sm:$0xff] }
 0x4f8   : > { %15223 = vmatpush1.bf16.msra.mxu1 %v15222_v39  ;;  %15126 = vmatprep.subr.bf16.mxu0 %v15125_v58  ;;  %v15287_v39 = vpack.c.bf16 %v12228_v37, %v12223_v44  ;;  %v12231_v58 = vld [vmem:[%s25434_s7 + $0x12c8] sm:$0xff]  ;;  %v15289_v53 = vpack.c.bf16 %v12227_v11, %v12222_v26  ;;  %v12250_v37 = vld [vmem:[%s25434_s7 + $0x1360] sm:$0xff]  ;;  %v12261_v26 = vld [vmem:[%s25434_s7 + $0x13b8] sm:$0xff] }
 0x4f9   : > { %15224 = vmatprep.subr.bf16.mxu1 %v16916_v5  ;;  %v12266_v11 = vld [vmem:[%s25434_s7 + $0x13e0] sm:$0xff] }
 0x4fa   : > { %v15247_v45 = vpack.c.bf16 %v12266_v11, %v12261_v26  ;;  %v12298_v26 = vld [vmem:[%s25434_s7 + $0x14e0] sm:$0xff] }
 0x4fb   : > { %15128 = vmatpush1.bf16.msra.mxu0 %v15127_v15 }
 0x4fc   : > { %15226 = vmatpush1.bf16.msra.mxu1 %v15225_v61  ;;  %12190 = vmatprep.subr.msk.mxu0 %vm2045_vm4, %v12186_v50  ;;  %v12232_v61 = vld [vmem:[%s25434_s7 + $0x12d0] sm:$0xff]  ;;  %v12237_v50 = vld [vmem:[%s25434_s7 + $0x12f8] sm:$0xff] }
 0x4fd   : > { %5438 = vmatprep.subr.mxu1 %v16914_v7  ;;  %v15293_v51 = vpack.c.bf16 %v12237_v50, %v12232_v61  ;;  %v12271_v61 = vld [vmem:[%s25434_s7 + $0x1408] sm:$0xff]  ;;  %v12276_v50 = vld [vmem:[%s25434_s7 + $0x1430] sm:$0xff] }
 0x4ff   : > { %12191 = vmatpush1.msk.msra.mxu0 %vm2045_vm4, %v12185_v33  ;;  %v12248_v33 = vld [vmem:[%s25434_s7 + $0x1350] sm:$0xff] }
 0x500   : > { %12204 = vmatpush1.msk.msra.mxu1 %vm2045_vm4, %v12189_v2  ;;  %5257 = vmatmul.mubr.f32.vlgmr.msra.gmra.mrb[50].mxu0 %v20860_v28  ;;  %v15295_v43 = vpack.c.bf16 %v12248_v33, %v12243_v59  ;;  %v12270_v59 = vld [vmem:[%s25434_s7 + $0x1400] sm:$0xff]  ;;  %v12275_v33 = vld [vmem:[%s25434_s7 + $0x1428] sm:$0xff] }
 0x501   : > { %5447 = vmatmul.mubr.f32.vlgmr.msra.gmra.mrb[70].mxu1 %v20860_v28  ;;  %15228 = vmatprep.subr.bf16.mxu0 %v15227_v4  ;;  %v12236_v28 = vld [vmem:[%s25434_s7 + $0x12f0] sm:$0xff]  ;;  %v12242_v4 = vld [vmem:[%s25434_s7 + $0x1320] sm:$0xff] }
 0x502   : > { %15284 = vmatprep.subr.bf16.mxu1 %v15283_v20  ;;  %12193 = vmatprep.mubr.msk.f32.mxu0 %vm3888_vm9, %v20882_v46  ;;  %v15235_v15 = vpack.c.bf16 %v12236_v28, %v12231_v58  ;;  %v12251_v20 = vld [vmem:[%s25434_s7 + $0x1368] sm:$0xff]  ;;  %v15297_v44 = vpack.c.bf16 %v12247_v3, %v12242_v4  ;;  %v12268_v58 = vld [vmem:[%s25434_s7 + $0x13f0] sm:$0xff]  ;;  %v12286_v4 = vld [vmem:[%s25434_s7 + $0x1480] sm:$0xff] }
 0x503   : > { %12206 = vmatprep.mubr.msk.f32.mxu1 %vm3888_vm9, %v20882_v46  ;;  %15230 = vmatpush1.bf16.msra.mxu0 %v15229_v22  ;;  %v12235_v46 = vld [vmem:[%s25434_s7 + $0x12e8] sm:$0xff]  ;;  %v12258_v22 = vld [vmem:[%s25434_s7 + $0x13a0] sm:$0xff] }
 0x504   : > { %15286 = vmatpush1.bf16.msra.mxu1 %v15285_v40  ;;  %5263 = vmatmul.mubr.f32.gmra.mrb[52].mxu0 %v20895_v13  ;;  %v15237_v24 = vpack.c.bf16 %v12235_v46, %v12230_v49  ;;  %v12252_v40 = vld [vmem:[%s25434_s7 + $0x1370] sm:$0xff]  ;;  %v12265_v49 = vld [vmem:[%s25434_s7 + $0x13d8] sm:$0xff]  ;;  %v12283_v3 = vld [vmem:[%s25434_s7 + $0x1468] sm:$0xff] }
 0x505   : > { %5452 = vmatmul.mubr.f32.gmra.mrb[72].mxu1 %v20895_v13  ;;  %15232 = vmatprep.subr.bf16.mxu0 %v15231_v56  ;;  %v12246_v13 = vld [vmem:[%s25434_s7 + $0x1340] sm:$0xff]  ;;  %v12257_v56 = vld [vmem:[%s25434_s7 + $0x1398] sm:$0xff] }
 0x506   : > { %15288 = vmatprep.subr.bf16.mxu1 %v15287_v39  ;;  %12194 = vmatprep.mubr.msk.f32.mxu0 %vm3888_vm9, %v20915_v52  ;;  %v15239_v2 = vpack.c.bf16 %v12246_v13, %v12241_v9  ;;  %v12263_v39 = vld [vmem:[%s25434_s7 + $0x13c8] sm:$0xff]  ;;  %v15301_v6 = vpack.c.bf16 %v12257_v56, %v12252_v40  ;;  %v12293_v56 = vld [vmem:[%s25434_s7 + $0x14b8] sm:$0xff] }
 0x507   : > { %12207 = vmatprep.mubr.msk.f32.mxu1 %vm3888_vm9, %v20915_v52  ;;  %15234 = vmatpush1.bf16.msra.mxu0 %v15233_v21  ;;  %v12245_v52 = vld [vmem:[%s25434_s7 + $0x1338] sm:$0xff]  ;;  %v5646_v21 = vrot.slane %v19416_v57, 4  ;;  %v15303_v46 = vpack.c.bf16 %v12268_v58, %v12263_v39  ;;  %v12291_v40 = vld [vmem:[%s25434_s7 + $0x14a8] sm:$0xff]  ;;  %v12290_v58 = vld [vmem:[%s25434_s7 + $0x14a0] sm:$0xff] }
 0x508   : > { %15290 = vmatpush1.bf16.msra.mxu1 %v15289_v53  ;;  %5269 = vmatmul.mubr.f32.gmra.mrb[54].mxu0 %v20930_v23  ;;  %v15241_v48 = vpack.c.bf16 %v12245_v52, %v12240_v41  ;;  %v12260_v53 = vld [vmem:[%s25434_s7 + $0x13b0] sm:$0xff]  ;;  %v12277_v52 = vld [vmem:[%s25434_s7 + $0x1438] sm:$0xff] }
 0x509   : > { %5457 = vmatmul.mubr.f32.gmra.mrb[74].mxu1 %v20930_v23  ;;  %15236 = vmatprep.subr.bf16.mxu0 %v15235_v15  ;;  %v12256_v23 = vld [vmem:[%s25434_s7 + $0x1390] sm:$0xff]  ;;  %v21359_v57 = vsel %vm2045_vm4, %v5646_v21, %v5647_v14  ;;  %v12267_v15 = vld [vmem:[%s25434_s7 + $0x13e8] sm:$0xff]  ;;  %v15249_v9 = vpack.c.bf16 %v12265_v49, %v12260_v53  ;;  %v12301_v53 = vld [vmem:[%s25434_s7 + $0x14f8] sm:$0xff] }
 0x50a   : > { %15292 = vmatprep.subr.bf16.mxu1 %v15291_v63  ;;  %12195 = vmatprep.mubr.msk.f32.mxu0 %vm3888_vm9, %v20953_v38  ;;  %v15243_v29 = vpack.c.bf16 %v12256_v23, %v12251_v20  ;;  %v12278_v63 = vld [vmem:[%s25434_s7 + $0x1440] sm:$0xff]  ;;  %v15253_v20 = vpack.c.bf16 %v12275_v33, %v12270_v59  ;;  %v12292_v21 = vld [vmem:[%s25434_s7 + $0x14b0] sm:$0xff]  ;;  %v12307_v33 = vld [vmem:[%s25434_s7 + $0x1528] sm:$0xff] }
 0x50b   : > { %12208 = vmatprep.mubr.msk.f32.mxu1 %vm3888_vm9, %v20953_v38  ;;  %15238 = vmatpush1.bf16.msra.mxu0 %v15237_v24  ;;  %v12255_v38 = vld [vmem:[%s25434_s7 + $0x1388] sm:$0xff]  ;;  %v15251_v24 = vpack.c.bf16 %v12276_v50, %v12271_v61  ;;  %v12306_v49 = vld [vmem:[%s25434_s7 + $0x1520] sm:$0xff] }
 0x50c   : > { %15294 = vmatpush1.bf16.msra.mxu1 %v15293_v51  ;;  %5275 = vmatmul.mubr.f32.gmra.mrb[56].mxu0 %v20966_v10  ;;  %v15245_v28 = vpack.c.bf16 %v12255_v38, %v12250_v37  ;;  %v12272_v51 = vld [vmem:[%s25434_s7 + $0x1410] sm:$0xff]  ;;  %v12287_v38 = vld [vmem:[%s25434_s7 + $0x1488] sm:$0xff]  ;;  %v15263_v50 = vpack.c.bf16 %v12306_v49, %v12301_v53 }
 0x50d   : > { %5462 = vmatmul.mubr.f32.gmra.mrb[76].mxu1 %v20966_v10  ;;  %15240 = vmatprep.subr.bf16.mxu0 %v15239_v2  ;;  %v15299_v10 = vpack.c.bf16 %v12258_v22, %v12253_v12  ;;  %v12281_v2 = vld [vmem:[%s25434_s7 + $0x1458] sm:$0xff]  ;;  %v15309_v23 = vpack.c.bf16 %v12277_v52, %v12272_v51  ;;  %v12280_v12 = vld [vmem:[%s25434_s7 + $0x1450] sm:$0xff]  ;;  %v12327_v53 = vld [vmem:[%s25434_s7 + $0x15c8] sm:$0xff] }
 0x50e   : > { %15296 = vmatprep.subr.bf16.mxu1 %v15295_v43  ;;  %12196 = vmatprep.mubr.msk.f32.mxu0 %vm3888_vm9, %v20918_v55  ;;  %v12288_v43 = vld [vmem:[%s25434_s7 + $0x1490] sm:$0xff]  ;;  %v12285_v22 = vld [vmem:[%s25434_s7 + $0x1478] sm:$0xff] }
 0x50f   : > { %12209 = vmatprep.mubr.msk.f32.mxu1 %vm3888_vm9, %v20918_v55  ;;  %15242 = vmatpush1.bf16.msra.mxu0 %v15241_v48  ;;  %v12262_v55 = vld [vmem:[%s25434_s7 + $0x13c0] sm:$0xff]  ;;  %v15255_v48 = vpack.c.bf16 %v12286_v4, %v12281_v2  ;;  %v15311_v37 = vpack.c.bf16 %v12288_v43, %v12283_v3  ;;  %v15257_v11 = vpack.c.bf16 %v12285_v22, %v12280_v12  ;;  %v12316_v52 = vld [vmem:[%s25434_s7 + $0x1570] sm:$0xff]  ;;  %v12313_v2 = vld [vmem:[%s25434_s7 + $0x1558] sm:$0xff] }
 0x510   : > { %15298 = vmatpush1.bf16.msra.mxu1 %v15297_v44  ;;  %5281 = vmatmul.mubr.f32.gmra.mrb[58].mxu0 %v20933_v17  ;;  %v15305_v13 = vpack.c.bf16 %v12267_v15, %v12262_v55  ;;  %v12282_v44 = vld [vmem:[%s25434_s7 + $0x1460] sm:$0xff]  ;;  %v12303_v55 = vld [vmem:[%s25434_s7 + $0x1508] sm:$0xff]  ;;  %v12312_v12 = vld [vmem:[%s25434_s7 + $0x1550] sm:$0xff] }
 0x511   : > { %5467 = vmatmul.mubr.f32.gmra.mrb[78].mxu1 %v20933_v17  ;;  %15244 = vmatprep.subr.bf16.mxu0 %v15243_v29  ;;  %v12273_v17 = vld [vmem:[%s25434_s7 + $0x1418] sm:$0xff]  ;;  %v12296_v29 = vld [vmem:[%s25434_s7 + $0x14d0] sm:$0xff] }
 0x512   : > { %15300 = vmatprep.subr.bf16.mxu1 %v15299_v10  ;;  %12357 = vmatprep.mubr.msk.f32.mxu0 %vm3888_vm9, %v21359_v57  ;;  %v15307_v41 = vpack.c.bf16 %v12278_v63, %v12273_v17  ;;  %v15313_v10 = vpack.c.bf16 %v12287_v38, %v12282_v44  ;;  %v15259_v39 = vpack.c.bf16 %v12296_v29, %v12291_v40  ;;  %v12300_v63 = vld [vmem:[%s25434_s7 + $0x14f0] sm:$0xff]  ;;  %v12321_v40 = vld [vmem:[%s25434_s7 + $0x1598] sm:$0xff]  ;;  %v12326_v29 = vld [vmem:[%s25434_s7 + $0x15c0] sm:$0xff] }
 0x513   : > { %15246 = vmatpush1.bf16.msra.mxu0 %v15245_v28  ;;  %12364 = vmatprep.mubr.msk.f32.mxu1 %vm3888_vm9, %v21359_v57  ;;  %v12295_v28 = vld [vmem:[%s25434_s7 + $0x14c8] sm:$0xff] }
 0x514   : > { %15302 = vmatpush1.bf16.msra.mxu1 %v15301_v6  ;;  %15248 = vmatprep.subr.bf16.mxu0 %v15247_v45  ;;  %v15315_v6 = vpack.c.bf16 %v12298_v26, %v12293_v56  ;;  %v12297_v45 = vld [vmem:[%s25434_s7 + $0x14d8] sm:$0xff]  ;;  %v15261_v15 = vpack.c.bf16 %v12295_v28, %v12290_v58  ;;  %v12323_v56 = vld [vmem:[%s25434_s7 + $0x15a8] sm:$0xff]  ;;  %v12320_v58 = vld [vmem:[%s25434_s7 + $0x1590] sm:$0xff] }
 0x515   : > { %15304 = vmatprep.subr.bf16.mxu1 %v15303_v46  ;;  %v12308_v46 = vld [vmem:[%s25434_s7 + $0x1530] sm:$0xff]  ;;  %v15317_v61 = vpack.c.bf16 %v12297_v45, %v12292_v21  ;;  %v12325_v28 = vld [vmem:[%s25434_s7 + $0x15b8] sm:$0xff]  ;;  %v12322_v21 = vld [vmem:[%s25434_s7 + $0x15a0] sm:$0xff] }
 0x517   : > { %15250 = vmatpush1.bf16.msra.mxu0 %v15249_v9  ;;  %v12305_v9 = vld [vmem:[%s25434_s7 + $0x1518] sm:$0xff] }
 0x518   : > { %15306 = vmatpush1.bf16.msra.mxu1 %v15305_v13  ;;  %15252 = vmatprep.subr.bf16.mxu0 %v15251_v24  ;;  %v12302_v13 = vld [vmem:[%s25434_s7 + $0x1500] sm:$0xff]  ;;  %v15319_v24 = vpack.c.bf16 %v12308_v46, %v12303_v55  ;;  %v15265_v4 = vpack.c.bf16 %v12305_v9, %v12300_v63  ;;  %v12331_v55 = vld [vmem:[%s25434_s7 + $0x15e8] sm:$0xff]  ;;  %v12336_v46 = vld [vmem:[%s25434_s7 + $0x1610] sm:$0xff] }
 0x519   : > { %15308 = vmatprep.subr.bf16.mxu1 %v15307_v41  ;;  %v12311_v41 = vld [vmem:[%s25434_s7 + $0x1548] sm:$0xff]  ;;  %v15321_v3 = vpack.c.bf16 %v12307_v33, %v12302_v13  ;;  %v12330_v9 = vld [vmem:[%s25434_s7 + $0x15e0] sm:$0xff] }
 0x51a   : > { %v15267_v43 = vpack.c.bf16 %v12316_v52, %v12311_v41  ;;  %v12335_v13 = vld [vmem:[%s25434_s7 + $0x1608] sm:$0xff]  ;;  %v12337_v41 = vld [vmem:[%s25434_s7 + $0x1618] sm:$0xff] }
 0x51b   : > { %15254 = vmatpush1.bf16.msra.mxu0 %v15253_v20 }
 0x51c   : > { %15310 = vmatpush1.bf16.msra.mxu1 %v15309_v23  ;;  %15256 = vmatprep.subr.bf16.mxu0 %v15255_v48  ;;  %v12310_v23 = vld [vmem:[%s25434_s7 + $0x1540] sm:$0xff]  ;;  %v12315_v48 = vld [vmem:[%s25434_s7 + $0x1568] sm:$0xff] }
 0x51d   : > { %15312 = vmatprep.subr.bf16.mxu1 %v15311_v37  ;;  %v12317_v37 = vld [vmem:[%s25434_s7 + $0x1578] sm:$0xff]  ;;  %v15269_v26 = vpack.c.bf16 %v12315_v48, %v12310_v23  ;;  %v12340_v48 = vld [vmem:[%s25434_s7 + $0x1630] sm:$0xff] }
 0x51f   : > { %15258 = vmatpush1.bf16.msra.mxu0 %v15257_v11  ;;  %v15325_v11 = vpack.c.bf16 %v12317_v37, %v12312_v12  ;;  %v12345_v12 = vld [vmem:[%s25434_s7 + $0x1658] sm:$0xff] }
 0x520   : > { %15314 = vmatpush1.bf16.msra.mxu1 %v15313_v10  ;;  %15260 = vmatprep.subr.bf16.mxu0 %v15259_v39  ;;  %v4475_v17 = vpop.f32.mrb[60].mxu1  ;;  %v15271_v10 = vpack.c.bf16 %v12326_v29, %v12321_v40  ;;  %v12347_v40 = vld [vmem:[%s25434_s7 + $0x1668] sm:$0xff] }
 0x521   : > { %15316 = vmatprep.subr.bf16.mxu1 %v15315_v6  ;;  %v21462_v59 = vadd.f32 %v4475_v17, %v21074_v8  ;;  %v4477_v51 = vpop.f32.mrb[61].mxu1  ;;  %v12318_v8 = vld [vmem:[%s25434_s7 + $0x1580] sm:$0xff]  ;;  %v15275_v17 = vpack.c.bf16 %v12336_v46, %v12331_v55  ;;  %v5655_v55 = vrot.slane %v19485_v42, 4 }
 0x522   : > { %v15323_v22 = vpack.c.bf16 %v12318_v8, %v12313_v2  ;;  %v12341_v2 = vld [vmem:[%s25434_s7 + $0x1638] sm:$0xff]  ;;  %v12346_v8 = vld [vmem:[%s25434_s7 + $0x1660] sm:$0xff] }
 0x523   : > { %15262 = vmatpush1.bf16.msra.mxu0 %v15261_v15  ;;  %v12333_v15 = vld [vmem:[%s25434_s7 + $0x15f8] sm:$0xff] }
 0x524   : > { %15318 = vmatpush1.bf16.msra.mxu1 %v15317_v61  ;;  %15264 = vmatprep.subr.bf16.mxu0 %v15263_v50  ;;  %v4480_v20 = vpop.f32.mrb[62].mxu1  ;;  %v15273_v61 = vpack.c.bf16 %v12325_v28, %v12320_v58  ;;  %v15329_v50 = vpack.c.bf16 %v12327_v53, %v12322_v21  ;;  %v12219_v58 = vld [vmem:[%s25434_s7 + $0x1268] sm:$0xff]  ;;  %v5643_v28 = vrot.slane %v19414_v35, 4  ;;  %v5651_v21 = vrot.slane %v19449_v1, 4  ;;  %v12224_v35 = vld [vmem:[%s25434_s7 + $0x1290] sm:$0xff]  ;;  %v12229_v1 = vld [vmem:[%s25434_s7 + $0x12b8] sm:$0xff] }
 0x525   : > { %15320 = vmatprep.subr.bf16.mxu1 %v15319_v24  ;;  %v21489_v44 = vadd.f32 %v4480_v20, %v21095_v47  ;;  %v4482_v38 = vpop.f32.mrb[63].mxu1  ;;  %v12328_v47 = vld [vmem:[%s25434_s7 + $0x15d0] sm:$0xff]  ;;  %v15279_v20 = vpack.c.bf16 %v12346_v8, %v12341_v2  ;;  %v15343_v46 = vpack.c.bf16 %v12229_v1, %v12224_v35  ;;  %v12269_v2 = vld [vmem:[%s25434_s7 + $0x13f8] sm:$0xff] }
 0x526   : > { %v15327_v6 = vpack.c.bf16 %v12328_v47, %v12323_v56  ;;  %v12332_v24 = vld [vmem:[%s25434_s7 + $0x15f0] sm:$0xff]  ;;  %v12342_v38 = vld [vmem:[%s25434_s7 + $0x1640] sm:$0xff]  ;;  %v15281_v56 = vpack.c.bf16 %v12345_v12, %v12340_v48  ;;  %v21630_v0 = vsel %vm2045_vm4, %v5651_v21, %v5655_v55  ;;  %v12299_v48 = vld [vmem:[%s25434_s7 + $0x14e8] sm:$0xff] }
 0x527   : > { %15266 = vmatpush1.bf16.msra.mxu0 %v15265_v4  ;;  %v12343_v4 = vld [vmem:[%s25434_s7 + $0x1648] sm:$0xff]  ;;  %v15337_v47 = vpack.c.bf16 %v12347_v40, %v12342_v38  ;;  %v12309_v38 = vld [vmem:[%s25434_s7 + $0x1538] sm:$0xff] }
 0x528   : > { %15322 = vmatpush1.bf16.msra.mxu1 %v15321_v3  ;;  %15268 = vmatprep.subr.bf16.mxu0 %v15267_v43  ;;  %v4485_v39 = vpop.f32.mrb[64].mxu1  ;;  %v15277_v3 = vpack.c.bf16 %v12335_v13, %v12330_v9  ;;  %v15333_v43 = vpack.c.bf16 %v12337_v41, %v12332_v24  ;;  %v12249_v9 = vld [vmem:[%s25434_s7 + $0x1358] sm:$0xff]  ;;  %v12254_v24 = vld [vmem:[%s25434_s7 + $0x1380] sm:$0xff] }
 0x529   : > { %15324 = vmatprep.subr.bf16.mxu1 %v15323_v22  ;;  %v21516_v45 = vadd.f32 %v4485_v39, %v21116_v36  ;;  %v4487_v49 = vpop.f32.mrb[65].mxu1  ;;  %v12338_v36 = vld [vmem:[%s25434_s7 + $0x1620] sm:$0xff] }
 0x52a   : > { %v15331_v33 = vpack.c.bf16 %v12338_v36, %v12333_v15  ;;  %v12214_v39 = vld [vmem:[%s25434_s7 + $0x1240] sm:$0xff]  ;;  %v5649_v49 = vrot.slane %v19443_v54, 4  ;;  %v21617_v54 = vsel %vm2045_vm4, %v5647_v14, %v5651_v21  ;;  %v5653_v15 = vrot.slane %v19480_v34, 4 }
 0x52b   : > { %15270 = vmatpush1.bf16.msra.mxu0 %v15269_v26  ;;  %v12353_v26 = vld [vmem:[%s25434_s7 + $0x1698] sm:$0xf]  ;;  %v15340_v53 = vpack.c.bf16 %v12219_v58, %v12214_v39  ;;  %v21633_v14 = vrot.slane %v19522_v16, 4  ;;  %v12234_v36 = vld [vmem:[%s25434_s7 + $0x12e0] sm:$0xff]  ;;  %v12339_v39 = vld [vmem:[%s25434_s7 + $0x1628] sm:$0xff] }
 0x52c   : > { %15326 = vmatpush1.bf16.msra.mxu1 %v15325_v11  ;;  %15272 = vmatprep.subr.bf16.mxu0 %v15271_v10  ;;  %v4490_v63 = vpop.f32.mrb[66].mxu1  ;;  %v5644_v11 = vrot.slane %v19418_v62, 4  ;;  %v12350_v10 = vld [vmem:[%s25434_s7 + $0x1680] sm:$0xf]  ;;  %v12352_v62 = vld [vmem:[%s25434_s7 + $0x1690] sm:$0xf]  ;;  %v21647_v34 = vsel %vm2045_vm4, %v5649_v49, %v5653_v15 }
 0x52d   : > { %15328 = vmatprep.subr.bf16.mxu1 %v15327_v6  ;;  %v21543_v51 = vadd.f32 %v4490_v63, %v21137_v19  ;;  %v4492_v52 = vpop.f32.mrb[67].mxu1  ;;  %v12348_v19 = vld [vmem:[%s25434_s7 + $0x1670] sm:$0xff] }
 0x52e   : > { %v15335_v22 = vpack.c.bf16 %v12348_v19, %v12343_v4  ;;  %v21600_v6 = vsel %vm2045_vm4, %v5643_v28, %v5644_v11  ;;  %v21624_v42 = vsel %vm2045_vm4, %v5644_v11, %v5649_v49  ;;  %v12244_v63 = vld [vmem:[%s25434_s7 + $0x1330] sm:$0xff]  ;;  %v12274_v4 = vld [vmem:[%s25434_s7 + $0x1420] sm:$0xff]  ;;  %v12279_v19 = vld [vmem:[%s25434_s7 + $0x1448] sm:$0xff] }
 0x52f   : > { %15274 = vmatpush1.bf16.msra.mxu0 %v15273_v61  ;;  %v12239_v61 = vld [vmem:[%s25434_s7 + $0x1308] sm:$0xff]  ;;  %v15349_v13 = vpack.c.bf16 %v12249_v9, %v12244_v63  ;;  %v12264_v52 = vld [vmem:[%s25434_s7 + $0x13d0] sm:$0xff]  ;;  %v12349_v28 = vld [vmem:[%s25434_s7 + $0x1678] sm:$0xff] }
 0x530   : > { %15330 = vmatpush1.bf16.msra.mxu1 %v15329_v50  ;;  %15276 = vmatprep.subr.bf16.mxu0 %v15275_v17  ;;  %v4495_v23 = vpop.f32.mrb[68].mxu1  ;;  %v15346_v16 = vpack.c.bf16 %v12239_v61, %v12234_v36  ;;  %v21650_v50 = vrot.slane %v19517_v60, 4  ;;  %v21656_v17 = vsel %vm2045_vm4, %v5655_v55, %v21633_v14  ;;  %v15355_v8 = vpack.c.bf16 %v12269_v2, %v12264_v52  ;;  %v21794_v2 = vld [vmem:[%s25435_s8] sm:$0x1f] }
 0x531   : > { %15332 = vmatprep.subr.bf16.mxu1 %v15331_v33  ;;  %v21567_v37 = vadd.f32 %v4495_v23, %v21158_v18  ;;  %v4497_v29 = vpop.f32.mrb[69].mxu1  ;;  %v12351_v18 = vld [vmem:[%s25434_s7 + $0x1688] sm:$0xf]  ;;  %v12294_v23 = vld [vmem:[%s25434_s7 + $0x14c0] sm:$0xff] }
 0x532   : > { %v21671_v60 = vsel %vm2045_vm4, %v5653_v15, %v21650_v50  ;;  %v12259_v33 = vld [vmem:[%s25434_s7 + $0x13a8] sm:$0xff]  ;;  %v15364_v12 = vpack.c.bf16 %v12299_v48, %v12294_v23  ;;  %v12314_v29 = vld [vmem:[%s25434_s7 + $0x1560] sm:$0xff] }
 0x533   : > { %15278 = vmatpush1.bf16.msra.mxu0 %v15277_v3  ;;  %v15352_v41 = vpack.c.bf16 %v12259_v33, %v12254_v24  ;;  %v15358_v3 = vpack.c.bf16 %v12279_v19, %v12274_v4  ;;  %v21804_v19 = vrot.slane %v21794_v2, %v2387_v30 }
 0x534   : > { %15334 = vmatpush1.bf16.msra.mxu1 %v15333_v43  ;;  %15280 = vmatprep.subr.bf16.mxu0 %v15279_v20  ;;  %v12289_v43 = vld [vmem:[%s25434_s7 + $0x1498] sm:$0xff] }
 0x535   : > { %15336 = vmatprep.subr.bf16.mxu1 %v15335_v22  ;;  %v12304_v22 = vld [vmem:[%s25434_s7 + $0x1510] sm:$0xff] }
 0x536   : > { %v15367_v40 = vpack.c.bf16 %v12309_v38, %v12304_v22 }
 0x537   : > { %15282 = vmatpush1.bf16.msra.mxu0 %v15281_v56  ;;  %v12319_v56 = vld [vmem:[%s25434_s7 + $0x1588] sm:$0xff] }
 0x538   : > { %15338 = vmatpush1.bf16.msra.mxu1 %v15337_v47  ;;  %12355 = vmatprep.subr.msk.mxu0 %vm2045_vm4, %v12351_v18  ;;  %v15370_v47 = vpack.c.bf16 %v12319_v56, %v12314_v29  ;;  %v12324_v18 = vld [vmem:[%s25434_s7 + $0x15b0] sm:$0xff] }
 0x539   : > { %12362 = vmatprep.subr.msk.mxu1 %vm2045_vm4, %v12353_v26  ;;  %v12329_v26 = vld [vmem:[%s25434_s7 + $0x15d8] sm:$0xff] }
 0x53a   : > { %v15373_v11 = vpack.c.bf16 %v12329_v26, %v12324_v18 }
 0x53b   : > { %12356 = vmatpush1.msk.msra.mxu0 %vm2045_vm4, %v12350_v10  ;;  %v12334_v10 = vld [vmem:[%s25434_s7 + $0x1600] sm:$0xff] }
 0x53c   : > { %12363 = vmatpush1.msk.msra.mxu1 %vm2045_vm4, %v12352_v62  ;;  %5756 = vmatmul.mubr.f32.vlgmr.msra.gmra.mrb[50].mxu0 %v21600_v6  ;;  %v15376_v58 = vpack.c.bf16 %v12339_v39, %v12334_v10  ;;  %v12344_v62 = vld [vmem:[%s25434_s7 + $0x1650] sm:$0xff] }
 0x53d   : > { %5851 = vmatmul.mubr.f32.vlgmr.msra.gmra.mrb[50].mxu1 %v21600_v6  ;;  %15339 = vmatprep.subr.bf16.mxu0 %v16916_v5  ;;  %v15379_v21 = vpack.c.bf16 %v12349_v28, %v12344_v62 }
 0x53e   : > { %12358 = vmatprep.mubr.msk.f32.mxu0 %vm3888_vm9, %v21617_v54  ;;  %12365 = vmatprep.mubr.msk.f32.mxu1 %vm3888_vm9, %v21617_v54 }
 0x53f   : > { %15341 = vmatpush1.bf16.msra.mxu0 %v15340_v53  ;;  %v12354_v53 = vld [vmem:[%s25434_s7 + $0x16a0] sm:$0xf] }
 0x540   : > { %5762 = vmatmul.mubr.f32.gmra.mrb[52].mxu0 %v21624_v42  ;;  %15342 = vmatprep.subr.bf16.mxu0 %v16916_v5 }
 0x541   : > { %5857 = vmatmul.mubr.f32.gmra.mrb[52].mxu1 %v21624_v42  ;;  %12359 = vmatprep.mubr.msk.f32.mxu0 %vm3888_vm9, %v21630_v0 }
 0x542   : > { %12366 = vmatprep.mubr.msk.f32.mxu1 %vm3888_vm9, %v21630_v0 }
 0x543   : > { %15344 = vmatpush1.bf16.msra.mxu0 %v15343_v46 }
 0x544   : > { %5768 = vmatmul.mubr.f32.gmra.mrb[54].mxu0 %v21647_v34  ;;  %15345 = vmatprep.subr.bf16.mxu0 %v16916_v5 }
 0x545   : > { %5863 = vmatmul.mubr.f32.gmra.mrb[54].mxu1 %v21647_v34  ;;  %12360 = vmatprep.mubr.msk.f32.mxu0 %vm3888_vm9, %v21656_v17 }
 0x546   : > { %12367 = vmatprep.mubr.msk.f32.mxu1 %vm3888_vm9, %v21656_v17 }
 0x547   : > { %15347 = vmatpush1.bf16.msra.mxu0 %v15346_v16 }
 0x548   : > { %5774 = vmatmul.mubr.f32.gmra.mrb[56].mxu0 %v21671_v60  ;;  %15348 = vmatprep.subr.bf16.mxu0 %v16916_v5 }
 0x549   : > { %5869 = vmatmul.mubr.f32.gmra.mrb[56].mxu1 %v21671_v60  ;;  %12361 = vmatprep.mubr.msk.f32.mxu0 %vm3888_vm9, %v21633_v14 }
 0x54a   : > { %12368 = vmatprep.mubr.msk.f32.mxu1 %vm3888_vm9, %v21633_v14 }
 0x54b   : > { %15350 = vmatpush1.bf16.msra.mxu0 %v15349_v13 }
 0x54c   : > { %5780 = vmatmul.mubr.f32.gmra.mrb[58].mxu0 %v21650_v50  ;;  %15351 = vmatprep.subr.bf16.mxu0 %v16916_v5 }
 0x54d   : > { %5875 = vmatmul.mubr.f32.gmra.mrb[58].mxu1 %v21650_v50  ;;  %12370 = vmatprep.mubr.msk.f32.mxu0 %vm3888_vm9, %v21359_v57  ;;  %v12284_v57 = vld [vmem:[%s25434_s7 + $0x1470] sm:$0xff] }
 0x54e   : > { %6166 = vmatprep.mubr.f32.mxu1 %v16914_v7  ;;  %v15361_v20 = vpack.c.bf16 %v12289_v43, %v12284_v57 }
 0x54f   : > { %15353 = vmatpush1.bf16.msra.mxu0 %v15352_v41 }
 0x550   : > { %15354 = vmatprep.subr.bf16.mxu0 %v16916_v5 }
 0x553   : > { %15356 = vmatpush1.bf16.msra.mxu0 %v15355_v8  ;;  %v21799_v8 = vrot.slane %v21794_v2, %v2379_v27 }
 0x554   : > { %15357 = vmatprep.subr.bf16.mxu0 %v16916_v5 }
 0x557   : > { %15359 = vmatpush1.bf16.msra.mxu0 %v15358_v3  ;;  %v6005_v3 = vrot.slane %v21794_v2, %v2383_v31 }
 0x558   : > { %15360 = vmatprep.subr.bf16.mxu0 %v16916_v5 }
 0x55b   : > { %15362 = vmatpush1.bf16.msra.mxu0 %v15361_v20  ;;  %v21812_v20 = vrot.slane %v21794_v2, %v2391_v32 }
 0x55c   : > { %15363 = vmatprep.subr.bf16.mxu0 %v16916_v5 }
 0x55f   : > { %15365 = vmatpush1.bf16.msra.mxu0 %v15364_v12 }
 0x560   : > { %15366 = vmatprep.subr.bf16.mxu0 %v16916_v5 }
 0x563   : > { %15368 = vmatpush1.bf16.msra.mxu0 %v15367_v40 }
 0x564   : > { %15369 = vmatprep.subr.bf16.mxu0 %v16916_v5 }
 0x567   : > { %15371 = vmatpush1.bf16.msra.mxu0 %v15370_v47 }
 0x568   : > { %15372 = vmatprep.subr.bf16.mxu0 %v16916_v5 }
 0x56b   : > { %15374 = vmatpush1.bf16.msra.mxu0 %v15373_v11 }
 0x56c   : > { %15375 = vmatprep.subr.bf16.mxu0 %v16916_v5 }
 0x56f   : > { %15377 = vmatpush1.bf16.msra.mxu0 %v15376_v58 }
 0x570   : > { %15378 = vmatprep.subr.bf16.mxu0 %v16916_v5 }
 0x573   : > { %15380 = vmatpush1.bf16.msra.mxu0 %v15379_v21 }
 0x574   : > { %5937 = vmatprep.subr.mxu0 %v16914_v7 }
 0x577   : > { %12369 = vmatpush1.msk.msra.mxu0 %vm2045_vm4, %v12354_v53 }
 0x578   : > { %5946 = vmatmul.mubr.f32.vlgmr.msra.gmra.mrb[80].mxu0 %v21600_v6  ;;  %15419 = vmatprep.subr.bf16.mxu0 %v16916_v5 }
 0x579   : > { %12371 = vmatprep.mubr.msk.f32.mxu0 %vm3888_vm9, %v21617_v54 }
 0x57c   : > { %5951 = vmatmul.mubr.f32.gmra.mrb[82].mxu0 %v21624_v42 }
 0x57d   : > { %12372 = vmatprep.mubr.msk.f32.mxu0 %vm3888_vm9, %v21630_v0 }
 0x580   : > { %5956 = vmatmul.mubr.f32.gmra.mrb[84].mxu0 %v21647_v34 }
 0x581   : > { %12373 = vmatprep.mubr.msk.f32.mxu0 %vm3888_vm9, %v21656_v17 }
 0x584   : > { %5961 = vmatmul.mubr.f32.gmra.mrb[86].mxu0 %v21671_v60 }
 0x585   : > { %12374 = vmatprep.mubr.msk.f32.mxu0 %vm3888_vm9, %v21633_v14 }
 0x588   : > { %5966 = vmatmul.mubr.f32.gmra.mrb[88].mxu0 %v21650_v50 }
 0x589   : > { %13879 = vmatprep.mubr.msk.f32.mxu0 %vm16917_vm10, %v16914_v7 }
 0x597   : > { %v4949_v6 = vpop.f32.mrb[70].mxu0 }
 0x598   : > { %v4977_v49 = vadd.f32 %v4949_v6, %v21462_v59  ;;  %v4951_v55 = vpop.f32.mrb[71].mxu0 }
 0x59b   : > { %v4954_v35 = vpop.f32.mrb[72].mxu0 }
 0x59c   : > { %v4982_v1 = vadd.f32 %v4954_v35, %v21489_v44  ;;  %v4956_v54 = vpop.f32.mrb[73].mxu0 }
 0x59f   : > { %v4959_v42 = vpop.f32.mrb[74].mxu0 }
 0x5a0   : > { %v4987_v46 = vadd.f32 %v4959_v42, %v21516_v45  ;;  %v4961_v15 = vpop.f32.mrb[75].mxu0 }
 0x5a3   : > { %v4964_v0 = vpop.f32.mrb[76].mxu0 }
 0x5a4   : > { %v4992_v36 = vadd.f32 %v4964_v0, %v21543_v51  ;;  %v4966_v61 = vpop.f32.mrb[77].mxu0 }
 0x5a7   : > { %v4969_v34 = vpop.f32.mrb[78].mxu0 }
 0x5a8   : > { %v4997_v14 = vadd.f32 %v4969_v34, %v21567_v37  ;;  %v4971_v16 = vpop.f32.mrb[79].mxu0 }
 0x5d4   : > { %v5448_v50 = vpop.f32.mrb[70].mxu1 }
 0x5d5   : > { %v21779_v17 = vadd.f32 %v5448_v50, %v4977_v49  ;;  %v5450_v59 = vpop.f32.mrb[71].mxu1 }
 0x5d8   : > { %v5453_v63 = vpop.f32.mrb[72].mxu1 }
 0x5d9   : > { %v21781_v9 = vadd.f32 %v5453_v63, %v4982_v1  ;;  %v5455_v44 = vpop.f32.mrb[73].mxu1 }
 0x5dc   : > { %v5458_v60 = vpop.f32.mrb[74].mxu1 }
 0x5dd   : > { %v21783_v13 = vadd.f32 %v5458_v60, %v4987_v46  ;;  %v5460_v45 = vpop.f32.mrb[75].mxu1 }
 0x5e0   : > { %v5463_v24 = vpop.f32.mrb[76].mxu1 }
 0x5e1   : > { %v21785_v33 = vadd.f32 %v5463_v24, %v4992_v36  ;;  %v5465_v51 = vpop.f32.mrb[77].mxu1 }
 0x5e4   : > { %v5468_v41 = vpop.f32.mrb[78].mxu1 }
 0x5e5   : > { %v21787_v52 = vadd.f32 %v5468_v41, %v4997_v14  ;;  %v5470_v37 = vpop.f32.mrb[79].mxu1 }
 0x60f   : > { %v5757_v4 = vpop.f32.mrb[50].mxu0 }
 0x610   : > { %v5852_v57 = vpop.f32.mrb[50].mxu1  ;;  %v5759_v43 = vpop.f32.mrb[51].mxu0  ;;  %v6023_v27 = vadd.f32 %v21799_v8, %v5757_v4 }
 0x611   : > { %v5854_v23 = vpop.f32.mrb[51].mxu1  ;;  %v6025_v48 = vadd.f32 %v21804_v19, %v5852_v57  ;;  %v6024_v12 = vadd.f32 %v6005_v3, %v5759_v43 }
 0x612   : > { %v6026_v30 = vadd.f32 %v21812_v20, %v5854_v23  ;;  %v6048_v18 = vmax.f32 %v6023_v27, 0.0 }
 0x613   : > { %v5763_v22 = vpop.f32.mrb[52].mxu0  ;;  %v6050_v11 = vmax.f32 %v6025_v48, 0.0  ;;  %v6049_v10 = vmax.f32 %v6024_v12, 0.0 }
 0x614   : > { %v6028_v38 = vadd.f32 %v21799_v8, %v5763_v22  ;;  %v5858_v40 = vpop.f32.mrb[52].mxu1  ;;  %v5765_v31 = vpop.f32.mrb[53].mxu0  ;;  %v6051_v28 = vmax.f32 %v6026_v30, 0.0 }
 0x615   : > { %v6030_v29 = vadd.f32 %v21804_v19, %v5858_v40  ;;  %v6029_v56 = vadd.f32 %v6005_v3, %v5765_v31  ;;  %v5860_v47 = vpop.f32.mrb[53].mxu1 }
 0x616   : > { %v6053_v32 = vmax.f32 %v6028_v38, 0.0  ;;  %v6031_v26 = vadd.f32 %v21812_v20, %v5860_v47 }
 0x617   : > { %v6055_v39 = vmax.f32 %v6030_v29, 0.0  ;;  %v6054_v58 = vmax.f32 %v6029_v56, 0.0  ;;  %v5769_v62 = vpop.f32.mrb[54].mxu0  ;;  %v21859_v29 = vld [vmem:[%s25436_s9] sm:$0xff]  ;;  %v21875_v56 = vld [vmem:[%s25436_s9 + $0x8] sm:$0xff] }
 0x618   : > { %v21820_v21 = vpack.c.bf16 %v6053_v32, %v6048_v18  ;;  %v6056_v53 = vmax.f32 %v6031_v26, 0.0  ;;  %v5864_v6 = vpop.f32.mrb[54].mxu1  ;;  %v5771_v49 = vpop.f32.mrb[55].mxu0  ;;  %v6033_v42 = vadd.f32 %v21799_v8, %v5769_v62  ;;  %v21889_v18 = vld [vmem:[%s25436_s9 + $0x10] sm:$0x1]  ;;  %v6016_v32 = vsub.s32 4, %v18065_v25 }
 0x619   : > { %v21822_v55 = vpack.c.bf16 %v6055_v39, %v6050_v11  ;;  %v21824_v35 = vpack.c.bf16 %v6054_v58, %v6049_v10  ;;  %v5866_v1 = vpop.f32.mrb[55].mxu1  ;;  %v6035_v46 = vadd.f32 %v21804_v19, %v5864_v6  ;;  %v6034_v15 = vadd.f32 %v6005_v3, %v5771_v49 }
 0x61a   : > { %v21826_v54 = vpack.c.bf16 %v6056_v53, %v6051_v28  ;;  %v6036_v36 = vadd.f32 %v21812_v20, %v5866_v1  ;;  %v6058_v63 = vmax.f32 %v6033_v42, 0.0  ;;  %v6017_v10 = vrot.slane %v21794_v2, %v6016_v32 }
 0x61b   : > { %v5775_v0 = vpop.f32.mrb[56].mxu0  ;;  %15382 = vmatprep.subr.bf16.mxu1 %v21824_v35  ;;  %v6060_v45 = vmax.f32 %v6035_v46, 0.0  ;;  %v6059_v24 = vmax.f32 %v6034_v15, 0.0 }
 0x61c   : > { %v6038_v61 = vadd.f32 %v21799_v8, %v5775_v0  ;;  %v5870_v34 = vpop.f32.mrb[56].mxu1  ;;  %v5777_v14 = vpop.f32.mrb[57].mxu0  ;;  %15384 = vmatpush1.bf16.msra.mxu1 %v21820_v21  ;;  %v6061_v4 = vmax.f32 %v6036_v36, 0.0 }
 0x61d   : > { %v6040_v16 = vadd.f32 %v21804_v19, %v5870_v34  ;;  %v6039_v50 = vadd.f32 %v6005_v3, %v5777_v14  ;;  %v5872_v59 = vpop.f32.mrb[57].mxu1 }
 0x61e   : > { %v6063_v44 = vmax.f32 %v6038_v61, 0.0  ;;  %v6041_v60 = vadd.f32 %v21812_v20, %v5872_v59 }
 0x61f   : > { %v6065_v51 = vmax.f32 %v6040_v16, 0.0  ;;  %v6064_v41 = vmax.f32 %v6039_v50, 0.0  ;;  %v5781_v37 = vpop.f32.mrb[58].mxu0 }
 0x620   : > { %v21836_v57 = vpack.c.bf16 %v6063_v44, %v6058_v63  ;;  %v6066_v43 = vmax.f32 %v6041_v60, 0.0  ;;  %v5876_v23 = vpop.f32.mrb[58].mxu1  ;;  %v5783_v27 = vpop.f32.mrb[59].mxu0  ;;  %v21847_v40 = vadd.f32 %v21799_v8, %v5781_v37  ;;  %v6348_v63 = vld [vmem:[%s25437_s10] sm:$0xff]  ;;  %v6624_v60 = vld [vmem:[%s25438_s11 + $0x18] sm:$0xff]  ;;  %v6627_v37 = vld [vmem:[%s25438_s11 + $0x30] sm:$0xff] }
 0x621   : > { %v21838_v48 = vpack.c.bf16 %v6065_v51, %v6060_v45  ;;  %v21840_v12 = vpack.c.bf16 %v6064_v41, %v6059_v24  ;;  %v21842_v22 = vadd.f32 %v6005_v3, %v5783_v27  ;;  %v5878_v30 = vpop.f32.mrb[59].mxu1  ;;  %v21879_v47 = vadd.f32 %v21804_v19, %v5876_v23  ;;  %v6625_v44 = vld [vmem:[%s25438_s11 + $0x20] sm:$0xff]  ;;  %v6628_v45 = vld [vmem:[%s25438_s11 + $0x38] sm:$0xff]  ;;  %v6631_v24 = vld [vmem:[%s25438_s11 + $0x50] sm:$0xff] }
 0x622   : > { %v21844_v38 = vpack.c.bf16 %v6066_v43, %v6061_v4  ;;  %v6068_v3 = vmax.f32 %v21847_v40, 0.0  ;;  %v21865_v8 = vadd.f32 %v21812_v20, %v5878_v30  ;;  %v15429_v41 = vpack.c.bf16 %v6631_v24, %v6628_v45  ;;  %v6630_v4 = vld [vmem:[%s25438_s11 + $0x48] sm:$0xff]  ;;  %v6637_v43 = vld [vmem:[%s25438_s11 + $0x80] sm:$0xff]  ;;  %v6643_v30 = vld [vmem:[%s25438_s11 + $0xb0] sm:$0xff] }
 0x623   : > { %v6069_v31 = vmax.f32 %v21842_v22, 0.0  ;;  %15386 = vmatprep.subr.bf16.mxu1 %v21840_v12  ;;  %v6070_v19 = vmax.f32 %v21879_v47, 0.0  ;;  %v15431_v23 = vpack.c.bf16 %v6630_v4, %v6627_v37  ;;  %v6640_v22 = vld [vmem:[%s25438_s11 + $0x98] sm:$0xff]  ;;  %v6623_v47 = vld [vmem:[%s25438_s11 + $0x10] sm:$0xff]  ;;  %v6666_v4 = vld [vmem:[%s25438_s11 + $0x168] sm:$0xff] }
 0x624   : > { %15388 = vmatpush1.bf16.msra.mxu1 %v21836_v57  ;;  %v6071_v20 = vmax.f32 %v21865_v8, 0.0  ;;  %v6642_v8 = vld [vmem:[%s25438_s11 + $0xa8] sm:$0xff]  ;;  %v6695_v45 = vld [vmem:[%s25438_s11 + $0x250] sm:$0xff] }
 0x625   : > { %12375 = vmatprep.subr.msk.mxu1 %vm6086_vm11, %v6069_v31 }
 0x628   : > { %12376 = vmatpush1.msk.msra.mxu1 %vm6086_vm11, %v6068_v3 }
 0x629   : > { %15390 = vmatprep.subr.bf16.mxu1 %v21826_v54  ;;  %12377 = vmatmul.mubr.msk.f32.vlgmr.msra.gmra.mrb[80].mxu1 %vm6076_vm12, %v21859_v29 }
 0x62a   : > { %15392 = vmatpush1.bf16.msra.mxu1 %v21822_v55  ;;  %6172 = vmatprep.mubr.f32.mxu1 %v16914_v7 }
 0x62b   : > { %15394 = vmatprep.subr.bf16.mxu1 %v21844_v38 }
 0x62d   : > { %12378 = vmatmul.mubr.msk.f32.gmra.mrb[82].mxu1 %vm6076_vm12, %v21875_v56 }
 0x62e   : > { %15396 = vmatpush1.bf16.msra.mxu1 %v21838_v48  ;;  %6178 = vmatprep.mubr.f32.mxu1 %v16914_v7 }
 0x62f   : > { %12380 = vmatprep.subr.msk.mxu1 %vm6086_vm11, %v6071_v20 }
 0x631   : > { %12379 = vmatmul.mubr.msk.f32.gmra.mrb[84].mxu1 %vm6076_vm12, %v21889_v18 }
 0x632   : > { %12381 = vmatpush1.msk.msra.mxu1 %vm6086_vm11, %v6070_v19  ;;  %6249 = vmatprep.mubr.f32.mxu1 %v16914_v7 }
 0x633   : > { %15397 = vmatprep.subr.bf16.mxu1 %v16916_v5 }
 0x635   : > { %12382 = vmatmul.mubr.msk.f32.vlgmr.msra.gmra.mrb[86].mxu1 %vm6076_vm12, %v21859_v29 }
 0x636   : > { %6255 = vmatprep.mubr.f32.mxu1 %v16914_v7 }
 0x639   : > { %12383 = vmatmul.mubr.msk.f32.gmra.mrb[88].mxu1 %vm6076_vm12, %v21875_v56 }
 0x63a   : > { %6261 = vmatprep.mubr.f32.mxu1 %v16914_v7 }
 0x63d   : > { %12384 = vmatmul.mubr.msk.f32.gmra.mrb[90].mxu1 %vm6076_vm12, %v21889_v18 }
 0x63e   : > { %13860 = vmatprep.mubr.msk.f32.mxu1 %vm16917_vm10, %v16914_v7 }
 0x64b   : > { %v5947_v26 = vpop.f32.mrb[80].mxu0 }
 0x64c   : > { %v5975_v11 = vadd.f32 %v5947_v26, %v21779_v17  ;;  %v5949_v39 = vpop.f32.mrb[81].mxu0  ;;  %v6677_v26 = vld [vmem:[%s25438_s11 + $0x1c0] sm:$0xff] }
 0x64d   : > { %v6680_v39 = vld [vmem:[%s25438_s11 + $0x1d8] sm:$0xff] }
 0x64e   : > { %v6027_v62 = vadd.f32 %v6017_v10, %v5975_v11 }
 0x64f   : > { %v5952_v58 = vpop.f32.mrb[82].mxu0 }
 0x650   : > { %v5980_v28 = vadd.f32 %v5952_v58, %v21781_v9  ;;  %v5954_v53 = vpop.f32.mrb[83].mxu0  ;;  %v6052_v1 = vmax.f32 %v6027_v62, 0.0  ;;  %v6648_v62 = vld [vmem:[%s25438_s11 + $0xd8] sm:$0xff] }
 0x651   : > { %v6629_v53 = vld [vmem:[%s25438_s11 + $0x40] sm:$0xff] }
 0x652   : > { %v6032_v6 = vadd.f32 %v6017_v10, %v5980_v28  ;;  %v15565_v28 = vpack.c.bf16 %v6680_v39, %v6677_v26  ;;  %v6681_v26 = vld [vmem:[%s25438_s11 + $0x1e0] sm:$0xff]  ;;  %v6691_v39 = vld [vmem:[%s25438_s11 + $0x230] sm:$0xff] }
 0x653   : > { %v5957_v49 = vpop.f32.mrb[84].mxu0 }
 0x654   : > { %v6057_v42 = vmax.f32 %v6032_v6, 0.0  ;;  %v5985_v46 = vadd.f32 %v5957_v49, %v21783_v13  ;;  %v5959_v15 = vpop.f32.mrb[85].mxu0  ;;  %v6632_v6 = vld [vmem:[%s25438_s11 + $0x58] sm:$0xff] }
 0x655   : > { %v6652_v49 = vld [vmem:[%s25438_s11 + $0xf8] sm:$0xff] }
 0x656   : > { %v15398_v0 = vpack.c.bf16 %v6057_v42, %v6052_v1  ;;  %v6037_v36 = vadd.f32 %v6017_v10, %v5985_v46  ;;  %v6655_v1 = vld [vmem:[%s25438_s11 + $0x110] sm:$0xff]  ;;  %v15567_v42 = vpack.c.bf16 %v6632_v6, %v6629_v53  ;;  %v6690_v53 = vld [vmem:[%s25438_s11 + $0x228] sm:$0xff] }
 0x657   : > { %v5962_v25 = vpop.f32.mrb[86].mxu0  ;;  %v6683_v46 = vld [vmem:[%s25438_s11 + $0x1f0] sm:$0xff]  ;;  %v6694_v6 = vld [vmem:[%s25438_s11 + $0x248] sm:$0xff] }
 0x658   : > { %v5990_v17 = vadd.f32 %v5962_v25, %v21785_v33  ;;  %v5964_v61 = vpop.f32.mrb[87].mxu0  ;;  %15399 = vmatpush3.bf16.msra.mxu1 %v15398_v0  ;;  %15421 = vmatpush3.bf16.msra.mxu0 %v15398_v0  ;;  %v6062_v34 = vmax.f32 %v6037_v36, 0.0  ;;  %v6651_v0 = vld [vmem:[%s25438_s11 + $0xf0] sm:$0xff]  ;;  %v6686_v25 = vld [vmem:[%s25438_s11 + $0x208] sm:$0xff]  ;;  %v15445_v36 = vpack.c.bf16 %v6655_v1, %v6652_v49  ;;  %v6697_v49 = vld [vmem:[%s25438_s11 + $0x260] sm:$0xff] }
 0x659   : > { %15400 = vmatprep.subr.bf16.mxu1 %v16916_v5  ;;  %15422 = vmatprep.subr.bf16.mxu0 %v16916_v5  ;;  %v15569_v61 = vpack.c.bf16 %v6686_v25, %v6683_v46  ;;  %v6693_v46 = vld [vmem:[%s25438_s11 + $0x240] sm:$0xff]  ;;  %v6700_v25 = vld [vmem:[%s25438_s11 + $0x278] sm:$0xff] }
 0x65a   : > { %v6042_v9 = vadd.f32 %v6017_v10, %v5990_v17  ;;  %v6654_v17 = vld [vmem:[%s25438_s11 + $0x108] sm:$0xff] }
 0x65b   : > { %v5967_v2 = vpop.f32.mrb[88].mxu0 }
 0x65c   : > { %v6067_v14 = vmax.f32 %v6042_v9, 0.0  ;;  %v5995_v16 = vadd.f32 %v5967_v2, %v21787_v52  ;;  %v5969_v13 = vpop.f32.mrb[89].mxu0  ;;  %v6349_v52 = vld [vmem:[%s25437_s10 + $0x8] sm:$0xff]  ;;  %v6635_v9 = vld [vmem:[%s25438_s11 + $0x70] sm:$0xff] }
 0x65d   : > { %v6638_v2 = vld [vmem:[%s25438_s11 + $0x88] sm:$0xff]  ;;  %v6689_v13 = vld [vmem:[%s25438_s11 + $0x220] sm:$0xff] }
 0x65e   : > { %v15401_v50 = vpack.c.bf16 %v6067_v14, %v6062_v34  ;;  %v6047_v59 = vadd.f32 %v6017_v10, %v5995_v16  ;;  %v6645_v10 = vld [vmem:[%s25438_s11 + $0xc0] sm:$0xff]  ;;  %v6658_v34 = vld [vmem:[%s25438_s11 + $0x128] sm:$0xff]  ;;  %v15571_v16 = vpack.c.bf16 %v6638_v2, %v6635_v9  ;;  %v6704_v9 = vld [vmem:[%s25438_s11 + $0x298] sm:$0xff] }
 0x65f   : > { %v15443_v15 = vpack.c.bf16 %v6648_v62, %v6645_v10  ;;  %v6661_v14 = vld [vmem:[%s25438_s11 + $0x140] sm:$0xff]  ;;  %v6688_v10 = vld [vmem:[%s25438_s11 + $0x218] sm:$0xff]  ;;  %v6699_v2 = vld [vmem:[%s25438_s11 + $0x270] sm:$0xff] }
 0x660   : > { %15402 = vmatpush3.bf16.msra.mxu1 %v15401_v50  ;;  %15424 = vmatpush3.bf16.msra.mxu0 %v15401_v50  ;;  %v6072_v33 = vmax.f32 %v6047_v59, 0.0  ;;  %v15447_v50 = vpack.c.bf16 %v6654_v17, %v6651_v0  ;;  %v6657_v59 = vld [vmem:[%s25438_s11 + $0x120] sm:$0xff]  ;;  %v15469_v62 = vpack.c.bf16 %v6691_v39, %v6688_v10 }
 0x661   : > { %13858 = vmatprep.subr.mxu1 %v16914_v7  ;;  %13877 = vmatprep.subr.mxu0 %v16914_v7  ;;  %v6701_v17 = vld [vmem:[%s25438_s11 + $0x280] sm:$0xff] }
 0x664   : > { %13859 = vmatpush3.msk.msra.mxu1 %vm6086_vm11, %v6072_v33  ;;  %13878 = vmatpush3.msk.msra.mxu0 %vm6086_vm11, %v6072_v33  ;;  %v6692_v33 = vld [vmem:[%s25438_s11 + $0x238] sm:$0xff] }
 0x665   : > { %13861 = vmatmul.mubr.msk.f32.vlgmr.msra.gmra.mrb[92].mxu1 %vm6076_vm12, %v21859_v29  ;;  %15404 = vmatprep.subr.bf16.mxu1 %v21824_v35  ;;  %v6622_v35 = vld [vmem:[%s25438_s11 + $0x8] sm:$0xff]  ;;  %v15437_v29 = vpack.c.bf16 %v6643_v30, %v6640_v22 }
 0x666   : > { %15406 = vmatpush1.bf16.msra.mxu1 %v21820_v21  ;;  %13863 = vmatprep.mubr.msk.f32.mxu1 %vm16917_vm10, %v16914_v7  ;;  %v6350_v21 = vld [vmem:[%s25437_s10 + $0x10] sm:$0x1] }
 0x667   : > { %15408 = vmatprep.subr.bf16.mxu1 %v21840_v12  ;;  %13880 = vmatmul.mubr.msk.f32.vlgmr.msra.gmra.mrb[90].mxu0 %vm6076_vm12, %v6348_v63  ;;  %v6636_v12 = vld [vmem:[%s25438_s11 + $0x78] sm:$0xff] }
 0x668   : > { %13882 = vmatprep.mubr.msk.f32.mxu0 %vm16917_vm10, %v16914_v7 }
 0x669   : > { %13864 = vmatmul.mubr.msk.f32.gmra.mrb[94].mxu1 %vm6076_vm12, %v21875_v56 }
 0x66a   : > { %15410 = vmatpush1.bf16.msra.mxu1 %v21836_v57  ;;  %13866 = vmatprep.mubr.msk.f32.mxu1 %vm16917_vm10, %v16914_v7  ;;  %v6634_v57 = vld [vmem:[%s25438_s11 + $0x68] sm:$0xff] }
 0x66b   : > { %12389 = vmatprep.subr.msk.mxu1 %vm6086_vm11, %v6069_v31  ;;  %13883 = vmatmul.mubr.msk.f32.gmra.mrb[92].mxu0 %vm6076_vm12, %v6349_v52  ;;  %v15433_v27 = vpack.c.bf16 %v6637_v43, %v6634_v57  ;;  %v6639_v31 = vld [vmem:[%s25438_s11 + $0x90] sm:$0xff] }
 0x66c   : > { %13885 = vmatprep.mubr.msk.f32.mxu0 %vm16917_vm10, %v16914_v7  ;;  %v15439_v11 = vpack.c.bf16 %v6642_v8, %v6639_v31  ;;  %v6647_v43 = vld [vmem:[%s25438_s11 + $0xd0] sm:$0xff]  ;;  %v6676_v31 = vld [vmem:[%s25438_s11 + $0x1b8] sm:$0xff] }
 0x66d   : > { %13867 = vmatmul.mubr.msk.f32.gmra.mrb[96].mxu1 %vm6076_vm12, %v21889_v18  ;;  %v6646_v18 = vld [vmem:[%s25438_s11 + $0xc8] sm:$0xff] }
 0x66e   : > { %12390 = vmatpush1.msk.msra.mxu1 %vm6086_vm11, %v6068_v3  ;;  %6424 = vmatprep.mubr.f32.mxu1 %v16914_v7  ;;  %v6674_v3 = vld [vmem:[%s25438_s11 + $0x1a8] sm:$0xff] }
 0x66f   : > { %15412 = vmatprep.subr.bf16.mxu1 %v21826_v54  ;;  %13886 = vmatmul.mubr.msk.f32.gmra.mrb[94].mxu0 %vm6076_vm12, %v6350_v21  ;;  %v6621_v54 = vld [vmem:[%s25438_s11] sm:$0xff] }
 0x670   : > { %v15427_v51 = vpack.c.bf16 %v6624_v60, %v6621_v54  ;;  %v6667_v54 = vld [vmem:[%s25438_s11 + $0x170] sm:$0xff] }
 0x671   : > { %12391 = vmatmul.mubr.msk.f32.vlgmr.msra.gmra.mrb[98].mxu1 %vm6076_vm12, %v6348_v63 }
 0x672   : > { %15414 = vmatpush1.bf16.msra.mxu1 %v21822_v55  ;;  %6430 = vmatprep.mubr.f32.mxu1 %v16914_v7  ;;  %v15425_v55 = vpack.c.bf16 %v6625_v44, %v6622_v35  ;;  %v6641_v35 = vld [vmem:[%s25438_s11 + $0xa0] sm:$0xff]  ;;  %v6644_v44 = vld [vmem:[%s25438_s11 + $0xb8] sm:$0xff] }
 0x673   : > { %15416 = vmatprep.subr.bf16.mxu1 %v21844_v38  ;;  %v6671_v38 = vld [vmem:[%s25438_s11 + $0x190] sm:$0xff]  ;;  %v15575_v60 = vpack.c.bf16 %v6644_v44, %v6641_v35  ;;  %v6710_v35 = vld [vmem:[%s25438_s11 + $0x2c8] sm:$0xff]  ;;  %v6705_v44 = vld [vmem:[%s25438_s11 + $0x2a0] sm:$0xff] }
 0x674   : > { %v15561_v56 = vpack.c.bf16 %v6674_v3, %v6671_v38  ;;  %v6669_v38 = vld [vmem:[%s25438_s11 + $0x180] sm:$0xff]  ;;  %v6679_v3 = vld [vmem:[%s25438_s11 + $0x1d0] sm:$0xff] }
 0x675   : > { %12392 = vmatmul.mubr.msk.f32.gmra.mrb[100].mxu1 %vm6076_vm12, %v6349_v52  ;;  %v15461_v8 = vpack.c.bf16 %v6679_v3, %v6676_v31  ;;  %v6721_v31 = vld [vmem:[%s25438_s11 + $0x320] sm:$0xff]  ;;  %v6767_v3 = vld [vmem:[%s25438_s11 + $0x490] sm:$0xff] }
 0x676   : > { %15418 = vmatpush1.bf16.msra.mxu1 %v21838_v48  ;;  %6436 = vmatprep.mubr.f32.mxu1 %v16914_v7  ;;  %v6633_v48 = vld [vmem:[%s25438_s11 + $0x60] sm:$0xff] }
 0x677   : > { %12394 = vmatprep.subr.msk.mxu1 %vm6086_vm11, %v6071_v20  ;;  %v15435_v40 = vpack.c.bf16 %v6636_v12, %v6633_v48  ;;  %v6626_v20 = vld [vmem:[%s25438_s11 + $0x28] sm:$0xff]  ;;  %15562 = vmatprep.subr.bf16.mxu0 %v15561_v56  ;;  %v6673_v48 = vld [vmem:[%s25438_s11 + $0x1a0] sm:$0xff]  ;;  %v6675_v56 = vld [vmem:[%s25438_s11 + $0x1b0] sm:$0xff] }
 0x678   : > { %v15563_v32 = vpack.c.bf16 %v6626_v20, %v6623_v47  ;;  %v6678_v47 = vld [vmem:[%s25438_s11 + $0x1c8] sm:$0xff] }
 0x679   : > { %12393 = vmatmul.mubr.msk.f32.gmra.mrb[102].mxu1 %vm6076_vm12, %v6350_v21  ;;  %v6682_v20 = vld [vmem:[%s25438_s11 + $0x1e8] sm:$0xff] }
 0x67a   : > { %12395 = vmatpush1.msk.msra.mxu1 %vm6086_vm11, %v6070_v19  ;;  %6507 = vmatprep.mubr.f32.mxu1 %v16914_v7  ;;  %v6649_v19 = vld [vmem:[%s25438_s11 + $0xe0] sm:$0xff] }
 0x67b   : > { %15426 = vmatprep.subr.bf16.mxu1 %v15425_v55  ;;  %15564 = vmatpush3.bf16.msra.mxu0 %v15563_v32  ;;  %v15441_v58 = vpack.c.bf16 %v6649_v19, %v6646_v18  ;;  %v6664_v55 = vld [vmem:[%s25438_s11 + $0x158] sm:$0xff]  ;;  %v6685_v18 = vld [vmem:[%s25438_s11 + $0x200] sm:$0xff]  ;;  %v15463_v19 = vpack.c.bf16 %v6678_v47, %v6675_v56 }
 0x67c   : > { %15566 = vmatprep.subr.bf16.mxu0 %v15565_v28  ;;  %v15453_v37 = vpack.c.bf16 %v6667_v54, %v6664_v55  ;;  %v15465_v32 = vpack.c.bf16 %v6685_v18, %v6682_v20  ;;  %v6687_v28 = vld [vmem:[%s25438_s11 + $0x210] sm:$0xff]  ;;  %v6708_v55 = vld [vmem:[%s25438_s11 + $0x2b8] sm:$0xff] }
 0x67d   : > { %12396 = vmatmul.mubr.msk.f32.vlgmr.msra.gmra.mrb[104].mxu1 %vm6076_vm12, %v6348_v63  ;;  %v15449_v63 = vpack.c.bf16 %v6661_v14, %v6658_v34  ;;  %v15471_v1 = vpack.c.bf16 %v6690_v53, %v6687_v28  ;;  %v6702_v34 = vld [vmem:[%s25438_s11 + $0x288] sm:$0xff]  ;;  %v15581_v14 = vpack.c.bf16 %v6704_v9, %v6701_v17 }
 0x67e   : > { %6513 = vmatprep.mubr.f32.mxu1 %v16914_v7  ;;  %15428 = vmatpush1.bf16.msra.mxu1 %v15427_v51  ;;  %v6663_v51 = vld [vmem:[%s25438_s11 + $0x150] sm:$0xff] }
 0x67f   : > { %15430 = vmatprep.subr.bf16.mxu1 %v15429_v41  ;;  %15568 = vmatpush3.bf16.msra.mxu0 %v15567_v42  ;;  %v6698_v41 = vld [vmem:[%s25438_s11 + $0x268] sm:$0xff]  ;;  %v15455_v22 = vpack.c.bf16 %v6666_v4, %v6663_v51  ;;  %v15473_v42 = vpack.c.bf16 %v6697_v49, %v6694_v6  ;;  %v6713_v4 = vld [vmem:[%s25438_s11 + $0x2e0] sm:$0xff] }
 0x680   : > { %15570 = vmatprep.subr.bf16.mxu0 %v15569_v61  ;;  %v15577_v57 = vpack.c.bf16 %v6698_v41, %v6695_v45  ;;  %v6659_v45 = vld [vmem:[%s25438_s11 + $0x130] sm:$0xff]  ;;  %v6712_v41 = vld [vmem:[%s25438_s11 + $0x2d8] sm:$0xff] }
 0x681   : > { %12397 = vmatmul.mubr.msk.f32.gmra.mrb[106].mxu1 %vm6076_vm12, %v6349_v52  ;;  %v6660_v52 = vld [vmem:[%s25438_s11 + $0x138] sm:$0xff] }
 0x682   : > { %6519 = vmatprep.mubr.f32.mxu1 %v16914_v7  ;;  %15432 = vmatpush1.bf16.msra.mxu1 %v15431_v23  ;;  %v15451_v24 = vpack.c.bf16 %v6660_v52, %v6657_v59  ;;  %v6650_v23 = vld [vmem:[%s25438_s11 + $0xe8] sm:$0xff]  ;;  %v6707_v52 = vld [vmem:[%s25438_s11 + $0x2b0] sm:$0xff] }
 0x683   : > { %15434 = vmatprep.subr.bf16.mxu1 %v15433_v27  ;;  %15572 = vmatpush3.bf16.msra.mxu0 %v15571_v16  ;;  %v6670_v27 = vld [vmem:[%s25438_s11 + $0x188] sm:$0xff]  ;;  %v15579_v12 = vpack.c.bf16 %v6650_v23, %v6647_v43  ;;  %v15479_v16 = vpack.c.bf16 %v6702_v34, %v6699_v2  ;;  %v15585_v54 = vpack.c.bf16 %v6710_v35, %v6707_v52  ;;  %v6716_v43 = vld [vmem:[%s25438_s11 + $0x2f8] sm:$0xff]  ;;  %v6711_v23 = vld [vmem:[%s25438_s11 + $0x2d0] sm:$0xff] }
 0x684   : > { %v15457_v30 = vpack.c.bf16 %v6673_v48, %v6670_v27  ;;  %v6714_v27 = vld [vmem:[%s25438_s11 + $0x2e8] sm:$0xff]  ;;  %v15589_v48 = vpack.c.bf16 %v6716_v43, %v6713_v4  ;;  %v6717_v2 = vld [vmem:[%s25438_s11 + $0x300] sm:$0xff]  ;;  %v6720_v34 = vld [vmem:[%s25438_s11 + $0x318] sm:$0xff] }
 0x685   : > { %12398 = vmatmul.mubr.msk.f32.gmra.mrb[108].mxu1 %vm6076_vm12, %v6350_v21  ;;  %v15573_v21 = vpack.c.bf16 %v6692_v33, %v6689_v13  ;;  %v6653_v13 = vld [vmem:[%s25438_s11 + $0x100] sm:$0xff]  ;;  %v6706_v33 = vld [vmem:[%s25438_s11 + $0x2a8] sm:$0xff]  ;;  %v6728_v4 = vld [vmem:[%s25438_s11 + $0x358] sm:$0xff] }
 0x686   : > { %15436 = vmatpush1.bf16.msra.mxu1 %v15435_v40  ;;  %v6672_v40 = vld [vmem:[%s25438_s11 + $0x198] sm:$0xff]  ;;  %v6773_v52 = vld [vmem:[%s25438_s11 + $0x4c0] sm:$0xff] }
 0x687   : > { %15438 = vmatprep.subr.bf16.mxu1 %v15437_v29  ;;  %15574 = vmatprep.subr.bf16.mxu0 %v15573_v21  ;;  %v15459_v29 = vpack.c.bf16 %v6672_v40, %v6669_v38  ;;  %v6718_v40 = vld [vmem:[%s25438_s11 + $0x308] sm:$0xff] }
 0x688   : > { %15576 = vmatpush3.bf16.msra.mxu0 %v15575_v60  ;;  %v15483_v60 = vpack.c.bf16 %v6708_v55, %v6705_v44 }
 0x689   : > { %15578 = vmatprep.subr.bf16.mxu0 %v15577_v57 }
 0x68a   : > { %15440 = vmatpush1.bf16.msra.mxu1 %v15439_v11  ;;  %v6684_v11 = vld [vmem:[%s25438_s11 + $0x1f8] sm:$0xff] }
 0x68b   : > { %15442 = vmatprep.subr.bf16.mxu1 %v15441_v58  ;;  %v15467_v58 = vpack.c.bf16 %v6684_v11, %v6681_v26 }
 0x68c   : > { %15580 = vmatpush3.bf16.msra.mxu0 %v15579_v12  ;;  %v15487_v12 = vpack.c.bf16 %v6714_v27, %v6711_v23  ;;  %v6733_v23 = vld [vmem:[%s25438_s11 + $0x380] sm:$0xff]  ;;  %v6779_v27 = vld [vmem:[%s25438_s11 + $0x4f0] sm:$0xff] }
 0x68d   : > { %15582 = vmatprep.subr.bf16.mxu0 %v15581_v14 }
 0x68e   : > { %15444 = vmatpush1.bf16.msra.mxu1 %v15443_v15  ;;  %v6696_v15 = vld [vmem:[%s25438_s11 + $0x258] sm:$0xff] }
 0x68f   : > { %15446 = vmatprep.subr.bf16.mxu1 %v15445_v36  ;;  %v15475_v0 = vpack.c.bf16 %v6696_v15, %v6693_v46  ;;  %v6703_v36 = vld [vmem:[%s25438_s11 + $0x290] sm:$0xff] }
 0x690   : > { %v15477_v61 = vpack.c.bf16 %v6703_v36, %v6700_v25 }
 0x692   : > { %15448 = vmatpush1.bf16.msra.mxu1 %v15447_v50  ;;  %v6656_v50 = vld [vmem:[%s25438_s11 + $0x118] sm:$0xff] }
 0x693   : > { %15450 = vmatprep.subr.bf16.mxu1 %v15449_v63  ;;  %v15583_v59 = vpack.c.bf16 %v6656_v50, %v6653_v13  ;;  %v6709_v63 = vld [vmem:[%s25438_s11 + $0x2c0] sm:$0xff]  ;;  %v6722_v13 = vld [vmem:[%s25438_s11 + $0x328] sm:$0xff]  ;;  %v6724_v50 = vld [vmem:[%s25438_s11 + $0x338] sm:$0xff] }
 0x694   : > { %v15481_v21 = vpack.c.bf16 %v6709_v63, %v6706_v33  ;;  %v6727_v63 = vld [vmem:[%s25438_s11 + $0x350] sm:$0xff] }
 0x695   : > { %15584 = vmatpush3.bf16.msra.mxu0 %v15583_v59 }
 0x696   : > { %15452 = vmatpush1.bf16.msra.mxu1 %v15451_v24  ;;  %v6662_v24 = vld [vmem:[%s25438_s11 + $0x148] sm:$0xff]  ;;  %15586 = vmatprep.subr.bf16.mxu0 %v15585_v54  ;;  %v15491_v54 = vpack.c.bf16 %v6720_v34, %v6717_v2 }
 0x697   : > { %15454 = vmatprep.subr.bf16.mxu1 %v15453_v37  ;;  %v15587_v51 = vpack.c.bf16 %v6662_v24, %v6659_v45  ;;  %v6715_v37 = vld [vmem:[%s25438_s11 + $0x2f0] sm:$0xff]  ;;  %v6726_v24 = vld [vmem:[%s25438_s11 + $0x348] sm:$0xff] }
 0x698   : > { %v15485_v57 = vpack.c.bf16 %v6715_v37, %v6712_v41  ;;  %v6723_v45 = vld [vmem:[%s25438_s11 + $0x330] sm:$0xff]  ;;  %v6725_v37 = vld [vmem:[%s25438_s11 + $0x340] sm:$0xff]  ;;  %v6742_v2 = vld [vmem:[%s25438_s11 + $0x3c8] sm:$0xff] }
 0x699   : > { %15588 = vmatpush3.bf16.msra.mxu0 %v15587_v51  ;;  %v15493_v51 = vpack.c.bf16 %v6727_v63, %v6724_v50  ;;  %v6794_v50 = vld [vmem:[%s25438_s11 + $0x568] sm:$0xff] }
 0x69a   : > { %15456 = vmatpush1.bf16.msra.mxu1 %v15455_v22  ;;  %v6665_v22 = vld [vmem:[%s25438_s11 + $0x160] sm:$0xff]  ;;  %15590 = vmatprep.subr.bf16.mxu0 %v15589_v48  ;;  %v6782_v48 = vld [vmem:[%s25438_s11 + $0x508] sm:$0xff] }
 0x69b   : > { %15458 = vmatprep.subr.bf16.mxu1 %v15457_v30  ;;  %v6668_v30 = vld [vmem:[%s25438_s11 + $0x178] sm:$0xff] }
 0x69c   : > { %v15591_v38 = vpack.c.bf16 %v6668_v30, %v6665_v22 }
 0x69e   : > { %15460 = vmatpush1.bf16.msra.mxu1 %v15459_v29  ;;  %15592 = vmatpush3.bf16.msra.mxu0 %v15591_v38  ;;  %v15489_v29 = vpack.c.bf16 %v6721_v31, %v6718_v40  ;;  %v15495_v38 = vpack.c.bf16 %v6726_v24, %v6723_v45  ;;  %v15599_v40 = vpack.c.bf16 %v6728_v4, %v6725_v37  ;;  %v6729_v31 = vld [vmem:[%s25438_s11 + $0x360] sm:$0xff]  ;;  %v6746_v45 = vld [vmem:[%s25438_s11 + $0x3e8] sm:$0xff]  ;;  %v6748_v24 = vld [vmem:[%s25438_s11 + $0x3f8] sm:$0xff] }
 0x69f   : > { %15462 = vmatprep.subr.bf16.mxu1 %v15461_v8  ;;  %v6770_v8 = vld [vmem:[%s25438_s11 + $0x4a8] sm:$0xff]  ;;  %v6797_v37 = vld [vmem:[%s25438_s11 + $0x580] sm:$0xff]  ;;  %v6800_v4 = vld [vmem:[%s25438_s11 + $0x598] sm:$0xff] }
 0x6a0   : > { %v15593_v56 = vpack.c.bf16 %v6770_v8, %v6767_v3  ;;  %v6732_v3 = vld [vmem:[%s25438_s11 + $0x378] sm:$0xff]  ;;  %v15601_v8 = vpack.c.bf16 %v6782_v48, %v6779_v27 }
 0x6a2   : > { %15464 = vmatpush1.bf16.msra.mxu1 %v15463_v19  ;;  %15594 = vmatprep.subr.bf16.mxu0 %v15593_v56  ;;  %v6731_v56 = vld [vmem:[%s25438_s11 + $0x370] sm:$0xff] }
 0x6a3   : > { %15466 = vmatprep.subr.bf16.mxu1 %v15465_v32 }
 0x6a6   : > { %15468 = vmatpush1.bf16.msra.mxu1 %v15467_v58 }
 0x6a7   : > { %15470 = vmatprep.subr.bf16.mxu1 %v15469_v62 }
 0x6aa   : > { %15472 = vmatpush1.bf16.msra.mxu1 %v15471_v1 }
 0x6ab   : > { %15474 = vmatprep.subr.bf16.mxu1 %v15473_v42 }
 0x6ae   : > { %15476 = vmatpush1.bf16.msra.mxu1 %v15475_v0 }
 0x6af   : > { %15478 = vmatprep.subr.bf16.mxu1 %v15477_v61 }
 0x6b2   : > { %15480 = vmatpush1.bf16.msra.mxu1 %v15479_v16  ;;  %v6719_v16 = vld [vmem:[%s25438_s11 + $0x310] sm:$0xff] }
 0x6b3   : > { %15482 = vmatprep.subr.bf16.mxu1 %v15481_v21  ;;  %v6776_v21 = vld [vmem:[%s25438_s11 + $0x4d8] sm:$0xff] }
 0x6b4   : > { %v15597_v41 = vpack.c.bf16 %v6776_v21, %v6773_v52 }
 0x6b6   : > { %15484 = vmatpush1.bf16.msra.mxu1 %v15483_v60  ;;  %v15595_v60 = vpack.c.bf16 %v6722_v13, %v6719_v16  ;;  %v6745_v16 = vld [vmem:[%s25438_s11 + $0x3e0] sm:$0xff]  ;;  %v6791_v13 = vld [vmem:[%s25438_s11 + $0x550] sm:$0xff] }
 0x6b7   : > { %15486 = vmatprep.subr.bf16.mxu1 %v15485_v57  ;;  %v6730_v57 = vld [vmem:[%s25438_s11 + $0x368] sm:$0xff] }
 0x6ba   : > { %15488 = vmatpush1.bf16.msra.mxu1 %v15487_v12 }
 0x6bb   : > { %15490 = vmatprep.subr.bf16.mxu1 %v15489_v29  ;;  %v15497_v29 = vpack.c.bf16 %v6733_v23, %v6730_v57 }
 0x6fc   : > { %v6168_v47 = vpop.f32.mrb[80].mxu1 }
 0x6fd   : > { %v6170_v20 = vpop.f32.mrb[81].mxu1 }
 0x700   : > { %v6174_v18 = vpop.f32.mrb[82].mxu1 }
 0x701   : > { %v6176_v19 = vpop.f32.mrb[83].mxu1 }
 0x704   : > { %v22283_v32 = vpop.f32.mrb[84].mxu1 }
 0x705   : > { %v22285_v26 = vpop.f32.mrb[85].mxu1 }
 0x708   : > { %v22287_v11 = vpop.f32.mrb[86].mxu1 }
 0x709   : > { %v22289_v10 = vpop.f32.mrb[87].mxu1 }
 0x70c   : > { %v22291_v39 = vpop.f32.mrb[88].mxu1 }
 0x70d   : > { %v22293_v58 = vpop.f32.mrb[89].mxu1 }
 0x710   : > { %v22295_v62 = vpop.f32.mrb[90].mxu1 }
 0x711   : > { %v22297_v28 = vpop.f32.mrb[91].mxu1 }
 0x738   : > { %v6334_v53 = vpop.f32.mrb[92].mxu1 }
 0x739   : > { %v13862_v6 = vpop.f32.mrb[93].mxu1 }
 0x73a   : > { %v6592_v49 = vpop.f32.mrb[90].mxu0  ;;  %v6788_v6 = vld [vmem:[%s25438_s11 + $0x538] sm:$0xff] }
 0x73b   : > { %v22299_v1 = vmax.f32 %v6334_v53, %v6592_v49  ;;  %v13881_v42 = vpop.f32.mrb[91].mxu0  ;;  %v6785_v53 = vld [vmem:[%s25438_s11 + $0x520] sm:$0xff] }
 0x73c   : > { %v6339_v46 = vpop.f32.mrb[94].mxu1 }
 0x73d   : > { %v13865_v15 = vpop.f32.mrb[95].mxu1 }
 0x73e   : > { %v6597_v0 = vpop.f32.mrb[92].mxu0  ;;  %v15499_v15 = vpack.c.bf16 %v6732_v3, %v6729_v31  ;;  %v6752_v31 = vld [vmem:[%s25438_s11 + $0x418] sm:$0xff]  ;;  %v6754_v3 = vld [vmem:[%s25438_s11 + $0x428] sm:$0xff] }
 0x73f   : > { %v22301_v25 = vmax.f32 %v6339_v46, %v6597_v0  ;;  %v13884_v36 = vpop.f32.mrb[93].mxu0 }
 0x740   : > { %v6344_v17 = vpop.f32.mrb[96].mxu1  ;;  %v6735_v36 = vld [vmem:[%s25438_s11 + $0x390] sm:$0xff] }
 0x741   : > { %v13868_v61 = vpop.f32.mrb[97].mxu1 }
 0x742   : > { %v6602_v9 = vpop.f32.mrb[94].mxu0  ;;  %v15605_v61 = vpack.c.bf16 %v6788_v6, %v6785_v53 }
 0x743   : > { %v22309_v14 = vmax.f32 %v6344_v17, %v6602_v9  ;;  %v13887_v59 = vpop.f32.mrb[95].mxu0  ;;  %v6740_v9 = vld [vmem:[%s25438_s11 + $0x3b8] sm:$0xff] }
 0x744   : > { %v6426_v33 = vpop.f32.mrb[98].mxu1 }
 0x745   : > { %v22329_v35 = vmax.f32 %v6168_v47, %v6426_v33  ;;  %v6428_v44 = vpop.f32.mrb[99].mxu1  ;;  %v6734_v47 = vld [vmem:[%s25438_s11 + $0x388] sm:$0xff] }
 0x746   : > { %v22331_v55 = vmax.f32 %v6170_v20, %v6428_v44  ;;  %v6736_v20 = vld [vmem:[%s25438_s11 + $0x398] sm:$0xff]  ;;  %v15603_v0 = vpack.c.bf16 %v6734_v47, %v6731_v56  ;;  %v6741_v44 = vld [vmem:[%s25438_s11 + $0x3c0] sm:$0xff]  ;;  %v6803_v56 = vld [vmem:[%s25438_s11 + $0x5b0] sm:$0xff] }
 0x747   : > { %v6806_v47 = vld [vmem:[%s25438_s11 + $0x5c8] sm:$0xff] }
 0x748   : > { %v6432_v43 = vpop.f32.mrb[100].mxu1  ;;  %6899 = vmatprep.mubr.f32.mxu1 %v22331_v55  ;;  %7148 = vmatprep.mubr.f32.mxu0 %v22331_v55 }
 0x749   : > { %v22359_v12 = vmax.f32 %v6174_v18, %v6432_v43  ;;  %v6434_v22 = vpop.f32.mrb[101].mxu1  ;;  %6900 = vmatmul.mubr.f32.vlgmr.msra.gmra.mrb[110].mxu1 %v22329_v35  ;;  %7149 = vmatmul.mubr.f32.vlgmr.msra.gmra.mrb[96].mxu0 %v22329_v35 }
 0x74a   : > { %v22363_v30 = vmax.f32 %v6176_v19, %v6434_v22  ;;  %15492 = vmatpush1.bf16.msra.mxu1 %v15491_v54  ;;  %15596 = vmatpush3.bf16.msra.mxu0 %v15595_v60  ;;  %v6739_v19 = vld [vmem:[%s25438_s11 + $0x3b0] sm:$0xff]  ;;  %v15505_v54 = vpack.c.bf16 %v6745_v16, %v6742_v2  ;;  %v15609_v60 = vpack.c.bf16 %v6794_v50, %v6791_v13  ;;  %v6762_v50 = vld [vmem:[%s25438_s11 + $0x468] sm:$0xff] }
 0x74b   : > { %15494 = vmatprep.subr.bf16.mxu1 %v15493_v51  ;;  %15598 = vmatprep.subr.bf16.mxu0 %v15597_v41  ;;  %v15501_v17 = vpack.c.bf16 %v6739_v19, %v6736_v20  ;;  %v6751_v41 = vld [vmem:[%s25438_s11 + $0x410] sm:$0xff] }
 0x74c   : > { %v6438_v18 = vpop.f32.mrb[102].mxu1  ;;  %6905 = vmatprep.mubr.f32.mxu1 %v22363_v30  ;;  %7153 = vmatprep.mubr.f32.mxu0 %v22363_v30  ;;  %v6747_v22 = vld [vmem:[%s25438_s11 + $0x3f0] sm:$0xff] }
 0x74d   : > { %v22392_v49 = vmax.f32 %v22283_v32, %v6438_v18  ;;  %v6440_v42 = vpop.f32.mrb[103].mxu1  ;;  %6906 = vmatmul.mubr.f32.gmra.mrb[112].mxu1 %v22359_v12  ;;  %7154 = vmatmul.mubr.f32.gmra.mrb[98].mxu0 %v22359_v12  ;;  %v6738_v32 = vld [vmem:[%s25438_s11 + $0x3a8] sm:$0xff] }
 0x74e   : > { %v22397_v46 = vmax.f32 %v22285_v26, %v6440_v42  ;;  %15496 = vmatpush1.bf16.msra.mxu1 %v15495_v38  ;;  %15600 = vmatpush3.bf16.msra.mxu0 %v15599_v40  ;;  %v6737_v26 = vld [vmem:[%s25438_s11 + $0x3a0] sm:$0xff]  ;;  %v15503_v52 = vpack.c.bf16 %v6738_v32, %v6735_v36  ;;  %v6750_v38 = vld [vmem:[%s25438_s11 + $0x408] sm:$0xff]  ;;  %v15613_v40 = vpack.c.bf16 %v6800_v4, %v6797_v37  ;;  %v6760_v32 = vld [vmem:[%s25438_s11 + $0x458] sm:$0xff] }
 0x74f   : > { %15498 = vmatprep.subr.bf16.mxu1 %v15497_v29  ;;  %15602 = vmatprep.subr.bf16.mxu0 %v15601_v8  ;;  %v15607_v21 = vpack.c.bf16 %v6740_v9, %v6737_v26  ;;  %v6757_v8 = vld [vmem:[%s25438_s11 + $0x440] sm:$0xff]  ;;  %v15511_v53 = vpack.c.bf16 %v6750_v38, %v6747_v22  ;;  %v6758_v36 = vld [vmem:[%s25438_s11 + $0x448] sm:$0xff]  ;;  %v6812_v26 = vld [vmem:[%s25438_s11 + $0x5f8] sm:$0xff] }
 0x750   : > { %v6509_v34 = vpop.f32.mrb[104].mxu1  ;;  %6911 = vmatprep.mubr.f32.mxu1 %v22397_v46  ;;  %7158 = vmatprep.mubr.f32.mxu0 %v22397_v46  ;;  %v6753_v42 = vld [vmem:[%s25438_s11 + $0x420] sm:$0xff]  ;;  %v6818_v37 = vld [vmem:[%s25438_s11 + $0x628] sm:$0xff] }
 0x751   : > { %v22426_v59 = vmax.f32 %v22287_v11, %v6509_v34  ;;  %v6511_v33 = vpop.f32.mrb[105].mxu1  ;;  %6912 = vmatmul.mubr.f32.gmra.mrb[114].mxu1 %v22392_v49  ;;  %7159 = vmatmul.mubr.f32.gmra.mrb[100].mxu0 %v22392_v49  ;;  %v6744_v11 = vld [vmem:[%s25438_s11 + $0x3d8] sm:$0xff]  ;;  %v6759_v34 = vld [vmem:[%s25438_s11 + $0x450] sm:$0xff]  ;;  %v6774_v22 = vld [vmem:[%s25438_s11 + $0x4c8] sm:$0xff] }
 0x752   : > { %v22431_v63 = vmax.f32 %v22289_v10, %v6511_v33  ;;  %15500 = vmatpush1.bf16.msra.mxu1 %v15499_v15  ;;  %15604 = vmatpush3.bf16.msra.mxu0 %v15603_v0  ;;  %v6743_v10 = vld [vmem:[%s25438_s11 + $0x3d0] sm:$0xff]  ;;  %v15507_v27 = vpack.c.bf16 %v6744_v11, %v6741_v44  ;;  %v6756_v15 = vld [vmem:[%s25438_s11 + $0x438] sm:$0xff]  ;;  %v15617_v0 = vpack.c.bf16 %v6806_v47, %v6803_v56  ;;  %v6761_v33 = vld [vmem:[%s25438_s11 + $0x460] sm:$0xff] }
 0x753   : > { %15502 = vmatprep.subr.bf16.mxu1 %v15501_v17  ;;  %15606 = vmatprep.subr.bf16.mxu0 %v15605_v61  ;;  %v15611_v48 = vpack.c.bf16 %v6746_v45, %v6743_v10  ;;  %v6763_v17 = vld [vmem:[%s25438_s11 + $0x470] sm:$0xff]  ;;  %v6809_v61 = vld [vmem:[%s25438_s11 + $0x5e0] sm:$0xff]  ;;  %v15515_v9 = vpack.c.bf16 %v6756_v15, %v6753_v42  ;;  %v15519_v11 = vpack.c.bf16 %v6762_v50, %v6759_v34  ;;  %v6768_v45 = vld [vmem:[%s25438_s11 + $0x498] sm:$0xff] }
 0x754   : > { %v6515_v51 = vpop.f32.mrb[106].mxu1  ;;  %6982 = vmatprep.mubr.f32.mxu1 %v22431_v63  ;;  %7228 = vmatprep.mubr.f32.mxu0 %v22431_v63  ;;  %v15517_v16 = vpack.c.bf16 %v6763_v17, %v6760_v32  ;;  %v15621_v13 = vpack.c.bf16 %v6812_v26, %v6809_v61  ;;  %v6769_v44 = vld [vmem:[%s25438_s11 + $0x4a0] sm:$0xff]  ;;  %v6778_v38 = vld [vmem:[%s25438_s11 + $0x4e8] sm:$0xff]  ;;  %v6787_v42 = vld [vmem:[%s25438_s11 + $0x530] sm:$0xff] }
 0x755   : > { %v22460_v57 = vmax.f32 %v22291_v39, %v6515_v51  ;;  %v6517_v43 = vpop.f32.mrb[107].mxu1  ;;  %v15509_v39 = vpack.c.bf16 %v6751_v41, %v6748_v24  ;;  %v6765_v10 = vld [vmem:[%s25438_s11 + $0x480] sm:$0xff]  ;;  %v6772_v24 = vld [vmem:[%s25438_s11 + $0x4b8] sm:$0xff]  ;;  %v6775_v51 = vld [vmem:[%s25438_s11 + $0x4d0] sm:$0xff] }
 0x756   : > { %v22463_v23 = vmax.f32 %v22293_v58, %v6517_v43  ;;  %15504 = vmatpush1.bf16.msra.mxu1 %v15503_v52  ;;  %15608 = vmatpush3.bf16.msra.mxu0 %v15607_v21  ;;  %v6749_v58 = vld [vmem:[%s25438_s11 + $0x400] sm:$0xff]  ;;  %v6764_v52 = vld [vmem:[%s25438_s11 + $0x478] sm:$0xff]  ;;  %v6766_v21 = vld [vmem:[%s25438_s11 + $0x488] sm:$0xff]  ;;  %v15523_v4 = vpack.c.bf16 %v6768_v45, %v6765_v10  ;;  %v15525_v43 = vpack.c.bf16 %v6775_v51, %v6772_v24 }
 0x757   : > { %15506 = vmatprep.subr.bf16.mxu1 %v15505_v54  ;;  %15610 = vmatprep.subr.bf16.mxu0 %v15609_v60  ;;  %v15615_v6 = vpack.c.bf16 %v6752_v31, %v6749_v58  ;;  %v15623_v54 = vpack.c.bf16 %v6764_v52, %v6761_v33  ;;  %v15521_v60 = vpack.c.bf16 %v6769_v44, %v6766_v21  ;;  %v6815_v41 = vld [vmem:[%s25438_s11 + $0x610] sm:$0xff]  ;;  %v6824_v58 = vld [vmem:[%s25438_s11 + $0x658] sm:$0xff]  ;;  %v7325_v31 = vld [vmem:[%s25439_s12 + $0x8] sm:$0xff] }
 0x758   : > { %v6521_v29 = vpop.f32.mrb[108].mxu1  ;;  %v6777_v47 = vld [vmem:[%s25438_s11 + $0x4e0] sm:$0xff]  ;;  %v6786_v32 = vld [vmem:[%s25438_s11 + $0x528] sm:$0xff]  ;;  %v7331_v17 = vld [vmem:[%s25439_s12 + $0x38] sm:$0xff] }
 0x759   : > { %v22490_v20 = vmax.f32 %v22295_v62, %v6521_v29  ;;  %v6523_v18 = vpop.f32.mrb[109].mxu1  ;;  %v15513_v62 = vpack.c.bf16 %v6757_v8, %v6754_v3  ;;  %v7328_v3 = vld [vmem:[%s25439_s12 + $0x20] sm:$0xff]  ;;  %v7334_v61 = vld [vmem:[%s25439_s12 + $0x50] sm:$0xff]  ;;  %v6790_v26 = vld [vmem:[%s25438_s11 + $0x548] sm:$0xff] }
 0x75a   : > { %v22493_v19 = vmax.f32 %v22297_v28, %v6523_v18  ;;  %15508 = vmatpush1.bf16.msra.mxu1 %v15507_v27  ;;  %15612 = vmatpush3.bf16.msra.mxu0 %v15611_v48  ;;  %v6755_v28 = vld [vmem:[%s25438_s11 + $0x430] sm:$0xff]  ;;  %v15626_v27 = vpack.c.bf16 %v6818_v37, %v6815_v41  ;;  %v6780_v18 = vld [vmem:[%s25438_s11 + $0x4f8] sm:$0xff]  ;;  %v7333_v50 = vld [vmem:[%s25439_s12 + $0x48] sm:$0xff] }
 0x75b   : > { %15510 = vmatprep.subr.bf16.mxu1 %v15509_v39  ;;  %15614 = vmatprep.subr.bf16.mxu0 %v15613_v40  ;;  %v15619_v2 = vpack.c.bf16 %v6758_v36, %v6755_v28  ;;  %v6771_v48 = vld [vmem:[%s25438_s11 + $0x4b0] sm:$0xff]  ;;  %v6781_v39 = vld [vmem:[%s25438_s11 + $0x500] sm:$0xff]  ;;  %v15531_v15 = vpack.c.bf16 %v6780_v18, %v6777_v47  ;;  %v7327_v28 = vld [vmem:[%s25439_s12 + $0x18] sm:$0xff] }
 0x75c   : > { %v6821_v40 = vld [vmem:[%s25438_s11 + $0x640] sm:$0xff]  ;;  %v15527_v29 = vpack.c.bf16 %v6774_v22, %v6771_v48  ;;  %v15529_v8 = vpack.c.bf16 %v6781_v39, %v6778_v38  ;;  %v6783_v36 = vld [vmem:[%s25438_s11 + $0x510] sm:$0xff]  ;;  %v6792_v52 = vld [vmem:[%s25438_s11 + $0x558] sm:$0xff] }
 0x75d   : > { %v15629_v56 = vpack.c.bf16 %v6824_v58, %v6821_v40  ;;  %v15535_v34 = vpack.c.bf16 %v6786_v32, %v6783_v36  ;;  %v6789_v33 = vld [vmem:[%s25438_s11 + $0x540] sm:$0xff]  ;;  %v7337_v44 = vld [vmem:[%s25439_s12 + $0x68] sm:$0xff]  ;;  %v7339_v41 = vld [vmem:[%s25439_s12 + $0x78] sm:$0xff] }
 0x75e   : > { %15512 = vmatpush1.bf16.msra.mxu1 %v15511_v53  ;;  %15616 = vmatpush3.bf16.msra.mxu0 %v15615_v6  ;;  %v15631_v53 = vpack.c.bf16 %v7328_v3, %v7325_v31  ;;  %v6784_v6 = vld [vmem:[%s25438_s11 + $0x518] sm:$0xff]  ;;  %v15539_v45 = vpack.c.bf16 %v6792_v52, %v6789_v33  ;;  %v7336_v24 = vld [vmem:[%s25439_s12 + $0x60] sm:$0xff]  ;;  %v6795_v37 = vld [vmem:[%s25438_s11 + $0x570] sm:$0xff] }
 0x75f   : > { %15514 = vmatprep.subr.bf16.mxu1 %v15513_v62  ;;  %15618 = vmatprep.subr.bf16.mxu0 %v15617_v0  ;;  %v7324_v62 = vld [vmem:[%s25439_s12] sm:$0xff]  ;;  %v15533_v0 = vpack.c.bf16 %v6787_v42, %v6784_v6  ;;  %v7346_v48 = vld [vmem:[%s25439_s12 + $0xb0] sm:$0xff]  ;;  %v6802_v22 = vld [vmem:[%s25438_s11 + $0x5a8] sm:$0xff]  ;;  %v15641_v39 = vpack.c.bf16 %v7339_v41, %v7336_v24 }
 0x760   : > { %v6805_v38 = vld [vmem:[%s25438_s11 + $0x5c0] sm:$0xff]  ;;  %v7342_v58 = vld [vmem:[%s25439_s12 + $0x90] sm:$0xff]  ;;  %v7345_v31 = vld [vmem:[%s25439_s12 + $0xa8] sm:$0xff] }
 0x761   : > { %v15545_v47 = vpack.c.bf16 %v6805_v38, %v6802_v22  ;;  %v7352_v18 = vld [vmem:[%s25439_s12 + $0xe0] sm:$0xff]  ;;  %v6811_v6 = vld [vmem:[%s25438_s11 + $0x5f0] sm:$0xff]  ;;  %v15645_v42 = vpack.c.bf16 %v7345_v31, %v7342_v58  ;;  %v7357_v33 = vld [vmem:[%s25439_s12 + $0x108] sm:$0xff] }
 0x762   : > { %15516 = vmatpush1.bf16.msra.mxu1 %v15515_v9  ;;  %15620 = vmatpush3.bf16.msra.mxu0 %v15619_v2  ;;  %v6793_v9 = vld [vmem:[%s25438_s11 + $0x560] sm:$0xff]  ;;  %v15633_v2 = vpack.c.bf16 %v7327_v28, %v7324_v62  ;;  %v6807_v32 = vld [vmem:[%s25438_s11 + $0x5d0] sm:$0xff]  ;;  %v6822_v22 = vld [vmem:[%s25438_s11 + $0x648] sm:$0xff] }
 0x763   : > { %15518 = vmatprep.subr.bf16.mxu1 %v15517_v16  ;;  %15622 = vmatprep.subr.bf16.mxu0 %v15621_v13  ;;  %v7330_v16 = vld [vmem:[%s25439_s12 + $0x30] sm:$0xff]  ;;  %v15635_v13 = vpack.c.bf16 %v7334_v61, %v7331_v17  ;;  %v15537_v21 = vpack.c.bf16 %v6793_v9, %v6790_v26  ;;  %v7348_v62 = vld [vmem:[%s25439_s12 + $0xc0] sm:$0xff]  ;;  %v6810_v17 = vld [vmem:[%s25438_s11 + $0x5e8] sm:$0xff] }
 0x764   : > { %v15637_v10 = vpack.c.bf16 %v7333_v50, %v7330_v16  ;;  %v7355_v61 = vld [vmem:[%s25439_s12 + $0xf8] sm:$0xff]  ;;  %v7358_v26 = vld [vmem:[%s25439_s12 + $0x110] sm:$0xff]  ;;  %v6814_v9 = vld [vmem:[%s25438_s11 + $0x608] sm:$0xff]  ;;  %v15551_v16 = vpack.c.bf16 %v6810_v17, %v6807_v32 }
 0x765   : > { %v7354_v50 = vld [vmem:[%s25439_s12 + $0xf0] sm:$0xff]  ;;  %v7360_v41 = vld [vmem:[%s25439_s12 + $0x120] sm:$0xff]  ;;  %v7383_v32 = vld [vmem:[%s25439_s12 + $0x1d8] sm:$0xff] }
 0x766   : > { %15520 = vmatpush1.bf16.msra.mxu1 %v15519_v11  ;;  %15624 = vmatpush3.bf16.msra.mxu0 %v15623_v54  ;;  %v7340_v11 = vld [vmem:[%s25439_s12 + $0x80] sm:$0xff]  ;;  %v6796_v54 = vld [vmem:[%s25438_s11 + $0x578] sm:$0xff]  ;;  %v7374_v38 = vld [vmem:[%s25439_s12 + $0x190] sm:$0xff] }
 0x767   : > { %15522 = vmatprep.subr.bf16.mxu1 %v15521_v60  ;;  %15625 = vmatprep.subr.bf16.mxu0 %v16916_v5  ;;  %v6799_v60 = vld [vmem:[%s25438_s11 + $0x590] sm:$0xff]  ;;  %v15639_v51 = vpack.c.bf16 %v7340_v11, %v7337_v44  ;;  %v7364_v44 = vld [vmem:[%s25439_s12 + $0x140] sm:$0xff] }
 0x768   : > { %v6813_v11 = vld [vmem:[%s25438_s11 + $0x600] sm:$0xff] }
 0x769   : > { %7229 = vmatmul.mubr.f32.vlgmr.msra.gmra.mrb[102].mxu0 %v22426_v59 }
 0x76a   : > { %15524 = vmatpush1.bf16.msra.mxu1 %v15523_v4  ;;  %7233 = vmatprep.mubr.f32.mxu0 %v22463_v23  ;;  %v6798_v4 = vld [vmem:[%s25438_s11 + $0x588] sm:$0xff] }
 0x76b   : > { %15526 = vmatprep.subr.bf16.mxu1 %v15525_v43  ;;  %15627 = vmatpush3.bf16.msra.mxu0 %v15626_v27  ;;  %v15541_v43 = vpack.c.bf16 %v6799_v60, %v6796_v54  ;;  %v7343_v27 = vld [vmem:[%s25439_s12 + $0x98] sm:$0xff]  ;;  %v15543_v40 = vpack.c.bf16 %v6798_v4, %v6795_v37 }
 0x76c   : > { %15628 = vmatprep.subr.bf16.mxu0 %v16916_v5  ;;  %v15643_v3 = vpack.c.bf16 %v7346_v48, %v7343_v27  ;;  %v6816_v54 = vld [vmem:[%s25438_s11 + $0x618] sm:$0xff]  ;;  %v7370_v27 = vld [vmem:[%s25439_s12 + $0x170] sm:$0xff] }
 0x76d   : > { %7234 = vmatmul.mubr.f32.gmra.mrb[104].mxu0 %v22460_v57  ;;  %v6820_v60 = vld [vmem:[%s25438_s11 + $0x638] sm:$0xff]  ;;  %v6819_v48 = vld [vmem:[%s25438_s11 + $0x630] sm:$0xff] }
 0x76e   : > { %15528 = vmatpush1.bf16.msra.mxu1 %v15527_v29  ;;  %7238 = vmatprep.mubr.f32.mxu0 %v22493_v19  ;;  %v6801_v29 = vld [vmem:[%s25438_s11 + $0x5a0] sm:$0xff]  ;;  %v7363_v37 = vld [vmem:[%s25439_s12 + $0x138] sm:$0xff]  ;;  %v15559_v31 = vpack.c.bf16 %v6822_v22, %v6819_v48  ;;  %v7390_v22 = vld [vmem:[%s25439_s12 + $0x210] sm:$0xff] }
 0x76f   : > { %15530 = vmatprep.subr.bf16.mxu1 %v15529_v8  ;;  %15630 = vmatpush3.bf16.msra.mxu0 %v15629_v56  ;;  %v6804_v8 = vld [vmem:[%s25438_s11 + $0x5b8] sm:$0xff]  ;;  %v7349_v56 = vld [vmem:[%s25439_s12 + $0xc8] sm:$0xff] }
 0x770   : > { %15632 = vmatprep.subr.bf16.mxu0 %v15631_v53  ;;  %v6808_v53 = vld [vmem:[%s25438_s11 + $0x5d8] sm:$0xff]  ;;  %v15647_v28 = vpack.c.bf16 %v7352_v18, %v7349_v56  ;;  %v7376_v56 = vld [vmem:[%s25439_s12 + $0x1a0] sm:$0xff] }
 0x771   : > { %7239 = vmatmul.mubr.f32.gmra.mrb[106].mxu0 %v22490_v20  ;;  %v15549_v36 = vpack.c.bf16 %v6811_v6, %v6808_v53  ;;  %v7367_v4 = vld [vmem:[%s25439_s12 + $0x158] sm:$0xff]  ;;  %v7372_v53 = vld [vmem:[%s25439_s12 + $0x180] sm:$0xff] }
 0x772   : > { %15532 = vmatpush1.bf16.msra.mxu1 %v15531_v15  ;;  %13896 = vmatprep.mubr.msk.f32.mxu0 %vm16917_vm10, %v16914_v7  ;;  %v15547_v15 = vpack.c.bf16 %v6804_v8, %v6801_v29  ;;  %v15659_v58 = vpack.c.bf16 %v7370_v27, %v7367_v4  ;;  %v7369_v29 = vld [vmem:[%s25439_s12 + $0x168] sm:$0xff]  ;;  %v7392_v4 = vld [vmem:[%s25439_s12 + $0x220] sm:$0xff] }
 0x773   : > { %15534 = vmatprep.subr.bf16.mxu1 %v15533_v0  ;;  %v7351_v0 = vld [vmem:[%s25439_s12 + $0xd8] sm:$0xff]  ;;  %v7373_v8 = vld [vmem:[%s25439_s12 + $0x188] sm:$0xff] }
 0x774   : > { %v15663_v6 = vpack.c.bf16 %v7376_v56, %v7373_v8  ;;  %v7398_v8 = vld [vmem:[%s25439_s12 + $0x250] sm:$0xff]  ;;  %v7401_v56 = vld [vmem:[%s25439_s12 + $0x268] sm:$0xff] }
 0x775   : > { %13897 = vmatmul.mubr.msk.f32.vlgmr.msra.gmra.mrb[108].mxu0 %vm6825_vm13, %v22299_v1 }
 0x776   : > { %15634 = vmatpush1.bf16.msra.mxu0 %v15633_v2  ;;  %15536 = vmatpush1.bf16.msra.mxu1 %v15535_v34  ;;  %v6817_v2 = vld [vmem:[%s25438_s11 + $0x620] sm:$0xff]  ;;  %v15649_v34 = vpack.c.bf16 %v7351_v0, %v7348_v62  ;;  %v7329_v62 = vld [vmem:[%s25439_s12 + $0x28] sm:$0xff]  ;;  %v7379_v0 = vld [vmem:[%s25439_s12 + $0x1b8] sm:$0xff] }
 0x777   : > { %13899 = vmatprep.mubr.msk.f32.mxu0 %vm16917_vm10, %v16914_v7  ;;  %15636 = vmatprep.subr.bf16.mxu0 %v15635_v13  ;;  %v15651_v13 = vpack.c.bf16 %v7358_v26, %v7355_v61  ;;  %v15553_v52 = vpack.c.bf16 %v6817_v2, %v6814_v9  ;;  %v7378_v26 = vld [vmem:[%s25439_s12 + $0x1b0] sm:$0xff]  ;;  %v7381_v2 = vld [vmem:[%s25439_s12 + $0x1c8] sm:$0xff] }
 0x778   : > { %15538 = vmatprep.subr.bf16.mxu1 %v15537_v21  ;;  %v7361_v21 = vld [vmem:[%s25439_s12 + $0x128] sm:$0xff] }
 0x779   : > { %13900 = vmatmul.mubr.msk.f32.gmra.mrb[110].mxu0 %vm6825_vm13, %v22301_v25  ;;  %v15655_v24 = vpack.c.bf16 %v7364_v44, %v7361_v21  ;;  %v7389_v21 = vld [vmem:[%s25439_s12 + $0x208] sm:$0xff]  ;;  %v15669_v44 = vpack.c.bf16 %v7381_v2, %v7378_v26  ;;  %v7402_v26 = vld [vmem:[%s25439_s12 + $0x270] sm:$0xff] }
 0x77a   : > { %15638 = vmatpush1.bf16.msra.mxu0 %v15637_v10  ;;  %15540 = vmatpush1.bf16.msra.mxu1 %v15539_v45  ;;  %v6823_v10 = vld [vmem:[%s25438_s11 + $0x650] sm:$0xff]  ;;  %v15653_v45 = vpack.c.bf16 %v7357_v33, %v7354_v50  ;;  %v7385_v50 = vld [vmem:[%s25439_s12 + $0x1e8] sm:$0xff]  ;;  %v7388_v33 = vld [vmem:[%s25439_s12 + $0x200] sm:$0xff] }
 0x77b   : > { %13902 = vmatprep.mubr.msk.f32.mxu0 %vm16917_vm10, %v16914_v7  ;;  %15640 = vmatprep.subr.bf16.mxu0 %v15639_v51  ;;  %v15555_v51 = vpack.c.bf16 %v6816_v54, %v6813_v11  ;;  %v7384_v54 = vld [vmem:[%s25439_s12 + $0x1e0] sm:$0xff] }
 0x77c   : > { %15542 = vmatprep.subr.bf16.mxu1 %v15541_v43  ;;  %v15557_v43 = vpack.c.bf16 %v6823_v10, %v6820_v60  ;;  %v15671_v60 = vpack.c.bf16 %v7388_v33, %v7385_v50  ;;  %v7387_v10 = vld [vmem:[%s25439_s12 + $0x1f8] sm:$0xff]  ;;  %v7409_v50 = vld [vmem:[%s25439_s12 + $0x2a8] sm:$0xff]  ;;  %v7412_v33 = vld [vmem:[%s25439_s12 + $0x2c0] sm:$0xff] }
 0x77d   : > { %13903 = vmatmul.mubr.msk.f32.gmra.mrb[112].mxu0 %vm6825_vm13, %v22309_v14  ;;  %v15673_v27 = vpack.c.bf16 %v7387_v10, %v7384_v54  ;;  %v7408_v54 = vld [vmem:[%s25439_s12 + $0x2a0] sm:$0xff]  ;;  %v15687_v10 = vpack.c.bf16 %v7412_v33, %v7409_v50  ;;  %v7433_v50 = vld [vmem:[%s25439_s12 + $0x368] sm:$0xff] }
 0x77e   : > { %15642 = vmatpush1.bf16.msra.mxu0 %v15641_v39  ;;  %15544 = vmatpush1.bf16.msra.mxu1 %v15543_v40  ;;  %v7377_v39 = vld [vmem:[%s25439_s12 + $0x1a8] sm:$0xff]  ;;  %v15657_v40 = vpack.c.bf16 %v7363_v37, %v7360_v41  ;;  %v7391_v41 = vld [vmem:[%s25439_s12 + $0x218] sm:$0xff]  ;;  %v7394_v37 = vld [vmem:[%s25439_s12 + $0x230] sm:$0xff] }
 0x77f   : > { %7592 = vmatprep.mubr.f32.mxu0 %v22331_v55  ;;  %15644 = vmatprep.subr.bf16.mxu0 %v15643_v3  ;;  %v7366_v3 = vld [vmem:[%s25439_s12 + $0x150] sm:$0xff]  ;;  %v7436_v33 = vld [vmem:[%s25439_s12 + $0x380] sm:$0xff] }
 0x780   : > { %15546 = vmatprep.subr.bf16.mxu1 %v15545_v47  ;;  %v15767_v47 = vpack.c.bf16 %v7377_v39, %v7374_v38  ;;  %v15661_v18 = vpack.c.bf16 %v7369_v29, %v7366_v3  ;;  %v7393_v38 = vld [vmem:[%s25439_s12 + $0x228] sm:$0xff]  ;;  %v15675_v39 = vpack.c.bf16 %v7394_v37, %v7391_v41  ;;  %v7400_v29 = vld [vmem:[%s25439_s12 + $0x260] sm:$0xff]  ;;  %v7415_v41 = vld [vmem:[%s25439_s12 + $0x2d8] sm:$0xff] }
 0x781   : > { %v7418_v37 = vld [vmem:[%s25439_s12 + $0x2f0] sm:$0xff] }
 0x782   : > { %15646 = vmatpush1.bf16.msra.mxu0 %v15645_v42  ;;  %15548 = vmatpush1.bf16.msra.mxu1 %v15547_v15  ;;  %v7375_v42 = vld [vmem:[%s25439_s12 + $0x198] sm:$0xff]  ;;  %v7326_v15 = vld [vmem:[%s25439_s12 + $0x10] sm:$0xff] }
 0x783   : > { %15648 = vmatprep.subr.bf16.mxu0 %v15647_v28  ;;  %15550 = vmatprep.subr.bf16.mxu1 %v15549_v36  ;;  %v7382_v28 = vld [vmem:[%s25439_s12 + $0x1d0] sm:$0xff]  ;;  %v7380_v36 = vld [vmem:[%s25439_s12 + $0x1c0] sm:$0xff]  ;;  %v15665_v17 = vpack.c.bf16 %v7375_v42, %v7372_v53  ;;  %v15769_v61 = vpack.c.bf16 %v7329_v62, %v7326_v15  ;;  %v15783_v15 = vpack.c.bf16 %v7401_v56, %v7398_v8  ;;  %v7473_v56 = vld [vmem:[%s25439_s12 + $0x4a8] sm:$0xff] }
 0x784   : > { %v15667_v9 = vpack.c.bf16 %v7382_v28, %v7379_v0  ;;  %v7396_v53 = vld [vmem:[%s25439_s12 + $0x240] sm:$0xff]  ;;  %v7350_v62 = vld [vmem:[%s25439_s12 + $0xd0] sm:$0xff]  ;;  %v7353_v0 = vld [vmem:[%s25439_s12 + $0xe8] sm:$0xff] }
 0x785   : > { %v7403_v28 = vld [vmem:[%s25439_s12 + $0x278] sm:$0xff]  ;;  %v7470_v8 = vld [vmem:[%s25439_s12 + $0x490] sm:$0xff] }
 0x786   : > { %15650 = vmatpush1.bf16.msra.mxu0 %v15649_v34  ;;  %15552 = vmatpush1.bf16.msra.mxu1 %v15551_v16  ;;  %v7332_v34 = vld [vmem:[%s25439_s12 + $0x40] sm:$0xff]  ;;  %v7335_v16 = vld [vmem:[%s25439_s12 + $0x58] sm:$0xff] }
 0x787   : > { %15652 = vmatprep.subr.bf16.mxu0 %v15651_v13  ;;  %15554 = vmatprep.subr.bf16.mxu1 %v15553_v52  ;;  %v15771_v13 = vpack.c.bf16 %v7383_v32, %v7380_v36  ;;  %v7386_v52 = vld [vmem:[%s25439_s12 + $0x1f0] sm:$0xff]  ;;  %v15773_v11 = vpack.c.bf16 %v7335_v16, %v7332_v34  ;;  %v7404_v36 = vld [vmem:[%s25439_s12 + $0x280] sm:$0xff]  ;;  %v7407_v32 = vld [vmem:[%s25439_s12 + $0x298] sm:$0xff] }
 0x788   : > { %v15787_v34 = vpack.c.bf16 %v7407_v32, %v7404_v36  ;;  %v7356_v16 = vld [vmem:[%s25439_s12 + $0x100] sm:$0xff]  ;;  %v7479_v32 = vld [vmem:[%s25439_s12 + $0x4d8] sm:$0xff] }
 0x789   : > { %6983 = vmatmul.mubr.f32.vlgmr.msra.gmra.mrb[110].mxu1 %v22426_v59  ;;  %v7476_v36 = vld [vmem:[%s25439_s12 + $0x4c0] sm:$0xff] }
 0x78a   : > { %15654 = vmatpush1.bf16.msra.mxu0 %v15653_v45  ;;  %6988 = vmatprep.mubr.f32.mxu1 %v22463_v23  ;;  %v7338_v45 = vld [vmem:[%s25439_s12 + $0x70] sm:$0xff] }
 0x78b   : > { %15656 = vmatprep.subr.bf16.mxu0 %v15655_v24  ;;  %15556 = vmatpush1.bf16.msra.mxu1 %v15555_v51  ;;  %v7341_v24 = vld [vmem:[%s25439_s12 + $0x88] sm:$0xff]  ;;  %v15775_v51 = vpack.c.bf16 %v7389_v21, %v7386_v52  ;;  %v7410_v52 = vld [vmem:[%s25439_s12 + $0x2b0] sm:$0xff] }
 0x78c   : > { %15558 = vmatprep.subr.bf16.mxu1 %v15557_v43  ;;  %v7395_v43 = vld [vmem:[%s25439_s12 + $0x238] sm:$0xff]  ;;  %v15777_v48 = vpack.c.bf16 %v7341_v24, %v7338_v45  ;;  %v7413_v21 = vld [vmem:[%s25439_s12 + $0x2c8] sm:$0xff]  ;;  %v7362_v24 = vld [vmem:[%s25439_s12 + $0x130] sm:$0xff] }
 0x78d   : > { %6989 = vmatmul.mubr.f32.gmra.mrb[112].mxu1 %v22460_v57  ;;  %v15779_v3 = vpack.c.bf16 %v7395_v43, %v7392_v4  ;;  %v15791_v45 = vpack.c.bf16 %v7413_v21, %v7410_v52  ;;  %v7416_v4 = vld [vmem:[%s25439_s12 + $0x2e0] sm:$0xff]  ;;  %v7419_v43 = vld [vmem:[%s25439_s12 + $0x2f8] sm:$0xff]  ;;  %v7482_v52 = vld [vmem:[%s25439_s12 + $0x4f0] sm:$0xff] }
 0x78e   : > { %15658 = vmatpush1.bf16.msra.mxu0 %v15657_v40  ;;  %6994 = vmatprep.mubr.f32.mxu1 %v22493_v19  ;;  %v7344_v40 = vld [vmem:[%s25439_s12 + $0xa0] sm:$0xff]  ;;  %v7485_v21 = vld [vmem:[%s25439_s12 + $0x508] sm:$0xff] }
 0x78f   : > { %15660 = vmatprep.subr.bf16.mxu0 %v15659_v58  ;;  %15560 = vmatpush1.bf16.msra.mxu1 %v15559_v31  ;;  %v7347_v58 = vld [vmem:[%s25439_s12 + $0xb8] sm:$0xff]  ;;  %v7397_v31 = vld [vmem:[%s25439_s12 + $0x248] sm:$0xff] }
 0x790   : > { %15768 = vmatprep.subr.bf16.mxu1 %v15767_v47  ;;  %v15677_v47 = vpack.c.bf16 %v7393_v38, %v7390_v22  ;;  %v15679_v42 = vpack.c.bf16 %v7400_v29, %v7397_v31  ;;  %v7414_v22 = vld [vmem:[%s25439_s12 + $0x2d0] sm:$0xff]  ;;  %v7417_v38 = vld [vmem:[%s25439_s12 + $0x2e8] sm:$0xff]  ;;  %v7371_v31 = vld [vmem:[%s25439_s12 + $0x178] sm:$0xff] }
 0x791   : > { %6995 = vmatmul.mubr.f32.gmra.mrb[114].mxu1 %v22490_v20  ;;  %v7424_v29 = vld [vmem:[%s25439_s12 + $0x320] sm:$0xff] }
 0x792   : > { %15662 = vmatpush1.bf16.msra.mxu0 %v15661_v18  ;;  %7065 = vmatprep.mubr.f32.mxu1 %v16914_v7  ;;  %v15781_v18 = vpack.c.bf16 %v7347_v58, %v7344_v40  ;;  %v15795_v40 = vpack.c.bf16 %v7419_v43, %v7416_v4  ;;  %v7368_v58 = vld [vmem:[%s25439_s12 + $0x160] sm:$0xff]  ;;  %v7438_v43 = vld [vmem:[%s25439_s12 + $0x390] sm:$0xff] }
 0x793   : > { %15664 = vmatprep.subr.bf16.mxu0 %v15663_v6  ;;  %v7399_v6 = vld [vmem:[%s25439_s12 + $0x258] sm:$0xff] }
 0x795   : > { %12403 = vmatmul.mubr.msk.f32.vlgmr.msra.gmra.mrb[110].mxu1 %vm6825_vm13, %v22299_v1 }
 0x796   : > { %15666 = vmatpush1.bf16.msra.mxu0 %v15665_v17  ;;  %15770 = vmatpush3.bf16.msra.mxu1 %v15769_v61  ;;  %v15681_v17 = vpack.c.bf16 %v7399_v6, %v7396_v53  ;;  %v15785_v61 = vpack.c.bf16 %v7353_v0, %v7350_v62  ;;  %v15799_v6 = vpack.c.bf16 %v7473_v56, %v7470_v8  ;;  %v7422_v62 = vld [vmem:[%s25439_s12 + $0x310] sm:$0xff]  ;;  %v7425_v0 = vld [vmem:[%s25439_s12 + $0x328] sm:$0xff]  ;;  %v7447_v56 = vld [vmem:[%s25439_s12 + $0x3d8] sm:$0xff] }
 0x797   : > { %7071 = vmatprep.mubr.f32.mxu1 %v16914_v7  ;;  %15668 = vmatprep.subr.bf16.mxu0 %v15667_v9  ;;  %v7405_v9 = vld [vmem:[%s25439_s12 + $0x288] sm:$0xff] }
 0x798   : > { %15772 = vmatprep.subr.bf16.mxu1 %v15771_v13  ;;  %v7359_v13 = vld [vmem:[%s25439_s12 + $0x118] sm:$0xff] }
 0x799   : > { %12404 = vmatmul.mubr.msk.f32.gmra.mrb[112].mxu1 %vm6825_vm13, %v22301_v25 }
 0x79a   : > { %15670 = vmatpush1.bf16.msra.mxu0 %v15669_v44  ;;  %15774 = vmatpush3.bf16.msra.mxu1 %v15773_v11  ;;  %v15685_v44 = vpack.c.bf16 %v7405_v9, %v7402_v26  ;;  %v15789_v11 = vpack.c.bf16 %v7359_v13, %v7356_v16  ;;  %v7426_v26 = vld [vmem:[%s25439_s12 + $0x330] sm:$0xff]  ;;  %v7429_v9 = vld [vmem:[%s25439_s12 + $0x348] sm:$0xff]  ;;  %v7428_v16 = vld [vmem:[%s25439_s12 + $0x340] sm:$0xff] }
 0x79b   : > { %7077 = vmatprep.mubr.f32.mxu1 %v16914_v7  ;;  %15672 = vmatprep.subr.bf16.mxu0 %v15671_v60  ;;  %v7411_v60 = vld [vmem:[%s25439_s12 + $0x2b8] sm:$0xff] }
 0x79c   : > { %15776 = vmatprep.subr.bf16.mxu1 %v15775_v51  ;;  %v7365_v51 = vld [vmem:[%s25439_s12 + $0x148] sm:$0xff]  ;;  %v7431_v13 = vld [vmem:[%s25439_s12 + $0x358] sm:$0xff] }
 0x79d   : > { %12405 = vmatmul.mubr.msk.f32.gmra.mrb[114].mxu1 %vm6825_vm13, %v22309_v14 }
 0x79e   : > { %15674 = vmatpush1.bf16.msra.mxu0 %v15673_v27  ;;  %15778 = vmatpush3.bf16.msra.mxu1 %v15777_v48  ;;  %v15689_v27 = vpack.c.bf16 %v7411_v60, %v7408_v54  ;;  %v15793_v48 = vpack.c.bf16 %v7365_v51, %v7362_v24  ;;  %v7435_v54 = vld [vmem:[%s25439_s12 + $0x378] sm:$0xff]  ;;  %v15703_v60 = vpack.c.bf16 %v7436_v33, %v7433_v50  ;;  %v7442_v51 = vld [vmem:[%s25439_s12 + $0x3b0] sm:$0xff]  ;;  %v7456_v33 = vld [vmem:[%s25439_s12 + $0x420] sm:$0xff] }
 0x79f   : > { %7841 = vmatprep.mubr.f32.mxu1 %v22331_v55  ;;  %15676 = vmatprep.subr.bf16.mxu0 %v15675_v39  ;;  %v7406_v55 = vld [vmem:[%s25439_s12 + $0x290] sm:$0xff]  ;;  %v15691_v39 = vpack.c.bf16 %v7418_v37, %v7415_v41  ;;  %v7439_v24 = vld [vmem:[%s25439_s12 + $0x398] sm:$0xff]  ;;  %v7488_v41 = vld [vmem:[%s25439_s12 + $0x520] sm:$0xff] }
 0x7a0   : > { %15780 = vmatprep.subr.bf16.mxu1 %v15779_v3  ;;  %v15683_v2 = vpack.c.bf16 %v7406_v55, %v7403_v28  ;;  %v7421_v3 = vld [vmem:[%s25439_s12 + $0x308] sm:$0xff]  ;;  %v7427_v28 = vld [vmem:[%s25439_s12 + $0x338] sm:$0xff]  ;;  %v7430_v55 = vld [vmem:[%s25439_s12 + $0x350] sm:$0xff] }
 0x7a1   : > { %v15695_v53 = vpack.c.bf16 %v7424_v29, %v7421_v3  ;;  %v7491_v37 = vld [vmem:[%s25439_s12 + $0x538] sm:$0xff] }
 0x7a2   : > { %15678 = vmatpush1.bf16.msra.mxu0 %v15677_v47  ;;  %15782 = vmatpush3.bf16.msra.mxu1 %v15781_v18  ;;  %v15693_v47 = vpack.c.bf16 %v7417_v38, %v7414_v22  ;;  %v15797_v18 = vpack.c.bf16 %v7371_v31, %v7368_v58  ;;  %v15707_v22 = vpack.c.bf16 %v7442_v51, %v7439_v24  ;;  %v7494_v58 = vld [vmem:[%s25439_s12 + $0x550] sm:$0xff]  ;;  %v7497_v31 = vld [vmem:[%s25439_s12 + $0x568] sm:$0xff] }
 0x7a3   : > { %15680 = vmatprep.subr.bf16.mxu0 %v15679_v42  ;;  %15784 = vmatprep.subr.bf16.mxu1 %v15783_v15  ;;  %v7420_v42 = vld [vmem:[%s25439_s12 + $0x300] sm:$0xff]  ;;  %v7423_v15 = vld [vmem:[%s25439_s12 + $0x318] sm:$0xff]  ;;  %v15811_v38 = vpack.c.bf16 %v7491_v37, %v7488_v41  ;;  %v7462_v51 = vld [vmem:[%s25439_s12 + $0x450] sm:$0xff] }
 0x7a4   : > { %v7465_v41 = vld [vmem:[%s25439_s12 + $0x468] sm:$0xff]  ;;  %v7464_v37 = vld [vmem:[%s25439_s12 + $0x460] sm:$0xff] }
 0x7a6   : > { %15682 = vmatpush1.bf16.msra.mxu0 %v15681_v17  ;;  %15786 = vmatpush3.bf16.msra.mxu1 %v15785_v61  ;;  %v15697_v17 = vpack.c.bf16 %v7423_v15, %v7420_v42  ;;  %v15801_v61 = vpack.c.bf16 %v7425_v0, %v7422_v62  ;;  %v7500_v42 = vld [vmem:[%s25439_s12 + $0x580] sm:$0xff]  ;;  %v7503_v15 = vld [vmem:[%s25439_s12 + $0x598] sm:$0xff] }
 0x7a7   : > { %15684 = vmatprep.subr.bf16.mxu0 %v15683_v2  ;;  %15788 = vmatprep.subr.bf16.mxu1 %v15787_v34  ;;  %v15699_v2 = vpack.c.bf16 %v7430_v55, %v7427_v28  ;;  %v15803_v34 = vpack.c.bf16 %v7479_v32, %v7476_v36  ;;  %v7450_v55 = vld [vmem:[%s25439_s12 + $0x3f0] sm:$0xff]  ;;  %v7453_v36 = vld [vmem:[%s25439_s12 + $0x408] sm:$0xff]  ;;  %v7452_v32 = vld [vmem:[%s25439_s12 + $0x400] sm:$0xff] }
 0x7aa   : > { %15686 = vmatpush1.bf16.msra.mxu0 %v15685_v44  ;;  %15790 = vmatpush3.bf16.msra.mxu1 %v15789_v11  ;;  %v15701_v44 = vpack.c.bf16 %v7429_v9, %v7426_v26  ;;  %v7432_v11 = vld [vmem:[%s25439_s12 + $0x360] sm:$0xff]  ;;  %v7457_v26 = vld [vmem:[%s25439_s12 + $0x428] sm:$0xff] }
 0x7ab   : > { %15688 = vmatprep.subr.bf16.mxu0 %v15687_v10  ;;  %15792 = vmatprep.subr.bf16.mxu1 %v15791_v45  ;;  %v15807_v10 = vpack.c.bf16 %v7485_v21, %v7482_v52  ;;  %v7434_v45 = vld [vmem:[%s25439_s12 + $0x370] sm:$0xff]  ;;  %v15705_v4 = vpack.c.bf16 %v7435_v54, %v7432_v11  ;;  %v7460_v9 = vld [vmem:[%s25439_s12 + $0x440] sm:$0xff]  ;;  %v7459_v52 = vld [vmem:[%s25439_s12 + $0x438] sm:$0xff] }
 0x7ac   : > { %v15719_v50 = vpack.c.bf16 %v7460_v9, %v7457_v26  ;;  %v7458_v21 = vld [vmem:[%s25439_s12 + $0x430] sm:$0xff]  ;;  %v7463_v11 = vld [vmem:[%s25439_s12 + $0x458] sm:$0xff]  ;;  %v7489_v26 = vld [vmem:[%s25439_s12 + $0x528] sm:$0xff] }
 0x7ad   : > { %v7466_v54 = vld [vmem:[%s25439_s12 + $0x470] sm:$0xff]  ;;  %v7493_v9 = vld [vmem:[%s25439_s12 + $0x548] sm:$0xff] }
 0x7ae   : > { %15690 = vmatpush1.bf16.msra.mxu0 %v15689_v27  ;;  %15794 = vmatpush3.bf16.msra.mxu1 %v15793_v48  ;;  %v7441_v27 = vld [vmem:[%s25439_s12 + $0x3a8] sm:$0xff]  ;;  %v7440_v48 = vld [vmem:[%s25439_s12 + $0x3a0] sm:$0xff]  ;;  %v15723_v24 = vpack.c.bf16 %v7466_v54, %v7463_v11 }
 0x7af   : > { %15692 = vmatprep.subr.bf16.mxu0 %v15691_v39  ;;  %15796 = vmatprep.subr.bf16.mxu1 %v15795_v40  ;;  %v7445_v39 = vld [vmem:[%s25439_s12 + $0x3c8] sm:$0xff]  ;;  %v7448_v40 = vld [vmem:[%s25439_s12 + $0x3e0] sm:$0xff]  ;;  %v15709_v3 = vpack.c.bf16 %v7441_v27, %v7438_v43 }
 0x7b0   : > { %v15711_v8 = vpack.c.bf16 %v7448_v40, %v7445_v39  ;;  %v7469_v43 = vld [vmem:[%s25439_s12 + $0x488] sm:$0xff]  ;;  %v7472_v27 = vld [vmem:[%s25439_s12 + $0x4a0] sm:$0xff]  ;;  %v7471_v39 = vld [vmem:[%s25439_s12 + $0x498] sm:$0xff] }
 0x7b1   : > { %v7475_v40 = vld [vmem:[%s25439_s12 + $0x4b8] sm:$0xff]  ;;  %v7501_v11 = vld [vmem:[%s25439_s12 + $0x588] sm:$0xff] }
 0x7b2   : > { %15694 = vmatpush1.bf16.msra.mxu0 %v15693_v47  ;;  %15798 = vmatpush3.bf16.msra.mxu1 %v15797_v18  ;;  %v7446_v47 = vld [vmem:[%s25439_s12 + $0x3d0] sm:$0xff]  ;;  %v15815_v18 = vpack.c.bf16 %v7497_v31, %v7494_v58  ;;  %v7505_v54 = vld [vmem:[%s25439_s12 + $0x5a8] sm:$0xff] }
 0x7b3   : > { %15696 = vmatprep.subr.bf16.mxu0 %v15695_v53  ;;  %15800 = vmatprep.subr.bf16.mxu1 %v15799_v6  ;;  %v7451_v53 = vld [vmem:[%s25439_s12 + $0x3f8] sm:$0xff]  ;;  %v7454_v6 = vld [vmem:[%s25439_s12 + $0x410] sm:$0xff] }
 0x7b4   : > { %v15715_v28 = vpack.c.bf16 %v7454_v6, %v7451_v53  ;;  %v7478_v58 = vld [vmem:[%s25439_s12 + $0x4d0] sm:$0xff]  ;;  %v7524_v53 = vld [vmem:[%s25439_s12 + $0x640] sm:$0xff]  ;;  %v7527_v6 = vld [vmem:[%s25439_s12 + $0x658] sm:$0xff] }
 0x7b5   : > { %7593 = vmatmul.mubr.f32.vlgmr.msra.gmra.mrb[114].mxu0 %v22329_v35  ;;  %7842 = vmatmul.mubr.f32.vlgmr.msra.gmra.mrb[116].mxu1 %v22329_v35  ;;  %v15805_v35 = vpack.c.bf16 %v7431_v13, %v7428_v16  ;;  %v15717_v16 = vpack.c.bf16 %v7453_v36, %v7450_v55  ;;  %v7518_v31 = vld [vmem:[%s25439_s12 + $0x610] sm:$0xff]  ;;  %v7487_v55 = vld [vmem:[%s25439_s12 + $0x518] sm:$0xff] }
 0x7b6   : > { %7598 = vmatprep.mubr.f32.mxu0 %v22363_v30  ;;  %15698 = vmatpush1.bf16.msra.mxu0 %v15697_v17  ;;  %v15819_v17 = vpack.c.bf16 %v7503_v15, %v7500_v42  ;;  %v7490_v36 = vld [vmem:[%s25439_s12 + $0x530] sm:$0xff] }
 0x7b7   : > { %7846 = vmatprep.mubr.f32.mxu1 %v22363_v30  ;;  %15802 = vmatpush3.bf16.msra.mxu1 %v15801_v61  ;;  %v7437_v30 = vld [vmem:[%s25439_s12 + $0x388] sm:$0xff]  ;;  %v7455_v61 = vld [vmem:[%s25439_s12 + $0x418] sm:$0xff] }
 0x7b8   : > { %15700 = vmatprep.subr.bf16.mxu0 %v15699_v2  ;;  %15804 = vmatprep.subr.bf16.mxu1 %v15803_v34  ;;  %v7506_v2 = vld [vmem:[%s25439_s12 + $0x5b0] sm:$0xff]  ;;  %v7509_v34 = vld [vmem:[%s25439_s12 + $0x5c8] sm:$0xff]  ;;  %v15821_v13 = vpack.c.bf16 %v7455_v61, %v7452_v32 }
 0x7b9   : > { %7599 = vmatmul.mubr.f32.gmra.mrb[116].mxu0 %v22359_v12  ;;  %7847 = vmatmul.mubr.f32.gmra.mrb[118].mxu1 %v22359_v12  ;;  %v15809_v12 = vpack.c.bf16 %v7437_v30, %v7434_v45  ;;  %v15721_v45 = vpack.c.bf16 %v7459_v52, %v7456_v33  ;;  %v7486_v61 = vld [vmem:[%s25439_s12 + $0x510] sm:$0xff]  ;;  %v7499_v33 = vld [vmem:[%s25439_s12 + $0x578] sm:$0xff] }
 0x7ba   : > { %7604 = vmatprep.mubr.f32.mxu0 %v22397_v46  ;;  %15702 = vmatpush1.bf16.msra.mxu0 %v15701_v44  ;;  %v15823_v44 = vpack.c.bf16 %v7509_v34, %v7506_v2  ;;  %v7496_v2 = vld [vmem:[%s25439_s12 + $0x560] sm:$0xff]  ;;  %v15741_v34 = vpack.c.bf16 %v7489_v26, %v7486_v61  ;;  %v7502_v52 = vld [vmem:[%s25439_s12 + $0x590] sm:$0xff]  ;;  %v8046_v26 = vld [vmem:[%s25440_s13 + $0x98] sm:$0xff] }
 0x7bb   : > { %7851 = vmatprep.mubr.f32.mxu1 %v22397_v46  ;;  %15806 = vmatpush3.bf16.msra.mxu1 %v15805_v35  ;;  %v7443_v46 = vld [vmem:[%s25439_s12 + $0x3b8] sm:$0xff]  ;;  %v7461_v35 = vld [vmem:[%s25439_s12 + $0x448] sm:$0xff]  ;;  %v8045_v61 = vld [vmem:[%s25440_s13 + $0x90] sm:$0xff] }
 0x7bc   : > { %15704 = vmatprep.subr.bf16.mxu0 %v15703_v60  ;;  %15808 = vmatprep.subr.bf16.mxu1 %v15807_v10  ;;  %v15813_v29 = vpack.c.bf16 %v7443_v46, %v7440_v48  ;;  %v7512_v60 = vld [vmem:[%s25439_s12 + $0x5e0] sm:$0xff]  ;;  %v7515_v10 = vld [vmem:[%s25439_s12 + $0x5f8] sm:$0xff]  ;;  %v15825_v30 = vpack.c.bf16 %v7461_v35, %v7458_v21  ;;  %v15725_v48 = vpack.c.bf16 %v7465_v41, %v7462_v51  ;;  %v7498_v35 = vld [vmem:[%s25439_s12 + $0x570] sm:$0xff] }
 0x7bd   : > { %7605 = vmatmul.mubr.f32.gmra.mrb[118].mxu0 %v22392_v49  ;;  %7852 = vmatmul.mubr.f32.gmra.mrb[120].mxu1 %v22392_v49  ;;  %v7444_v49 = vld [vmem:[%s25439_s12 + $0x3c0] sm:$0xff]  ;;  %v7511_v51 = vld [vmem:[%s25439_s12 + $0x5d8] sm:$0xff]  ;;  %v7514_v41 = vld [vmem:[%s25439_s12 + $0x5f0] sm:$0xff] }
 0x7be   : > { %15706 = vmatpush1.bf16.msra.mxu0 %v15705_v4  ;;  %7675 = vmatprep.mubr.f32.mxu0 %v22431_v63  ;;  %v15713_v62 = vpack.c.bf16 %v7447_v56, %v7444_v49  ;;  %v15827_v4 = vpack.c.bf16 %v7515_v10, %v7512_v60  ;;  %v7468_v46 = vld [vmem:[%s25439_s12 + $0x480] sm:$0xff]  ;;  %v7474_v49 = vld [vmem:[%s25439_s12 + $0x4b0] sm:$0xff]  ;;  %v7477_v56 = vld [vmem:[%s25439_s12 + $0x4c8] sm:$0xff]  ;;  %v15749_v10 = vpack.c.bf16 %v7501_v11, %v7498_v35 }
 0x7bf   : > { %15810 = vmatpush3.bf16.msra.mxu1 %v15809_v12  ;;  %7921 = vmatprep.mubr.f32.mxu1 %v22431_v63  ;;  %v7449_v63 = vld [vmem:[%s25439_s12 + $0x3e8] sm:$0xff]  ;;  %v7467_v12 = vld [vmem:[%s25439_s12 + $0x478] sm:$0xff]  ;;  %v15733_v42 = vpack.c.bf16 %v7477_v56, %v7474_v49  ;;  %v7508_v60 = vld [vmem:[%s25439_s12 + $0x5c0] sm:$0xff] }
 0x7c0   : > { %15708 = vmatprep.subr.bf16.mxu0 %v15707_v22  ;;  %15812 = vmatprep.subr.bf16.mxu1 %v15811_v38  ;;  %v15817_v0 = vpack.c.bf16 %v7449_v63, %v7446_v47  ;;  %v15829_v22 = vpack.c.bf16 %v7467_v12, %v7464_v37  ;;  %v15727_v38 = vpack.c.bf16 %v7472_v27, %v7469_v43  ;;  %v7484_v63 = vld [vmem:[%s25439_s12 + $0x500] sm:$0xff]  ;;  %v7510_v12 = vld [vmem:[%s25439_s12 + $0x5d0] sm:$0xff]  ;;  %v7513_v43 = vld [vmem:[%s25439_s12 + $0x5e8] sm:$0xff] }
 0x7c1   : > { %v7517_v27 = vld [vmem:[%s25439_s12 + $0x608] sm:$0xff] }
 0x7c2   : > { %15710 = vmatpush1.bf16.msra.mxu0 %v15709_v3  ;;  %v7521_v3 = vld [vmem:[%s25439_s12 + $0x628] sm:$0xff] }
 0x7c3   : > { %15814 = vmatpush3.bf16.msra.mxu1 %v15813_v29  ;;  %15712 = vmatprep.subr.bf16.mxu0 %v15711_v8  ;;  %v15729_v29 = vpack.c.bf16 %v7471_v39, %v7468_v46  ;;  %v15731_v8 = vpack.c.bf16 %v7478_v58, %v7475_v40  ;;  %v15832_v47 = vpack.c.bf16 %v7521_v3, %v7518_v31  ;;  %v7516_v46 = vld [vmem:[%s25439_s12 + $0x600] sm:$0xff]  ;;  %v7519_v39 = vld [vmem:[%s25439_s12 + $0x618] sm:$0xff]  ;;  %v7526_v58 = vld [vmem:[%s25439_s12 + $0x650] sm:$0xff] }
 0x7c4   : > { %15816 = vmatprep.subr.bf16.mxu1 %v15815_v18  ;;  %v7481_v18 = vld [vmem:[%s25439_s12 + $0x4e8] sm:$0xff]  ;;  %v7523_v40 = vld [vmem:[%s25439_s12 + $0x638] sm:$0xff]  ;;  %v15761_v31 = vpack.c.bf16 %v7519_v39, %v7516_v46  ;;  %v8035_v46 = vld [vmem:[%s25440_s13 + $0x40] sm:$0xff] }
 0x7c5   : > { %v15735_v15 = vpack.c.bf16 %v7484_v63, %v7481_v18  ;;  %v15763_v3 = vpack.c.bf16 %v7526_v58, %v7523_v40  ;;  %v8036_v39 = vld [vmem:[%s25440_s13 + $0x48] sm:$0xff] }
 0x7c6   : > { %15714 = vmatpush1.bf16.msra.mxu0 %v15713_v62  ;;  %v7480_v62 = vld [vmem:[%s25439_s12 + $0x4e0] sm:$0xff] }
 0x7c7   : > { %15818 = vmatpush3.bf16.msra.mxu1 %v15817_v0  ;;  %15716 = vmatprep.subr.bf16.mxu0 %v15715_v28  ;;  %v7483_v0 = vld [vmem:[%s25439_s12 + $0x4f8] sm:$0xff]  ;;  %v15835_v28 = vpack.c.bf16 %v7527_v6, %v7524_v53  ;;  %v8043_v53 = vld [vmem:[%s25440_s13 + $0x80] sm:$0xff]  ;;  %v8044_v6 = vld [vmem:[%s25440_s13 + $0x88] sm:$0xff] }
 0x7c8   : > { %15820 = vmatprep.subr.bf16.mxu1 %v15819_v17  ;;  %v15737_v32 = vpack.c.bf16 %v7483_v0, %v7480_v62  ;;  %v15739_v17 = vpack.c.bf16 %v7490_v36, %v7487_v55  ;;  %v8028_v62 = vld [vmem:[%s25440_s13 + $0x8] sm:$0xff]  ;;  %v12432_v55 = vld [vmem:[%s25440_s13 + $0x190] sm:$0xff]  ;;  %v12433_v36 = vld [vmem:[%s25440_s13 + $0x198] sm:$0xff] }
 0x7ca   : > { %15718 = vmatpush1.bf16.msra.mxu0 %v15717_v16  ;;  %v15743_v16 = vpack.c.bf16 %v7496_v2, %v7493_v9  ;;  %v15841_v2 = vpack.c.bf16 %v8046_v26, %v8045_v61  ;;  %v12468_v61 = vld [vmem:[%s25440_s13 + $0x2a8] sm:$0xff] }
 0x7cb   : > { %15822 = vmatpush3.bf16.msra.mxu1 %v15821_v13  ;;  %15720 = vmatprep.subr.bf16.mxu0 %v15719_v50  ;;  %v7492_v13 = vld [vmem:[%s25439_s12 + $0x540] sm:$0xff]  ;;  %v7495_v50 = vld [vmem:[%s25439_s12 + $0x558] sm:$0xff] }
 0x7cc   : > { %15824 = vmatprep.subr.bf16.mxu1 %v15823_v44  ;;  %v15745_v21 = vpack.c.bf16 %v7495_v50, %v7492_v13  ;;  %v15747_v44 = vpack.c.bf16 %v7502_v52, %v7499_v33  ;;  %v8047_v52 = vld [vmem:[%s25440_s13 + $0xa0] sm:$0xff] }
 0x7ce   : > { %15722 = vmatpush1.bf16.msra.mxu0 %v15721_v45  ;;  %v15751_v45 = vpack.c.bf16 %v7508_v60, %v7505_v54  ;;  %v8031_v54 = vld [vmem:[%s25440_s13 + $0x20] sm:$0xff]  ;;  %v8032_v60 = vld [vmem:[%s25440_s13 + $0x28] sm:$0xff] }
 0x7cf   : > { %15826 = vmatpush3.bf16.msra.mxu1 %v15825_v30  ;;  %15724 = vmatprep.subr.bf16.mxu0 %v15723_v24  ;;  %v7504_v30 = vld [vmem:[%s25439_s12 + $0x5a0] sm:$0xff]  ;;  %v7507_v24 = vld [vmem:[%s25439_s12 + $0x5b8] sm:$0xff] }
 0x7d0   : > { %15828 = vmatprep.subr.bf16.mxu1 %v15827_v4  ;;  %v15753_v37 = vpack.c.bf16 %v7507_v24, %v7504_v30  ;;  %v15755_v4 = vpack.c.bf16 %v7514_v41, %v7511_v51  ;;  %v8050_v30 = vld [vmem:[%s25440_s13 + $0xb8] sm:$0xff] }
 0x7d2   : > { %15726 = vmatpush1.bf16.msra.mxu0 %v15725_v48  ;;  %v7520_v48 = vld [vmem:[%s25439_s12 + $0x620] sm:$0xff] }
 0x7d3   : > { %15830 = vmatpush3.bf16.msra.mxu1 %v15829_v22  ;;  %15728 = vmatprep.subr.bf16.mxu0 %v15727_v38  ;;  %v15757_v22 = vpack.c.bf16 %v7513_v43, %v7510_v12  ;;  %v15759_v38 = vpack.c.bf16 %v7520_v48, %v7517_v27  ;;  %v8034_v12 = vld [vmem:[%s25440_s13 + $0x38] sm:$0xff]  ;;  %v8051_v48 = vld [vmem:[%s25440_s13 + $0xc0] sm:$0xff] }
 0x7d4   : > { %15831 = vmatprep.subr.bf16.mxu1 %v16916_v5 }
 0x7d6   : > { %7922 = vmatmul.mubr.f32.vlgmr.msra.gmra.mrb[122].mxu1 %v22426_v59  ;;  %15730 = vmatpush1.bf16.msra.mxu0 %v15729_v29  ;;  %v7522_v29 = vld [vmem:[%s25439_s12 + $0x630] sm:$0xff] }
 0x7d7   : > { %7926 = vmatprep.mubr.f32.mxu1 %v22463_v23  ;;  %15732 = vmatprep.subr.bf16.mxu0 %v15731_v8  ;;  %v7525_v8 = vld [vmem:[%s25439_s12 + $0x648] sm:$0xff] }
 0x7d8   : > { %15833 = vmatpush3.bf16.msra.mxu1 %v15832_v47  ;;  %v15765_v49 = vpack.c.bf16 %v7525_v8, %v7522_v29  ;;  %v15855_v8 = vpack.c.bf16 %v8036_v39, %v8035_v46 }
 0x7d9   : > { %15834 = vmatprep.subr.bf16.mxu1 %v16916_v5 }
 0x7da   : > { %7927 = vmatmul.mubr.f32.gmra.mrb[124].mxu1 %v22460_v57  ;;  %15734 = vmatpush1.bf16.msra.mxu0 %v15733_v42  ;;  %v15837_v42 = vpack.c.bf16 %v8044_v6, %v8043_v53 }
 0x7db   : > { %7931 = vmatprep.mubr.f32.mxu1 %v22493_v19  ;;  %15736 = vmatprep.subr.bf16.mxu0 %v15735_v15  ;;  %v8027_v15 = vld [vmem:[%s25440_s13] sm:$0xff] }
 0x7dc   : > { %15836 = vmatpush3.bf16.msra.mxu1 %v15835_v28  ;;  %v15839_v0 = vpack.c.bf16 %v8028_v62, %v8027_v15  ;;  %v8057_v62 = vld [vmem:[%s25440_s13 + $0xf0] sm:$0xff] }
 0x7dd   : > { %15838 = vmatprep.subr.bf16.mxu1 %v15837_v42 }
 0x7de   : > { %7932 = vmatmul.mubr.f32.gmra.mrb[126].mxu1 %v22490_v20  ;;  %15738 = vmatpush1.bf16.msra.mxu0 %v15737_v32 }
 0x7df   : > { %13913 = vmatprep.mubr.msk.f32.mxu1 %vm16917_vm10, %v16914_v7  ;;  %15740 = vmatprep.subr.bf16.mxu0 %v15739_v17  ;;  %v15872_v17 = vpack.c.bf16 %v12433_v36, %v12432_v55  ;;  %v8041_v55 = vld [vmem:[%s25440_s13 + $0x70] sm:$0xff]  ;;  %v8042_v36 = vld [vmem:[%s25440_s13 + $0x78] sm:$0xff] }
 0x7e2   : > { %13914 = vmatmul.mubr.msk.f32.vlgmr.msra.gmra.mrb[128].mxu1 %vm6825_vm13, %v22299_v1  ;;  %15742 = vmatpush1.bf16.msra.mxu0 %v15741_v34  ;;  %v8029_v34 = vld [vmem:[%s25440_s13 + $0x10] sm:$0xff] }
 0x7e3   : > { %13916 = vmatprep.mubr.msk.f32.mxu1 %vm16917_vm10, %v16914_v7  ;;  %15744 = vmatprep.subr.bf16.mxu0 %v15743_v16  ;;  %v8030_v16 = vld [vmem:[%s25440_s13 + $0x18] sm:$0xff] }
 0x7e4   : > { %15840 = vmatpush3.bf16.msra.mxu1 %v15839_v0  ;;  %v15843_v13 = vpack.c.bf16 %v8030_v16, %v8029_v34  ;;  %v8058_v0 = vld [vmem:[%s25440_s13 + $0xf8] sm:$0xff] }
 0x7e5   : > { %15842 = vmatprep.subr.bf16.mxu1 %v15841_v2 }
 0x7e6   : > { %13917 = vmatmul.mubr.msk.f32.gmra.mrb[130].mxu1 %vm6825_vm13, %v22301_v25  ;;  %15746 = vmatpush1.bf16.msra.mxu0 %v15745_v21 }
 0x7e7   : > { %13919 = vmatprep.mubr.msk.f32.mxu1 %vm16917_vm10, %v16914_v7  ;;  %15748 = vmatprep.subr.bf16.mxu0 %v15747_v44  ;;  %v8048_v44 = vld [vmem:[%s25440_s13 + $0xa8] sm:$0xff] }
 0x7e8   : > { %15844 = vmatpush3.bf16.msra.mxu1 %v15843_v13  ;;  %v15845_v11 = vpack.c.bf16 %v8048_v44, %v8047_v52 }
 0x7ea   : > { %13920 = vmatmul.mubr.msk.f32.gmra.mrb[132].mxu1 %vm6825_vm13, %v22309_v14  ;;  %15750 = vmatpush1.bf16.msra.mxu0 %v15749_v10  ;;  %v15847_v10 = vpack.c.bf16 %v8032_v60, %v8031_v54 }
 0x7eb   : > { %15752 = vmatprep.subr.bf16.mxu0 %v15751_v45  ;;  %v8049_v45 = vld [vmem:[%s25440_s13 + $0xb0] sm:$0xff]  ;;  %15846 = vmatprep.subr.bf16.mxu1 %v15845_v11 }
 0x7ec   : > { %v15849_v41 = vpack.c.bf16 %v8050_v30, %v8049_v45  ;;  %15848 = vmatpush3.bf16.msra.mxu1 %v15847_v10 }
 0x7ee   : > { %15754 = vmatpush1.bf16.msra.mxu0 %v15753_v37  ;;  %v8033_v37 = vld [vmem:[%s25440_s13 + $0x30] sm:$0xff]  ;;  %15850 = vmatprep.subr.bf16.mxu1 %v15849_v41 }
 0x7ef   : > { %15756 = vmatprep.subr.bf16.mxu0 %v15755_v4  ;;  %v15851_v27 = vpack.c.bf16 %v8034_v12, %v8033_v37 }
 0x7f1   : > { %15852 = vmatpush3.bf16.msra.mxu1 %v15851_v27 }
 0x7f2   : > { %15758 = vmatpush1.bf16.msra.mxu0 %v15757_v22  ;;  %v8052_v22 = vld [vmem:[%s25440_s13 + $0xc8] sm:$0xff] }
 0x7f3   : > { %15760 = vmatprep.subr.bf16.mxu0 %v15759_v38  ;;  %v15853_v38 = vpack.c.bf16 %v8052_v22, %v8051_v48  ;;  %v12416_v22 = vld [vmem:[%s25440_s13 + $0x110] sm:$0xff] }
 0x7f5   : > { %7676 = vmatmul.mubr.f32.vlgmr.msra.gmra.mrb[114].mxu0 %v22426_v59  ;;  %15854 = vmatprep.subr.bf16.mxu1 %v15853_v38  ;;  %v12417_v38 = vld [vmem:[%s25440_s13 + $0x118] sm:$0xff] }
 0x7f6   : > { %7681 = vmatprep.mubr.f32.mxu0 %v22463_v23  ;;  %15762 = vmatpush1.bf16.msra.mxu0 %v15761_v31  ;;  %v8053_v31 = vld [vmem:[%s25440_s13 + $0xd0] sm:$0xff] }
 0x7f7   : > { %15764 = vmatprep.subr.bf16.mxu0 %v15763_v3  ;;  %15856 = vmatpush3.bf16.msra.mxu1 %v15855_v8  ;;  %v15874_v8 = vpack.c.bf16 %v12417_v38, %v12416_v22  ;;  %v12430_v22 = vld [vmem:[%s25440_s13 + $0x180] sm:$0xff]  ;;  %v12431_v38 = vld [vmem:[%s25440_s13 + $0x188] sm:$0xff] }
 0x7f9   : > { %7682 = vmatmul.mubr.f32.gmra.mrb[116].mxu0 %v22460_v57 }
 0x7fa   : > { %7687 = vmatprep.mubr.f32.mxu0 %v22493_v19  ;;  %15766 = vmatpush1.bf16.msra.mxu0 %v15765_v49  ;;  %v8054_v49 = vld [vmem:[%s25440_s13 + $0xd8] sm:$0xff] }
 0x7fb   : > { %15869 = vmatprep.subr.bf16.mxu0 %v16916_v5 }
 0x7fd   : > { %7688 = vmatmul.mubr.f32.gmra.mrb[118].mxu0 %v22490_v20 }
 0x7fe   : > { %7758 = vmatprep.mubr.f32.mxu0 %v16914_v7 }
 0x801   : > { %12409 = vmatmul.mubr.msk.f32.vlgmr.msra.gmra.mrb[114].mxu0 %vm6825_vm13, %v22299_v1 }
 0x802   : > { %7764 = vmatprep.mubr.f32.mxu0 %v16914_v7 }
 0x805   : > { %12410 = vmatmul.mubr.msk.f32.gmra.mrb[116].mxu0 %vm6825_vm13, %v22301_v25  ;;  %v8059_v25 = vld [vmem:[%s25440_s13 + $0x100] sm:$0xff] }
 0x806   : > { %7770 = vmatprep.mubr.f32.mxu0 %v16914_v7 }
 0x809   : > { %12411 = vmatmul.mubr.msk.f32.gmra.mrb[118].mxu0 %vm6825_vm13, %v22309_v14  ;;  %v8060_v14 = vld [vmem:[%s25440_s13 + $0x108] sm:$0xff] }
 0x80a   : > { %13926 = vmatprep.mubr.msk.f32.mxu0 %vm16917_vm10, %v16914_v7  ;;  %v15870_v63 = vpack.c.bf16 %v8060_v14, %v8059_v25  ;;  %v8039_v14 = vld [vmem:[%s25440_s13 + $0x60] sm:$0xff] }
 0x80c   : > { %15871 = vmatpush3.bf16.msra.mxu0 %v15870_v63  ;;  %v8040_v63 = vld [vmem:[%s25440_s13 + $0x68] sm:$0xff] }
 0x80d   : > { %15873 = vmatprep.subr.bf16.mxu0 %v15872_v17  ;;  %v15863_v15 = vpack.c.bf16 %v8040_v63, %v8039_v14  ;;  %v12467_v17 = vld [vmem:[%s25440_s13 + $0x2a0] sm:$0xff]  ;;  %v12420_v63 = vld [vmem:[%s25440_s13 + $0x130] sm:$0xff] }
 0x80e   : > { %v15907_v26 = vpack.c.bf16 %v12468_v61, %v12467_v17  ;;  %v12423_v17 = vld [vmem:[%s25440_s13 + $0x148] sm:$0xff]  ;;  %v12440_v61 = vld [vmem:[%s25440_s13 + $0x1d0] sm:$0xff] }
 0x81c   : > { %v13030_v59 = vpop.f32.mrb[96].mxu0 }
 0x81d   : > { %v13031_v57 = vpop.f32.mrb[97].mxu0 }
 0x81e   : > { %v13032_v23 = vadd.f32 %v13031_v57, %v13030_v59  ;;  %v15857_v59 = vpack.c.bf16 %v8054_v49, %v8053_v31  ;;  %v8037_v57 = vld [vmem:[%s25440_s13 + $0x50] sm:$0xff] }
 0x820   : > { %v13033_v20 = vpop.f32.mrb[98].mxu0  ;;  %15858 = vmatprep.subr.bf16.mxu1 %v15857_v59 }
 0x821   : > { %v13034_v19 = vpop.f32.mrb[99].mxu0 }
 0x822   : > { %v13035_v56 = vadd.f32 %v13034_v19, %v13033_v20  ;;  %v8055_v19 = vld [vmem:[%s25440_s13 + $0xe0] sm:$0xff] }
 0x824   : > { %v13036_v1 = vpop.f32.mrb[100].mxu0 }
 0x825   : > { %v13037_v47 = vpop.f32.mrb[101].mxu0 }
 0x826   : > { %v13038_v18 = vadd.f32 %v13037_v47, %v13036_v1 }
 0x83c   : > { %v13071_v28 = vpop.f32.mrb[102].mxu0 }
 0x83d   : > { %v13072_v32 = vpop.f32.mrb[103].mxu0 }
 0x83e   : > { %v13073_v9 = vadd.f32 %v13072_v32, %v13071_v28  ;;  %v15865_v28 = vpack.c.bf16 %v8058_v0, %v8057_v62  ;;  %v15867_v32 = vpack.c.bf16 %v8042_v36, %v8041_v55 }
 0x840   : > { %v13074_v50 = vpop.f32.mrb[104].mxu0  ;;  %v7231_v33 = vadd.f32 %v13073_v9, %v13032_v23  ;;  %v8038_v23 = vld [vmem:[%s25440_s13 + $0x58] sm:$0xff] }
 0x841   : > { %v13075_v21 = vpop.f32.mrb[105].mxu0 }
 0x842   : > { %v13076_v35 = vadd.f32 %v13075_v21, %v13074_v50 }
 0x844   : > { %v13077_v24 = vpop.f32.mrb[106].mxu0  ;;  %v7236_v51 = vadd.f32 %v13076_v35, %v13035_v56  ;;  %v8056_v56 = vld [vmem:[%s25440_s13 + $0xe8] sm:$0xff] }
 0x845   : > { %v13078_v4 = vpop.f32.mrb[107].mxu0  ;;  %v15861_v25 = vpack.c.bf16 %v8056_v56, %v8055_v19  ;;  %v12436_v19 = vld [vmem:[%s25440_s13 + $0x1b0] sm:$0xff]  ;;  %v12437_v56 = vld [vmem:[%s25440_s13 + $0x1b8] sm:$0xff] }
 0x846   : > { %v13079_v43 = vadd.f32 %v13078_v4, %v13077_v24  ;;  %v15880_v14 = vpack.c.bf16 %v12437_v56, %v12436_v19  ;;  %v12454_v56 = vld [vmem:[%s25440_s13 + $0x238] sm:$0xff] }
 0x848   : > { %v7310_v40 = vpop.f32.mrb[108].mxu0  ;;  %v7241_v58 = vadd.f32 %v13079_v43, %v13038_v18  ;;  %v15859_v18 = vpack.c.bf16 %v8038_v23, %v8037_v57  ;;  %v12418_v57 = vld [vmem:[%s25440_s13 + $0x120] sm:$0xff]  ;;  %v12419_v23 = vld [vmem:[%s25440_s13 + $0x128] sm:$0xff] }
 0x849   : > { %v23433_v3 = vadd.f32 %v7310_v40, %v7231_v33  ;;  %v13898_v29 = vpop.f32.mrb[109].mxu0  ;;  %v12434_v40 = vld [vmem:[%s25440_s13 + $0x1a0] sm:$0xff] }
 0x84a   : > { %15860 = vmatpush3.bf16.msra.mxu1 %v15859_v18  ;;  %v15878_v18 = vpack.c.bf16 %v12419_v23, %v12418_v57  ;;  %v12469_v57 = vld [vmem:[%s25440_s13 + $0x2b0] sm:$0xff]  ;;  %v12470_v23 = vld [vmem:[%s25440_s13 + $0x2b8] sm:$0xff] }
 0x84b   : > { %15862 = vmatprep.subr.bf16.mxu1 %v15861_v25 }
 0x84c   : > { %v7315_v20 = vpop.f32.mrb[110].mxu0 }
 0x84d   : > { %v23450_v1 = vadd.f32 %v7315_v20, %v7236_v51  ;;  %v13901_v47 = vpop.f32.mrb[111].mxu0 }
 0x84e   : > { %15864 = vmatpush3.bf16.msra.mxu1 %v15863_v15  ;;  %v12438_v15 = vld [vmem:[%s25440_s13 + $0x1c0] sm:$0xff] }
 0x84f   : > { %15866 = vmatprep.subr.bf16.mxu1 %v15865_v28 }
 0x850   : > { %v7320_v53 = vpop.f32.mrb[112].mxu0 }
 0x851   : > { %v23458_v6 = vadd.f32 %v7320_v53, %v7241_v58  ;;  %v13904_v42 = vpop.f32.mrb[113].mxu0  ;;  %v12435_v58 = vld [vmem:[%s25440_s13 + $0x1a8] sm:$0xff]  ;;  %v12421_v53 = vld [vmem:[%s25440_s13 + $0x138] sm:$0xff] }
 0x852   : > { %15868 = vmatpush3.bf16.msra.mxu1 %v15867_v32  ;;  %v15876_v59 = vpack.c.bf16 %v12435_v58, %v12434_v40  ;;  %v15882_v28 = vpack.c.bf16 %v12421_v53, %v12420_v63  ;;  %v12422_v32 = vld [vmem:[%s25440_s13 + $0x140] sm:$0xff]  ;;  %v12452_v40 = vld [vmem:[%s25440_s13 + $0x228] sm:$0xff] }
 0x853   : > { %15908 = vmatprep.subr.bf16.mxu1 %v15907_v26  ;;  %v12441_v26 = vld [vmem:[%s25440_s13 + $0x1d8] sm:$0xff]  ;;  %v12471_v63 = vld [vmem:[%s25440_s13 + $0x2c0] sm:$0xff]  ;;  %v12472_v53 = vld [vmem:[%s25440_s13 + $0x2c8] sm:$0xff] }
 0x868   : > { %v23478_v9 = vpop.f32.mrb[110].mxu1 }
 0x869   : > { %v23480_v2 = vpop.f32.mrb[111].mxu1 }
 0x86c   : > { %v23482_v34 = vpop.f32.mrb[112].mxu1 }
 0x86d   : > { %v23484_v16 = vpop.f32.mrb[113].mxu1 }
 0x870   : > { %v23486_v13 = vpop.f32.mrb[114].mxu1 }
 0x871   : > { %v23488_v50 = vpop.f32.mrb[115].mxu1 }
 0x888   : > { %v13119_v33 = vpop.f32.mrb[116].mxu1 }
 0x889   : > { %v13120_v52 = vpop.f32.mrb[117].mxu1 }
 0x88a   : > { %v13121_v21 = vadd.f32 %v13120_v52, %v13119_v33  ;;  %v15886_v33 = vpack.c.bf16 %v12423_v17, %v12422_v32  ;;  %v15888_v52 = vpack.c.bf16 %v12441_v26, %v12440_v61  ;;  %v12502_v32 = vld [vmem:[%s25440_s13 + $0x3b0] sm:$0xff]  ;;  %v12503_v17 = vld [vmem:[%s25440_s13 + $0x3b8] sm:$0xff]  ;;  %v15915_v61 = vpack.c.bf16 %v12472_v53, %v12471_v63  ;;  %v12455_v26 = vld [vmem:[%s25440_s13 + $0x240] sm:$0xff] }
 0x88b   : > { %v12480_v63 = vld [vmem:[%s25440_s13 + $0x308] sm:$0xff] }
 0x88c   : > { %v13122_v44 = vpop.f32.mrb[118].mxu1 }
 0x88d   : > { %v13123_v35 = vpop.f32.mrb[119].mxu1 }
 0x88e   : > { %v13124_v11 = vadd.f32 %v13123_v35, %v13122_v44  ;;  %v12425_v44 = vld [vmem:[%s25440_s13 + $0x158] sm:$0xff]  ;;  %v12442_v35 = vld [vmem:[%s25440_s13 + $0x1e0] sm:$0xff] }
 0x890   : > { %v13125_v54 = vpop.f32.mrb[120].mxu1 }
 0x891   : > { %v13126_v60 = vpop.f32.mrb[121].mxu1 }
 0x892   : > { %v13127_v10 = vadd.f32 %v13126_v60, %v13125_v54 }
 0x8a9   : > { %v13160_v45 = vpop.f32.mrb[122].mxu1 }
 0x8aa   : > { %v13161_v30 = vpop.f32.mrb[123].mxu1 }
 0x8ab   : > { %v13162_v24 = vadd.f32 %v13161_v30, %v13160_v45  ;;  %v12427_v45 = vld [vmem:[%s25440_s13 + $0x168] sm:$0xff]  ;;  %v12444_v30 = vld [vmem:[%s25440_s13 + $0x1f0] sm:$0xff] }
 0x8ad   : > { %v13163_v51 = vpop.f32.mrb[124].mxu1  ;;  %v7924_v41 = vadd.f32 %v13162_v24, %v13121_v21  ;;  %v12424_v21 = vld [vmem:[%s25440_s13 + $0x150] sm:$0xff]  ;;  %v12445_v24 = vld [vmem:[%s25440_s13 + $0x1f8] sm:$0xff] }
 0x8ae   : > { %v13164_v37 = vpop.f32.mrb[125].mxu1  ;;  %v15890_v54 = vpack.c.bf16 %v12425_v44, %v12424_v21  ;;  %v12473_v21 = vld [vmem:[%s25440_s13 + $0x2d0] sm:$0xff]  ;;  %v12474_v44 = vld [vmem:[%s25440_s13 + $0x2d8] sm:$0xff] }
 0x8af   : > { %v13165_v4 = vadd.f32 %v13164_v37, %v13163_v51  ;;  %v12428_v37 = vld [vmem:[%s25440_s13 + $0x170] sm:$0xff] }
 0x8b1   : > { %v13166_v12 = vpop.f32.mrb[126].mxu1  ;;  %v7929_v43 = vadd.f32 %v13165_v4, %v13124_v11  ;;  %v12443_v11 = vld [vmem:[%s25440_s13 + $0x1e8] sm:$0xff]  ;;  %v12429_v4 = vld [vmem:[%s25440_s13 + $0x178] sm:$0xff] }
 0x8b2   : > { %v13167_v27 = vpop.f32.mrb[127].mxu1  ;;  %v15892_v60 = vpack.c.bf16 %v12443_v11, %v12442_v35 }
 0x8b3   : > { %v13168_v48 = vadd.f32 %v13167_v27, %v13166_v12  ;;  %v12446_v12 = vld [vmem:[%s25440_s13 + $0x200] sm:$0xff]  ;;  %v15898_v27 = vpack.c.bf16 %v12429_v4, %v12428_v37  ;;  %v12476_v37 = vld [vmem:[%s25440_s13 + $0x2e8] sm:$0xff]  ;;  %v12486_v4 = vld [vmem:[%s25440_s13 + $0x330] sm:$0xff] }
 0x8b5   : > { %v8003_v46 = vpop.f32.mrb[128].mxu1  ;;  %v7934_v39 = vadd.f32 %v13168_v48, %v13127_v10  ;;  %v12426_v10 = vld [vmem:[%s25440_s13 + $0x160] sm:$0xff] }
 0x8b6   : > { %v8004_v31 = vadd.f32 %v8003_v46, %v7924_v41  ;;  %v13915_v29 = vpop.f32.mrb[129].mxu1  ;;  %v15894_v51 = vpack.c.bf16 %v12427_v45, %v12426_v10  ;;  %v15896_v41 = vpack.c.bf16 %v12445_v24, %v12444_v30  ;;  %v15902_v46 = vpack.c.bf16 %v12431_v38, %v12430_v22  ;;  %v12457_v24 = vld [vmem:[%s25440_s13 + $0x250] sm:$0xff]  ;;  %v12459_v38 = vld [vmem:[%s25440_s13 + $0x260] sm:$0xff] }
 0x8b7   : > { %v15919_v30 = vpack.c.bf16 %v12474_v44, %v12473_v21  ;;  %v12492_v44 = vld [vmem:[%s25440_s13 + $0x360] sm:$0xff] }
 0x8b8   : > { %v23503_v49 = vmax.f32 %v23433_v3, %v8004_v31  ;;  %v12448_v31 = vld [vmem:[%s25440_s13 + $0x210] sm:$0xff] }
 0x8b9   : > { %v8008_v20 = vpop.f32.mrb[130].mxu1 }
 0x8ba   : > { %v8009_v3 = vadd.f32 %v8008_v20, %v7929_v43  ;;  %v13918_v47 = vpop.f32.mrb[131].mxu1  ;;  %13927 = vmatmul.mubr.msk.f32.vlgmr.msra.gmra.mrb[120].mxu0 %vm8061_vm14, %v23503_v49  ;;  %v12447_v43 = vld [vmem:[%s25440_s13 + $0x208] sm:$0xff] }
 0x8bb   : > { %15875 = vmatpush3.bf16.msra.mxu0 %v15874_v8  ;;  %v15900_v48 = vpack.c.bf16 %v12447_v43, %v12446_v12  ;;  %v12487_v12 = vld [vmem:[%s25440_s13 + $0x338] sm:$0xff] }
 0x8bc   : > { %v23520_v25 = vmax.f32 %v23450_v1, %v8009_v3  ;;  %15877 = vmatprep.subr.bf16.mxu0 %v15876_v59  ;;  %v12439_v1 = vld [vmem:[%s25440_s13 + $0x1c8] sm:$0xff]  ;;  %v12449_v59 = vld [vmem:[%s25440_s13 + $0x218] sm:$0xff] }
 0x8bd   : > { %v8013_v42 = vpop.f32.mrb[132].mxu1  ;;  %v15884_v36 = vpack.c.bf16 %v12439_v1, %v12438_v15 }
 0x8be   : > { %v23534_v62 = vadd.f32 %v8013_v42, %v7934_v39  ;;  %v13921_v0 = vpop.f32.mrb[133].mxu1  ;;  %v12451_v39 = vld [vmem:[%s25440_s13 + $0x220] sm:$0xff] }
 0x8bf   : > { %15879 = vmatpush3.bf16.msra.mxu0 %v15878_v18  ;;  %v15909_v19 = vpack.c.bf16 %v12452_v40, %v12451_v39  ;;  %v12483_v0 = vld [vmem:[%s25440_s13 + $0x320] sm:$0xff]  ;;  %v15944_v39 = vpack.c.bf16 %v12487_v12, %v12486_v4  ;;  %v12477_v40 = vld [vmem:[%s25440_s13 + $0x2f0] sm:$0xff]  ;;  %v12538_v12 = vld [vmem:[%s25440_s13 + $0x4c8] sm:$0xff] }
 0x8c0   : > { %v8025_v55 = vmax.f32 %v23458_v6, %v23534_v62  ;;  %15881 = vmatprep.subr.bf16.mxu0 %v15880_v14  ;;  %v15911_v14 = vpack.c.bf16 %v12470_v23, %v12469_v57  ;;  %v12489_v57 = vld [vmem:[%s25440_s13 + $0x348] sm:$0xff]  ;;  %v12537_v4 = vld [vmem:[%s25440_s13 + $0x4c0] sm:$0xff] }
 0x8c1   : > { %v11131_v6 = vld [vmem:[%s25442_s15] sm:$0xff]  ;;  %v11132_v62 = vld [vmem:[%s25442_s15 + $0x8] sm:$0xff] }
 0x8c3   : > { %15883 = vmatpush3.bf16.msra.mxu0 %v15882_v28  ;;  %v12484_v28 = vld [vmem:[%s25440_s13 + $0x328] sm:$0xff] }
 0x8c4   : > { %15885 = vmatprep.subr.bf16.mxu0 %v15884_v36 }
 0x8c7   : > { %15887 = vmatpush3.bf16.msra.mxu0 %v15886_v33 }
 0x8c8   : > { %15889 = vmatprep.subr.bf16.mxu0 %v15888_v52  ;;  %v15940_v52 = vpack.c.bf16 %v12484_v28, %v12483_v0  ;;  %v12508_v28 = vld [vmem:[%s25440_s13 + $0x3e0] sm:$0xff] }
 0x8cb   : > { %15891 = vmatpush3.bf16.msra.mxu0 %v15890_v54  ;;  %v8245_v54 = vrot.slane %v23503_v49, 1 }
 0x8cc   : > { %15893 = vmatprep.subr.bf16.mxu0 %v15892_v60  ;;  %v15942_v60 = vpack.c.bf16 %v12503_v17, %v12502_v32  ;;  %v12463_v17 = vld [vmem:[%s25440_s13 + $0x280] sm:$0xff] }
 0x8cf   : > { %15895 = vmatpush3.bf16.msra.mxu0 %v15894_v51  ;;  %v12458_v51 = vld [vmem:[%s25440_s13 + $0x258] sm:$0xff] }
 0x8d0   : > { %15897 = vmatprep.subr.bf16.mxu0 %v15896_v41  ;;  %v12475_v41 = vld [vmem:[%s25440_s13 + $0x2e0] sm:$0xff]  ;;  %v15921_v43 = vpack.c.bf16 %v12458_v51, %v12457_v24  ;;  %v12465_v51 = vld [vmem:[%s25440_s13 + $0x290] sm:$0xff] }
 0x8d1   : > { %v15923_v22 = vpack.c.bf16 %v12476_v37, %v12475_v41  ;;  %v12466_v41 = vld [vmem:[%s25440_s13 + $0x298] sm:$0xff] }
 0x8d3   : > { %15899 = vmatpush3.bf16.msra.mxu0 %v15898_v27  ;;  %v12504_v27 = vld [vmem:[%s25440_s13 + $0x3c0] sm:$0xff] }
 0x8d4   : > { %v7760_v58 = vpop.f32.mrb[114].mxu0  ;;  %15901 = vmatprep.subr.bf16.mxu0 %v15900_v48  ;;  %v12505_v48 = vld [vmem:[%s25440_s13 + $0x3c8] sm:$0xff] }
 0x8d5   : > { %v23602_v29 = vmax.f32 %v23478_v9, %v7760_v58  ;;  %v7762_v8 = vpop.f32.mrb[115].mxu0  ;;  %v12453_v9 = vld [vmem:[%s25440_s13 + $0x230] sm:$0xff]  ;;  %v12478_v58 = vld [vmem:[%s25440_s13 + $0x2f8] sm:$0xff] }
 0x8d6   : > { %v23614_v20 = vmax.f32 %v23480_v2, %v7762_v8  ;;  %v15905_v2 = vpack.c.bf16 %v12449_v59, %v12448_v31  ;;  %v8428_v31 = vrot.slane %v23503_v49, 2  ;;  %v15946_v8 = vpack.c.bf16 %v12505_v48, %v12504_v27  ;;  %v12488_v59 = vld [vmem:[%s25440_s13 + $0x340] sm:$0xff]  ;;  %v12494_v27 = vld [vmem:[%s25440_s13 + $0x370] sm:$0xff]  ;;  %v12495_v48 = vld [vmem:[%s25440_s13 + $0x378] sm:$0xff] }
 0x8d7   : > { %15903 = vmatpush3.bf16.msra.mxu0 %v15902_v46  ;;  %v8243_v1 = vrot.slane %v23602_v29, 1  ;;  %v12460_v46 = vld [vmem:[%s25440_s13 + $0x268] sm:$0xff] }
 0x8d8   : > { %v7766_v3 = vpop.f32.mrb[116].mxu0  ;;  %8129 = vmatprep.mubr.f32.mxu1 %v23614_v20  ;;  %v8244_v47 = vrot.slane %v23614_v20, 1  ;;  %v8427_v18 = vrot.slane %v23614_v20, 2  ;;  %15904 = vmatprep.subr.bf16.mxu0 %v16916_v5  ;;  %v8610_v23 = vrot.slane %v23614_v20, 3 }
 0x8d9   : > { %v23633_v42 = vmax.f32 %v23482_v34, %v7766_v3  ;;  %v7768_v15 = vpop.f32.mrb[117].mxu0  ;;  %8130 = vmatmul.mubr.f32.vlgmr.msra.gmra.mrb[134].mxu1 %v23602_v29  ;;  %v15913_v34 = vpack.c.bf16 %v12454_v56, %v12453_v9  ;;  %v12506_v9 = vld [vmem:[%s25440_s13 + $0x3d0] sm:$0xff]  ;;  %v12507_v56 = vld [vmem:[%s25440_s13 + $0x3d8] sm:$0xff]  ;;  %v15927_v3 = vpack.c.bf16 %v12478_v58, %v12477_v40  ;;  %v12521_v40 = vld [vmem:[%s25440_s13 + $0x440] sm:$0xff] }
 0x8da   : > { %v23644_v36 = vmax.f32 %v23484_v16, %v7768_v15  ;;  %15910 = vmatpush3.bf16.msra.mxu1 %v15909_v19  ;;  %8314 = vmatprep.mubr.f32.mxu0 %v8244_v47  ;;  %v12456_v16 = vld [vmem:[%s25440_s13 + $0x248] sm:$0xff]  ;;  %v15925_v19 = vpack.c.bf16 %v12460_v46, %v12459_v38  ;;  %v12461_v47 = vld [vmem:[%s25440_s13 + $0x270] sm:$0xff]  ;;  %v15950_v53 = vpack.c.bf16 %v12507_v56, %v12506_v9  ;;  %v12512_v38 = vld [vmem:[%s25440_s13 + $0x400] sm:$0xff] }
 0x8db   : > { %8497 = vmatprep.mubr.f32.mxu1 %v8427_v18  ;;  %8315 = vmatmul.mubr.f32.vlgmr.msra.gmra.mrb[122].mxu0 %v8243_v1  ;;  %v15917_v45 = vpack.c.bf16 %v12456_v16, %v12455_v26  ;;  %v12462_v18 = vld [vmem:[%s25440_s13 + $0x278] sm:$0xff]  ;;  %v12490_v15 = vld [vmem:[%s25440_s13 + $0x350] sm:$0xff]  ;;  %v12513_v46 = vld [vmem:[%s25440_s13 + $0x408] sm:$0xff] }
 0x8dc   : > { %v23658_v33 = vpop.f32.mrb[118].mxu0  ;;  %15906 = vmatpush3.bf16.msra.mxu0 %v15905_v2  ;;  %15912 = vmatprep.subr.bf16.mxu1 %v15911_v14  ;;  %v15948_v2 = vpack.c.bf16 %v12489_v57, %v12488_v59  ;;  %v12479_v14 = vld [vmem:[%s25440_s13 + $0x300] sm:$0xff]  ;;  %v12491_v1 = vld [vmem:[%s25440_s13 + $0x358] sm:$0xff]  ;;  %v15929_v0 = vpack.c.bf16 %v12462_v18, %v12461_v47  ;;  %v12481_v16 = vld [vmem:[%s25440_s13 + $0x310] sm:$0xff]  ;;  %v15962_v57 = vpack.c.bf16 %v12513_v46, %v12512_v38  ;;  %v8426_v47 = vrot.slane %v23602_v29, 2 }
 0x8dd   : > { %v8023_v35 = vmax.f32 %v23486_v13, %v23658_v33  ;;  %v23668_v11 = vpop.f32.mrb[119].mxu0  ;;  %13933 = vmatprep.mubr.msk.f32.mxu0 %vm16917_vm10, %v16914_v7  ;;  %15939 = vmatprep.subr.bf16.mxu0 %v16916_v5  ;;  %v15931_v32 = vpack.c.bf16 %v12480_v63, %v12479_v14  ;;  %v15952_v26 = vpack.c.bf16 %v12491_v1, %v12490_v15  ;;  %v12522_v58 = vld [vmem:[%s25440_s13 + $0x448] sm:$0xff]  ;;  %v12540_v59 = vld [vmem:[%s25440_s13 + $0x4d8] sm:$0xff]  ;;  %v12514_v56 = vld [vmem:[%s25440_s13 + $0x410] sm:$0xff]  ;;  %v8793_v63 = vrot.slane %v23614_v20, 4 }
 0x8de   : > { %v8024_v10 = vmax.f32 %v23488_v50, %v23668_v11  ;;  %15914 = vmatpush3.bf16.msra.mxu1 %v15913_v34  ;;  %v12509_v34 = vld [vmem:[%s25440_s13 + $0x3e8] sm:$0xff]  ;;  %v15979_v9 = vpack.c.bf16 %v12522_v58, %v12521_v40  ;;  %v12524_v14 = vld [vmem:[%s25440_s13 + $0x458] sm:$0xff]  ;;  %v12541_v15 = vld [vmem:[%s25440_s13 + $0x4e0] sm:$0xff] }
 0x8df   : > { %13934 = vmatmul.mubr.msk.f32.vlgmr.msra.gmra.mrb[120].mxu0 %vm8061_vm14, %v8245_v54  ;;  %15916 = vmatprep.subr.bf16.mxu1 %v15915_v61  ;;  %v12464_v61 = vld [vmem:[%s25440_s13 + $0x288] sm:$0xff]  ;;  %v15954_v21 = vpack.c.bf16 %v12509_v34, %v12508_v28  ;;  %v12498_v28 = vld [vmem:[%s25440_s13 + $0x390] sm:$0xff]  ;;  %v12499_v34 = vld [vmem:[%s25440_s13 + $0x398] sm:$0xff] }
 0x8e0   : > { %15941 = vmatpush3.bf16.msra.mxu0 %v15940_v52  ;;  %13940 = vmatprep.mubr.msk.f32.mxu0 %vm16917_vm10, %v16914_v7  ;;  %v12482_v52 = vld [vmem:[%s25440_s13 + $0x318] sm:$0xff]  ;;  %v12493_v54 = vld [vmem:[%s25440_s13 + $0x368] sm:$0xff]  ;;  %v12529_v46 = vld [vmem:[%s25440_s13 + $0x480] sm:$0xff] }
 0x8e1   : > { %15943 = vmatprep.subr.bf16.mxu0 %v15942_v60  ;;  %v15933_v60 = vpack.c.bf16 %v12464_v61, %v12463_v17  ;;  %v15935_v24 = vpack.c.bf16 %v12482_v52, %v12481_v16  ;;  %v15956_v37 = vpack.c.bf16 %v12493_v54, %v12492_v44  ;;  %v12542_v1 = vld [vmem:[%s25440_s13 + $0x4e8] sm:$0xff]  ;;  %v12516_v17 = vld [vmem:[%s25440_s13 + $0x420] sm:$0xff]  ;;  %v12543_v44 = vld [vmem:[%s25440_s13 + $0x4f0] sm:$0xff] }
 0x8e2   : > { %15918 = vmatpush3.bf16.msra.mxu1 %v15917_v45  ;;  %v12510_v45 = vld [vmem:[%s25440_s13 + $0x3f0] sm:$0xff]  ;;  %v12517_v61 = vld [vmem:[%s25440_s13 + $0x428] sm:$0xff]  ;;  %v12525_v16 = vld [vmem:[%s25440_s13 + $0x460] sm:$0xff] }
 0x8e3   : > { %15920 = vmatprep.subr.bf16.mxu1 %v15919_v30  ;;  %v12511_v30 = vld [vmem:[%s25440_s13 + $0x3f8] sm:$0xff]  ;;  %v12526_v52 = vld [vmem:[%s25440_s13 + $0x468] sm:$0xff]  ;;  %v12547_v58 = vld [vmem:[%s25440_s13 + $0x510] sm:$0xff] }
 0x8e4   : > { %v12544_v54 = vld [vmem:[%s25440_s13 + $0x4f8] sm:$0xff]  ;;  %v12946_v50 = vld [vmem:[%s25440_s13 + $0x1128] sm:$0xff] }
 0x8e6   : > { %15922 = vmatpush3.bf16.msra.mxu1 %v15921_v43  ;;  %v15958_v43 = vpack.c.bf16 %v12511_v30, %v12510_v45  ;;  %v12500_v45 = vld [vmem:[%s25440_s13 + $0x3a0] sm:$0xff]  ;;  %v12501_v30 = vld [vmem:[%s25440_s13 + $0x3a8] sm:$0xff] }
 0x8e7   : > { %13941 = vmatmul.mubr.msk.f32.vlgmr.msra.gmra.mrb[120].mxu0 %vm8061_vm14, %v8428_v31  ;;  %15924 = vmatprep.subr.bf16.mxu1 %v15923_v22  ;;  %v15937_v22 = vpack.c.bf16 %v12466_v41, %v12465_v51  ;;  %v15960_v31 = vpack.c.bf16 %v12495_v48, %v12494_v27  ;;  %v15989_v51 = vpack.c.bf16 %v12544_v54, %v12543_v44  ;;  %v12527_v41 = vld [vmem:[%s25440_s13 + $0x470] sm:$0xff]  ;;  %v12519_v48 = vld [vmem:[%s25440_s13 + $0x438] sm:$0xff] }
 0x8e8   : > { %15945 = vmatpush3.bf16.msra.mxu0 %v15944_v39  ;;  %8680 = vmatprep.mubr.f32.mxu0 %v8610_v23  ;;  %v15977_v39 = vpack.c.bf16 %v12538_v12, %v12537_v4  ;;  %v12496_v23 = vld [vmem:[%s25440_s13 + $0x380] sm:$0xff]  ;;  %v15972_v4 = vpack.c.bf16 %v12501_v30, %v12500_v45  ;;  %v12518_v27 = vld [vmem:[%s25440_s13 + $0x430] sm:$0xff]  ;;  %v12573_v54 = vld [vmem:[%s25440_s13 + $0x5d8] sm:$0xff] }
 0x8e9   : > { %15947 = vmatprep.subr.bf16.mxu0 %v15946_v8  ;;  %v12539_v8 = vld [vmem:[%s25440_s13 + $0x4d0] sm:$0xff]  ;;  %v12545_v12 = vld [vmem:[%s25440_s13 + $0x500] sm:$0xff]  ;;  %v15975_v40 = vpack.c.bf16 %v12519_v48, %v12518_v27 }
 0x8ea   : > { %15926 = vmatpush3.bf16.msra.mxu1 %v15925_v19  ;;  %v12497_v19 = vld [vmem:[%s25440_s13 + $0x388] sm:$0xff]  ;;  %v15981_v18 = vpack.c.bf16 %v12540_v59, %v12539_v8  ;;  %v8609_v8 = vrot.slane %v23602_v29, 3  ;;  %v12553_v59 = vld [vmem:[%s25440_s13 + $0x540] sm:$0xff]  ;;  %v12572_v44 = vld [vmem:[%s25440_s13 + $0x5d0] sm:$0xff] }
 0x8eb   : > { %15928 = vmatprep.subr.bf16.mxu1 %v15927_v3  ;;  %v12515_v3 = vld [vmem:[%s25440_s13 + $0x418] sm:$0xff]  ;;  %v12609_v48 = vld [vmem:[%s25440_s13 + $0x6f0] sm:$0xff] }
 0x8ec   : > { %15949 = vmatpush3.bf16.msra.mxu0 %v15948_v2  ;;  %v12523_v2 = vld [vmem:[%s25440_s13 + $0x450] sm:$0xff] }
 0x8ed   : > { %15951 = vmatprep.subr.bf16.mxu0 %v15950_v53  ;;  %v15964_v53 = vpack.c.bf16 %v12497_v19, %v12496_v23 }
 0x8ee   : > { %15930 = vmatpush3.bf16.msra.mxu1 %v15929_v0  ;;  %v15966_v0 = vpack.c.bf16 %v12515_v3, %v12514_v56  ;;  %v12532_v56 = vld [vmem:[%s25440_s13 + $0x498] sm:$0xff] }
 0x8ef   : > { %15932 = vmatprep.subr.bf16.mxu1 %v15931_v32  ;;  %v15983_v32 = vpack.c.bf16 %v12524_v14, %v12523_v2  ;;  %v8611_v2 = vrot.slane %v23503_v49, 3 }
 0x8f0   : > { %15953 = vmatpush3.bf16.msra.mxu0 %v15952_v26  ;;  %v15985_v26 = vpack.c.bf16 %v12542_v1, %v12541_v15  ;;  %v12534_v15 = vld [vmem:[%s25440_s13 + $0x4a8] sm:$0xff]  ;;  %v12551_v1 = vld [vmem:[%s25440_s13 + $0x530] sm:$0xff] }
 0x8f1   : > { %15955 = vmatprep.subr.bf16.mxu0 %v15954_v21  ;;  %v15968_v21 = vpack.c.bf16 %v12499_v34, %v12498_v28  ;;  %v12588_v28 = vld [vmem:[%s25440_s13 + $0x650] sm:$0xff]  ;;  %v12589_v34 = vld [vmem:[%s25440_s13 + $0x658] sm:$0xff] }
 0x8f2   : > { %15934 = vmatpush3.bf16.msra.mxu1 %v15933_v60  ;;  %v15970_v60 = vpack.c.bf16 %v12517_v61, %v12516_v17  ;;  %v12607_v17 = vld [vmem:[%s25440_s13 + $0x6e0] sm:$0xff]  ;;  %v12608_v61 = vld [vmem:[%s25440_s13 + $0x6e8] sm:$0xff] }
 0x8f3   : > { %15936 = vmatprep.subr.bf16.mxu1 %v15935_v24  ;;  %v15987_v24 = vpack.c.bf16 %v12526_v52, %v12525_v16  ;;  %v12535_v16 = vld [vmem:[%s25440_s13 + $0x4b0] sm:$0xff]  ;;  %v12536_v52 = vld [vmem:[%s25440_s13 + $0x4b8] sm:$0xff]  ;;  %v16047_v45 = vpack.c.bf16 %v12608_v61, %v12607_v17 }
 0x8f4   : > { %15957 = vmatpush3.bf16.msra.mxu0 %v15956_v37  ;;  %v12528_v37 = vld [vmem:[%s25440_s13 + $0x478] sm:$0xff]  ;;  %v16007_v30 = vpack.c.bf16 %v12536_v52, %v12535_v16  ;;  %v12613_v17 = vld [vmem:[%s25440_s13 + $0x710] sm:$0xff]  ;;  %v12562_v16 = vld [vmem:[%s25440_s13 + $0x580] sm:$0xff] }
 0x8f5   : > { %15959 = vmatprep.subr.bf16.mxu0 %v15958_v43  ;;  %v12546_v43 = vld [vmem:[%s25440_s13 + $0x508] sm:$0xff]  ;;  %v12614_v61 = vld [vmem:[%s25440_s13 + $0x718] sm:$0xff] }
 0x8f6   : > { %15938 = vmatpush3.bf16.msra.mxu1 %v15937_v22  ;;  %v15991_v22 = vpack.c.bf16 %v12528_v37, %v12527_v41  ;;  %v15993_v38 = vpack.c.bf16 %v12546_v43, %v12545_v12  ;;  %v12557_v41 = vld [vmem:[%s25440_s13 + $0x558] sm:$0xff]  ;;  %v12574_v37 = vld [vmem:[%s25440_s13 + $0x5e0] sm:$0xff]  ;;  %v12592_v43 = vld [vmem:[%s25440_s13 + $0x668] sm:$0xff] }
 0x8f7   : > { %15978 = vmatprep.subr.bf16.mxu1 %v15977_v39  ;;  %v12530_v39 = vld [vmem:[%s25440_s13 + $0x488] sm:$0xff]  ;;  %v12591_v12 = vld [vmem:[%s25440_s13 + $0x660] sm:$0xff] }
 0x8f8   : > { %15961 = vmatpush3.bf16.msra.mxu0 %v15960_v31  ;;  %v12548_v31 = vld [vmem:[%s25440_s13 + $0x518] sm:$0xff]  ;;  %v15995_v23 = vpack.c.bf16 %v12530_v39, %v12529_v46  ;;  %v12558_v39 = vld [vmem:[%s25440_s13 + $0x560] sm:$0xff]  ;;  %v12563_v52 = vld [vmem:[%s25440_s13 + $0x588] sm:$0xff] }
 0x8f9   : > { %8498 = vmatmul.mubr.f32.vlgmr.msra.gmra.mrb[136].mxu1 %v8426_v47  ;;  %15963 = vmatprep.subr.bf16.mxu0 %v15962_v57  ;;  %v12554_v57 = vld [vmem:[%s25440_s13 + $0x548] sm:$0xff]  ;;  %v15997_v19 = vpack.c.bf16 %v12548_v31, %v12547_v58  ;;  %v12549_v47 = vld [vmem:[%s25440_s13 + $0x520] sm:$0xff]  ;;  %v8976_v58 = vrot.slane %v23614_v20, 5  ;;  %v16049_v31 = vpack.c.bf16 %v12592_v43, %v12591_v12  ;;  %v12565_v12 = vld [vmem:[%s25440_s13 + $0x598] sm:$0xff] }
 0x8fa   : > { %15980 = vmatpush3.bf16.msra.mxu1 %v15979_v9  ;;  %8863 = vmatprep.mubr.f32.mxu1 %v8793_v63  ;;  %v12531_v9 = vld [vmem:[%s25440_s13 + $0x490] sm:$0xff]  ;;  %v16010_v3 = vpack.c.bf16 %v12554_v57, %v12553_v59  ;;  %v12577_v59 = vld [vmem:[%s25440_s13 + $0x5f8] sm:$0xff]  ;;  %v8977_v57 = vrot.slane %v23503_v49, 5 }
 0x8fb   : > { %15982 = vmatprep.subr.bf16.mxu1 %v15981_v18  ;;  %v12550_v18 = vld [vmem:[%s25440_s13 + $0x528] sm:$0xff]  ;;  %v15999_v14 = vpack.c.bf16 %v12532_v56, %v12531_v9  ;;  %v12594_v9 = vld [vmem:[%s25440_s13 + $0x678] sm:$0xff]  ;;  %v9159_v56 = vrot.slane %v23614_v20, 6 }
 0x8fc   : > { %15965 = vmatpush3.bf16.msra.mxu0 %v15964_v53  ;;  %v16001_v63 = vpack.c.bf16 %v12550_v18, %v12549_v47  ;;  %v12533_v53 = vld [vmem:[%s25440_s13 + $0x4a0] sm:$0xff]  ;;  %v12612_v18 = vld [vmem:[%s25440_s13 + $0x708] sm:$0xff] }
 0x8fd   : > { %15967 = vmatprep.subr.bf16.mxu0 %v15966_v0  ;;  %v12552_v0 = vld [vmem:[%s25440_s13 + $0x538] sm:$0xff]  ;;  %v12611_v47 = vld [vmem:[%s25440_s13 + $0x700] sm:$0xff] }
 0x8fe   : > { %15984 = vmatpush3.bf16.msra.mxu1 %v15983_v32  ;;  %v16003_v32 = vpack.c.bf16 %v12534_v15, %v12533_v53  ;;  %v12578_v15 = vld [vmem:[%s25440_s13 + $0x600] sm:$0xff] }
 0x8ff   : > { %15986 = vmatprep.subr.bf16.mxu1 %v15985_v26  ;;  %v16005_v26 = vpack.c.bf16 %v12552_v0, %v12551_v1  ;;  %v12579_v1 = vld [vmem:[%s25440_s13 + $0x608] sm:$0xff]  ;;  %v16055_v0 = vpack.c.bf16 %v12612_v18, %v12611_v47  ;;  %v12619_v18 = vld [vmem:[%s25440_s13 + $0x740] sm:$0xff] }
 0x900   : > { %15969 = vmatpush3.bf16.msra.mxu0 %v15968_v21  ;;  %v16045_v21 = vpack.c.bf16 %v12589_v34, %v12588_v28  ;;  %v12595_v28 = vld [vmem:[%s25440_s13 + $0x680] sm:$0xff]  ;;  %v12596_v34 = vld [vmem:[%s25440_s13 + $0x688] sm:$0xff] }
 0x901   : > { %15971 = vmatprep.subr.bf16.mxu0 %v15970_v60  ;;  %v8794_v60 = vrot.slane %v23503_v49, 4 }
 0x902   : > { %15988 = vmatpush3.bf16.msra.mxu1 %v15987_v24  ;;  %v16012_v24 = vpack.c.bf16 %v12573_v54, %v12572_v44  ;;  %v12580_v44 = vld [vmem:[%s25440_s13 + $0x610] sm:$0xff]  ;;  %v12581_v54 = vld [vmem:[%s25440_s13 + $0x618] sm:$0xff] }
 0x903   : > { %15990 = vmatprep.subr.bf16.mxu1 %v15989_v51  ;;  %v12556_v51 = vld [vmem:[%s25440_s13 + $0x550] sm:$0xff] }
 0x904   : > { %15973 = vmatpush3.bf16.msra.mxu0 %v15972_v4  ;;  %v12575_v4 = vld [vmem:[%s25440_s13 + $0x5e8] sm:$0xff]  ;;  %v16014_v27 = vpack.c.bf16 %v12557_v41, %v12556_v51  ;;  %v12615_v51 = vld [vmem:[%s25440_s13 + $0x720] sm:$0xff] }
 0x905   : > { %15974 = vmatprep.subr.bf16.mxu0 %v16916_v5  ;;  %v16016_v46 = vpack.c.bf16 %v12575_v4, %v12574_v37  ;;  %v12616_v41 = vld [vmem:[%s25440_s13 + $0x728] sm:$0xff]  ;;  %v16028_v37 = vpack.c.bf16 %v12581_v54, %v12580_v44  ;;  %v12564_v4 = vld [vmem:[%s25440_s13 + $0x590] sm:$0xff] }
 0x906   : > { %15992 = vmatpush3.bf16.msra.mxu1 %v15991_v22  ;;  %v12610_v22 = vld [vmem:[%s25440_s13 + $0x6f8] sm:$0xff]  ;;  %v12642_v54 = vld [vmem:[%s25440_s13 + $0x7f0] sm:$0xff] }
 0x907   : > { %8681 = vmatmul.mubr.f32.vlgmr.msra.gmra.mrb[124].mxu0 %v8609_v8  ;;  %15994 = vmatprep.subr.bf16.mxu1 %v15993_v38  ;;  %v8792_v38 = vrot.slane %v23602_v29, 4  ;;  %v12576_v8 = vld [vmem:[%s25440_s13 + $0x5f0] sm:$0xff] }
 0x908   : > { %15976 = vmatpush3.bf16.msra.mxu0 %v15975_v40  ;;  %13947 = vmatprep.mubr.msk.f32.mxu0 %vm16917_vm10, %v16914_v7  ;;  %v12559_v40 = vld [vmem:[%s25440_s13 + $0x568] sm:$0xff] }
 0x909   : > { %16009 = vmatprep.subr.bf16.mxu0 %v16916_v5 }
 0x90a   : > { %15996 = vmatpush3.bf16.msra.mxu1 %v15995_v23  ;;  %v16051_v23 = vpack.c.bf16 %v12610_v22, %v12609_v48  ;;  %v12583_v48 = vld [vmem:[%s25440_s13 + $0x628] sm:$0xff]  ;;  %v16063_v22 = vpack.c.bf16 %v12616_v41, %v12615_v51 }
 0x90b   : > { %13948 = vmatmul.mubr.msk.f32.vlgmr.msra.gmra.mrb[120].mxu0 %vm8061_vm14, %v8611_v2  ;;  %15998 = vmatprep.subr.bf16.mxu1 %v15997_v19  ;;  %v12593_v19 = vld [vmem:[%s25440_s13 + $0x670] sm:$0xff]  ;;  %v16020_v2 = vpack.c.bf16 %v12577_v59, %v12576_v8  ;;  %v12566_v8 = vld [vmem:[%s25440_s13 + $0x5a0] sm:$0xff]  ;;  %v12567_v59 = vld [vmem:[%s25440_s13 + $0x5a8] sm:$0xff] }
 0x90c   : > { %16011 = vmatpush3.bf16.msra.mxu0 %v16010_v3  ;;  %13954 = vmatprep.mubr.msk.f32.mxu0 %vm16917_vm10, %v16914_v7  ;;  %v16018_v3 = vpack.c.bf16 %v12559_v40, %v12558_v39  ;;  %v16053_v53 = vpack.c.bf16 %v12594_v9, %v12593_v19  ;;  %v16030_v39 = vpack.c.bf16 %v12565_v12, %v12564_v4  ;;  %v12617_v40 = vld [vmem:[%s25440_s13 + $0x730] sm:$0xff]  ;;  %v12585_v19 = vld [vmem:[%s25440_s13 + $0x638] sm:$0xff] }
 0x90d   : > { %16044 = vmatprep.subr.bf16.mxu0 %v16916_v5  ;;  %v16034_v47 = vpack.c.bf16 %v12567_v59, %v12566_v8  ;;  %v12627_v4 = vld [vmem:[%s25440_s13 + $0x778] sm:$0xff]  ;;  %v12646_v59 = vld [vmem:[%s25440_s13 + $0x810] sm:$0xff] }
 0x90e   : > { %16000 = vmatpush3.bf16.msra.mxu1 %v15999_v14  ;;  %v12560_v14 = vld [vmem:[%s25440_s13 + $0x570] sm:$0xff] }
 0x90f   : > { %16002 = vmatprep.subr.bf16.mxu1 %v16001_v63  ;;  %v12561_v63 = vld [vmem:[%s25440_s13 + $0x578] sm:$0xff] }
 0x912   : > { %16004 = vmatpush3.bf16.msra.mxu1 %v16003_v32  ;;  %v16022_v32 = vpack.c.bf16 %v12561_v63, %v12560_v14  ;;  %v12568_v63 = vld [vmem:[%s25440_s13 + $0x5b0] sm:$0xff] }
 0x913   : > { %13955 = vmatmul.mubr.msk.f32.vlgmr.msra.gmra.mrb[120].mxu0 %vm8061_vm14, %v8794_v60  ;;  %16006 = vmatprep.subr.bf16.mxu1 %v16005_v26  ;;  %v16024_v26 = vpack.c.bf16 %v12579_v1, %v12578_v15  ;;  %v16059_v60 = vpack.c.bf16 %v12614_v61, %v12613_v17  ;;  %v12586_v1 = vld [vmem:[%s25440_s13 + $0x640] sm:$0xff]  ;;  %v12621_v61 = vld [vmem:[%s25440_s13 + $0x750] sm:$0xff] }
 0x914   : > { %16046 = vmatpush3.bf16.msra.mxu0 %v16045_v21  ;;  %13961 = vmatprep.mubr.msk.f32.mxu0 %vm16917_vm10, %v16914_v7  ;;  %v16057_v21 = vpack.c.bf16 %v12596_v34, %v12595_v28  ;;  %v12603_v34 = vld [vmem:[%s25440_s13 + $0x6c0] sm:$0xff] }
 0x915   : > { %16048 = vmatprep.subr.bf16.mxu0 %v16047_v45  ;;  %v12597_v45 = vld [vmem:[%s25440_s13 + $0x690] sm:$0xff] }
 0x916   : > { %16008 = vmatpush3.bf16.msra.mxu1 %v16007_v30  ;;  %v12598_v30 = vld [vmem:[%s25440_s13 + $0x698] sm:$0xff] }
 0x917   : > { %16013 = vmatprep.subr.bf16.mxu1 %v16012_v24  ;;  %v16026_v24 = vpack.c.bf16 %v12563_v52, %v12562_v16  ;;  %v16061_v43 = vpack.c.bf16 %v12598_v30, %v12597_v45  ;;  %v12570_v52 = vld [vmem:[%s25440_s13 + $0x5c0] sm:$0xff]  ;;  %v12605_v30 = vld [vmem:[%s25440_s13 + $0x6d0] sm:$0xff] }
 0x919   : > { %8864 = vmatmul.mubr.f32.vlgmr.msra.gmra.mrb[138].mxu1 %v8792_v38  ;;  %v12599_v38 = vld [vmem:[%s25440_s13 + $0x6a0] sm:$0xff] }
 0x91a   : > { %16015 = vmatpush3.bf16.msra.mxu1 %v16014_v27  ;;  %9046 = vmatprep.mubr.f32.mxu1 %v8976_v58  ;;  %v12582_v27 = vld [vmem:[%s25440_s13 + $0x620] sm:$0xff]  ;;  %v12618_v58 = vld [vmem:[%s25440_s13 + $0x738] sm:$0xff] }
 0x91b   : > { %13962 = vmatmul.mubr.msk.f32.vlgmr.msra.gmra.mrb[120].mxu0 %vm8061_vm14, %v8977_v57  ;;  %16017 = vmatprep.subr.bf16.mxu1 %v16016_v46  ;;  %v12600_v46 = vld [vmem:[%s25440_s13 + $0x6a8] sm:$0xff]  ;;  %v16067_v9 = vpack.c.bf16 %v12618_v58, %v12617_v40  ;;  %v12628_v40 = vld [vmem:[%s25440_s13 + $0x780] sm:$0xff] }
 0x91c   : > { %16050 = vmatpush3.bf16.msra.mxu0 %v16049_v31  ;;  %9229 = vmatprep.mubr.f32.mxu0 %v9159_v56  ;;  %v16032_v31 = vpack.c.bf16 %v12583_v48, %v12582_v27  ;;  %v16065_v57 = vpack.c.bf16 %v12600_v46, %v12599_v38  ;;  %v12601_v56 = vld [vmem:[%s25440_s13 + $0x6b0] sm:$0xff]  ;;  %v12645_v27 = vld [vmem:[%s25440_s13 + $0x808] sm:$0xff]  ;;  %v12623_v48 = vld [vmem:[%s25440_s13 + $0x760] sm:$0xff]  ;;  %v8975_v46 = vrot.slane %v23602_v29, 5 }
 0x91d   : > { %16052 = vmatprep.subr.bf16.mxu0 %v16051_v23  ;;  %v12584_v23 = vld [vmem:[%s25440_s13 + $0x630] sm:$0xff]  ;;  %v12629_v58 = vld [vmem:[%s25440_s13 + $0x788] sm:$0xff] }
 0x91e   : > { %16019 = vmatpush3.bf16.msra.mxu1 %v16018_v3  ;;  %v12602_v3 = vld [vmem:[%s25440_s13 + $0x6b8] sm:$0xff]  ;;  %v16036_v14 = vpack.c.bf16 %v12585_v19, %v12584_v23  ;;  %v9158_v23 = vrot.slane %v23602_v29, 6  ;;  %v12658_v19 = vld [vmem:[%s25440_s13 + $0x870] sm:$0xff] }
 0x91f   : > { %16021 = vmatprep.subr.bf16.mxu1 %v16020_v2  ;;  %v12620_v2 = vld [vmem:[%s25440_s13 + $0x748] sm:$0xff]  ;;  %v16069_v15 = vpack.c.bf16 %v12602_v3, %v12601_v56  ;;  %v12677_v56 = vld [vmem:[%s25440_s13 + $0x900] sm:$0xff] }
 0x920   : > { %16054 = vmatpush3.bf16.msra.mxu0 %v16053_v53  ;;  %v12569_v53 = vld [vmem:[%s25440_s13 + $0x5b8] sm:$0xff]  ;;  %v16071_v28 = vpack.c.bf16 %v12620_v2, %v12619_v18  ;;  %v12678_v3 = vld [vmem:[%s25440_s13 + $0x908] sm:$0xff]  ;;  %v12630_v18 = vld [vmem:[%s25440_s13 + $0x790] sm:$0xff] }
 0x921   : > { %16056 = vmatprep.subr.bf16.mxu0 %v16055_v0  ;;  %v12587_v0 = vld [vmem:[%s25440_s13 + $0x648] sm:$0xff]  ;;  %v16038_v17 = vpack.c.bf16 %v12569_v53, %v12568_v63  ;;  %v12631_v2 = vld [vmem:[%s25440_s13 + $0x798] sm:$0xff]  ;;  %v12648_v63 = vld [vmem:[%s25440_s13 + $0x820] sm:$0xff] }
 0x922   : > { %16023 = vmatpush3.bf16.msra.mxu1 %v16022_v32  ;;  %v12604_v32 = vld [vmem:[%s25440_s13 + $0x6c8] sm:$0xff]  ;;  %v16040_v16 = vpack.c.bf16 %v12587_v0, %v12586_v1  ;;  %v16117_v1 = vpack.c.bf16 %v12678_v3, %v12677_v56  ;;  %v16092_v0 = vpack.c.bf16 %v12631_v2, %v12630_v18  ;;  %v12656_v3 = vld [vmem:[%s25440_s13 + $0x860] sm:$0xff]  ;;  %v12667_v2 = vld [vmem:[%s25440_s13 + $0x8b0] sm:$0xff] }
 0x923   : > { %16025 = vmatprep.subr.bf16.mxu1 %v16024_v26  ;;  %v12622_v26 = vld [vmem:[%s25440_s13 + $0x758] sm:$0xff]  ;;  %v16073_v44 = vpack.c.bf16 %v12604_v32, %v12603_v34  ;;  %v12649_v53 = vld [vmem:[%s25440_s13 + $0x828] sm:$0xff]  ;;  %v12632_v34 = vld [vmem:[%s25440_s13 + $0x7a0] sm:$0xff] }
 0x924   : > { %16058 = vmatpush3.bf16.msra.mxu0 %v16057_v21  ;;  %v12571_v21 = vld [vmem:[%s25440_s13 + $0x5c8] sm:$0xff]  ;;  %v16075_v45 = vpack.c.bf16 %v12622_v26, %v12621_v61  ;;  %v12651_v61 = vld [vmem:[%s25440_s13 + $0x838] sm:$0xff]  ;;  %v12661_v26 = vld [vmem:[%s25440_s13 + $0x880] sm:$0xff] }
 0x925   : > { %16060 = vmatprep.subr.bf16.mxu0 %v16059_v60  ;;  %v12643_v60 = vld [vmem:[%s25440_s13 + $0x7f8] sm:$0xff]  ;;  %v16042_v51 = vpack.c.bf16 %v12571_v21, %v12570_v52  ;;  %v12633_v32 = vld [vmem:[%s25440_s13 + $0x7a8] sm:$0xff]  ;;  %v12679_v21 = vld [vmem:[%s25440_s13 + $0x910] sm:$0xff] }
 0x926   : > { %16027 = vmatpush3.bf16.msra.mxu1 %v16026_v24  ;;  %v12606_v24 = vld [vmem:[%s25440_s13 + $0x6d8] sm:$0xff]  ;;  %v16082_v41 = vpack.c.bf16 %v12643_v60, %v12642_v54  ;;  %v16096_v52 = vpack.c.bf16 %v12633_v32, %v12632_v34  ;;  %v12634_v60 = vld [vmem:[%s25440_s13 + $0x7b0] sm:$0xff] }
 0x927   : > { %16029 = vmatprep.subr.bf16.mxu1 %v16028_v37  ;;  %v12626_v37 = vld [vmem:[%s25440_s13 + $0x770] sm:$0xff]  ;;  %v16077_v12 = vpack.c.bf16 %v12606_v24, %v12605_v30  ;;  %v12652_v24 = vld [vmem:[%s25440_s13 + $0x840] sm:$0xff] }
 0x928   : > { %16062 = vmatpush3.bf16.msra.mxu0 %v16061_v43  ;;  %v12644_v43 = vld [vmem:[%s25440_s13 + $0x800] sm:$0xff]  ;;  %v16084_v38 = vpack.c.bf16 %v12627_v4, %v12626_v37  ;;  %v12663_v4 = vld [vmem:[%s25440_s13 + $0x890] sm:$0xff] }
 0x929   : > { %16064 = vmatprep.subr.bf16.mxu0 %v16063_v22  ;;  %v12624_v22 = vld [vmem:[%s25440_s13 + $0x768] sm:$0xff]  ;;  %v12712_v32 = vld [vmem:[%s25440_s13 + $0xa10] sm:$0xff] }
 0x92a   : > { %16031 = vmatpush3.bf16.msra.mxu1 %v16030_v39  ;;  %v16086_v39 = vpack.c.bf16 %v12645_v27, %v12644_v43  ;;  %v16080_v8 = vpack.c.bf16 %v12624_v22, %v12623_v48  ;;  %v12681_v27 = vld [vmem:[%s25440_s13 + $0x920] sm:$0xff]  ;;  %v12682_v48 = vld [vmem:[%s25440_s13 + $0x928] sm:$0xff] }
 0x92b   : > { %16033 = vmatprep.subr.bf16.mxu1 %v16032_v31  ;;  %v9342_v31 = vrot.slane %v23614_v20, 7  ;;  %v12659_v20 = vld [vmem:[%s25440_s13 + $0x878] sm:$0xff]  ;;  %v12636_v22 = vld [vmem:[%s25440_s13 + $0x7c0] sm:$0xff] }
 0x92c   : > { %16066 = vmatpush3.bf16.msra.mxu0 %v16065_v57  ;;  %v12647_v57 = vld [vmem:[%s25440_s13 + $0x818] sm:$0xff] }
 0x92d   : > { %16068 = vmatprep.subr.bf16.mxu0 %v16067_v9  ;;  %v16088_v9 = vpack.c.bf16 %v12629_v58, %v12628_v40  ;;  %v12655_v40 = vld [vmem:[%s25440_s13 + $0x858] sm:$0xff]  ;;  %v16125_v58 = vpack.c.bf16 %v12682_v48, %v12681_v27  ;;  %v12690_v27 = vld [vmem:[%s25440_s13 + $0x968] sm:$0xff]  ;;  %v9341_v48 = vrot.slane %v23602_v29, 7 }
 0x92e   : > { %16035 = vmatpush3.bf16.msra.mxu1 %v16034_v47  ;;  %v16090_v47 = vpack.c.bf16 %v12647_v57, %v12646_v59  ;;  %v12683_v57 = vld [vmem:[%s25440_s13 + $0x930] sm:$0xff]  ;;  %v12717_v29 = vld [vmem:[%s25440_s13 + $0xa38] sm:$0xff] }
 0x92f   : > { %16037 = vmatprep.subr.bf16.mxu1 %v16036_v14  ;;  %v16115_v14 = vpack.c.bf16 %v12659_v20, %v12658_v19  ;;  %v12638_v20 = vld [vmem:[%s25440_s13 + $0x7d0] sm:$0xff] }
 0x930   : > { %16070 = vmatpush3.bf16.msra.mxu0 %v16069_v15  ;;  %v9160_v15 = vrot.slane %v23503_v49, 6 }
 0x931   : > { %16072 = vmatprep.subr.bf16.mxu0 %v16071_v28  ;;  %v16094_v28 = vpack.c.bf16 %v12649_v53, %v12648_v63  ;;  %v12685_v53 = vld [vmem:[%s25440_s13 + $0x940] sm:$0xff] }
 0x932   : > { %16039 = vmatpush3.bf16.msra.mxu1 %v16038_v17  ;;  %v12650_v17 = vld [vmem:[%s25440_s13 + $0x830] sm:$0xff] }
 0x933   : > { %16041 = vmatprep.subr.bf16.mxu1 %v16040_v16  ;;  %v12662_v16 = vld [vmem:[%s25440_s13 + $0x888] sm:$0xff]  ;;  %v16098_v54 = vpack.c.bf16 %v12651_v61, %v12650_v17  ;;  %v12713_v17 = vld [vmem:[%s25440_s13 + $0xa18] sm:$0xff] }
 0x934   : > { %16074 = vmatpush3.bf16.msra.mxu0 %v16073_v44  ;;  %v12680_v44 = vld [vmem:[%s25440_s13 + $0x918] sm:$0xff]  ;;  %v16119_v30 = vpack.c.bf16 %v12662_v16, %v12661_v26  ;;  %v12669_v26 = vld [vmem:[%s25440_s13 + $0x8c0] sm:$0xff]  ;;  %v12670_v16 = vld [vmem:[%s25440_s13 + $0x8c8] sm:$0xff] }
 0x935   : > { %16076 = vmatprep.subr.bf16.mxu0 %v16075_v45  ;;  %v12635_v45 = vld [vmem:[%s25440_s13 + $0x7b8] sm:$0xff]  ;;  %v16121_v37 = vpack.c.bf16 %v12680_v44, %v12679_v21  ;;  %v12687_v21 = vld [vmem:[%s25440_s13 + $0x950] sm:$0xff] }
 0x936   : > { %16043 = vmatpush3.bf16.msra.mxu1 %v16042_v51  ;;  %v12653_v51 = vld [vmem:[%s25440_s13 + $0x848] sm:$0xff]  ;;  %v16100_v43 = vpack.c.bf16 %v12635_v45, %v12634_v60  ;;  %v12688_v44 = vld [vmem:[%s25440_s13 + $0x958] sm:$0xff]  ;;  %v12696_v60 = vld [vmem:[%s25440_s13 + $0x990] sm:$0xff] }
 0x937   : > { %16083 = vmatprep.subr.bf16.mxu1 %v16082_v41  ;;  %v9343_v41 = vrot.slane %v23503_v49, 7  ;;  %v16102_v49 = vpack.c.bf16 %v12653_v51, %v12652_v24  ;;  %v12697_v45 = vld [vmem:[%s25440_s13 + $0x998] sm:$0xff]  ;;  %v12714_v24 = vld [vmem:[%s25440_s13 + $0xa20] sm:$0xff]  ;;  %v12715_v51 = vld [vmem:[%s25440_s13 + $0xa28] sm:$0xff] }
 0x938   : > { %16078 = vmatpush3.bf16.msra.mxu0 %v16077_v12  ;;  %v12664_v12 = vld [vmem:[%s25440_s13 + $0x898] sm:$0xff] }
 0x939   : > { %9047 = vmatmul.mubr.f32.vlgmr.msra.gmra.mrb[140].mxu1 %v8975_v46  ;;  %16079 = vmatprep.subr.bf16.mxu0 %v16916_v5  ;;  %v16123_v46 = vpack.c.bf16 %v12664_v12, %v12663_v4  ;;  %v12672_v4 = vld [vmem:[%s25440_s13 + $0x8d8] sm:$0xff]  ;;  %v16154_v12 = vpack.c.bf16 %v12697_v45, %v12696_v60  ;;  %v12728_v60 = vld [vmem:[%s25440_s13 + $0xa90] sm:$0xff] }
 0x93a   : > { %16085 = vmatpush3.bf16.msra.mxu1 %v16084_v38  ;;  %9412 = vmatprep.mubr.f32.mxu1 %v9342_v31  ;;  %v12637_v38 = vld [vmem:[%s25440_s13 + $0x7c8] sm:$0xff]  ;;  %v12665_v31 = vld [vmem:[%s25440_s13 + $0x8a0] sm:$0xff]  ;;  %v12729_v45 = vld [vmem:[%s25440_s13 + $0xa98] sm:$0xff] }
 0x93b   : > { %9230 = vmatmul.mubr.f32.vlgmr.msra.gmra.mrb[126].mxu0 %v9158_v23  ;;  %16087 = vmatprep.subr.bf16.mxu1 %v16086_v39  ;;  %v12654_v39 = vld [vmem:[%s25440_s13 + $0x850] sm:$0xff]  ;;  %v16104_v59 = vpack.c.bf16 %v12637_v38, %v12636_v22  ;;  %v12684_v23 = vld [vmem:[%s25440_s13 + $0x938] sm:$0xff]  ;;  %v12698_v22 = vld [vmem:[%s25440_s13 + $0x9a0] sm:$0xff] }
 0x93c   : > { %16081 = vmatpush3.bf16.msra.mxu0 %v16080_v8  ;;  %13968 = vmatprep.mubr.msk.f32.mxu0 %vm16917_vm10, %v16914_v7  ;;  %v12666_v8 = vld [vmem:[%s25440_s13 + $0x8a8] sm:$0xff]  ;;  %v16106_v19 = vpack.c.bf16 %v12655_v40, %v12654_v39  ;;  %v16129_v18 = vpack.c.bf16 %v12684_v23, %v12683_v57  ;;  %v9706_v39 = vrot.slane %v23644_v36, 1  ;;  %v12716_v40 = vld [vmem:[%s25440_s13 + $0xa30] sm:$0xff]  ;;  %v12692_v23 = vld [vmem:[%s25440_s13 + $0x978] sm:$0xff] }
 0x93d   : > { %16114 = vmatprep.subr.bf16.mxu0 %v16916_v5  ;;  %v16127_v56 = vpack.c.bf16 %v12666_v8, %v12665_v31  ;;  %v12699_v38 = vld [vmem:[%s25440_s13 + $0x9a8] sm:$0xff]  ;;  %v12673_v31 = vld [vmem:[%s25440_s13 + $0x8e0] sm:$0xff]  ;;  %v12691_v57 = vld [vmem:[%s25440_s13 + $0x970] sm:$0xff] }
 0x93e   : > { %16089 = vmatpush3.bf16.msra.mxu1 %v16088_v9  ;;  %v12639_v9 = vld [vmem:[%s25440_s13 + $0x7d8] sm:$0xff]  ;;  %v12674_v8 = vld [vmem:[%s25440_s13 + $0x8e8] sm:$0xff] }
 0x93f   : > { %13969 = vmatmul.mubr.msk.f32.vlgmr.msra.gmra.mrb[120].mxu0 %vm8061_vm14, %v9160_v15  ;;  %16091 = vmatprep.subr.bf16.mxu1 %v16090_v47  ;;  %v12657_v47 = vld [vmem:[%s25440_s13 + $0x868] sm:$0xff]  ;;  %v16108_v63 = vpack.c.bf16 %v12639_v9, %v12638_v20  ;;  %v12700_v20 = vld [vmem:[%s25440_s13 + $0x9b0] sm:$0xff]  ;;  %v12701_v9 = vld [vmem:[%s25440_s13 + $0x9b8] sm:$0xff] }
 0x940   : > { %16116 = vmatpush3.bf16.msra.mxu0 %v16115_v14  ;;  %13975 = vmatprep.mubr.msk.f32.mxu0 %vm16917_vm10, %v16914_v7  ;;  %v12668_v14 = vld [vmem:[%s25440_s13 + $0x8b8] sm:$0xff]  ;;  %v12686_v15 = vld [vmem:[%s25440_s13 + $0x948] sm:$0xff] }
 0x941   : > { %16118 = vmatprep.subr.bf16.mxu0 %v16117_v1  ;;  %v16110_v1 = vpack.c.bf16 %v12657_v47, %v12656_v3  ;;  %v16131_v34 = vpack.c.bf16 %v12668_v14, %v12667_v2  ;;  %v16133_v61 = vpack.c.bf16 %v12686_v15, %v12685_v53  ;;  %v12718_v3 = vld [vmem:[%s25440_s13 + $0xa40] sm:$0xff]  ;;  %v12719_v47 = vld [vmem:[%s25440_s13 + $0xa48] sm:$0xff]  ;;  %v12675_v2 = vld [vmem:[%s25440_s13 + $0x8f0] sm:$0xff] }
 0x942   : > { %16093 = vmatpush3.bf16.msra.mxu1 %v16092_v0  ;;  %v12640_v0 = vld [vmem:[%s25440_s13 + $0x7e0] sm:$0xff]  ;;  %v12676_v14 = vld [vmem:[%s25440_s13 + $0x8f8] sm:$0xff]  ;;  %v16164_v53 = vpack.c.bf16 %v12719_v47, %v12718_v3  ;;  %v9707_v3 = vrot.slane %v23520_v25, 1 }
 0x943   : > { %16095 = vmatprep.subr.bf16.mxu1 %v16094_v28  ;;  %v12641_v28 = vld [vmem:[%s25440_s13 + $0x7e8] sm:$0xff]  ;;  %v12702_v15 = vld [vmem:[%s25440_s13 + $0x9c0] sm:$0xff] }
 0x946   : > { %16097 = vmatpush3.bf16.msra.mxu1 %v16096_v52  ;;  %v16112_v52 = vpack.c.bf16 %v12641_v28, %v12640_v0  ;;  %v16147_v0 = vpack.c.bf16 %v12676_v14, %v12675_v2  ;;  %v12720_v28 = vld [vmem:[%s25440_s13 + $0xa50] sm:$0xff]  ;;  %v12734_v2 = vld [vmem:[%s25440_s13 + $0xab8] sm:$0xff]  ;;  %v9889_v14 = vrot.slane %v23644_v36, 2 }
 0x947   : > { %13976 = vmatmul.mubr.msk.f32.vlgmr.msra.gmra.mrb[120].mxu0 %vm8061_vm14, %v9343_v41  ;;  %16099 = vmatprep.subr.bf16.mxu1 %v16098_v54  ;;  %v16152_v54 = vpack.c.bf16 %v12713_v17, %v12712_v32  ;;  %v16137_v41 = vpack.c.bf16 %v12688_v44, %v12687_v21  ;;  %v12693_v32 = vld [vmem:[%s25440_s13 + $0x980] sm:$0xff]  ;;  %v12694_v17 = vld [vmem:[%s25440_s13 + $0x988] sm:$0xff] }
 0x948   : > { %16120 = vmatpush3.bf16.msra.mxu0 %v16119_v30  ;;  %9591 = vmatprep.mubr.f32.mxu0 %v23644_v36  ;;  %v16135_v30 = vpack.c.bf16 %v12670_v16, %v12669_v26  ;;  %v12704_v16 = vld [vmem:[%s25440_s13 + $0x9d0] sm:$0xff]  ;;  %v16150_v21 = vpack.c.bf16 %v12694_v17, %v12693_v32  ;;  %v12722_v44 = vld [vmem:[%s25440_s13 + $0xa60] sm:$0xff]  ;;  %v12785_v17 = vld [vmem:[%s25440_s13 + $0xc48] sm:$0xff] }
 0x949   : > { %16122 = vmatprep.subr.bf16.mxu0 %v16121_v37  ;;  %v12671_v37 = vld [vmem:[%s25440_s13 + $0x8d0] sm:$0xff]  ;;  %v12784_v32 = vld [vmem:[%s25440_s13 + $0xc40] sm:$0xff] }
 0x94a   : > { %16101 = vmatpush3.bf16.msra.mxu1 %v16100_v43  ;;  %v12689_v43 = vld [vmem:[%s25440_s13 + $0x960] sm:$0xff] }
 0x94b   : > { %16103 = vmatprep.subr.bf16.mxu1 %v16102_v49  ;;  %v16156_v49 = vpack.c.bf16 %v12715_v51, %v12714_v24  ;;  %v12747_v24 = vld [vmem:[%s25440_s13 + $0xb20] sm:$0xff]  ;;  %v12748_v51 = vld [vmem:[%s25440_s13 + $0xb28] sm:$0xff] }
 0x94c   : > { %16124 = vmatpush3.bf16.msra.mxu0 %v16123_v46  ;;  %v16139_v46 = vpack.c.bf16 %v12672_v4, %v12671_v37  ;;  %v12706_v37 = vld [vmem:[%s25440_s13 + $0x9e0] sm:$0xff]  ;;  %v12707_v4 = vld [vmem:[%s25440_s13 + $0x9e8] sm:$0xff] }
 0x94d   : > { %16126 = vmatprep.subr.bf16.mxu0 %v16125_v58  ;;  %v16141_v58 = vpack.c.bf16 %v12690_v27, %v12689_v43  ;;  %v12724_v43 = vld [vmem:[%s25440_s13 + $0xa70] sm:$0xff]  ;;  %v12725_v27 = vld [vmem:[%s25440_s13 + $0xa78] sm:$0xff] }
 0x94e   : > { %16105 = vmatpush3.bf16.msra.mxu1 %v16104_v59  ;;  %v16158_v59 = vpack.c.bf16 %v12699_v38, %v12698_v22  ;;  %v16176_v22 = vpack.c.bf16 %v12725_v27, %v12724_v43  ;;  %v12708_v38 = vld [vmem:[%s25440_s13 + $0x9f0] sm:$0xff]  ;;  %v12738_v43 = vld [vmem:[%s25440_s13 + $0xad8] sm:$0xff] }
 0x94f   : > { %16107 = vmatprep.subr.bf16.mxu1 %v16106_v19  ;;  %v16160_v19 = vpack.c.bf16 %v12717_v29, %v12716_v40  ;;  %v12727_v40 = vld [vmem:[%s25440_s13 + $0xa88] sm:$0xff]  ;;  %v12731_v29 = vld [vmem:[%s25440_s13 + $0xaa0] sm:$0xff] }
 0x950   : > { %16128 = vmatpush3.bf16.msra.mxu0 %v16127_v56  ;;  %v16143_v56 = vpack.c.bf16 %v12674_v8, %v12673_v31  ;;  %v12749_v8 = vld [vmem:[%s25440_s13 + $0xb30] sm:$0xff] }
 0x951   : > { %16130 = vmatprep.subr.bf16.mxu0 %v16129_v18  ;;  %v16145_v18 = vpack.c.bf16 %v12692_v23, %v12691_v57  ;;  %v12710_v23 = vld [vmem:[%s25440_s13 + $0xa00] sm:$0xff] }
 0x952   : > { %16109 = vmatpush3.bf16.msra.mxu1 %v16108_v63  ;;  %v16162_v63 = vpack.c.bf16 %v12701_v9, %v12700_v20  ;;  %v12782_v9 = vld [vmem:[%s25440_s13 + $0xc30] sm:$0xff] }
 0x953   : > { %16111 = vmatprep.subr.bf16.mxu1 %v16110_v1  ;;  %v12703_v1 = vld [vmem:[%s25440_s13 + $0x9c8] sm:$0xff] }
 0x954   : > { %16132 = vmatpush3.bf16.msra.mxu0 %v16131_v34  ;;  %v12721_v34 = vld [vmem:[%s25440_s13 + $0xa58] sm:$0xff] }
 0x955   : > { %16134 = vmatprep.subr.bf16.mxu0 %v16133_v61  ;;  %v16166_v61 = vpack.c.bf16 %v12703_v1, %v12702_v15  ;;  %v16168_v26 = vpack.c.bf16 %v12721_v34, %v12720_v28  ;;  %v12752_v15 = vld [vmem:[%s25440_s13 + $0xb48] sm:$0xff]  ;;  %v12767_v28 = vld [vmem:[%s25440_s13 + $0xbb8] sm:$0xff] }
 0x956   : > { %16113 = vmatpush3.bf16.msra.mxu1 %v16112_v52  ;;  %v12705_v52 = vld [vmem:[%s25440_s13 + $0x9d8] sm:$0xff] }
 0x957   : > { %16153 = vmatprep.subr.bf16.mxu1 %v16152_v54  ;;  %v12723_v54 = vld [vmem:[%s25440_s13 + $0xa68] sm:$0xff] }
 0x958   : > { %16136 = vmatpush3.bf16.msra.mxu0 %v16135_v30  ;;  %v16170_v30 = vpack.c.bf16 %v12705_v52, %v12704_v16  ;;  %v12736_v16 = vld [vmem:[%s25440_s13 + $0xac8] sm:$0xff] }
 0x959   : > { %9413 = vmatmul.mubr.f32.vlgmr.msra.gmra.mrb[142].mxu1 %v9341_v48  ;;  %16138 = vmatprep.subr.bf16.mxu0 %v16137_v41  ;;  %v16172_v41 = vpack.c.bf16 %v12723_v54, %v12722_v44  ;;  %v16187_v48 = vpack.c.bf16 %v12748_v51, %v12747_v24  ;;  %v12754_v44 = vld [vmem:[%s25440_s13 + $0xb58] sm:$0xff]  ;;  %v9705_v54 = vrot.slane %v23633_v42, 1  ;;  %v10072_v51 = vrot.slane %v23644_v36, 3 }
 0x95a   : > { %16155 = vmatpush3.bf16.msra.mxu1 %v16154_v12  ;;  %9776 = vmatprep.mubr.f32.mxu1 %v9706_v39  ;;  %v16185_v12 = vpack.c.bf16 %v12729_v45, %v12728_v60  ;;  %v12726_v39 = vld [vmem:[%s25440_s13 + $0xa80] sm:$0xff]  ;;  %v16226_v60 = vpack.c.bf16 %v12785_v17, %v12784_v32  ;;  %v12793_v17 = vld [vmem:[%s25440_s13 + $0xc88] sm:$0xff] }
 0x95b   : > { %16157 = vmatprep.subr.bf16.mxu1 %v16156_v49  ;;  %v16174_v49 = vpack.c.bf16 %v12707_v4, %v12706_v37  ;;  %v16180_v57 = vpack.c.bf16 %v12727_v40, %v12726_v39  ;;  %v12768_v45 = vld [vmem:[%s25440_s13 + $0xbc0] sm:$0xff]  ;;  %v12787_v37 = vld [vmem:[%s25440_s13 + $0xc58] sm:$0xff] }
 0x95c   : > { %16140 = vmatpush3.bf16.msra.mxu0 %v16139_v46  ;;  %v12709_v46 = vld [vmem:[%s25440_s13 + $0x9f8] sm:$0xff]  ;;  %v12788_v40 = vld [vmem:[%s25440_s13 + $0xc60] sm:$0xff] }
 0x95d   : > { %16142 = vmatprep.subr.bf16.mxu0 %v16141_v58  ;;  %v12732_v58 = vld [vmem:[%s25440_s13 + $0xaa8] sm:$0xff]  ;;  %v16178_v31 = vpack.c.bf16 %v12709_v46, %v12708_v38  ;;  %v12770_v38 = vld [vmem:[%s25440_s13 + $0xbd0] sm:$0xff]  ;;  %v12771_v46 = vld [vmem:[%s25440_s13 + $0xbd8] sm:$0xff] }
 0x95e   : > { %16159 = vmatpush3.bf16.msra.mxu1 %v16158_v59  ;;  %v12750_v59 = vld [vmem:[%s25440_s13 + $0xb38] sm:$0xff]  ;;  %v16189_v20 = vpack.c.bf16 %v12732_v58, %v12731_v29  ;;  %v12789_v29 = vld [vmem:[%s25440_s13 + $0xc68] sm:$0xff]  ;;  %v12792_v32 = vld [vmem:[%s25440_s13 + $0xc80] sm:$0xff] }
 0x95f   : > { %16161 = vmatprep.subr.bf16.mxu1 %v16160_v19  ;;  %v12711_v19 = vld [vmem:[%s25440_s13 + $0xa08] sm:$0xff]  ;;  %v16191_v47 = vpack.c.bf16 %v12750_v59, %v12749_v8  ;;  %v16232_v59 = vpack.c.bf16 %v12771_v46, %v12770_v38  ;;  %v12763_v46 = vld [vmem:[%s25440_s13 + $0xba0] sm:$0xff] }
 0x960   : > { %16144 = vmatpush3.bf16.msra.mxu0 %v16143_v56  ;;  %v12783_v56 = vld [vmem:[%s25440_s13 + $0xc38] sm:$0xff]  ;;  %v12740_v8 = vld [vmem:[%s25440_s13 + $0xae8] sm:$0xff] }
 0x961   : > { %16146 = vmatprep.subr.bf16.mxu0 %v16145_v18  ;;  %v12733_v18 = vld [vmem:[%s25440_s13 + $0xab0] sm:$0xff]  ;;  %v16222_v1 = vpack.c.bf16 %v12783_v56, %v12782_v9  ;;  %v12773_v9 = vld [vmem:[%s25440_s13 + $0xbe8] sm:$0xff] }
 0x962   : > { %16163 = vmatpush3.bf16.msra.mxu1 %v16162_v63  ;;  %v16182_v63 = vpack.c.bf16 %v12711_v19, %v12710_v23  ;;  %v16193_v34 = vpack.c.bf16 %v12734_v2, %v12733_v18  ;;  %v12758_v23 = vld [vmem:[%s25440_s13 + $0xb78] sm:$0xff]  ;;  %v16234_v19 = vpack.c.bf16 %v12789_v29, %v12788_v40  ;;  %v12741_v2 = vld [vmem:[%s25440_s13 + $0xaf0] sm:$0xff]  ;;  %v12797_v38 = vld [vmem:[%s25440_s13 + $0xca8] sm:$0xff] }
 0x963   : > { %16165 = vmatprep.subr.bf16.mxu1 %v16164_v53  ;;  %v12751_v53 = vld [vmem:[%s25440_s13 + $0xb40] sm:$0xff] }
 0x964   : > { %16148 = vmatpush3.bf16.msra.mxu0 %v16147_v0  ;;  %v12766_v0 = vld [vmem:[%s25440_s13 + $0xbb0] sm:$0xff] }
 0x965   : > { %16149 = vmatprep.subr.bf16.mxu0 %v16916_v5  ;;  %v16224_v52 = vpack.c.bf16 %v12767_v28, %v12766_v0  ;;  %v12774_v0 = vld [vmem:[%s25440_s13 + $0xbf0] sm:$0xff]  ;;  %v12775_v28 = vld [vmem:[%s25440_s13 + $0xbf8] sm:$0xff] }
 0x966   : > { %16167 = vmatpush3.bf16.msra.mxu1 %v16166_v61  ;;  %v16195_v61 = vpack.c.bf16 %v12752_v15, %v12751_v53  ;;  %v12759_v53 = vld [vmem:[%s25440_s13 + $0xb80] sm:$0xff]  ;;  %v12760_v15 = vld [vmem:[%s25440_s13 + $0xb88] sm:$0xff] }
 0x967   : > { %9592 = vmatmul.mubr.f32.vlgmr.msra.gmra.mrb[128].mxu0 %v23633_v42  ;;  %16169 = vmatprep.subr.bf16.mxu1 %v16168_v26  ;;  %v12735_v26 = vld [vmem:[%s25440_s13 + $0xac0] sm:$0xff] }
 0x968   : > { %16151 = vmatpush3.bf16.msra.mxu0 %v16150_v21  ;;  %13982 = vmatprep.mubr.msk.f32.mxu0 %vm16917_vm10, %v16914_v7  ;;  %v12753_v21 = vld [vmem:[%s25440_s13 + $0xb50] sm:$0xff]  ;;  %v16197_v24 = vpack.c.bf16 %v12736_v16, %v12735_v26  ;;  %v12743_v26 = vld [vmem:[%s25440_s13 + $0xb00] sm:$0xff]  ;;  %v12744_v16 = vld [vmem:[%s25440_s13 + $0xb08] sm:$0xff] }
 0x969   : > { %16184 = vmatprep.subr.bf16.mxu0 %v16916_v5  ;;  %v16199_v4 = vpack.c.bf16 %v12754_v44, %v12753_v21  ;;  %v12761_v21 = vld [vmem:[%s25440_s13 + $0xb90] sm:$0xff]  ;;  %v12762_v44 = vld [vmem:[%s25440_s13 + $0xb98] sm:$0xff] }
 0x96a   : > { %16171 = vmatpush3.bf16.msra.mxu1 %v16170_v30  ;;  %v12769_v30 = vld [vmem:[%s25440_s13 + $0xbc8] sm:$0xff] }
 0x96b   : > { %13983 = vmatmul.mubr.msk.f32.vlgmr.msra.gmra.mrb[120].mxu0 %vm8061_vm14, %v23520_v25  ;;  %16173 = vmatprep.subr.bf16.mxu1 %v16172_v41  ;;  %v12786_v41 = vld [vmem:[%s25440_s13 + $0xc50] sm:$0xff]  ;;  %v16228_v27 = vpack.c.bf16 %v12769_v30, %v12768_v45  ;;  %v12777_v45 = vld [vmem:[%s25440_s13 + $0xc08] sm:$0xff]  ;;  %v16213_v30 = vpack.c.bf16 %v12744_v16, %v12743_v26 }
 0x96c   : > { %16186 = vmatpush3.bf16.msra.mxu0 %v16185_v12  ;;  %13989 = vmatprep.mubr.msk.f32.mxu0 %vm16917_vm10, %v16914_v7  ;;  %v12737_v12 = vld [vmem:[%s25440_s13 + $0xad0] sm:$0xff]  ;;  %v12834_v26 = vld [vmem:[%s25440_s13 + $0xdc8] sm:$0xff] }
 0x96d   : > { %16188 = vmatprep.subr.bf16.mxu0 %v16187_v48  ;;  %v12755_v48 = vld [vmem:[%s25440_s13 + $0xb60] sm:$0xff]  ;;  %v16201_v39 = vpack.c.bf16 %v12738_v43, %v12737_v12 }
 0x96e   : > { %16175 = vmatpush3.bf16.msra.mxu1 %v16174_v49  ;;  %v12756_v49 = vld [vmem:[%s25440_s13 + $0xb68] sm:$0xff] }
 0x96f   : > { %16177 = vmatprep.subr.bf16.mxu1 %v16176_v22  ;;  %v16230_v22 = vpack.c.bf16 %v12787_v37, %v12786_v41  ;;  %v16203_v58 = vpack.c.bf16 %v12756_v49, %v12755_v48  ;;  %v16215_v41 = vpack.c.bf16 %v12762_v44, %v12761_v21  ;;  %v12745_v37 = vld [vmem:[%s25440_s13 + $0xb10] sm:$0xff]  ;;  %v12779_v48 = vld [vmem:[%s25440_s13 + $0xc18] sm:$0xff] }
 0x970   : > { %v12853_v21 = vld [vmem:[%s25440_s13 + $0xe58] sm:$0xff] }
 0x972   : > { %16179 = vmatpush3.bf16.msra.mxu1 %v16178_v31  ;;  %v12739_v31 = vld [vmem:[%s25440_s13 + $0xae0] sm:$0xff] }
 0x973   : > { %13990 = vmatmul.mubr.msk.f32.vlgmr.msra.gmra.mrb[120].mxu0 %vm8061_vm14, %v9707_v3  ;;  %16181 = vmatprep.subr.bf16.mxu1 %v16180_v57  ;;  %v12757_v57 = vld [vmem:[%s25440_s13 + $0xb70] sm:$0xff]  ;;  %v16205_v56 = vpack.c.bf16 %v12740_v8, %v12739_v31  ;;  %v12781_v31 = vld [vmem:[%s25440_s13 + $0xc28] sm:$0xff] }
 0x974   : > { %16190 = vmatpush3.bf16.msra.mxu0 %v16189_v20  ;;  %9959 = vmatprep.mubr.f32.mxu0 %v9889_v14  ;;  %v12772_v20 = vld [vmem:[%s25440_s13 + $0xbe0] sm:$0xff]  ;;  %v12790_v3 = vld [vmem:[%s25440_s13 + $0xc70] sm:$0xff]  ;;  %v16207_v18 = vpack.c.bf16 %v12758_v23, %v12757_v57  ;;  %v12742_v14 = vld [vmem:[%s25440_s13 + $0xaf8] sm:$0xff]  ;;  %v9888_v23 = vrot.slane %v23633_v42, 2 }
 0x975   : > { %16192 = vmatprep.subr.bf16.mxu0 %v16191_v47  ;;  %v12791_v47 = vld [vmem:[%s25440_s13 + $0xc78] sm:$0xff]  ;;  %v12818_v57 = vld [vmem:[%s25440_s13 + $0xd48] sm:$0xff] }
 0x976   : > { %16183 = vmatpush3.bf16.msra.mxu1 %v16182_v63  ;;  %v16236_v63 = vpack.c.bf16 %v12773_v9, %v12772_v20  ;;  %v12799_v20 = vld [vmem:[%s25440_s13 + $0xcb8] sm:$0xff] }
 0x977   : > { %16223 = vmatprep.subr.bf16.mxu1 %v16222_v1  ;;  %v16238_v1 = vpack.c.bf16 %v12791_v47, %v12790_v3  ;;  %v12801_v3 = vld [vmem:[%s25440_s13 + $0xcc0] sm:$0xff]  ;;  %v12802_v47 = vld [vmem:[%s25440_s13 + $0xcc8] sm:$0xff] }
 0x978   : > { %16194 = vmatpush3.bf16.msra.mxu0 %v16193_v34  ;;  %v16209_v34 = vpack.c.bf16 %v12742_v14, %v12741_v2  ;;  %v12819_v2 = vld [vmem:[%s25440_s13 + $0xd50] sm:$0xff]  ;;  %v12820_v14 = vld [vmem:[%s25440_s13 + $0xd58] sm:$0xff] }
 0x979   : > { %16196 = vmatprep.subr.bf16.mxu0 %v16195_v61  ;;  %9777 = vmatmul.mubr.f32.vlgmr.msra.gmra.mrb[144].mxu1 %v9705_v54  ;;  %v16211_v61 = vpack.c.bf16 %v12760_v15, %v12759_v53  ;;  %v16242_v54 = vpack.c.bf16 %v12793_v17, %v12792_v32  ;;  %v16259_v53 = vpack.c.bf16 %v12802_v47, %v12801_v3  ;;  %v10071_v15 = vrot.slane %v23633_v42, 3  ;;  %v12821_v32 = vld [vmem:[%s25440_s13 + $0xd60] sm:$0xff]  ;;  %v12822_v17 = vld [vmem:[%s25440_s13 + $0xd68] sm:$0xff]  ;;  %v12856_v3 = vld [vmem:[%s25440_s13 + $0xe70] sm:$0xff] }
 0x97a   : > { %16225 = vmatpush3.bf16.msra.mxu1 %v16224_v52  ;;  %10142 = vmatprep.mubr.f32.mxu1 %v10072_v51  ;;  %v16240_v52 = vpack.c.bf16 %v12775_v28, %v12774_v0  ;;  %v12795_v51 = vld [vmem:[%s25440_s13 + $0xc98] sm:$0xff]  ;;  %v12803_v0 = vld [vmem:[%s25440_s13 + $0xcd0] sm:$0xff]  ;;  %v16265_v44 = vpack.c.bf16 %v12822_v17, %v12821_v32  ;;  %v12858_v32 = vld [vmem:[%s25440_s13 + $0xe80] sm:$0xff] }
 0x97b   : > { %16227 = vmatprep.subr.bf16.mxu1 %v16226_v60  ;;  %v12776_v60 = vld [vmem:[%s25440_s13 + $0xc00] sm:$0xff]  ;;  %v12804_v28 = vld [vmem:[%s25440_s13 + $0xcd8] sm:$0xff]  ;;  %v12859_v17 = vld [vmem:[%s25440_s13 + $0xe88] sm:$0xff] }
 0x97c   : > { %16198 = vmatpush3.bf16.msra.mxu0 %v16197_v24  ;;  %v12794_v24 = vld [vmem:[%s25440_s13 + $0xc90] sm:$0xff]  ;;  %v16244_v12 = vpack.c.bf16 %v12777_v45, %v12776_v60  ;;  %v16263_v16 = vpack.c.bf16 %v12804_v28, %v12803_v0  ;;  %v12806_v60 = vld [vmem:[%s25440_s13 + $0xce8] sm:$0xff]  ;;  %v12857_v47 = vld [vmem:[%s25440_s13 + $0xe78] sm:$0xff] }
 0x97d   : > { %16200 = vmatprep.subr.bf16.mxu0 %v16199_v4  ;;  %v12746_v4 = vld [vmem:[%s25440_s13 + $0xb18] sm:$0xff]  ;;  %v16246_v43 = vpack.c.bf16 %v12795_v51, %v12794_v24  ;;  %v10073_v51 = vrot.slane %v23520_v25, 3  ;;  %v12840_v0 = vld [vmem:[%s25440_s13 + $0xdf0] sm:$0xff] }
 0x97e   : > { %16229 = vmatpush3.bf16.msra.mxu1 %v16228_v27  ;;  %v12778_v27 = vld [vmem:[%s25440_s13 + $0xc10] sm:$0xff]  ;;  %v16217_v49 = vpack.c.bf16 %v12746_v4, %v12745_v37  ;;  %v12824_v24 = vld [vmem:[%s25440_s13 + $0xd78] sm:$0xff] }
 0x97f   : > { %16231 = vmatprep.subr.bf16.mxu1 %v16230_v22  ;;  %v12796_v22 = vld [vmem:[%s25440_s13 + $0xca0] sm:$0xff]  ;;  %v16248_v40 = vpack.c.bf16 %v12779_v48, %v12778_v27  ;;  %v12826_v48 = vld [vmem:[%s25440_s13 + $0xd88] sm:$0xff]  ;;  %v12841_v28 = vld [vmem:[%s25440_s13 + $0xdf8] sm:$0xff] }
 0x980   : > { %16202 = vmatpush3.bf16.msra.mxu0 %v16201_v39  ;;  %v12764_v39 = vld [vmem:[%s25440_s13 + $0xba8] sm:$0xff]  ;;  %v16250_v29 = vpack.c.bf16 %v12797_v38, %v12796_v22  ;;  %v12825_v27 = vld [vmem:[%s25440_s13 + $0xd80] sm:$0xff]  ;;  %v12837_v22 = vld [vmem:[%s25440_s13 + $0xdd8] sm:$0xff] }
 0x981   : > { %16204 = vmatprep.subr.bf16.mxu0 %v16203_v58  ;;  %v12780_v58 = vld [vmem:[%s25440_s13 + $0xc20] sm:$0xff]  ;;  %v16220_v8 = vpack.c.bf16 %v12764_v39, %v12763_v46  ;;  %v12855_v39 = vld [vmem:[%s25440_s13 + $0xe68] sm:$0xff] }
 0x982   : > { %16233 = vmatpush3.bf16.msra.mxu1 %v16232_v59  ;;  %v12817_v59 = vld [vmem:[%s25440_s13 + $0xd40] sm:$0xff]  ;;  %v16252_v9 = vpack.c.bf16 %v12781_v31, %v12780_v58  ;;  %v12810_v58 = vld [vmem:[%s25440_s13 + $0xd08] sm:$0xff] }
 0x983   : > { %16235 = vmatprep.subr.bf16.mxu1 %v16234_v19  ;;  %v12798_v19 = vld [vmem:[%s25440_s13 + $0xcb0] sm:$0xff]  ;;  %v12854_v46 = vld [vmem:[%s25440_s13 + $0xe60] sm:$0xff] }
 0x984   : > { %16206 = vmatpush3.bf16.msra.mxu0 %v16205_v56  ;;  %v16257_v56 = vpack.c.bf16 %v12818_v57, %v12817_v59  ;;  %v12828_v59 = vld [vmem:[%s25440_s13 + $0xd98] sm:$0xff]  ;;  %v10256_v57 = vrot.slane %v23520_v25, 4 }
 0x985   : > { %16208 = vmatprep.subr.bf16.mxu0 %v16207_v18  ;;  %v16255_v18 = vpack.c.bf16 %v12799_v20, %v12798_v19  ;;  %v12838_v19 = vld [vmem:[%s25440_s13 + $0xde0] sm:$0xff]  ;;  %v12839_v20 = vld [vmem:[%s25440_s13 + $0xde8] sm:$0xff] }
 0x986   : > { %16237 = vmatpush3.bf16.msra.mxu1 %v16236_v63  ;;  %v9890_v63 = vrot.slane %v23520_v25, 2 }
 0x987   : > { %16239 = vmatprep.subr.bf16.mxu1 %v16238_v1  ;;  %v16261_v1 = vpack.c.bf16 %v12820_v14, %v12819_v2  ;;  %v12811_v2 = vld [vmem:[%s25440_s13 + $0xd10] sm:$0xff]  ;;  %v12812_v14 = vld [vmem:[%s25440_s13 + $0xd18] sm:$0xff] }
 0x988   : > { %16210 = vmatpush3.bf16.msra.mxu0 %v16209_v34  ;;  %v10255_v34 = vrot.slane %v23644_v36, 4 }
 0x989   : > { %16212 = vmatprep.subr.bf16.mxu0 %v16211_v61  ;;  %v12833_v61 = vld [vmem:[%s25440_s13 + $0xdc0] sm:$0xff] }
 0x98a   : > { %16241 = vmatpush3.bf16.msra.mxu1 %v16240_v52  ;;  %v12852_v52 = vld [vmem:[%s25440_s13 + $0xe50] sm:$0xff]  ;;  %v16290_v45 = vpack.c.bf16 %v12834_v26, %v12833_v61  ;;  %v12813_v26 = vld [vmem:[%s25440_s13 + $0xd20] sm:$0xff] }
 0x98b   : > { %16243 = vmatprep.subr.bf16.mxu1 %v16242_v54  ;;  %v12805_v54 = vld [vmem:[%s25440_s13 + $0xce0] sm:$0xff] }
 0x98c   : > { %16214 = vmatpush3.bf16.msra.mxu0 %v16213_v30  ;;  %v12823_v30 = vld [vmem:[%s25440_s13 + $0xd70] sm:$0xff]  ;;  %v16267_v37 = vpack.c.bf16 %v12806_v60, %v12805_v54  ;;  %v12832_v54 = vld [vmem:[%s25440_s13 + $0xdb8] sm:$0xff]  ;;  %v8026_v60 = vld [vmem:[%s25441_s14] sm:$0x1] }
 0x98d   : > { %16216 = vmatprep.subr.bf16.mxu0 %v16215_v41  ;;  %v16292_v41 = vpack.c.bf16 %v12853_v21, %v12852_v52  ;;  %v16269_v4 = vpack.c.bf16 %v12824_v24, %v12823_v30  ;;  %v16302_v52 = vpack.c.bf16 %v12841_v28, %v12840_v0  ;;  %v16304_v30 = vpack.c.bf16 %v12859_v17, %v12858_v32  ;;  %v12842_v24 = vld [vmem:[%s25440_s13 + $0xe00] sm:$0xff]  ;;  %v12874_v32 = vld [vmem:[%s25440_s13 + $0xef8] sm:$0xff] }
 0x98e   : > { %16245 = vmatpush3.bf16.msra.mxu1 %v16244_v12  ;;  %v12807_v12 = vld [vmem:[%s25440_s13 + $0xcf0] sm:$0xff]  ;;  %v10254_v0 = vrot.slane %v23633_v42, 4 }
 0x98f   : > { %16247 = vmatprep.subr.bf16.mxu1 %v16246_v43  ;;  %v12808_v43 = vld [vmem:[%s25440_s13 + $0xcf8] sm:$0xff] }
 0x990   : > { %16218 = vmatpush3.bf16.msra.mxu0 %v16217_v49  ;;  %v12836_v49 = vld [vmem:[%s25440_s13 + $0xdd0] sm:$0xff]  ;;  %v16271_v38 = vpack.c.bf16 %v12808_v43, %v12807_v12  ;;  %v12861_v43 = vld [vmem:[%s25440_s13 + $0xe98] sm:$0xff] }
 0x991   : > { %16219 = vmatprep.subr.bf16.mxu0 %v16916_v5  ;;  %v16294_v31 = vpack.c.bf16 %v12837_v22, %v12836_v49  ;;  %v12860_v12 = vld [vmem:[%s25440_s13 + $0xe90] sm:$0xff]  ;;  %v12816_v22 = vld [vmem:[%s25440_s13 + $0xd38] sm:$0xff] }
 0x992   : > { %16249 = vmatpush3.bf16.msra.mxu1 %v16248_v40  ;;  %v16273_v40 = vpack.c.bf16 %v12826_v48, %v12825_v27  ;;  %v12815_v49 = vld [vmem:[%s25440_s13 + $0xd30] sm:$0xff] }
 0x993   : > { %9960 = vmatmul.mubr.f32.vlgmr.msra.gmra.mrb[130].mxu0 %v9888_v23  ;;  %16251 = vmatprep.subr.bf16.mxu1 %v16250_v29  ;;  %v12809_v29 = vld [vmem:[%s25440_s13 + $0xd00] sm:$0xff]  ;;  %v16296_v23 = vpack.c.bf16 %v12855_v39, %v12854_v46 }
 0x994   : > { %16221 = vmatpush3.bf16.msra.mxu0 %v16220_v8  ;;  %13996 = vmatprep.mubr.msk.f32.mxu0 %vm16917_vm10, %v16914_v7  ;;  %v12827_v8 = vld [vmem:[%s25440_s13 + $0xd90] sm:$0xff] }
 0x995   : > { %16254 = vmatprep.subr.bf16.mxu0 %v16916_v5 }
 0x996   : > { %16253 = vmatpush3.bf16.msra.mxu1 %v16252_v9  ;;  %v10438_v9 = vrot.slane %v23644_v36, 5 }
 0x997   : > { %13997 = vmatmul.mubr.msk.f32.vlgmr.msra.gmra.mrb[120].mxu0 %vm8061_vm14, %v9890_v63  ;;  %16258 = vmatprep.subr.bf16.mxu1 %v16257_v56  ;;  %v16275_v56 = vpack.c.bf16 %v12810_v58, %v12809_v29  ;;  %v16298_v63 = vpack.c.bf16 %v12839_v20, %v12838_v19  ;;  %v12888_v29 = vld [vmem:[%s25440_s13 + $0xf68] sm:$0xff]  ;;  %v16308_v58 = vpack.c.bf16 %v12861_v43, %v12860_v12  ;;  %v12850_v43 = vld [vmem:[%s25440_s13 + $0xe40] sm:$0xff] }
 0x998   : > { %16256 = vmatpush3.bf16.msra.mxu0 %v16255_v18  ;;  %14003 = vmatprep.mubr.msk.f32.mxu0 %vm16917_vm10, %v16914_v7  ;;  %v16277_v18 = vpack.c.bf16 %v12828_v59, %v12827_v8  ;;  %v12845_v8 = vld [vmem:[%s25440_s13 + $0xe18] sm:$0xff]  ;;  %v12863_v19 = vld [vmem:[%s25440_s13 + $0xea8] sm:$0xff] }
 0x999   : > { %10143 = vmatmul.mubr.f32.vlgmr.msra.gmra.mrb[146].mxu1 %v10071_v15  ;;  %16289 = vmatprep.subr.bf16.mxu0 %v16916_v5  ;;  %v12830_v15 = vld [vmem:[%s25440_s13 + $0xda8] sm:$0xff] }
 0x99a   : > { %16260 = vmatpush3.bf16.msra.mxu1 %v16259_v53  ;;  %10325 = vmatprep.mubr.f32.mxu1 %v10255_v34  ;;  %v12829_v53 = vld [vmem:[%s25440_s13 + $0xda0] sm:$0xff]  ;;  %v16279_v34 = vpack.c.bf16 %v12812_v14, %v12811_v2 }
 0x99b   : > { %16262 = vmatprep.subr.bf16.mxu1 %v16261_v1  ;;  %v16300_v1 = vpack.c.bf16 %v12857_v47, %v12856_v3  ;;  %v16281_v61 = vpack.c.bf16 %v12830_v15, %v12829_v53  ;;  %v12889_v47 = vld [vmem:[%s25440_s13 + $0xf70] sm:$0xff]  ;;  %v12846_v14 = vld [vmem:[%s25440_s13 + $0xe20] sm:$0xff] }
 0x99c   : > { %v12864_v15 = vld [vmem:[%s25440_s13 + $0xeb0] sm:$0xff] }
 0x99e   : > { %16264 = vmatpush3.bf16.msra.mxu1 %v16263_v16  ;;  %v12814_v16 = vld [vmem:[%s25440_s13 + $0xd28] sm:$0xff] }
 0x99f   : > { %14004 = vmatmul.mubr.msk.f32.vlgmr.msra.gmra.mrb[120].mxu0 %vm8061_vm14, %v10073_v51  ;;  %16266 = vmatprep.subr.bf16.mxu1 %v16265_v44  ;;  %v12831_v44 = vld [vmem:[%s25440_s13 + $0xdb0] sm:$0xff]  ;;  %v12843_v51 = vld [vmem:[%s25440_s13 + $0xe08] sm:$0xff] }
 0x9a0   : > { %16291 = vmatpush3.bf16.msra.mxu0 %v16290_v45  ;;  %14010 = vmatprep.mubr.msk.f32.mxu0 %vm16917_vm10, %v16914_v7  ;;  %v16285_v48 = vpack.c.bf16 %v12832_v54, %v12831_v44  ;;  %v16306_v39 = vpack.c.bf16 %v12843_v51, %v12842_v24  ;;  %v12849_v44 = vld [vmem:[%s25440_s13 + $0xe38] sm:$0xff]  ;;  %v12875_v24 = vld [vmem:[%s25440_s13 + $0xf00] sm:$0xff]  ;;  %v12876_v51 = vld [vmem:[%s25440_s13 + $0xf08] sm:$0xff] }
 0x9a1   : > { %16293 = vmatprep.subr.bf16.mxu0 %v16292_v41 }
 0x9a2   : > { %16268 = vmatpush3.bf16.msra.mxu1 %v16267_v37 }
 0x9a3   : > { %16270 = vmatprep.subr.bf16.mxu1 %v16269_v4  ;;  %v16283_v4 = vpack.c.bf16 %v12814_v16, %v12813_v26  ;;  %v12891_v26 = vld [vmem:[%s25440_s13 + $0xf80] sm:$0xff]  ;;  %v12892_v16 = vld [vmem:[%s25440_s13 + $0xf88] sm:$0xff] }
 0x9a6   : > { %16272 = vmatpush3.bf16.msra.mxu1 %v16271_v38 }
 0x9a7   : > { %14011 = vmatmul.mubr.msk.f32.vlgmr.msra.gmra.mrb[120].mxu0 %vm8061_vm14, %v10256_v57  ;;  %16274 = vmatprep.subr.bf16.mxu1 %v16273_v40  ;;  %v12887_v40 = vld [vmem:[%s25440_s13 + $0xf60] sm:$0xff]  ;;  %v16287_v57 = vpack.c.bf16 %v12816_v22, %v12815_v49  ;;  %v12877_v22 = vld [vmem:[%s25440_s13 + $0xf10] sm:$0xff] }
 0x9a8   : > { %16295 = vmatpush3.bf16.msra.mxu0 %v16294_v31  ;;  %10508 = vmatprep.mubr.f32.mxu0 %v10438_v9  ;;  %v12844_v31 = vld [vmem:[%s25440_s13 + $0xe10] sm:$0xff]  ;;  %v16327_v20 = vpack.c.bf16 %v12888_v29, %v12887_v40  ;;  %v12871_v9 = vld [vmem:[%s25440_s13 + $0xee0] sm:$0xff]  ;;  %v12896_v40 = vld [vmem:[%s25440_s13 + $0xfa8] sm:$0xff] }
 0x9a9   : > { %16297 = vmatprep.subr.bf16.mxu0 %v16296_v23  ;;  %v12862_v23 = vld [vmem:[%s25440_s13 + $0xea0] sm:$0xff]  ;;  %v16310_v3 = vpack.c.bf16 %v12845_v8, %v12844_v31  ;;  %v12868_v29 = vld [vmem:[%s25440_s13 + $0xed0] sm:$0xff] }
 0x9aa   : > { %16276 = vmatpush3.bf16.msra.mxu1 %v16275_v56  ;;  %v12872_v56 = vld [vmem:[%s25440_s13 + $0xee8] sm:$0xff]  ;;  %v16312_v2 = vpack.c.bf16 %v12863_v19, %v12862_v23 }
 0x9ab   : > { %16278 = vmatprep.subr.bf16.mxu1 %v16277_v18  ;;  %v12890_v18 = vld [vmem:[%s25440_s13 + $0xf78] sm:$0xff]  ;;  %v16329_v53 = vpack.c.bf16 %v12872_v56, %v12871_v9  ;;  %v12880_v23 = vld [vmem:[%s25440_s13 + $0xf28] sm:$0xff]  ;;  %v10437_v56 = vrot.slane %v23633_v42, 5 }
 0x9ac   : > { %16299 = vmatpush3.bf16.msra.mxu0 %v16298_v63  ;;  %v13208_v21 = vpop.f32.mrb[134].mxu1  ;;  %v12847_v63 = vld [vmem:[%s25440_s13 + $0xe28] sm:$0xff]  ;;  %v16331_v28 = vpack.c.bf16 %v12890_v18, %v12889_v47  ;;  %v12898_v9 = vld [vmem:[%s25440_s13 + $0xfb8] sm:$0xff] }
 0x9ad   : > { %16301 = vmatprep.subr.bf16.mxu0 %v16300_v1  ;;  %v13209_v45 = vpop.f32.mrb[135].mxu1  ;;  %v12865_v1 = vld [vmem:[%s25440_s13 + $0xeb8] sm:$0xff]  ;;  %v16314_v17 = vpack.c.bf16 %v12847_v63, %v12846_v14  ;;  %v12904_v47 = vld [vmem:[%s25440_s13 + $0xfe8] sm:$0xff] }
 0x9ae   : > { %v13210_v41 = vadd.f32 %v13209_v45, %v13208_v21  ;;  %16280 = vmatpush3.bf16.msra.mxu1 %v16279_v34  ;;  %v13246_v37 = vpop.f32.mrb[122].mxu0  ;;  %v12873_v34 = vld [vmem:[%s25440_s13 + $0xef0] sm:$0xff]  ;;  %v12867_v45 = vld [vmem:[%s25440_s13 + $0xec8] sm:$0xff]  ;;  %v12923_v14 = vld [vmem:[%s25440_s13 + $0x1078] sm:$0xff] }
 0x9af   : > { %v13247_v27 = vpop.f32.mrb[123].mxu0  ;;  %16282 = vmatprep.subr.bf16.mxu1 %v16281_v61  ;;  %v10621_v61 = vrot.slane %v23644_v36, 6  ;;  %v12848_v21 = vld [vmem:[%s25440_s13 + $0xe30] sm:$0xff]  ;;  %v16333_v54 = vpack.c.bf16 %v12874_v32, %v12873_v34  ;;  %v10439_v34 = vrot.slane %v23520_v25, 5 }
 0x9b0   : > { %16303 = vmatpush3.bf16.msra.mxu0 %v16302_v52  ;;  %v16468_v38 = vadd.f32 %v13210_v41, %v8026_v60  ;;  %v13248_v46 = vadd.f32 %v13247_v27, %v13246_v37  ;;  %v16316_v52 = vpack.c.bf16 %v12865_v1, %v12864_v15  ;;  %v12866_v60 = vld [vmem:[%s25440_s13 + $0xec0] sm:$0xff]  ;;  %v16318_v41 = vpack.c.bf16 %v12849_v44, %v12848_v21  ;;  %v12893_v37 = vld [vmem:[%s25440_s13 + $0xf90] sm:$0xff]  ;;  %v12851_v27 = vld [vmem:[%s25440_s13 + $0xe48] sm:$0xff] }
 0x9b1   : > { %16305 = vmatprep.subr.bf16.mxu0 %v16304_v30  ;;  %v16335_v30 = vpack.c.bf16 %v12892_v16, %v12891_v26  ;;  %v16320_v12 = vpack.c.bf16 %v12867_v45, %v12866_v60  ;;  %v12882_v15 = vld [vmem:[%s25440_s13 + $0xf38] sm:$0xff]  ;;  %v12883_v26 = vld [vmem:[%s25440_s13 + $0xf40] sm:$0xff]  ;;  %v12884_v16 = vld [vmem:[%s25440_s13 + $0xf48] sm:$0xff] }
 0x9b2   : > { %v24889_v59 = vadd.f32 %v16468_v38, %v13248_v46  ;;  %16284 = vmatpush3.bf16.msra.mxu1 %v16283_v4  ;;  %v12894_v4 = vld [vmem:[%s25440_s13 + $0xf98] sm:$0xff]  ;;  %v16322_v46 = vpack.c.bf16 %v12851_v27, %v12850_v43  ;;  %v12901_v21 = vld [vmem:[%s25440_s13 + $0xfd0] sm:$0xff] }
 0x9b3   : > { %16286 = vmatprep.subr.bf16.mxu1 %v16285_v48  ;;  %v16337_v48 = vpack.c.bf16 %v12876_v51, %v12875_v24  ;;  %v16339_v49 = vpack.c.bf16 %v12894_v4, %v12893_v37  ;;  %v12878_v38 = vld [vmem:[%s25440_s13 + $0xf18] sm:$0xff]  ;;  %v12906_v60 = vld [vmem:[%s25440_s13 + $0xff0] sm:$0xff]  ;;  %v16353_v24 = vpack.c.bf16 %v12884_v16, %v12883_v26  ;;  %v12924_v51 = vld [vmem:[%s25440_s13 + $0x1080] sm:$0xff] }
 0x9b4   : > { %16307 = vmatpush3.bf16.msra.mxu0 %v16306_v39  ;;  %v12895_v39 = vld [vmem:[%s25440_s13 + $0xfa0] sm:$0xff]  ;;  %v16341_v31 = vpack.c.bf16 %v12878_v38, %v12877_v22  ;;  %v12902_v44 = vld [vmem:[%s25440_s13 + $0xfd8] sm:$0xff]  ;;  %v12885_v4 = vld [vmem:[%s25440_s13 + $0xf50] sm:$0xff]  ;;  %v10622_v22 = vrot.slane %v23520_v25, 6 }
 0x9b5   : > { %16309 = vmatprep.subr.bf16.mxu0 %v16308_v58  ;;  %v12869_v58 = vld [vmem:[%s25440_s13 + $0xed8] sm:$0xff]  ;;  %v16343_v8 = vpack.c.bf16 %v12896_v40, %v12895_v39  ;;  %v16355_v37 = vpack.c.bf16 %v12902_v44, %v12901_v21  ;;  %v10804_v39 = vrot.slane %v23644_v36, 7  ;;  %v12942_v36 = vld [vmem:[%s25440_s13 + $0x1108] sm:$0xff]  ;;  %v12945_v44 = vld [vmem:[%s25440_s13 + $0x1120] sm:$0xff] }
 0x9b6   : > { %16288 = vmatpush3.bf16.msra.mxu1 %v16287_v57  ;;  %v12879_v57 = vld [vmem:[%s25440_s13 + $0xf20] sm:$0xff]  ;;  %v16325_v19 = vpack.c.bf16 %v12869_v58, %v12868_v29  ;;  %v12907_v45 = vld [vmem:[%s25440_s13 + $0xff8] sm:$0xff]  ;;  %v12926_v29 = vld [vmem:[%s25440_s13 + $0x1090] sm:$0xff] }
 0x9b7   : > { %16328 = vmatprep.subr.bf16.mxu1 %v16327_v20  ;;  %v12897_v20 = vld [vmem:[%s25440_s13 + $0xfb0] sm:$0xff]  ;;  %v16345_v18 = vpack.c.bf16 %v12880_v23, %v12879_v57  ;;  %v16364_v27 = vpack.c.bf16 %v12907_v45, %v12906_v60  ;;  %v12927_v58 = vld [vmem:[%s25440_s13 + $0x1098] sm:$0xff] }
 0x9b8   : > { %16311 = vmatpush3.bf16.msra.mxu0 %v16310_v3  ;;  %v12903_v3 = vld [vmem:[%s25440_s13 + $0xfe0] sm:$0xff]  ;;  %v16347_v63 = vpack.c.bf16 %v12898_v9, %v12897_v20  ;;  %v12959_v23 = vld [vmem:[%s25440_s13 + $0x1190] sm:$0xff]  ;;  %v16370_v20 = vpack.c.bf16 %v12927_v58, %v12926_v29  ;;  %v12931_v26 = vld [vmem:[%s25440_s13 + $0x10b8] sm:$0xff] }
 0x9b9   : > { %16313 = vmatprep.subr.bf16.mxu0 %v16312_v2  ;;  %10326 = vmatmul.mubr.f32.vlgmr.msra.gmra.mrb[148].mxu1 %v10254_v0  ;;  %v12922_v2 = vld [vmem:[%s25440_s13 + $0x1070] sm:$0xff]  ;;  %v16360_v1 = vpack.c.bf16 %v12904_v47, %v12903_v3  ;;  %v12899_v0 = vld [vmem:[%s25440_s13 + $0xfc0] sm:$0xff]  ;;  %v12929_v47 = vld [vmem:[%s25440_s13 + $0x10a8] sm:$0xff] }
 0x9ba   : > { %16330 = vmatpush3.bf16.msra.mxu1 %v16329_v53  ;;  %10691 = vmatprep.mubr.f32.mxu1 %v10621_v61  ;;  %v12881_v53 = vld [vmem:[%s25440_s13 + $0xf30] sm:$0xff]  ;;  %v16362_v32 = vpack.c.bf16 %v12923_v14, %v12922_v2  ;;  %v12928_v3 = vld [vmem:[%s25440_s13 + $0x10a0] sm:$0xff]  ;;  %v10620_v2 = vrot.slane %v23633_v42, 6  ;;  %v12964_v60 = vld [vmem:[%s25440_s13 + $0x11b8] sm:$0xff] }
 0x9bb   : > { %16332 = vmatprep.subr.bf16.mxu1 %v16331_v28  ;;  %v12900_v28 = vld [vmem:[%s25440_s13 + $0xfc8] sm:$0xff]  ;;  %v12910_v9 = vld [vmem:[%s25440_s13 + $0x1010] sm:$0xff] }
 0x9bc   : > { %16315 = vmatpush3.bf16.msra.mxu0 %v16314_v17  ;;  %v16349_v17 = vpack.c.bf16 %v12882_v15, %v12881_v53  ;;  %v16351_v61 = vpack.c.bf16 %v12900_v28, %v12899_v0  ;;  %v12944_v53 = vld [vmem:[%s25440_s13 + $0x1118] sm:$0xff]  ;;  %v12962_v0 = vld [vmem:[%s25440_s13 + $0x11a8] sm:$0xff]  ;;  %v16374_v28 = vpack.c.bf16 %v12929_v47, %v12928_v3 }
 0x9bd   : > { %16317 = vmatprep.subr.bf16.mxu0 %v16316_v52  ;;  %v12937_v3 = vld [vmem:[%s25440_s13 + $0x10e8] sm:$0xff] }
 0x9be   : > { %16334 = vmatpush3.bf16.msra.mxu1 %v16333_v54 }
 0x9bf   : > { %16336 = vmatprep.subr.bf16.mxu1 %v16335_v30 }
 0x9c0   : > { %16319 = vmatpush3.bf16.msra.mxu0 %v16318_v41  ;;  %v12925_v41 = vld [vmem:[%s25440_s13 + $0x1088] sm:$0xff] }
 0x9c1   : > { %16321 = vmatprep.subr.bf16.mxu0 %v16320_v12  ;;  %v12886_v12 = vld [vmem:[%s25440_s13 + $0xf58] sm:$0xff]  ;;  %v16366_v38 = vpack.c.bf16 %v12925_v41, %v12924_v51  ;;  %v12932_v41 = vld [vmem:[%s25440_s13 + $0x10c0] sm:$0xff] }
 0x9c2   : > { %16338 = vmatpush3.bf16.msra.mxu1 %v16337_v48  ;;  %v12957_v48 = vld [vmem:[%s25440_s13 + $0x1180] sm:$0xff]  ;;  %v16357_v40 = vpack.c.bf16 %v12886_v12, %v12885_v4  ;;  %v16407_v4 = vpack.c.bf16 %v12946_v50, %v12945_v44  ;;  %v12938_v50 = vld [vmem:[%s25440_s13 + $0x10f0] sm:$0xff] }
 0x9c3   : > { %16340 = vmatprep.subr.bf16.mxu1 %v16339_v49  ;;  %v12958_v49 = vld [vmem:[%s25440_s13 + $0x1188] sm:$0xff] }
 0x9c4   : > { %16323 = vmatpush3.bf16.msra.mxu0 %v16322_v46  ;;  %v12908_v46 = vld [vmem:[%s25440_s13 + $0x1000] sm:$0xff] }
 0x9c5   : > { %16324 = vmatprep.subr.bf16.mxu0 %v16916_v5 }
 0x9c6   : > { %16342 = vmatpush3.bf16.msra.mxu1 %v16341_v31  ;;  %v16397_v31 = vpack.c.bf16 %v12958_v49, %v12957_v48  ;;  %v12965_v49 = vld [vmem:[%s25440_s13 + $0x11c0] sm:$0xff] }
 0x9c7   : > { %10509 = vmatmul.mubr.f32.vlgmr.msra.gmra.mrb[132].mxu0 %v10437_v56  ;;  %16344 = vmatprep.subr.bf16.mxu1 %v16343_v8  ;;  %v12941_v8 = vld [vmem:[%s25440_s13 + $0x1100] sm:$0xff]  ;;  %v12911_v56 = vld [vmem:[%s25440_s13 + $0x1018] sm:$0xff] }
 0x9c8   : > { %16326 = vmatpush3.bf16.msra.mxu0 %v16325_v19  ;;  %14017 = vmatprep.mubr.msk.f32.mxu0 %vm16917_vm10, %v16914_v7  ;;  %v12960_v19 = vld [vmem:[%s25440_s13 + $0x1198] sm:$0xff]  ;;  %v16372_v15 = vpack.c.bf16 %v12911_v56, %v12910_v9  ;;  %v12936_v56 = vld [vmem:[%s25440_s13 + $0x10e0] sm:$0xff] }
 0x9c9   : > { %16359 = vmatprep.subr.bf16.mxu0 %v16916_v5  ;;  %v16401_v14 = vpack.c.bf16 %v12960_v19, %v12959_v23  ;;  %v12968_v23 = vld [vmem:[%s25440_s13 + $0x11d8] sm:$0xff] }
 0x9ca   : > { %16346 = vmatpush3.bf16.msra.mxu1 %v16345_v18  ;;  %v16399_v18 = vpack.c.bf16 %v12942_v36, %v12941_v8  ;;  %v12950_v8 = vld [vmem:[%s25440_s13 + $0x1148] sm:$0xff]  ;;  %v12919_v9 = vld [vmem:[%s25440_s13 + $0x1058] sm:$0xff] }
 0x9cb   : > { %14018 = vmatmul.mubr.msk.f32.vlgmr.msra.gmra.mrb[120].mxu0 %vm8061_vm14, %v10439_v34  ;;  %16348 = vmatprep.subr.bf16.mxu1 %v16347_v63  ;;  %v12943_v63 = vld [vmem:[%s25440_s13 + $0x1110] sm:$0xff]  ;;  %v12912_v34 = vld [vmem:[%s25440_s13 + $0x1020] sm:$0xff] }
 0x9cc   : > { %16361 = vmatpush3.bf16.msra.mxu0 %v16360_v1  ;;  %v13284_v52 = vpop.f32.mrb[136].mxu1  ;;  %14024 = vmatprep.mubr.msk.f32.mxu0 %vm16917_vm10, %v16914_v7  ;;  %v12961_v1 = vld [vmem:[%s25440_s13 + $0x11a0] sm:$0xff]  ;;  %v16403_v16 = vpack.c.bf16 %v12944_v53, %v12943_v63 }
 0x9cd   : > { %v13285_v54 = vpop.f32.mrb[137].mxu1  ;;  %16363 = vmatprep.subr.bf16.mxu0 %v16362_v32  ;;  %v12913_v32 = vld [vmem:[%s25440_s13 + $0x1028] sm:$0xff]  ;;  %v16405_v21 = vpack.c.bf16 %v12962_v0, %v12961_v1  ;;  %v12969_v53 = vld [vmem:[%s25440_s13 + $0x11e0] sm:$0xff]  ;;  %v16390_v1 = vpack.c.bf16 %v12937_v3, %v12936_v56  ;;  %v11138_v56 = vld [vmem:[%s25442_s15 + $0x38] sm:$0xff] }
 0x9ce   : > { %v13286_v30 = vadd.f32 %v13285_v54, %v13284_v52  ;;  %16350 = vmatpush3.bf16.msra.mxu1 %v16349_v17  ;;  %v12963_v54 = vld [vmem:[%s25440_s13 + $0x11b0] sm:$0xff]  ;;  %v12920_v0 = vld [vmem:[%s25440_s13 + $0x1060] sm:$0xff] }
 0x9cf   : > { %16352 = vmatprep.subr.bf16.mxu1 %v16351_v61  ;;  %v12930_v61 = vld [vmem:[%s25440_s13 + $0x10b0] sm:$0xff]  ;;  %v16409_v12 = vpack.c.bf16 %v12964_v60, %v12963_v54 }
 0x9d0   : > { %v25059_v43 = vadd.f32 %v24889_v59, %v13286_v30  ;;  %v12909_v59 = vld [vmem:[%s25440_s13 + $0x1008] sm:$0xff]  ;;  %v16378_v45 = vpack.c.bf16 %v12931_v26, %v12930_v61  ;;  %v12914_v30 = vld [vmem:[%s25440_s13 + $0x1030] sm:$0xff] }
 0x9d1   : > { %v16368_v57 = vpack.c.bf16 %v12909_v59, %v12908_v46  ;;  %v12916_v46 = vld [vmem:[%s25440_s13 + $0x1040] sm:$0xff]  ;;  %v12917_v59 = vld [vmem:[%s25440_s13 + $0x1048] sm:$0xff] }
 0x9d2   : > { %16354 = vmatpush3.bf16.msra.mxu1 %v16353_v24  ;;  %v12915_v24 = vld [vmem:[%s25440_s13 + $0x1038] sm:$0xff]  ;;  %v16384_v36 = vpack.c.bf16 %v12917_v59, %v12916_v46  ;;  %v12954_v61 = vld [vmem:[%s25440_s13 + $0x1168] sm:$0xff] }
 0x9d3   : > { %14025 = vmatmul.mubr.msk.f32.vlgmr.msra.gmra.mrb[120].mxu0 %vm8061_vm14, %v10622_v22  ;;  %16356 = vmatprep.subr.bf16.mxu1 %v16355_v37  ;;  %v12933_v37 = vld [vmem:[%s25440_s13 + $0x10c8] sm:$0xff]  ;;  %v16380_v48 = vpack.c.bf16 %v12915_v24, %v12914_v30  ;;  %v12956_v30 = vld [vmem:[%s25440_s13 + $0x1178] sm:$0xff] }
 0x9d4   : > { %16365 = vmatpush3.bf16.msra.mxu0 %v16364_v27  ;;  %10874 = vmatprep.mubr.f32.mxu0 %v10804_v39  ;;  %v12947_v27 = vld [vmem:[%s25440_s13 + $0x1130] sm:$0xff]  ;;  %v12966_v22 = vld [vmem:[%s25440_s13 + $0x11c8] sm:$0xff] }
 0x9d5   : > { %16367 = vmatprep.subr.bf16.mxu0 %v16366_v38  ;;  %v16382_v38 = vpack.c.bf16 %v12933_v37, %v12932_v41  ;;  %v12934_v39 = vld [vmem:[%s25440_s13 + $0x10d0] sm:$0xff]  ;;  %v16413_v58 = vpack.c.bf16 %v12966_v22, %v12965_v49  ;;  %v10803_v37 = vrot.slane %v23633_v42, 7  ;;  %v10805_v42 = vrot.slane %v23520_v25, 7 }
 0x9d6   : > { %16358 = vmatpush3.bf16.msra.mxu1 %v16357_v40  ;;  %v12935_v40 = vld [vmem:[%s25440_s13 + $0x10d8] sm:$0xff] }
 0x9d7   : > { %16398 = vmatprep.subr.bf16.mxu1 %v16397_v31  ;;  %v12949_v31 = vld [vmem:[%s25440_s13 + $0x1140] sm:$0xff]  ;;  %v16386_v19 = vpack.c.bf16 %v12935_v40, %v12934_v39  ;;  %v16433_v40 = vpack.c.bf16 %v11132_v62, %v11131_v6 }
 0x9d8   : > { %16369 = vmatpush3.bf16.msra.mxu0 %v16368_v57  ;;  %v12967_v57 = vld [vmem:[%s25440_s13 + $0x11d0] sm:$0xff]  ;;  %v16415_v47 = vpack.c.bf16 %v12950_v8, %v12949_v31 }
 0x9d9   : > { %16371 = vmatprep.subr.bf16.mxu0 %v16370_v20  ;;  %10692 = vmatmul.mubr.f32.vlgmr.msra.gmra.mrb[150].mxu1 %v10620_v2  ;;  %v12918_v20 = vld [vmem:[%s25440_s13 + $0x1050] sm:$0xff] }
 0x9da   : > { %v13322_v17 = vpop.f32.mrb[124].mxu0  ;;  %16400 = vmatpush3.bf16.msra.mxu1 %v16399_v18  ;;  %11053 = vmatprep.mubr.f32.mxu1 %v8024_v10  ;;  %v16376_v10 = vpack.c.bf16 %v12913_v32, %v12912_v34  ;;  %v16417_v18 = vpack.c.bf16 %v12968_v23, %v12967_v57  ;;  %v12951_v2 = vld [vmem:[%s25440_s13 + $0x1150] sm:$0xff]  ;;  %v16388_v63 = vpack.c.bf16 %v12919_v9, %v12918_v20  ;;  %v11135_v23 = vld [vmem:[%s25442_s15 + $0x20] sm:$0xff] }
 0x9db   : > { %v13323_v52 = vpop.f32.mrb[125].mxu0  ;;  %16402 = vmatprep.subr.bf16.mxu1 %v16401_v14  ;;  %v12952_v14 = vld [vmem:[%s25440_s13 + $0x1158] sm:$0xff]  ;;  %v11137_v9 = vld [vmem:[%s25442_s15 + $0x30] sm:$0xff] }
 0x9dc   : > { %16373 = vmatpush3.bf16.msra.mxu0 %v16372_v15  ;;  %v13324_v11 = vadd.f32 %v13323_v52, %v13322_v17  ;;  %v12970_v15 = vld [vmem:[%s25440_s13 + $0x11e8] sm:$0xff]  ;;  %v16419_v34 = vpack.c.bf16 %v12952_v14, %v12951_v2  ;;  %v12953_v17 = vld [vmem:[%s25440_s13 + $0x1160] sm:$0xff]  ;;  %v12971_v52 = vld [vmem:[%s25440_s13 + $0x11f0] sm:$0xff]  ;;  %v16442_v3 = vpack.c.bf16 %v11138_v56, %v11137_v9 }
 0x9dd   : > { %16375 = vmatprep.subr.bf16.mxu0 %v16374_v28  ;;  %v12921_v28 = vld [vmem:[%s25440_s13 + $0x1068] sm:$0xff]  ;;  %v16421_v32 = vpack.c.bf16 %v12970_v15, %v12969_v53  ;;  %v16423_v54 = vpack.c.bf16 %v12954_v61, %v12953_v17  ;;  %v11141_v15 = vld [vmem:[%s25442_s15 + $0x50] sm:$0xff] }
 0x9de   : > { %v25153_v51 = vadd.f32 %v25059_v43, %v13324_v11  ;;  %16404 = vmatpush3.bf16.msra.mxu1 %v16403_v16  ;;  %v12948_v43 = vld [vmem:[%s25440_s13 + $0x1138] sm:$0xff]  ;;  %v16392_v26 = vpack.c.bf16 %v12921_v28, %v12920_v0  ;;  %v11145_v61 = vld [vmem:[%s25442_s15 + $0x70] sm:$0xff] }
 0x9df   : > { %16406 = vmatprep.subr.bf16.mxu1 %v16405_v21  ;;  %v16411_v29 = vpack.c.bf16 %v12948_v43, %v12947_v27  ;;  %v12972_v21 = vld [vmem:[%s25440_s13 + $0x11f8] sm:$0xff]  ;;  %v11232_v56 = vld [vmem:[%s25444_s17 + $0x50] sm:$0xf] }
 0x9e0   : > { %16377 = vmatpush3.bf16.msra.mxu0 %v16376_v10  ;;  %v12939_v11 = vld [vmem:[%s25440_s13 + $0x10f8] sm:$0xff]  ;;  %v16425_v60 = vpack.c.bf16 %v12972_v21, %v12971_v52  ;;  %v11224_v52 = vld [vmem:[%s25444_s17 + $0x10] sm:$0xff] }
 0x9e1   : > { %16379 = vmatprep.subr.bf16.mxu0 %v16378_v45  ;;  %v12955_v45 = vld [vmem:[%s25440_s13 + $0x1170] sm:$0xff]  ;;  %v16395_v41 = vpack.c.bf16 %v12939_v11, %v12938_v50  ;;  %v11226_v11 = vld [vmem:[%s25444_s17 + $0x20] sm:$0xff] }
 0x9e2   : > { %16408 = vmatpush3.bf16.msra.mxu1 %v16407_v4  ;;  %v12973_v4 = vld [vmem:[%s25440_s13 + $0x1200] sm:$0xff]  ;;  %v16427_v27 = vpack.c.bf16 %v12956_v30, %v12955_v45  ;;  %v11229_v45 = vld [vmem:[%s25444_s17 + $0x38] sm:$0xff] }
 0x9e3   : > { %16410 = vmatprep.subr.bf16.mxu1 %v16409_v12  ;;  %v12974_v12 = vld [vmem:[%s25440_s13 + $0x1208] sm:$0xff] }
 0x9e4   : > { %16381 = vmatpush3.bf16.msra.mxu0 %v16380_v48 }
 0x9e5   : > { %16383 = vmatprep.subr.bf16.mxu0 %v16382_v38 }
 0x9e6   : > { %16412 = vmatpush3.bf16.msra.mxu1 %v16411_v29  ;;  %v11134_v29 = vld [vmem:[%s25442_s15 + $0x18] sm:$0xff] }
 0x9e7   : > { %16414 = vmatprep.subr.bf16.mxu1 %v16413_v58 }
 0x9e8   : > { %16385 = vmatpush3.bf16.msra.mxu0 %v16384_v36 }
 0x9e9   : > { %16387 = vmatprep.subr.bf16.mxu0 %v16386_v19  ;;  %v11136_v19 = vld [vmem:[%s25442_s15 + $0x28] sm:$0xff] }
 0x9ea   : > { %16416 = vmatpush3.bf16.msra.mxu1 %v16415_v47  ;;  %v16439_v20 = vpack.c.bf16 %v11136_v19, %v11135_v23  ;;  %v11139_v47 = vld [vmem:[%s25442_s15 + $0x40] sm:$0xff] }
 0x9eb   : > { %16418 = vmatprep.subr.bf16.mxu1 %v16417_v18  ;;  %v11140_v18 = vld [vmem:[%s25442_s15 + $0x48] sm:$0xff]  ;;  %v11230_v19 = vld [vmem:[%s25444_s17 + $0x40] sm:$0xff] }
 0x9ec   : > { %16389 = vmatpush3.bf16.msra.mxu0 %v16388_v63  ;;  %v13360_v16 = vpop.f32.mrb[138].mxu1  ;;  %v16445_v2 = vpack.c.bf16 %v11140_v18, %v11139_v47 }
 0x9ed   : > { %16391 = vmatprep.subr.bf16.mxu0 %v16390_v1  ;;  %v13361_v44 = vpop.f32.mrb[139].mxu1  ;;  %v11142_v1 = vld [vmem:[%s25442_s15 + $0x58] sm:$0xff] }
 0x9ee   : > { %v13362_v10 = vadd.f32 %v13361_v44, %v13360_v16  ;;  %16420 = vmatpush3.bf16.msra.mxu1 %v16419_v34  ;;  %v16448_v28 = vpack.c.bf16 %v11142_v1, %v11141_v15  ;;  %v11143_v34 = vld [vmem:[%s25442_s15 + $0x60] sm:$0xff]  ;;  %v11223_v16 = vld [vmem:[%s25444_s17 + $0x8] sm:$0xff]  ;;  %v11225_v44 = vld [vmem:[%s25444_s17 + $0x18] sm:$0xff] }
 0x9ef   : > { %16422 = vmatprep.subr.bf16.mxu1 %v16421_v32  ;;  %v11144_v32 = vld [vmem:[%s25442_s15 + $0x68] sm:$0xff]  ;;  %v16457_v50 = vpack.c.bf16 %v11225_v44, %v11224_v52 }
 0x9f0   : > { %16393 = vmatpush3.bf16.msra.mxu0 %v16392_v26  ;;  %v16472_v24 = vadd.f32 %v25153_v51, %v13362_v10  ;;  %v16430_v51 = vpack.c.bf16 %v12974_v12, %v12973_v4  ;;  %v16451_v17 = vpack.c.bf16 %v11144_v32, %v11143_v34  ;;  %v11222_v26 = vld [vmem:[%s25444_s17] sm:$0xff]  ;;  %v11227_v10 = vld [vmem:[%s25444_s17 + $0x28] sm:$0xff] }
 0x9f1   : > { %16394 = vmatprep.subr.bf16.mxu0 %v16916_v5  ;;  %v16454_v21 = vpack.c.bf16 %v11223_v16, %v11222_v26 }
 0x9f2   : > { %16424 = vmatpush3.bf16.msra.mxu1 %v16423_v54  ;;  %v16460_v54 = vpack.c.bf16 %v11227_v10, %v11226_v11 }
 0x9f3   : > { %10875 = vmatmul.mubr.f32.vlgmr.msra.gmra.mrb[134].mxu0 %v10803_v37  ;;  %16426 = vmatprep.subr.bf16.mxu1 %v16425_v60  ;;  %v11228_v60 = vld [vmem:[%s25444_s17 + $0x30] sm:$0xff] }
 0x9f4   : > { %16396 = vmatpush3.bf16.msra.mxu0 %v16395_v41  ;;  %14031 = vmatprep.mubr.msk.f32.mxu0 %vm16917_vm10, %v16914_v7  ;;  %v16463_v30 = vpack.c.bf16 %v11229_v45, %v11228_v60 }
 0x9f5   : > { %16429 = vmatprep.subr.bf16.mxu0 %v16916_v5 }
 0x9f6   : > { %16428 = vmatpush3.bf16.msra.mxu1 %v16427_v27 }
 0x9f7   : > { %14032 = vmatmul.mubr.msk.f32.vlgmr.msra.gmra.mrb[120].mxu0 %vm8061_vm14, %v10805_v42  ;;  %16453 = vmatprep.subr.bf16.mxu1 %v16916_v5 }
 0x9f8   : > { %16431 = vmatpush3.bf16.msra.mxu0 %v16430_v51  ;;  %14038 = vmatprep.mubr.msk.f32.mxu0 %vm16917_vm10, %v16914_v7 }
 0x9f9   : > { %11054 = vmatmul.mubr.f32.vlgmr.msra.gmra.mrb[152].mxu1 %v8023_v35  ;;  %16432 = vmatprep.subr.bf16.mxu0 %v16916_v5 }
 0x9fa   : > { %14096 = vmatprep.mubr.msk.f32.mxu1 %vm16917_vm10, %v16914_v7  ;;  %16455 = vmatpush3.bf16.msra.mxu1 %v16454_v21 }
 0x9fb   : > { %16456 = vmatprep.subr.bf16.mxu1 %v16916_v5 }
 0x9fe   : > { %16458 = vmatpush3.bf16.msra.mxu1 %v16457_v50 }
 0x9ff   : > { %14039 = vmatmul.mubr.msk.f32.vlgmr.msra.gmra.mrb[120].mxu0 %vm8061_vm14, %v8025_v55  ;;  %v11133_v55 = vld [vmem:[%s25442_s15 + $0x10] sm:$0xff]  ;;  %16459 = vmatprep.subr.bf16.mxu1 %v16916_v5 }
 0xa00   : > { %14071 = vmatprep.mubr.msk.f32.mxu0 %vm16917_vm10, %v16914_v7  ;;  %16434 = vmatpush3.bf16.msra.mxu0 %v16433_v40  ;;  %v16436_v58 = vpack.c.bf16 %v11134_v29, %v11133_v55 }
 0xa01   : > { %16435 = vmatprep.subr.bf16.mxu0 %v16916_v5 }
 0xa02   : > { %16461 = vmatpush3.bf16.msra.mxu1 %v16460_v54 }
 0xa03   : > { %16462 = vmatprep.subr.bf16.mxu1 %v16916_v5 }
 0xa04   : > { %16437 = vmatpush3.bf16.msra.mxu0 %v16436_v58 }
 0xa05   : > { %16438 = vmatprep.subr.bf16.mxu0 %v16916_v5 }
 0xa06   : > { %16464 = vmatpush3.bf16.msra.mxu1 %v16463_v30 }
 0xa07   : > { %16465 = vmatprep.subr.bf16.mxu1 %v16916_v5 }
 0xa08   : > { %16440 = vmatpush3.bf16.msra.mxu0 %v16439_v20  ;;  %v11231_v20 = vld [vmem:[%s25444_s17 + $0x48] sm:$0xff] }
 0xa09   : > { %16441 = vmatprep.subr.bf16.mxu0 %v16916_v5  ;;  %v16466_v9 = vpack.c.bf16 %v11231_v20, %v11230_v19 }
 0xa0b   : > { %16467 = vmatpush3.bf16.msra.mxu1 %v16466_v9 }
 0xa0c   : > { %v13398_v25 = vpop.f32.mrb[140].mxu1  ;;  %16443 = vmatpush3.bf16.msra.mxu0 %v16442_v3  ;;  %14094 = vmatprep.subr.mxu1 %v16914_v7  ;;  %v11146_v3 = vld [vmem:[%s25443_s16] sm:$0x1] }
 0xa0d   : > { %v13399_v43 = vpop.f32.mrb[141].mxu1  ;;  %16444 = vmatprep.subr.bf16.mxu0 %v16916_v5 }
 0xa0e   : > { %v13400_v48 = vadd.f32 %v13399_v43, %v13398_v25  ;;  %v13436_v49 = vpop.f32.mrb[126].mxu0 }
 0xa0f   : > { %v13437_v22 = vpop.f32.mrb[127].mxu0  ;;  %14095 = vmatpush3.msk.msra.mxu1 %vm2045_vm4, %v11232_v56 }
 0xa10   : > { %v16473_v13 = vadd.f32 %v16472_v24, %v13400_v48  ;;  %v13438_v33 = vadd.f32 %v13437_v22, %v13436_v49  ;;  %16446 = vmatpush3.bf16.msra.mxu0 %v16445_v2 }
 0xa11   : > { %16447 = vmatprep.subr.bf16.mxu0 %v16916_v5 }
 0xa12   : > { %v16474_v35 = vadd.f32 %v16473_v13, %v13438_v33 }
 0xa14   : > { %16449 = vmatpush3.bf16.msra.mxu0 %v16448_v28 }
 0xa15   : > { %16450 = vmatprep.subr.bf16.mxu0 %v16916_v5 }
 0xa18   : > { %16452 = vmatpush3.bf16.msra.mxu0 %v16451_v17 }
 0xa19   : > { %14069 = vmatprep.subr.mxu0 %v16914_v7  ;;  %v11233_v7 = vld [vmem:[%s25445_s18] sm:$0x1] }
 0xa1c   : > { %14070 = vmatpush3.msra.mxu0 %v11145_v61 }
 0xa2c   : > { %v13474_v38 = vpop.f32.mrb[142].mxu1 }
 0xa2d   : > { %v13475_v46 = vpop.f32.mrb[143].mxu1 }
 0xa2e   : > { %v13476_v59 = vadd.f32 %v13475_v46, %v13474_v38 }
 0xa30   : > { %v16475_v39 = vadd.f32 %v16474_v35, %v13476_v59 }
 0xa3a   : > { %v13512_v31 = vpop.f32.mrb[128].mxu0 }
 0xa3b   : > { %v13513_v8 = vpop.f32.mrb[129].mxu0 }
 0xa3c   : > { %v13514_v36 = vadd.f32 %v13513_v8, %v13512_v31 }
 0xa3e   : > { %v16476_v57 = vadd.f32 %v16475_v39, %v13514_v36 }
 0xa4c   : > { %v13550_v14 = vpop.f32.mrb[144].mxu1 }
 0xa4d   : > { %v13551_v63 = vpop.f32.mrb[145].mxu1 }
 0xa4e   : > { %v13552_v53 = vadd.f32 %v13551_v63, %v13550_v14 }
 0xa50   : > { %v16477_v0 = vadd.f32 %v16476_v57, %v13552_v53 }
 0xa66   : > { %v13588_v24 = vpop.f32.mrb[130].mxu0 }
 0xa67   : > { %v13589_v41 = vpop.f32.mrb[131].mxu0 }
 0xa68   : > { %v13590_v37 = vadd.f32 %v13589_v41, %v13588_v24 }
 0xa6a   : > { %v16478_v4 = vadd.f32 %v16477_v0, %v13590_v37 }
 0xa6c   : > { %v13626_v12 = vpop.f32.mrb[146].mxu1 }
 0xa6d   : > { %v13627_v27 = vpop.f32.mrb[147].mxu1 }
 0xa6e   : > { %v13628_v51 = vadd.f32 %v13627_v27, %v13626_v12 }
 0xa70   : > { %v16479_v42 = vadd.f32 %v16478_v4, %v13628_v51 }
 0xa8c   : > { %v13664_v25 = vpop.f32.mrb[148].mxu1 }
 0xa8d   : > { %v13665_v43 = vpop.f32.mrb[149].mxu1 }
 0xa8e   : > { %v13666_v48 = vadd.f32 %v13665_v43, %v13664_v25 }
 0xa90   : > { %v16480_v49 = vadd.f32 %v16479_v42, %v13666_v48 }
 0xa9a   : > { %v13702_v22 = vpop.f32.mrb[132].mxu0 }
 0xa9b   : > { %v13703_v13 = vpop.f32.mrb[133].mxu0 }
 0xa9c   : > { %v13704_v33 = vadd.f32 %v13703_v13, %v13702_v22 }
 0xa9e   : > { %v16481_v35 = vadd.f32 %v16480_v49, %v13704_v33 }
 0xaac   : > { %v13740_v38 = vpop.f32.mrb[150].mxu1 }
 0xaad   : > { %v13741_v46 = vpop.f32.mrb[151].mxu1 }
 0xaae   : > { %v13742_v59 = vadd.f32 %v13741_v46, %v13740_v38 }
 0xab0   : > { %v16482_v39 = vadd.f32 %v16481_v35, %v13742_v59 }
 0xac6   : > { %v13778_v6 = vpop.f32.mrb[134].mxu0 }
 0xac7   : > { %v13779_v5 = vpop.f32.mrb[135].mxu0 }
 0xac8   : > { %v13780_v62 = vadd.f32 %v13779_v5, %v13778_v6 }
 0xaca   : > { %v16483_v55 = vadd.f32 %v16482_v39, %v13780_v62 }
 0xacc   : > { %v13816_v40 = vpop.f32.mrb[152].mxu1 }
 0xacd   : > { %v13817_v29 = vpop.f32.mrb[153].mxu1 }
 0xace   : > { %v13818_v58 = vadd.f32 %v13817_v29, %v13816_v40 }
 0xad0   : > { %v16484_v31 = vadd.f32 %v16483_v55, %v13818_v58 }
 0xad2   : > { %v11125_v8 = vpop.f32.mrb[120].mxu0 }
 0xad3   : > { %v16485_v36 = vadd.f32 %v16484_v31, %v11125_v8  ;;  %v14040_v57 = vpop.f32.mrb[121].mxu0 }
 0xad5   : > { %v11130_v23 = vmax.f32 %v16485_v36, 0.0 }
 0xad7   : > { %14072 = vmatmul.mubr.msk.f32.vlgmr.msra.gmra.mrb[136].mxu0 %vm11147_vm15, %v11130_v23 }
 0xbaa   : > { %v11217_v47 = vpop.f32.mrb[136].mxu0 }
 0xbab   : > { %v11218_v18 = vadd.f32 %v11217_v47, %v11146_v3  ;;  %v14073_v2 = vpop.f32.mrb[137].mxu0 }
 0xbad   : > { %v11221_v14 = vmax.f32 %v11218_v18, 0.0 }
 0xbaf   : > { %14097 = vmatmul.mubr.msk.f32.vlgmr.msra.gmra.mrb[154].mxu1 %vm11234_vm0, %v11221_v14 }
 0xc82   : > { %v11307_v63 = vpop.f32.mrb[154].mxu1 }
 0xc83   : > { %v11308_v53 = vadd.f32 %v11307_v63, %v11233_v7  ;;  %v14098_v15 = vpop.f32.mrb[155].mxu1 }
 0xc85   : > { %v11312_v1 = vsel %vm11311_vm1, %v11308_v53, -inf }
 0xc86   : > { %11313 = vmax.xlane.f32.xlu0 %v11312_v1 }
 0xd13   : > { %v11314_v0 = vpop.xlane.xlu0 %11313 }
 0xd14   : > { %v11315_v28 = vsub.f32 %v11308_v53, %v11314_v0 }
 0xd16   : > { %v11316_v34 = vmul.f32 1.442695, %v11315_v28 }
 0xd18   : > { %16846 = vpow2.f32 %v11316_v34 }
 0xd22   : > { %v16847_v32 = vpop.eup %16846 }
 0xd23   : > { %v11318_v17 = vsel %vm11311_vm1, %v16847_v32, 0.0 }
 0xd24   : > { %11319 = vadd.xlane.f32.xlu0 %v11318_v17 }
 0xdb1   : > { %v11320_v61 = vpop.xlane.xlu0 %11319 }
 0xdb2   : > { %16848 = vrcp.f32 %v11320_v61 }
 0xdbc   : > { %v16849_v26 = vpop.eup %16848 }
 0xdbd   : > { %v11322_v16 = vmul.f32 %v16849_v26, %v16847_v32 }
 0xdbf   : > { %11323 = vst.msk [vmem:[%s594_s25] sm:$0x1] %vm11311_vm1, %v11322_v16 }
 0xdc0   : > { %16863 = shalt.err (!%p16860_p3)
}
 0xdc1   : > { %s16864_s3 = scalar_lea.hbm %s25384_s24, 16  ;;  %s16868_s2 = scalar_lea.hbm %s25481_s26, 32 }
 0xdc2   : > { %p16865_p4 = scmp.ne.s32.totalorder %s25384_s24, %s16864_s3  ;;  %p16869_p9 = scmp.lt.u32.totalorder %s25384_s24, %s25481_s26 }
 0xdc3   : > { %p16870_p10 = scmp.lt.u32.totalorder %s16868_s2, %s16864_s3  ;;  %p16872_p12 = scmp.lt.u32.totalorder %s16864_s3, %s25384_s24 }
 0xdc4   : > { %p16866_p7 = pnand %p16865_p4, %p17057_p5 }
 0xdc5   : > { %p16871_p11 = por %p16870_p10, %p16869_p9 }
 0xdc6   : > { %p16867_p8 = pneg %p16866_p7 }
 0xdc7   : > { %p16873_p13 = por %p16872_p12, %p16871_p11 }
 0xdc9   : > { %p16874_p0 = pnand %p16873_p13, %p16867_p8 }
 0xdcb   : > { %16877 = shalt.err (!%p16874_p0)
}
 0xdcc   : > { %16803 = dma.vmem_to_hbm [thread:$0]  (%p17057_p5), %s25386_s20, 16, %s25384_s24, %s11325_s21  }
 0xdcd PF: > { %s25482_s4 = sld [smem:[#allocation7_spill]]  ;;  %s25483_s23 = sld [smem:[#allocation5_spill]] }
 0xdd3   : > { %p16809_p1 = scmp.ge.s32.totalorder %s25482_s4, 2  ;;  %s11349_s22 = sand.u32 1, %s25483_s23  }
 0xdd4   : > { %s11350_s25 = scalar_lea.sflag [#allocation3], %s11349_s22 }
 0xdd5   : > { %p16806_p2 = pnand %p16809_p1, %p17061_p6 }
 0xdd7   : > { %16895 = dma.done.wait (!%p16806_p2), %s11350_s25, 16  }
 0xdd8   : > { %16897 = vsyncadd (!%p16806_p2), %s11350_s25, 4294967280  ;;  %s25485_s21 = sld [smem:[#allocation8_spill]]  ;;  %s25486_s3 = sld [smem:[#allocation6_spill]] }
 0xdd9   : > { %s25487_s20 = sld [smem:[#allocation9_spill]]  ;;  %s25488_s0 = smov %s16904_s30 }
 0xdde   : > { %p29_p3 = scmp.ge.s32.totalorder %s25485_s21, 4   ;;  %s25489_s30 = smov %s25486_s3 }
 0xde0   :  { %31 = sbr.rel (!%p29_p3) target bundleno = 10 (0xa), region = 155 }
 0xde7   :  { %11354 = vsyncpa [#allocation3], 1 }
 0xde8   :  { %11356 = vsyncpa [#allocation3 + $0x1], 1 }

</bundles_post_ra>
